<compile_context>
chip_gen: v5e
topology: v5e:2x2
jax: 0.10.0
libtpu: 0.0.40
codegen_flags: <defaults>
</compile_context>

<pallas_src>
import functools

import jax
import jax.numpy as jnp
from jax import lax
from jax.experimental import pallas as pl
from jax.experimental.pallas import tpu as pltpu

EPS = 1e-5
LANE = 128
SUB = 16                                # sublane granularity for bf16 blocks
_VMEM_LIMIT = 64 * 1024 * 1024


def _ru(a, b):
    return (a + b - 1) // b * b


def _cdiv(a, b):
    return -(-a // b)


def _geometry(H, W):
    """Static sizes of the padded channels-last spatial layout.

    Pixel (h, w) lives at flat spatial slot  B0 + h*Wp + w  (Wp = W + 2).  All
    other slots are "pad slots": their content is arbitrary (but finite) and a
    (S, 1) validity mask zeroes them wherever it matters.
    """
    Wp = W + 2
    cands = [th for th in (8, 4, 2, 1) if H % th == 0]
    aligned = [th for th in cands if (th * Wp) % SUB == 0]
    TH = aligned[0] if aligned else cands[0]     # output rows per 3x3 tile
    T = H // TH
    L = TH * Wp                                  # output slots per 3x3 tile
    Lp = _ru(L, SUB)
    B0 = _ru(Wp + 1, SUB)                        # slot of pixel (0, 0)
    SA = _ru(B0 + Lp + Wp + 2, SUB)              # activation window incl. halo
    s_needed = max((T - 1) * L + SA,             # deepest activation read
                   B0 + (T - 1) * L + Lp,        # deepest output write
                   B0 + H * Wp)                  # extent of the real pixels
    if s_needed <= 2048:
        n_sp = 2                                 # keep >1 grid step even if tiny
    else:
        n_sp = _cdiv(s_needed, 1024)
    ST = _ru(_cdiv(s_needed, n_sp), SUB)         # spatial tile (pointwise kernel)
    S = ST * n_sp
    return dict(Wp=Wp, TH=TH, T=T, L=L, Lp=Lp, B0=B0, SA=SA, ST=ST, S=S)


# ----------------------------------------------------------------------------
# Kernel 1: fused BN1 (train) + ReLU + 1x1 conv (bf16 MXU) + stats of output
# ----------------------------------------------------------------------------
def _bn_relu_conv1x1_kernel(x_ref, vm_ref, scale_ref, shift_ref, w_ref,
                            mid_ref, sum_ref, sq_ref):
    @pl.when(pl.program_id(1) == 0)
    def _():
        sum_ref[...] = jnp.zeros_like(sum_ref)
        sq_ref[...] = jnp.zeros_like(sq_ref)

    x = x_ref[...].astype(jnp.float32)                          # (ST, K) bf16->f32
    a = jnp.maximum(x * scale_ref[...] + shift_ref[...], 0.0)   # BN + ReLU in f32
    m = jnp.dot(a.astype(jnp.bfloat16), w_ref[...],
                preferred_element_type=jnp.float32)              # bf16 MXU, f32 acc
    mid_ref[...] = m.astype(mid_ref.dtype)                       # bf16 store

    mm = m * vm_ref[...]                                         # mask pad slots
    sum_ref[...] += jnp.sum(mm, axis=0, keepdims=True)
    sq_ref[...] += jnp.sum(mm * m, axis=0, keepdims=True)


def bn_relu_conv1x1(buf, vmask, scale, shift, w_bf16, ST):
    N, S, _ = buf.shape
    K, Cmid = w_bf16.shape
    n_sp = S // ST
    mid, s, q = pl.pallas_call(
        _bn_relu_conv1x1_kernel,
        out_shape=(jax.ShapeDtypeStruct((N, S, Cmid), jnp.bfloat16),
                   jax.ShapeDtypeStruct((N, 1, Cmid), jnp.float32),
                   jax.ShapeDtypeStruct((N, 1, Cmid), jnp.float32)),
        grid=(N, n_sp),
        in_specs=[
            pl.BlockSpec((None, ST, K), lambda n, t: (n, t, 0)),
            pl.BlockSpec((ST, 1), lambda n, t: (t, 0)),
            pl.BlockSpec((1, K), lambda n, t: (0, 0)),
            pl.BlockSpec((1, K), lambda n, t: (0, 0)),
            pl.BlockSpec((K, Cmid), lambda n, t: (0, 0)),
        ],
        out_specs=(
            pl.BlockSpec((None, ST, Cmid), lambda n, t: (n, t, 0)),
            pl.BlockSpec((None, 1, Cmid), lambda n, t: (n, 0, 0)),
            pl.BlockSpec((None, 1, Cmid), lambda n, t: (n, 0, 0)),
        ),
        compiler_params=pltpu.CompilerParams(
            dimension_semantics=("parallel", "arbitrary"),
            vmem_limit_bytes=_VMEM_LIMIT),
    )(buf, vmask, scale, shift, w_bf16)
    return mid, jnp.sum(s, axis=(0, 1)), jnp.sum(q, axis=(0, 1))


# ----------------------------------------------------------------------------
# Kernel 2: fused BN2 (train) + ReLU + 3x3 conv (pad=1) written in place into
#           the concat slab (lane-masked merge, input_output_aliases) + stats
#           of the new channels.  The conv is 9 contiguous leading-axis slices
#           of a flat padded activation -> 9 bf16 MXU matmuls accumulated in
#           registers.
# ----------------------------------------------------------------------------
def _bn_relu_conv3x3_kernel(mid_ref, vm_ref, scale_ref, shift_ref, w_ref, old_ref,
                            buf_ref, nsum_ref, nsq_ref, act_ref,
                            *, Wp, B0, L, Lp, SA, tail_start, tail_len,
                            lane_lo, lane_hi):
    t = pl.program_id(1)
    is_aligned = (L % SUB == 0)

    base = t * L
    if is_aligned:
        base = pl.multiple_of(base, SUB)
    out_start = base + B0                          # B0 is a multiple of SUB
    if is_aligned:
        out_start = pl.multiple_of(out_start, SUB)

    @pl.when(t == 0)
    def _():
        nsum_ref[...] = jnp.zeros_like(nsum_ref)
        nsq_ref[...] = jnp.zeros_like(nsq_ref)
        # Rows never touched by the per-tile merges are all pad slots; zero them
        # so the output block is fully initialized (finite) before writeback.
        buf_ref[pl.ds(0, B0), :] = jnp.zeros((B0, LANE), buf_ref.dtype)
        if tail_len > 0:
            buf_ref[pl.ds(tail_start, tail_len), :] = jnp.zeros(
                (tail_len, LANE), buf_ref.dtype)

    # BN2 + ReLU over the tile plus its 3x3 halo; the validity mask supplies the
    # conv zero-padding.  Cast to bf16 exactly once into the act scratch.
    xm = mid_ref[pl.ds(base, SA), :].astype(jnp.float32)         # (SA, Cmid)
    a = jnp.maximum(xm * scale_ref[...] + shift_ref[...], 0.0)
    act_ref[...] = (a * vm_ref[pl.ds(base, SA), :]).astype(act_ref.dtype)

    # 9 shifted contiguous slices -> MXU matmuls, accumulated in registers.
    acc = None
    for k in range(9):
        kh, kw = divmod(k, 3)
        off = B0 - (Wp + 1) + kh * Wp + kw                       # static >= 0
        patch = act_ref[pl.ds(off, Lp), :]                       # bf16 (Lp, Cmid)
        contrib = jnp.dot(patch, w_ref[k], preferred_element_type=jnp.float32)
        acc = contrib if acc is None else acc + contrib          # (Lp, 128) f32

    # Merge the new channels into lanes [lane_lo, lane_hi) of the 128-wide
    # channel block of the concat slab; old lanes come from the aliased input.
    lane = lax.broadcasted_iota(jnp.int32, (1, LANE), 1)
    is_new = (lane >= lane_lo) & (lane < lane_hi)
    old_vals = old_ref[pl.ds(out_start, Lp), :]                  # bf16 (Lp, 128)
    buf_ref[pl.ds(out_start, Lp), :] = jnp.where(
        is_new, acc.astype(buf_ref.dtype), old_vals)

    # Fused BN stats of the new channels (valid pixels only, no double counting).
    vm_out = vm_ref[pl.ds(out_start, Lp), :]                     # (Lp, 1)
    if Lp != L:
        row = lax.broadcasted_iota(jnp.int32, (Lp, 1), 0)
        vm_out = vm_out * (row < L).astype(jnp.float32)
    nv = acc * vm_out
    nsum_ref[...] += jnp.sum(nv, axis=0, keepdims=True)
    nsq_ref[...] += jnp.sum(nv * acc, axis=0, keepdims=True)


def bn_relu_conv3x3_update(mid, vmask, scale, shift, w_packed, buf, geo,
                           lane_lo, lane_hi, cb0):
    N, S, Cmid = mid.shape
    Wp, B0, T, L, Lp, SA = (geo["Wp"], geo["B0"], geo["T"], geo["L"],
                            geo["Lp"], geo["SA"])
    tail_start = B0 + (T - 1) * L + Lp
    tail_len = S - tail_start
    kern = functools.partial(_bn_relu_conv3x3_kernel, Wp=Wp, B0=B0, L=L, Lp=Lp,
                             SA=SA, tail_start=tail_start, tail_len=tail_len,
                             lane_lo=lane_lo, lane_hi=lane_hi)
    new_buf, nsum, nsq = pl.pallas_call(
        kern,
        out_shape=(jax.ShapeDtypeStruct(buf.shape, buf.dtype),
                   jax.ShapeDtypeStruct((N, 1, LANE), jnp.float32),
                   jax.ShapeDtypeStruct((N, 1, LANE), jnp.float32)),
        grid=(N, T),
        in_specs=[
            pl.BlockSpec((None, S, Cmid), lambda n, t: (n, 0, 0)),
            pl.BlockSpec((S, 1), lambda n, t: (0, 0)),
            pl.BlockSpec((1, Cmid), lambda n, t: (0, 0)),
            pl.BlockSpec((1, Cmid), lambda n, t: (0, 0)),
            pl.BlockSpec((9, Cmid, LANE), lambda n, t: (0, 0, 0)),
            pl.BlockSpec((None, S, LANE), lambda n, t: (n, 0, cb0)),
        ],
        out_specs=(
            pl.BlockSpec((None, S, LANE), lambda n, t: (n, 0, cb0)),
            pl.BlockSpec((None, 1, LANE), lambda n, t: (n, 0, 0)),
            pl.BlockSpec((None, 1, LANE), lambda n, t: (n, 0, 0)),
        ),
        scratch_shapes=[
            pltpu.VMEM((SA, Cmid), jnp.bfloat16),   # BN+ReLU activation (+halo)
        ],
        input_output_aliases={5: 0},                # update the concat slab in place
        compiler_params=pltpu.CompilerParams(
            dimension_semantics=("parallel", "arbitrary"),
            vmem_limit_bytes=_VMEM_LIMIT),
    )(mid, vmask, scale, shift, w_packed, buf)
    return new_buf, jnp.sum(nsum, axis=(0, 1)), jnp.sum(nsq, axis=(0, 1))


# ----------------------------------------------------------------------------
# Parameter init (deterministic, shapes match the nn.Module __init__)
# ----------------------------------------------------------------------------
def init_dense_block_params(key, num_layers, in_channels, growth_rate):
    params = []
    for i in range(num_layers):
        C = in_channels + i * growth_rate
        Cmid = 4 * growth_rate
        key, k1, k2, k3, k4, k5, k6 = jax.random.split(key, 7)
        params.append(dict(
            gamma1=1.0 + 0.1 * jax.random.normal(k1, (C,), jnp.float32),
            beta1=0.1 * jax.random.normal(k2, (C,), jnp.float32),
            # torch conv1 weight (Cmid, C, 1, 1) stored as (C, Cmid)
            w1=jax.random.normal(k3, (C, Cmid), jnp.float32) * (2.0 / C) ** 0.5,
            gamma2=1.0 + 0.1 * jax.random.normal(k4, (Cmid,), jnp.float32),
            beta2=0.1 * jax.random.normal(k5, (Cmid,), jnp.float32),
            # torch conv2 weight (G, Cmid, 3, 3) stored as (3, 3, Cmid, G) (HWIO)
            w2=jax.random.normal(k6, (3, 3, Cmid, growth_rate), jnp.float32)
               * (2.0 / (9 * Cmid)) ** 0.5,
        ))
    return params


# ----------------------------------------------------------------------------
# DenseBlock forward (training-mode BatchNorm), NCHW in / NCHW out
# ----------------------------------------------------------------------------
def dense_block_forward(x_nchw, params):
    N, Cin, H, W = x_nchw.shape
    num_layers = len(params)
    G = params[0]["w2"].shape[-1]
    Cmid = params[0]["w1"].shape[1]
    C_total = Cin + num_layers * G
    C_pad = _ru(C_total, LANE)
    Cmid_pad = _ru(Cmid, LANE)

    geo = _geometry(H, W)
    Wp, B0, ST, S = geo["Wp"], geo["B0"], geo["ST"], geo["S"]

    # ---- one-time entry layout: NCHW -> padded channels-last bf16 slab ----
    x_nhwc = jnp.transpose(x_nchw, (0, 2, 3, 1)).astype(jnp.float32)
    x_bf = x_nhwc.astype(jnp.bfloat16)
    xw = jnp.pad(x_bf, ((0, 0), (0, 0), (0, Wp - W), (0, C_pad - Cin)))
    buf = jnp.pad(xw.reshape(N, H * Wp, C_pad),
                  ((0, 0), (B0, S - B0 - H * Wp), (0, 0)))

    # spatial validity mask: 1.0 at real pixels, 0.0 at pad slots
    sidx = jnp.arange(S) - B0
    vmask = ((sidx >= 0) & (sidx % Wp < W) & (sidx // Wp < H)
             ).astype(jnp.float32).reshape(S, 1)

    count = float(N * H * W)

    # one-time input-channel batch stats in plain XLA (no extra Pallas pass)
    x_f = x_bf.astype(jnp.float32)
    run_sum = jnp.zeros((C_pad,), jnp.float32).at[:Cin].set(
        jnp.sum(x_f, axis=(0, 1, 2)))
    run_sq = jnp.zeros((C_pad,), jnp.float32).at[:Cin].set(
        jnp.sum(x_f * x_f, axis=(0, 1, 2)))

    C_i = Cin
    for p in params:
        K_i = _ru(C_i, LANE)

        # BN1 affine from running stats; channels >= C_i get scale = shift = 0
        mean1 = run_sum[:K_i] / count
        var1 = jnp.maximum(run_sq[:K_i] / count - mean1 * mean1, 0.0)
        g1 = jnp.zeros((K_i,), jnp.float32).at[:C_i].set(p["gamma1"])
        b1 = jnp.zeros((K_i,), jnp.float32).at[:C_i].set(p["beta1"])
        s1 = g1 * lax.rsqrt(var1 + EPS)
        scale1 = s1.reshape(1, K_i)
        shift1 = (b1 - mean1 * s1).reshape(1, K_i)
        w1p = (jnp.zeros((K_i, Cmid_pad), jnp.float32)
               .at[:C_i, :Cmid].set(p["w1"])).astype(jnp.bfloat16)

        mid, msum, msq = bn_relu_conv1x1(buf, vmask, scale1, shift1, w1p, ST)

        # BN2 affine from the stats fused into the 1x1-conv kernel
        mean2 = msum / count
        var2 = jnp.maximum(msq / count - mean2 * mean2, 0.0)
        g2 = jnp.zeros((Cmid_pad,), jnp.float32).at[:Cmid].set(p["gamma2"])
        b2 = jnp.zeros((Cmid_pad,), jnp.float32).at[:Cmid].set(p["beta2"])
        s2 = g2 * lax.rsqrt(var2 + EPS)
        scale2 = s2.reshape(1, Cmid_pad)
        shift2 = (b2 - mean2 * s2).reshape(1, Cmid_pad)

        # pack the 3x3 weights so the G new output channels land on their lane
        # range inside the 128-wide channel block of the concat slab
        cb0 = C_i // LANE
        lane_lo = C_i - cb0 * LANE
        lane_hi = lane_lo + G
        if lane_hi > LANE:
            # TODO(synk): support a growth slice that straddles a 128-lane block.
            raise NotImplementedError("growth slice straddles a 128-lane block")
        w2p = (jnp.zeros((9, Cmid_pad, LANE), jnp.float32)
               .at[:, :Cmid, lane_lo:lane_hi]
               .set(p["w2"].reshape(9, Cmid, G))).astype(jnp.bfloat16)

        buf, nsum, nsq = bn_relu_conv3x3_update(
            mid, vmask, scale2, shift2, w2p, buf, geo, lane_lo, lane_hi, cb0)

        run_sum = run_sum.at[C_i:C_i + G].set(nsum[lane_lo:lane_hi])
        run_sq = run_sq.at[C_i:C_i + G].set(nsq[lane_lo:lane_hi])
        C_i += G

    # ---- one-time exit layout: slab -> NCHW.  torch.cat keeps x verbatim, so
    # splice the exact input back; the new channels come from the bf16 slab. ----
    new = buf[:, B0:B0 + H * Wp, Cin:C_total].astype(jnp.float32)
    new = new.reshape(N, H, Wp, C_total - Cin)[:, :, :W, :]
    new = jnp.transpose(new, (0, 3, 1, 2))
    return jnp.concatenate([x_nchw.astype(jnp.float32), new], axis=1)


# ----------------------------------------------------------------------------
# Pure-JAX reference (f32, matches the PyTorch module with training-mode BN)
# ----------------------------------------------------------------------------
def reference_forward(x_nchw, params):
    h = x_nchw.astype(jnp.float32)

    def bn(t, gamma, beta):
        m = jnp.mean(t, axis=(0, 2, 3), keepdims=True)
        v = jnp.mean(jnp.square(t - m), axis=(0, 2, 3), keepdims=True)
        return ((t - m) / jnp.sqrt(v + EPS) * gamma[None, :, None, None]
                + beta[None, :, None, None])

    for p in params:
        C, Cmid = p["w1"].shape
        a = jnp.maximum(bn(h, p["gamma1"], p["beta1"]), 0.0)
        mid = lax.conv_general_dilated(
            a, p["w1"].reshape(1, 1, C, Cmid), (1, 1), "VALID",
            dimension_numbers=("NCHW", "HWIO", "NCHW"),
            precision=lax.Precision.HIGHEST)
        b = jnp.maximum(bn(mid, p["gamma2"], p["beta2"]), 0.0)
        new = lax.conv_general_dilated(
            b, p["w2"], (1, 1), ((1, 1), (1, 1)),
            dimension_numbers=("NCHW", "HWIO", "NCHW"),
            precision=lax.Precision.HIGHEST)
        h = jnp.concatenate([h, new], axis=1)
    return h


if __name__ == "__main__":
    num_layers, in_channels, growth_rate = 3, 8, 4
    N, H, W = 2, 16, 16

    key = jax.random.PRNGKey(0)
    kx, kp = jax.random.split(key)
    x = jax.random.normal(kx, (N, in_channels, H, W), jnp.float32)   # NCHW input
    params = init_dense_block_params(kp, num_layers, in_channels, growth_rate)

    fwd = jax.jit(dense_block_forward)
    out = jax.block_until_ready(fwd(x, params))

    expected_channels = in_channels + num_layers * growth_rate
    assert out.shape == (N, expected_channels, H, W), out.shape
    assert bool(jnp.all(jnp.isfinite(out)))

    # loose tolerance: the Pallas path stores activations in bf16 and uses bf16
    # MXU operands (f32 accumulation)
    ref = reference_forward(x, params)
    err = float(jnp.max(jnp.abs(out - ref)))
    assert err < 0.2, f"max |pallas - reference| = {err}"

    print("KERNEL_OK")
</pallas_src>

<mosaic_0001>
module attributes {stable_mosaic.version = 11 : i64} {
  func.func @_bn_relu_conv1x1_kernel(%arg0: i32, %arg1: i32, %arg2: memref<1x176x128xbf16, #tpu.memory_space<vmem>>, %arg3: memref<176x1xf32, #tpu.memory_space<vmem>>, %arg4: memref<1x128xf32, #tpu.memory_space<vmem>>, %arg5: memref<1x128xf32, #tpu.memory_space<vmem>>, %arg6: memref<128x128xbf16, #tpu.memory_space<vmem>>, %arg7: memref<1x176x128xbf16, #tpu.memory_space<vmem>>, %arg8: memref<1x1x128xf32, #tpu.memory_space<vmem>>, %arg9: memref<1x1x128xf32, #tpu.memory_space<vmem>>) attributes {dimension_semantics = [#tpu.dimension_semantics<parallel>, #tpu.dimension_semantics<arbitrary>], iteration_bounds = array<i64: 2, 2>, scalar_prefetch = 0 : i64, scratch_operands = 0 : i64, tpu.core_type = #tpu.core_type<tc>, window_params = [{transform_indices = @transform_0, window_bounds = array<i64: 1, 176, 128>}, {transform_indices = @transform_1, window_bounds = array<i64: 176, 1>}, {pipeline_mode = #tpu.pipeline_mode<synchronous>, transform_indices = @transform_2, window_bounds = array<i64: 1, 128>}, {pipeline_mode = #tpu.pipeline_mode<synchronous>, transform_indices = @transform_3, window_bounds = array<i64: 1, 128>}, {pipeline_mode = #tpu.pipeline_mode<synchronous>, transform_indices = @transform_4, window_bounds = array<i64: 128, 128>}, {transform_indices = @transform_5, window_bounds = array<i64: 1, 176, 128>}, {transform_indices = @transform_6, window_bounds = array<i64: 1, 1, 128>}, {transform_indices = @transform_7, window_bounds = array<i64: 1, 1, 128>}]} {
    %c0_i32 = arith.constant 0 : i32
    %0 = arith.cmpi eq, %arg1, %c0_i32 : i32
    %1 = arith.extui %0 : i1 to i32
    %c0_i32_0 = arith.constant 0 : i32
    %2 = arith.cmpi ne, %1, %c0_i32_0 : i32
    scf.if %2 {
      %cst_29 = arith.constant 0.000000e+00 : f32
      %41 = vector.broadcast %cst_29 : f32 to vector<1x128xf32>
      %c0_30 = arith.constant 0 : index
      %c0_31 = arith.constant 0 : index
      %c0_32 = arith.constant 0 : index
      %42 = vector.load %arg8[%c0_30, %c0_31, %c0_32] : memref<1x1x128xf32, #tpu.memory_space<vmem>>, vector<1x1x128xf32>
      %43 = vector.shape_cast %42 : vector<1x1x128xf32> to vector<1x128xf32>
      %44 = vector.shape_cast %41 : vector<1x128xf32> to vector<1x1x128xf32>
      tpu.vector_store %arg8[%c0_30, %c0_31, %c0_32], %44 {strides = array<i32>} : memref<1x1x128xf32, #tpu.memory_space<vmem>>, vector<1x1x128xf32>,
      %cst_33 = arith.constant 0.000000e+00 : f32
      %45 = vector.broadcast %cst_33 : f32 to vector<1x128xf32>
      %c0_34 = arith.constant 0 : index
      %c0_35 = arith.constant 0 : index
      %c0_36 = arith.constant 0 : index
      %46 = vector.load %arg9[%c0_34, %c0_35, %c0_36] : memref<1x1x128xf32, #tpu.memory_space<vmem>>, vector<1x1x128xf32>
      %47 = vector.shape_cast %46 : vector<1x1x128xf32> to vector<1x128xf32>
      %48 = vector.shape_cast %45 : vector<1x128xf32> to vector<1x1x128xf32>
      tpu.vector_store %arg9[%c0_34, %c0_35, %c0_36], %48 {strides = array<i32>} : memref<1x1x128xf32, #tpu.memory_space<vmem>>, vector<1x1x128xf32>,
    } else {
    }
    %c0 = arith.constant 0 : index
    %c0_1 = arith.constant 0 : index
    %c0_2 = arith.constant 0 : index
    %3 = vector.load %arg2[%c0, %c0_1, %c0_2] : memref<1x176x128xbf16, #tpu.memory_space<vmem>>, vector<1x176x128xbf16>
    %4 = vector.shape_cast %3 : vector<1x176x128xbf16> to vector<176x128xbf16>
    %5 = arith.extf %4 : vector<176x128xbf16> to vector<176x128xf32>
    %c0_3 = arith.constant 0 : index
    %c0_4 = arith.constant 0 : index
    %6 = vector.load %arg4[%c0_3, %c0_4] : memref<1x128xf32, #tpu.memory_space<vmem>>, vector<1x128xf32>
    %7 = vector.broadcast %6 : vector<1x128xf32> to vector<176x128xf32>
    %8 = arith.mulf %5, %7 : vector<176x128xf32>
    %c0_5 = arith.constant 0 : index
    %c0_6 = arith.constant 0 : index
    %9 = vector.load %arg5[%c0_5, %c0_6] : memref<1x128xf32, #tpu.memory_space<vmem>>, vector<1x128xf32>
    %10 = vector.broadcast %9 : vector<1x128xf32> to vector<176x128xf32>
    %11 = arith.addf %8, %10 : vector<176x128xf32>
    %cst = arith.constant 0.000000e+00 : f32
    %12 = vector.broadcast %cst : f32 to vector<176x128xf32>
    %13 = arith.maximumf %11, %12 : vector<176x128xf32>
    %14 = arith.truncf %13 : vector<176x128xf32> to vector<176x128xbf16>
    %c0_7 = arith.constant 0 : index
    %c0_8 = arith.constant 0 : index
    %15 = vector.load %arg6[%c0_7, %c0_8] : memref<128x128xbf16, #tpu.memory_space<vmem>>, vector<128x128xbf16>
    %cst_9 = arith.constant dense<0.000000e+00> : vector<176x128xf32>
    %16 = tpu.matmul %14, %15, %cst_9 {dimension_numbers = #tpu.dot_dimension_numbers<[1], [0], [0], [1], [0, 0, 1, 1], [], []>} : vector<176x128xbf16>, vector<128x128xbf16>, vector<176x128xf32> -> vector<176x128xf32>
    %17 = arith.truncf %16 : vector<176x128xf32> to vector<176x128xbf16>
    %c0_10 = arith.constant 0 : index
    %c0_11 = arith.constant 0 : index
    %c0_12 = arith.constant 0 : index
    %18 = vector.load %arg7[%c0_10, %c0_11, %c0_12] : memref<1x176x128xbf16, #tpu.memory_space<vmem>>, vector<1x176x128xbf16>
    %19 = vector.shape_cast %18 : vector<1x176x128xbf16> to vector<176x128xbf16>
    %20 = vector.shape_cast %17 : vector<176x128xbf16> to vector<1x176x128xbf16>
    tpu.vector_store %arg7[%c0_10, %c0_11, %c0_12], %20 {strides = array<i32>} : memref<1x176x128xbf16, #tpu.memory_space<vmem>>, vector<1x176x128xbf16>,
    %c0_13 = arith.constant 0 : index
    %c0_14 = arith.constant 0 : index
    %21 = vector.load %arg3[%c0_13, %c0_14] : memref<176x1xf32, #tpu.memory_space<vmem>>, vector<176x1xf32>
    %22 = vector.broadcast %21 : vector<176x1xf32> to vector<176x128xf32>
    %23 = arith.mulf %16, %22 : vector<176x128xf32>
    %c0_15 = arith.constant 0 : index
    %c0_16 = arith.constant 0 : index
    %c0_17 = arith.constant 0 : index
    %24 = vector.load %arg8[%c0_15, %c0_16, %c0_17] : memref<1x1x128xf32, #tpu.memory_space<vmem>>, vector<1x1x128xf32>
    %25 = vector.shape_cast %24 : vector<1x1x128xf32> to vector<1x128xf32>
    %cst_18 = arith.constant dense<0.000000e+00> : vector<128xf32>
    %26 = vector.multi_reduction <add>, %23, %cst_18 [0] : vector<176x128xf32> to vector<128xf32>
    %27 = vector.shape_cast %26 : vector<128xf32> to vector<1x128xf32>
    %28 = arith.addf %25, %27 : vector<1x128xf32>
    %c0_19 = arith.constant 0 : index
    %c0_20 = arith.constant 0 : index
    %c0_21 = arith.constant 0 : index
    %29 = vector.load %arg8[%c0_19, %c0_20, %c0_21] : memref<1x1x128xf32, #tpu.memory_space<vmem>>, vector<1x1x128xf32>
    %30 = vector.shape_cast %29 : vector<1x1x128xf32> to vector<1x128xf32>
    %31 = vector.shape_cast %28 : vector<1x128xf32> to vector<1x1x128xf32>
    tpu.vector_store %arg8[%c0_19, %c0_20, %c0_21], %31 {strides = array<i32>} : memref<1x1x128xf32, #tpu.memory_space<vmem>>, vector<1x1x128xf32>,
    %c0_22 = arith.constant 0 : index
    %c0_23 = arith.constant 0 : index
    %c0_24 = arith.constant 0 : index
    %32 = vector.load %arg9[%c0_22, %c0_23, %c0_24] : memref<1x1x128xf32, #tpu.memory_space<vmem>>, vector<1x1x128xf32>
    %33 = vector.shape_cast %32 : vector<1x1x128xf32> to vector<1x128xf32>
    %34 = arith.mulf %23, %16 : vector<176x128xf32>
    %cst_25 = arith.constant dense<0.000000e+00> : vector<128xf32>
    %35 = vector.multi_reduction <add>, %34, %cst_25 [0] : vector<176x128xf32> to vector<128xf32>
    %36 = vector.shape_cast %35 : vector<128xf32> to vector<1x128xf32>
    %37 = arith.addf %33, %36 : vector<1x128xf32>
    %c0_26 = arith.constant 0 : index
    %c0_27 = arith.constant 0 : index
    %c0_28 = arith.constant 0 : index
    %38 = vector.load %arg9[%c0_26, %c0_27, %c0_28] : memref<1x1x128xf32, #tpu.memory_space<vmem>>, vector<1x1x128xf32>
    %39 = vector.shape_cast %38 : vector<1x1x128xf32> to vector<1x128xf32>
    %40 = vector.shape_cast %37 : vector<1x128xf32> to vector<1x1x128xf32>
    tpu.vector_store %arg9[%c0_26, %c0_27, %c0_28], %40 {strides = array<i32>} : memref<1x1x128xf32, #tpu.memory_space<vmem>>, vector<1x1x128xf32>,
    return
  }
  func.func @transform_0(%arg0: i32, %arg1: i32) -> (i32, i32, i32) {
    %c0_i32 = arith.constant 0 : i32
    %c0_i32_0 = arith.constant 0 : i32
    return %arg0, %arg1, %c0_i32 : i32, i32, i32
  }
  func.func @transform_1(%arg0: i32, %arg1: i32) -> (i32, i32) {
    %c0_i32 = arith.constant 0 : i32
    %c0_i32_0 = arith.constant 0 : i32
    return %arg1, %c0_i32 : i32, i32
  }
  func.func @transform_2(%arg0: i32, %arg1: i32) -> (i32, i32) {
    %c0_i32 = arith.constant 0 : i32
    %c0_i32_0 = arith.constant 0 : i32
    %c0_i32_1 = arith.constant 0 : i32
    return %c0_i32, %c0_i32_0 : i32, i32
  }
  func.func @transform_3(%arg0: i32, %arg1: i32) -> (i32, i32) {
    %c0_i32 = arith.constant 0 : i32
    %c0_i32_0 = arith.constant 0 : i32
    %c0_i32_1 = arith.constant 0 : i32
    return %c0_i32, %c0_i32_0 : i32, i32
  }
  func.func @transform_4(%arg0: i32, %arg1: i32) -> (i32, i32) {
    %c0_i32 = arith.constant 0 : i32
    %c0_i32_0 = arith.constant 0 : i32
    %c0_i32_1 = arith.constant 0 : i32
    return %c0_i32, %c0_i32_0 : i32, i32
  }
  func.func @transform_5(%arg0: i32, %arg1: i32) -> (i32, i32, i32) {
    %c0_i32 = arith.constant 0 : i32
    %c0_i32_0 = arith.constant 0 : i32
    return %arg0, %arg1, %c0_i32 : i32, i32, i32
  }
  func.func @transform_6(%arg0: i32, %arg1: i32) -> (i32, i32, i32) {
    %c0_i32 = arith.constant 0 : i32
    %c0_i32_0 = arith.constant 0 : i32
    %c0_i32_1 = arith.constant 0 : i32
    return %arg0, %c0_i32, %c0_i32_0 : i32, i32, i32
  }
  func.func @transform_7(%arg0: i32, %arg1: i32) -> (i32, i32, i32) {
    %c0_i32 = arith.constant 0 : i32
    %c0_i32_0 = arith.constant 0 : i32
    %c0_i32_1 = arith.constant 0 : i32
    return %arg0, %c0_i32, %c0_i32_0 : i32, i32, i32
  }
}

module attributes {stable_mosaic.version = 11 : i64} {
  func.func @_bn_relu_conv3x3_kernel(%arg0: i32, %arg1: i32, %arg2: memref<1x352x128xbf16, #tpu.memory_space<vmem>>, %arg3: memref<352x1xf32, #tpu.memory_space<vmem>>, %arg4: memref<1x128xf32, #tpu.memory_space<vmem>>, %arg5: memref<1x128xf32, #tpu.memory_space<vmem>>, %arg6: memref<9x128x128xbf16, #tpu.memory_space<vmem>>, %arg7: memref<1x352x128xbf16, #tpu.memory_space<vmem>>, %arg8: memref<1x352x128xbf16, #tpu.memory_space<vmem>>, %arg9: memref<1x1x128xf32, #tpu.memory_space<vmem>>, %arg10: memref<1x1x128xf32, #tpu.memory_space<vmem>>, %arg11: memref<208x128xbf16, #tpu.memory_space<vmem>>) attributes {dimension_semantics = [#tpu.dimension_semantics<parallel>, #tpu.dimension_semantics<arbitrary>], iteration_bounds = array<i64: 2, 2>, scalar_prefetch = 0 : i64, scratch_operands = 1 : i64, tpu.core_type = #tpu.core_type<tc>, window_params = [{transform_indices = @transform_0, window_bounds = array<i64: 1, 352, 128>}, {pipeline_mode = #tpu.pipeline_mode<synchronous>, transform_indices = @transform_1, window_bounds = array<i64: 352, 1>}, {pipeline_mode = #tpu.pipeline_mode<synchronous>, transform_indices = @transform_2, window_bounds = array<i64: 1, 128>}, {pipeline_mode = #tpu.pipeline_mode<synchronous>, transform_indices = @transform_3, window_bounds = array<i64: 1, 128>}, {pipeline_mode = #tpu.pipeline_mode<synchronous>, transform_indices = @transform_4, window_bounds = array<i64: 9, 128, 128>}, {transform_indices = @transform_5, window_bounds = array<i64: 1, 352, 128>}, {transform_indices = @transform_6, window_bounds = array<i64: 1, 352, 128>}, {transform_indices = @transform_7, window_bounds = array<i64: 1, 1, 128>}, {transform_indices = @transform_8, window_bounds = array<i64: 1, 1, 128>}]} {
    %c144_i32 = arith.constant 144 : i32
    %0 = arith.muli %arg1, %c144_i32 : i32
    %1 = tpu.assume_multiple %0, 16 : i32
    %c32_i32 = arith.constant 32 : i32
    %2 = arith.addi %1, %c32_i32 : i32
    %3 = tpu.assume_multiple %2, 16 : i32
    %c0_i32 = arith.constant 0 : i32
    %4 = arith.cmpi eq, %arg1, %c0_i32 : i32
    %5 = arith.extui %4 : i1 to i32
    %c0_i32_0 = arith.constant 0 : i32
    %6 = arith.cmpi ne, %5, %c0_i32_0 : i32
    scf.if %6 {
      %cst_65 = arith.constant 0.000000e+00 : f32
      %107 = vector.broadcast %cst_65 : f32 to vector<1x128xf32>
      %c0_66 = arith.constant 0 : index
      %c0_67 = arith.constant 0 : index
      %c0_68 = arith.constant 0 : index
      %108 = vector.load %arg9[%c0_66, %c0_67, %c0_68] : memref<1x1x128xf32, #tpu.memory_space<vmem>>, vector<1x1x128xf32>
      %109 = vector.shape_cast %108 : vector<1x1x128xf32> to vector<1x128xf32>
      %110 = vector.shape_cast %107 : vector<1x128xf32> to vector<1x1x128xf32>
      tpu.vector_store %arg9[%c0_66, %c0_67, %c0_68], %110 {strides = array<i32>} : memref<1x1x128xf32, #tpu.memory_space<vmem>>, vector<1x1x128xf32>,
      %cst_69 = arith.constant 0.000000e+00 : f32
      %111 = vector.broadcast %cst_69 : f32 to vector<1x128xf32>
      %c0_70 = arith.constant 0 : index
      %c0_71 = arith.constant 0 : index
      %c0_72 = arith.constant 0 : index
      %112 = vector.load %arg10[%c0_70, %c0_71, %c0_72] : memref<1x1x128xf32, #tpu.memory_space<vmem>>, vector<1x1x128xf32>
      %113 = vector.shape_cast %112 : vector<1x1x128xf32> to vector<1x128xf32>
      %114 = vector.shape_cast %111 : vector<1x128xf32> to vector<1x1x128xf32>
      tpu.vector_store %arg10[%c0_70, %c0_71, %c0_72], %114 {strides = array<i32>} : memref<1x1x128xf32, #tpu.memory_space<vmem>>, vector<1x1x128xf32>,
      %cst_73 = arith.constant 0.000000e+00 : bf16
      %115 = vector.broadcast %cst_73 : bf16 to vector<32x128xbf16>
      %c0_74 = arith.constant 0 : index
      %c0_75 = arith.constant 0 : index
      %c0_76 = arith.constant 0 : index
      %116 = vector.load %arg8[%c0_74, %c0_75, %c0_76] : memref<1x352x128xbf16, #tpu.memory_space<vmem>>, vector<1x32x128xbf16>
      %117 = vector.shape_cast %116 : vector<1x32x128xbf16> to vector<32x128xbf16>
      %118 = vector.shape_cast %115 : vector<32x128xbf16> to vector<1x32x128xbf16>
      tpu.vector_store %arg8[%c0_74, %c0_75, %c0_76], %118 {strides = array<i32>} : memref<1x352x128xbf16, #tpu.memory_space<vmem>>, vector<1x32x128xbf16>,
      %cst_77 = arith.constant 0.000000e+00 : bf16
      %119 = vector.broadcast %cst_77 : bf16 to vector<32x128xbf16>
      %c0_78 = arith.constant 0 : index
      %c320 = arith.constant 320 : index
      %c0_79 = arith.constant 0 : index
      %120 = vector.load %arg8[%c0_78, %c320, %c0_79] : memref<1x352x128xbf16, #tpu.memory_space<vmem>>, vector<1x32x128xbf16>
      %121 = vector.shape_cast %120 : vector<1x32x128xbf16> to vector<32x128xbf16>
      %122 = vector.shape_cast %119 : vector<32x128xbf16> to vector<1x32x128xbf16>
      tpu.vector_store %arg8[%c0_78, %c320, %c0_79], %122 {strides = array<i32>} : memref<1x352x128xbf16, #tpu.memory_space<vmem>>, vector<1x32x128xbf16>,
    } else {
    }
    %c0 = arith.constant 0 : index
    %7 = arith.index_cast %1 : i32 to index
    %c0_1 = arith.constant 0 : index
    %8 = vector.load %arg2[%c0, %7, %c0_1] : memref<1x352x128xbf16, #tpu.memory_space<vmem>>, vector<1x208x128xbf16>
    %9 = vector.shape_cast %8 : vector<1x208x128xbf16> to vector<208x128xbf16>
    %10 = arith.extf %9 : vector<208x128xbf16> to vector<208x128xf32>
    %c0_2 = arith.constant 0 : index
    %c0_3 = arith.constant 0 : index
    %11 = vector.load %arg4[%c0_2, %c0_3] : memref<1x128xf32, #tpu.memory_space<vmem>>, vector<1x128xf32>
    %12 = vector.broadcast %11 : vector<1x128xf32> to vector<208x128xf32>
    %13 = arith.mulf %10, %12 : vector<208x128xf32>
    %c0_4 = arith.constant 0 : index
    %c0_5 = arith.constant 0 : index
    %14 = vector.load %arg5[%c0_4, %c0_5] : memref<1x128xf32, #tpu.memory_space<vmem>>, vector<1x128xf32>
    %15 = vector.broadcast %14 : vector<1x128xf32> to vector<208x128xf32>
    %16 = arith.addf %13, %15 : vector<208x128xf32>
    %cst = arith.constant 0.000000e+00 : f32
    %17 = vector.broadcast %cst : f32 to vector<208x128xf32>
    %18 = arith.maximumf %16, %17 : vector<208x128xf32>
    %19 = arith.index_cast %1 : i32 to index
    %c0_6 = arith.constant 0 : index
    %20 = vector.load %arg3[%19, %c0_6] : memref<352x1xf32, #tpu.memory_space<vmem>>, vector<208x1xf32>
    %21 = vector.broadcast %20 : vector<208x1xf32> to vector<208x128xf32>
    %22 = arith.mulf %18, %21 : vector<208x128xf32>
    %23 = arith.truncf %22 : vector<208x128xf32> to vector<208x128xbf16>
    %c0_7 = arith.constant 0 : index
    %c0_8 = arith.constant 0 : index
    %24 = vector.load %arg11[%c0_7, %c0_8] : memref<208x128xbf16, #tpu.memory_space<vmem>>, vector<208x128xbf16>
    tpu.vector_store %arg11[%c0_7, %c0_8], %23 {strides = array<i32>} : memref<208x128xbf16, #tpu.memory_space<vmem>>, vector<208x128xbf16>,
    %c13 = arith.constant 13 : index
    %c0_9 = arith.constant 0 : index
    %25 = vector.load %arg11[%c13, %c0_9] : memref<208x128xbf16, #tpu.memory_space<vmem>>, vector<144x128xbf16>
    %c0_10 = arith.constant 0 : index
    %c0_11 = arith.constant 0 : index
    %c0_12 = arith.constant 0 : index
    %26 = vector.load %arg6[%c0_10, %c0_11, %c0_12] : memref<9x128x128xbf16, #tpu.memory_space<vmem>>, vector<1x128x128xbf16>
    %27 = vector.shape_cast %26 : vector<1x128x128xbf16> to vector<128x128xbf16>
    %cst_13 = arith.constant dense<0.000000e+00> : vector<144x128xf32>
    %28 = tpu.matmul %25, %27, %cst_13 {dimension_numbers = #tpu.dot_dimension_numbers<[1], [0], [0], [1], [0, 0, 1, 1], [], []>} : vector<144x128xbf16>, vector<128x128xbf16>, vector<144x128xf32> -> vector<144x128xf32>
    %c14 = arith.constant 14 : index
    %c0_14 = arith.constant 0 : index
    %29 = vector.load %arg11[%c14, %c0_14] : memref<208x128xbf16, #tpu.memory_space<vmem>>, vector<144x128xbf16>
    %c1 = arith.constant 1 : index
    %c0_15 = arith.constant 0 : index
    %c0_16 = arith.constant 0 : index
    %30 = vector.load %arg6[%c1, %c0_15, %c0_16] : memref<9x128x128xbf16, #tpu.memory_space<vmem>>, vector<1x128x128xbf16>
    %31 = vector.shape_cast %30 : vector<1x128x128xbf16> to vector<128x128xbf16>
    %cst_17 = arith.constant dense<0.000000e+00> : vector<144x128xf32>
    %32 = tpu.matmul %29, %31, %cst_17 {dimension_numbers = #tpu.dot_dimension_numbers<[1], [0], [0], [1], [0, 0, 1, 1], [], []>} : vector<144x128xbf16>, vector<128x128xbf16>, vector<144x128xf32> -> vector<144x128xf32>
    %33 = arith.addf %28, %32 : vector<144x128xf32>
    %c15 = arith.constant 15 : index
    %c0_18 = arith.constant 0 : index
    %34 = vector.load %arg11[%c15, %c0_18] : memref<208x128xbf16, #tpu.memory_space<vmem>>, vector<144x128xbf16>
    %c2 = arith.constant 2 : index
    %c0_19 = arith.constant 0 : index
    %c0_20 = arith.constant 0 : index
    %35 = vector.load %arg6[%c2, %c0_19, %c0_20] : memref<9x128x128xbf16, #tpu.memory_space<vmem>>, vector<1x128x128xbf16>
    %36 = vector.shape_cast %35 : vector<1x128x128xbf16> to vector<128x128xbf16>
    %cst_21 = arith.constant dense<0.000000e+00> : vector<144x128xf32>
    %37 = tpu.matmul %34, %36, %cst_21 {dimension_numbers = #tpu.dot_dimension_numbers<[1], [0], [0], [1], [0, 0, 1, 1], [], []>} : vector<144x128xbf16>, vector<128x128xbf16>, vector<144x128xf32> -> vector<144x128xf32>
    %38 = arith.addf %33, %37 : vector<144x128xf32>
    %c31 = arith.constant 31 : index
    %c0_22 = arith.constant 0 : index
    %39 = vector.load %arg11[%c31, %c0_22] : memref<208x128xbf16, #tpu.memory_space<vmem>>, vector<144x128xbf16>
    %c3 = arith.constant 3 : index
    %c0_23 = arith.constant 0 : index
    %c0_24 = arith.constant 0 : index
    %40 = vector.load %arg6[%c3, %c0_23, %c0_24] : memref<9x128x128xbf16, #tpu.memory_space<vmem>>, vector<1x128x128xbf16>
    %41 = vector.shape_cast %40 : vector<1x128x128xbf16> to vector<128x128xbf16>
    %cst_25 = arith.constant dense<0.000000e+00> : vector<144x128xf32>
    %42 = tpu.matmul %39, %41, %cst_25 {dimension_numbers = #tpu.dot_dimension_numbers<[1], [0], [0], [1], [0, 0, 1, 1], [], []>} : vector<144x128xbf16>, vector<128x128xbf16>, vector<144x128xf32> -> vector<144x128xf32>
    %43 = arith.addf %38, %42 : vector<144x128xf32>
    %c32 = arith.constant 32 : index
    %c0_26 = arith.constant 0 : index
    %44 = vector.load %arg11[%c32, %c0_26] : memref<208x128xbf16, #tpu.memory_space<vmem>>, vector<144x128xbf16>
    %c4 = arith.constant 4 : index
    %c0_27 = arith.constant 0 : index
    %c0_28 = arith.constant 0 : index
    %45 = vector.load %arg6[%c4, %c0_27, %c0_28] : memref<9x128x128xbf16, #tpu.memory_space<vmem>>, vector<1x128x128xbf16>
    %46 = vector.shape_cast %45 : vector<1x128x128xbf16> to vector<128x128xbf16>
    %cst_29 = arith.constant dense<0.000000e+00> : vector<144x128xf32>
    %47 = tpu.matmul %44, %46, %cst_29 {dimension_numbers = #tpu.dot_dimension_numbers<[1], [0], [0], [1], [0, 0, 1, 1], [], []>} : vector<144x128xbf16>, vector<128x128xbf16>, vector<144x128xf32> -> vector<144x128xf32>
    %48 = arith.addf %43, %47 : vector<144x128xf32>
    %c33 = arith.constant 33 : index
    %c0_30 = arith.constant 0 : index
    %49 = vector.load %arg11[%c33, %c0_30] : memref<208x128xbf16, #tpu.memory_space<vmem>>, vector<144x128xbf16>
    %c5 = arith.constant 5 : index
    %c0_31 = arith.constant 0 : index
    %c0_32 = arith.constant 0 : index
    %50 = vector.load %arg6[%c5, %c0_31, %c0_32] : memref<9x128x128xbf16, #tpu.memory_space<vmem>>, vector<1x128x128xbf16>
    %51 = vector.shape_cast %50 : vector<1x128x128xbf16> to vector<128x128xbf16>
    %cst_33 = arith.constant dense<0.000000e+00> : vector<144x128xf32>
    %52 = tpu.matmul %49, %51, %cst_33 {dimension_numbers = #tpu.dot_dimension_numbers<[1], [0], [0], [1], [0, 0, 1, 1], [], []>} : vector<144x128xbf16>, vector<128x128xbf16>, vector<144x128xf32> -> vector<144x128xf32>
    %53 = arith.addf %48, %52 : vector<144x128xf32>
    %c49 = arith.constant 49 : index
    %c0_34 = arith.constant 0 : index
    %54 = vector.load %arg11[%c49, %c0_34] : memref<208x128xbf16, #tpu.memory_space<vmem>>, vector<144x128xbf16>
    %c6 = arith.constant 6 : index
    %c0_35 = arith.constant 0 : index
    %c0_36 = arith.constant 0 : index
    %55 = vector.load %arg6[%c6, %c0_35, %c0_36] : memref<9x128x128xbf16, #tpu.memory_space<vmem>>, vector<1x128x128xbf16>
    %56 = vector.shape_cast %55 : vector<1x128x128xbf16> to vector<128x128xbf16>
    %cst_37 = arith.constant dense<0.000000e+00> : vector<144x128xf32>
    %57 = tpu.matmul %54, %56, %cst_37 {dimension_numbers = #tpu.dot_dimension_numbers<[1], [0], [0], [1], [0, 0, 1, 1], [], []>} : vector<144x128xbf16>, vector<128x128xbf16>, vector<144x128xf32> -> vector<144x128xf32>
    %58 = arith.addf %53, %57 : vector<144x128xf32>
    %c50 = arith.constant 50 : index
    %c0_38 = arith.constant 0 : index
    %59 = vector.load %arg11[%c50, %c0_38] : memref<208x128xbf16, #tpu.memory_space<vmem>>, vector<144x128xbf16>
    %c7 = arith.constant 7 : index
    %c0_39 = arith.constant 0 : index
    %c0_40 = arith.constant 0 : index
    %60 = vector.load %arg6[%c7, %c0_39, %c0_40] : memref<9x128x128xbf16, #tpu.memory_space<vmem>>, vector<1x128x128xbf16>
    %61 = vector.shape_cast %60 : vector<1x128x128xbf16> to vector<128x128xbf16>
    %cst_41 = arith.constant dense<0.000000e+00> : vector<144x128xf32>
    %62 = tpu.matmul %59, %61, %cst_41 {dimension_numbers = #tpu.dot_dimension_numbers<[1], [0], [0], [1], [0, 0, 1, 1], [], []>} : vector<144x128xbf16>, vector<128x128xbf16>, vector<144x128xf32> -> vector<144x128xf32>
    %63 = arith.addf %58, %62 : vector<144x128xf32>
    %c51 = arith.constant 51 : index
    %c0_42 = arith.constant 0 : index
    %64 = vector.load %arg11[%c51, %c0_42] : memref<208x128xbf16, #tpu.memory_space<vmem>>, vector<144x128xbf16>
    %c8 = arith.constant 8 : index
    %c0_43 = arith.constant 0 : index
    %c0_44 = arith.constant 0 : index
    %65 = vector.load %arg6[%c8, %c0_43, %c0_44] : memref<9x128x128xbf16, #tpu.memory_space<vmem>>, vector<1x128x128xbf16>
    %66 = vector.shape_cast %65 : vector<1x128x128xbf16> to vector<128x128xbf16>
    %cst_45 = arith.constant dense<0.000000e+00> : vector<144x128xf32>
    %67 = tpu.matmul %64, %66, %cst_45 {dimension_numbers = #tpu.dot_dimension_numbers<[1], [0], [0], [1], [0, 0, 1, 1], [], []>} : vector<144x128xbf16>, vector<128x128xbf16>, vector<144x128xf32> -> vector<144x128xf32>
    %68 = arith.addf %63, %67 : vector<144x128xf32>
    %69 = tpu.iota {dimensions = array<i32: 1>} : vector<1x128xi32>
    %c8_i32 = arith.constant 8 : i32
    %70 = vector.broadcast %c8_i32 : i32 to vector<1x128xi32>
    %71 = arith.cmpi sge, %69, %70 : vector<1x128xi32>
    %c12_i32 = arith.constant 12 : i32
    %72 = vector.broadcast %c12_i32 : i32 to vector<1x128xi32>
    %73 = arith.cmpi slt, %69, %72 : vector<1x128xi32>
    %74 = arith.andi %71, %73 : vector<1x128xi1>
    %c0_46 = arith.constant 0 : index
    %75 = arith.index_cast %3 : i32 to index
    %c0_47 = arith.constant 0 : index
    %76 = vector.load %arg7[%c0_46, %75, %c0_47] : memref<1x352x128xbf16, #tpu.memory_space<vmem>>, vector<1x144x128xbf16>
    %77 = vector.shape_cast %76 : vector<1x144x128xbf16> to vector<144x128xbf16>
    %78 = arith.truncf %68 : vector<144x128xf32> to vector<144x128xbf16>
    %79 = vector.shape_cast %74 : vector<1x128xi1> to vector<1x128xi1>
    %80 = vector.broadcast %79 : vector<1x128xi1> to vector<144x128xi1>
    %81 = arith.select %80, %78, %77 : vector<144x128xi1>, vector<144x128xbf16>
    %c0_48 = arith.constant 0 : index
    %82 = arith.index_cast %3 : i32 to index
    %c0_49 = arith.constant 0 : index
    %83 = vector.load %arg8[%c0_48, %82, %c0_49] : memref<1x352x128xbf16, #tpu.memory_space<vmem>>, vector<1x144x128xbf16>
    %84 = vector.shape_cast %83 : vector<1x144x128xbf16> to vector<144x128xbf16>
    %85 = vector.shape_cast %81 : vector<144x128xbf16> to vector<1x144x128xbf16>
    tpu.vector_store %arg8[%c0_48, %82, %c0_49], %85 {strides = array<i32>} : memref<1x352x128xbf16, #tpu.memory_space<vmem>>, vector<1x144x128xbf16>,
    %86 = arith.index_cast %3 : i32 to index
    %c0_50 = arith.constant 0 : index
    %87 = vector.load %arg3[%86, %c0_50] : memref<352x1xf32, #tpu.memory_space<vmem>>, vector<144x1xf32>
    %88 = vector.broadcast %87 : vector<144x1xf32> to vector<144x128xf32>
    %89 = arith.mulf %68, %88 : vector<144x128xf32>
    %c0_51 = arith.constant 0 : index
    %c0_52 = arith.constant 0 : index
    %c0_53 = arith.constant 0 : index
    %90 = vector.load %arg9[%c0_51, %c0_52, %c0_53] : memref<1x1x128xf32, #tpu.memory_space<vmem>>, vector<1x1x128xf32>
    %91 = vector.shape_cast %90 : vector<1x1x128xf32> to vector<1x128xf32>
    %cst_54 = arith.constant dense<0.000000e+00> : vector<128xf32>
    %92 = vector.multi_reduction <add>, %89, %cst_54 [0] : vector<144x128xf32> to vector<128xf32>
    %93 = vector.shape_cast %92 : vector<128xf32> to vector<1x128xf32>
    %94 = arith.addf %91, %93 : vector<1x128xf32>
    %c0_55 = arith.constant 0 : index
    %c0_56 = arith.constant 0 : index
    %c0_57 = arith.constant 0 : index
    %95 = vector.load %arg9[%c0_55, %c0_56, %c0_57] : memref<1x1x128xf32, #tpu.memory_space<vmem>>, vector<1x1x128xf32>
    %96 = vector.shape_cast %95 : vector<1x1x128xf32> to vector<1x128xf32>
    %97 = vector.shape_cast %94 : vector<1x128xf32> to vector<1x1x128xf32>
    tpu.vector_store %arg9[%c0_55, %c0_56, %c0_57], %97 {strides = array<i32>} : memref<1x1x128xf32, #tpu.memory_space<vmem>>, vector<1x1x128xf32>,
    %c0_58 = arith.constant 0 : index
    %c0_59 = arith.constant 0 : index
    %c0_60 = arith.constant 0 : index
    %98 = vector.load %arg10[%c0_58, %c0_59, %c0_60] : memref<1x1x128xf32, #tpu.memory_space<vmem>>, vector<1x1x128xf32>
    %99 = vector.shape_cast %98 : vector<1x1x128xf32> to vector<1x128xf32>
    %100 = arith.mulf %89, %68 : vector<144x128xf32>
    %cst_61 = arith.constant dense<0.000000e+00> : vector<128xf32>
    %101 = vector.multi_reduction <add>, %100, %cst_61 [0] : vector<144x128xf32> to vector<128xf32>
    %102 = vector.shape_cast %101 : vector<128xf32> to vector<1x128xf32>
    %103 = arith.addf %99, %102 : vector<1x128xf32>
    %c0_62 = arith.constant 0 : index
    %c0_63 = arith.constant 0 : index
    %c0_64 = arith.constant 0 : index
    %104 = vector.load %arg10[%c0_62, %c0_63, %c0_64] : memref<1x1x128xf32, #tpu.memory_space<vmem>>, vector<1x1x128xf32>
    %105 = vector.shape_cast %104 : vector<1x1x128xf32> to vector<1x128xf32>
    %106 = vector.shape_cast %103 : vector<1x128xf32> to vector<1x1x128xf32>
    tpu.vector_store %arg10[%c0_62, %c0_63, %c0_64], %106 {strides = array<i32>} : memref<1x1x128xf32, #tpu.memory_space<vmem>>, vector<1x1x128xf32>,
    return
  }
  func.func @transform_0(%arg0: i32, %arg1: i32) -> (i32, i32, i32) {
    %c0_i32 = arith.constant 0 : i32
    %c0_i32_0 = arith.constant 0 : i32
    %c0_i32_1 = arith.constant 0 : i32
    return %arg0, %c0_i32, %c0_i32_0 : i32, i32, i32
  }
  func.func @transform_1(%arg0: i32, %arg1: i32) -> (i32, i32) {
    %c0_i32 = arith.constant 0 : i32
    %c0_i32_0 = arith.constant 0 : i32
    %c0_i32_1 = arith.constant 0 : i32
    return %c0_i32, %c0_i32_0 : i32, i32
  }
  func.func @transform_2(%arg0: i32, %arg1: i32) -> (i32, i32) {
    %c0_i32 = arith.constant 0 : i32
    %c0_i32_0 = arith.constant 0 : i32
    %c0_i32_1 = arith.constant 0 : i32
    return %c0_i32, %c0_i32_0 : i32, i32
  }
  func.func @transform_3(%arg0: i32, %arg1: i32) -> (i32, i32) {
    %c0_i32 = arith.constant 0 : i32
    %c0_i32_0 = arith.constant 0 : i32
    %c0_i32_1 = arith.constant 0 : i32
    return %c0_i32, %c0_i32_0 : i32, i32
  }
  func.func @transform_4(%arg0: i32, %arg1: i32) -> (i32, i32, i32) {
    %c0_i32 = arith.constant 0 : i32
    %c0_i32_0 = arith.constant 0 : i32
    %c0_i32_1 = arith.constant 0 : i32
    %c0_i32_2 = arith.constant 0 : i32
    return %c0_i32, %c0_i32_0, %c0_i32_1 : i32, i32, i32
  }
  func.func @transform_5(%arg0: i32, %arg1: i32) -> (i32, i32, i32) {
    %c0_i32 = arith.constant 0 : i32
    %c0_i32_0 = arith.constant 0 : i32
    %c0_i32_1 = arith.constant 0 : i32
    return %arg0, %c0_i32, %c0_i32_0 : i32, i32, i32
  }
  func.func @transform_6(%arg0: i32, %arg1: i32) -> (i32, i32, i32) {
    %c0_i32 = arith.constant 0 : i32
    %c0_i32_0 = arith.constant 0 : i32
    %c0_i32_1 = arith.constant 0 : i32
    return %arg0, %c0_i32, %c0_i32_0 : i32, i32, i32
  }
  func.func @transform_7(%arg0: i32, %arg1: i32) -> (i32, i32, i32) {
    %c0_i32 = arith.constant 0 : i32
    %c0_i32_0 = arith.constant 0 : i32
    %c0_i32_1 = arith.constant 0 : i32
    return %arg0, %c0_i32, %c0_i32_0 : i32, i32, i32
  }
  func.func @transform_8(%arg0: i32, %arg1: i32) -> (i32, i32, i32) {
    %c0_i32 = arith.constant 0 : i32
    %c0_i32_0 = arith.constant 0 : i32
    %c0_i32_1 = arith.constant 0 : i32
    return %arg0, %c0_i32, %c0_i32_0 : i32, i32, i32
  }
}

module attributes {stable_mosaic.version = 11 : i64} {
  func.func @_bn_relu_conv3x3_kernel(%arg0: i32, %arg1: i32, %arg2: memref<1x352x128xbf16, #tpu.memory_space<vmem>>, %arg3: memref<352x1xf32, #tpu.memory_space<vmem>>, %arg4: memref<1x128xf32, #tpu.memory_space<vmem>>, %arg5: memref<1x128xf32, #tpu.memory_space<vmem>>, %arg6: memref<9x128x128xbf16, #tpu.memory_space<vmem>>, %arg7: memref<1x352x128xbf16, #tpu.memory_space<vmem>>, %arg8: memref<1x352x128xbf16, #tpu.memory_space<vmem>>, %arg9: memref<1x1x128xf32, #tpu.memory_space<vmem>>, %arg10: memref<1x1x128xf32, #tpu.memory_space<vmem>>, %arg11: memref<208x128xbf16, #tpu.memory_space<vmem>>) attributes {dimension_semantics = [#tpu.dimension_semantics<parallel>, #tpu.dimension_semantics<arbitrary>], iteration_bounds = array<i64: 2, 2>, scalar_prefetch = 0 : i64, scratch_operands = 1 : i64, tpu.core_type = #tpu.core_type<tc>, window_params = [{transform_indices = @transform_0, window_bounds = array<i64: 1, 352, 128>}, {pipeline_mode = #tpu.pipeline_mode<synchronous>, transform_indices = @transform_1, window_bounds = array<i64: 352, 1>}, {pipeline_mode = #tpu.pipeline_mode<synchronous>, transform_indices = @transform_2, window_bounds = array<i64: 1, 128>}, {pipeline_mode = #tpu.pipeline_mode<synchronous>, transform_indices = @transform_3, window_bounds = array<i64: 1, 128>}, {pipeline_mode = #tpu.pipeline_mode<synchronous>, transform_indices = @transform_4, window_bounds = array<i64: 9, 128, 128>}, {transform_indices = @transform_5, window_bounds = array<i64: 1, 352, 128>}, {transform_indices = @transform_6, window_bounds = array<i64: 1, 352, 128>}, {transform_indices = @transform_7, window_bounds = array<i64: 1, 1, 128>}, {transform_indices = @transform_8, window_bounds = array<i64: 1, 1, 128>}]} {
    %c144_i32 = arith.constant 144 : i32
    %0 = arith.muli %arg1, %c144_i32 : i32
    %1 = tpu.assume_multiple %0, 16 : i32
    %c32_i32 = arith.constant 32 : i32
    %2 = arith.addi %1, %c32_i32 : i32
    %3 = tpu.assume_multiple %2, 16 : i32
    %c0_i32 = arith.constant 0 : i32
    %4 = arith.cmpi eq, %arg1, %c0_i32 : i32
    %5 = arith.extui %4 : i1 to i32
    %c0_i32_0 = arith.constant 0 : i32
    %6 = arith.cmpi ne, %5, %c0_i32_0 : i32
    scf.if %6 {
      %cst_65 = arith.constant 0.000000e+00 : f32
      %107 = vector.broadcast %cst_65 : f32 to vector<1x128xf32>
      %c0_66 = arith.constant 0 : index
      %c0_67 = arith.constant 0 : index
      %c0_68 = arith.constant 0 : index
      %108 = vector.load %arg9[%c0_66, %c0_67, %c0_68] : memref<1x1x128xf32, #tpu.memory_space<vmem>>, vector<1x1x128xf32>
      %109 = vector.shape_cast %108 : vector<1x1x128xf32> to vector<1x128xf32>
      %110 = vector.shape_cast %107 : vector<1x128xf32> to vector<1x1x128xf32>
      tpu.vector_store %arg9[%c0_66, %c0_67, %c0_68], %110 {strides = array<i32>} : memref<1x1x128xf32, #tpu.memory_space<vmem>>, vector<1x1x128xf32>,
      %cst_69 = arith.constant 0.000000e+00 : f32
      %111 = vector.broadcast %cst_69 : f32 to vector<1x128xf32>
      %c0_70 = arith.constant 0 : index
      %c0_71 = arith.constant 0 : index
      %c0_72 = arith.constant 0 : index
      %112 = vector.load %arg10[%c0_70, %c0_71, %c0_72] : memref<1x1x128xf32, #tpu.memory_space<vmem>>, vector<1x1x128xf32>
      %113 = vector.shape_cast %112 : vector<1x1x128xf32> to vector<1x128xf32>
      %114 = vector.shape_cast %111 : vector<1x128xf32> to vector<1x1x128xf32>
      tpu.vector_store %arg10[%c0_70, %c0_71, %c0_72], %114 {strides = array<i32>} : memref<1x1x128xf32, #tpu.memory_space<vmem>>, vector<1x1x128xf32>,
      %cst_73 = arith.constant 0.000000e+00 : bf16
      %115 = vector.broadcast %cst_73 : bf16 to vector<32x128xbf16>
      %c0_74 = arith.constant 0 : index
      %c0_75 = arith.constant 0 : index
      %c0_76 = arith.constant 0 : index
      %116 = vector.load %arg8[%c0_74, %c0_75, %c0_76] : memref<1x352x128xbf16, #tpu.memory_space<vmem>>, vector<1x32x128xbf16>
      %117 = vector.shape_cast %116 : vector<1x32x128xbf16> to vector<32x128xbf16>
      %118 = vector.shape_cast %115 : vector<32x128xbf16> to vector<1x32x128xbf16>
      tpu.vector_store %arg8[%c0_74, %c0_75, %c0_76], %118 {strides = array<i32>} : memref<1x352x128xbf16, #tpu.memory_space<vmem>>, vector<1x32x128xbf16>,
      %cst_77 = arith.constant 0.000000e+00 : bf16
      %119 = vector.broadcast %cst_77 : bf16 to vector<32x128xbf16>
      %c0_78 = arith.constant 0 : index
      %c320 = arith.constant 320 : index
      %c0_79 = arith.constant 0 : index
      %120 = vector.load %arg8[%c0_78, %c320, %c0_79] : memref<1x352x128xbf16, #tpu.memory_space<vmem>>, vector<1x32x128xbf16>
      %121 = vector.shape_cast %120 : vector<1x32x128xbf16> to vector<32x128xbf16>
      %122 = vector.shape_cast %119 : vector<32x128xbf16> to vector<1x32x128xbf16>
      tpu.vector_store %arg8[%c0_78, %c320, %c0_79], %122 {strides = array<i32>} : memref<1x352x128xbf16, #tpu.memory_space<vmem>>, vector<1x32x128xbf16>,
    } else {
    }
    %c0 = arith.constant 0 : index
    %7 = arith.index_cast %1 : i32 to index
    %c0_1 = arith.constant 0 : index
    %8 = vector.load %arg2[%c0, %7, %c0_1] : memref<1x352x128xbf16, #tpu.memory_space<vmem>>, vector<1x208x128xbf16>
    %9 = vector.shape_cast %8 : vector<1x208x128xbf16> to vector<208x128xbf16>
    %10 = arith.extf %9 : vector<208x128xbf16> to vector<208x128xf32>
    %c0_2 = arith.constant 0 : index
    %c0_3 = arith.constant 0 : index
    %11 = vector.load %arg4[%c0_2, %c0_3] : memref<1x128xf32, #tpu.memory_space<vmem>>, vector<1x128xf32>
    %12 = vector.broadcast %11 : vector<1x128xf32> to vector<208x128xf32>
    %13 = arith.mulf %10, %12 : vector<208x128xf32>
    %c0_4 = arith.constant 0 : index
    %c0_5 = arith.constant 0 : index
    %14 = vector.load %arg5[%c0_4, %c0_5] : memref<1x128xf32, #tpu.memory_space<vmem>>, vector<1x128xf32>
    %15 = vector.broadcast %14 : vector<1x128xf32> to vector<208x128xf32>
    %16 = arith.addf %13, %15 : vector<208x128xf32>
    %cst = arith.constant 0.000000e+00 : f32
    %17 = vector.broadcast %cst : f32 to vector<208x128xf32>
    %18 = arith.maximumf %16, %17 : vector<208x128xf32>
    %19 = arith.index_cast %1 : i32 to index
    %c0_6 = arith.constant 0 : index
    %20 = vector.load %arg3[%19, %c0_6] : memref<352x1xf32, #tpu.memory_space<vmem>>, vector<208x1xf32>
    %21 = vector.broadcast %20 : vector<208x1xf32> to vector<208x128xf32>
    %22 = arith.mulf %18, %21 : vector<208x128xf32>
    %23 = arith.truncf %22 : vector<208x128xf32> to vector<208x128xbf16>
    %c0_7 = arith.constant 0 : index
    %c0_8 = arith.constant 0 : index
    %24 = vector.load %arg11[%c0_7, %c0_8] : memref<208x128xbf16, #tpu.memory_space<vmem>>, vector<208x128xbf16>
    tpu.vector_store %arg11[%c0_7, %c0_8], %23 {strides = array<i32>} : memref<208x128xbf16, #tpu.memory_space<vmem>>, vector<208x128xbf16>,
    %c13 = arith.constant 13 : index
    %c0_9 = arith.constant 0 : index
    %25 = vector.load %arg11[%c13, %c0_9] : memref<208x128xbf16, #tpu.memory_space<vmem>>, vector<144x128xbf16>
    %c0_10 = arith.constant 0 : index
    %c0_11 = arith.constant 0 : index
    %c0_12 = arith.constant 0 : index
    %26 = vector.load %arg6[%c0_10, %c0_11, %c0_12] : memref<9x128x128xbf16, #tpu.memory_space<vmem>>, vector<1x128x128xbf16>
    %27 = vector.shape_cast %26 : vector<1x128x128xbf16> to vector<128x128xbf16>
    %cst_13 = arith.constant dense<0.000000e+00> : vector<144x128xf32>
    %28 = tpu.matmul %25, %27, %cst_13 {dimension_numbers = #tpu.dot_dimension_numbers<[1], [0], [0], [1], [0, 0, 1, 1], [], []>} : vector<144x128xbf16>, vector<128x128xbf16>, vector<144x128xf32> -> vector<144x128xf32>
    %c14 = arith.constant 14 : index
    %c0_14 = arith.constant 0 : index
    %29 = vector.load %arg11[%c14, %c0_14] : memref<208x128xbf16, #tpu.memory_space<vmem>>, vector<144x128xbf16>
    %c1 = arith.constant 1 : index
    %c0_15 = arith.constant 0 : index
    %c0_16 = arith.constant 0 : index
    %30 = vector.load %arg6[%c1, %c0_15, %c0_16] : memref<9x128x128xbf16, #tpu.memory_space<vmem>>, vector<1x128x128xbf16>
    %31 = vector.shape_cast %30 : vector<1x128x128xbf16> to vector<128x128xbf16>
    %cst_17 = arith.constant dense<0.000000e+00> : vector<144x128xf32>
    %32 = tpu.matmul %29, %31, %cst_17 {dimension_numbers = #tpu.dot_dimension_numbers<[1], [0], [0], [1], [0, 0, 1, 1], [], []>} : vector<144x128xbf16>, vector<128x128xbf16>, vector<144x128xf32> -> vector<144x128xf32>
    %33 = arith.addf %28, %32 : vector<144x128xf32>
    %c15 = arith.constant 15 : index
    %c0_18 = arith.constant 0 : index
    %34 = vector.load %arg11[%c15, %c0_18] : memref<208x128xbf16, #tpu.memory_space<vmem>>, vector<144x128xbf16>
    %c2 = arith.constant 2 : index
    %c0_19 = arith.constant 0 : index
    %c0_20 = arith.constant 0 : index
    %35 = vector.load %arg6[%c2, %c0_19, %c0_20] : memref<9x128x128xbf16, #tpu.memory_space<vmem>>, vector<1x128x128xbf16>
    %36 = vector.shape_cast %35 : vector<1x128x128xbf16> to vector<128x128xbf16>
    %cst_21 = arith.constant dense<0.000000e+00> : vector<144x128xf32>
    %37 = tpu.matmul %34, %36, %cst_21 {dimension_numbers = #tpu.dot_dimension_numbers<[1], [0], [0], [1], [0, 0, 1, 1], [], []>} : vector<144x128xbf16>, vector<128x128xbf16>, vector<144x128xf32> -> vector<144x128xf32>
    %38 = arith.addf %33, %37 : vector<144x128xf32>
    %c31 = arith.constant 31 : index
    %c0_22 = arith.constant 0 : index
    %39 = vector.load %arg11[%c31, %c0_22] : memref<208x128xbf16, #tpu.memory_space<vmem>>, vector<144x128xbf16>
    %c3 = arith.constant 3 : index
    %c0_23 = arith.constant 0 : index
    %c0_24 = arith.constant 0 : index
    %40 = vector.load %arg6[%c3, %c0_23, %c0_24] : memref<9x128x128xbf16, #tpu.memory_space<vmem>>, vector<1x128x128xbf16>
    %41 = vector.shape_cast %40 : vector<1x128x128xbf16> to vector<128x128xbf16>
    %cst_25 = arith.constant dense<0.000000e+00> : vector<144x128xf32>
    %42 = tpu.matmul %39, %41, %cst_25 {dimension_numbers = #tpu.dot_dimension_numbers<[1], [0], [0], [1], [0, 0, 1, 1], [], []>} : vector<144x128xbf16>, vector<128x128xbf16>, vector<144x128xf32> -> vector<144x128xf32>
    %43 = arith.addf %38, %42 : vector<144x128xf32>
    %c32 = arith.constant 32 : index
    %c0_26 = arith.constant 0 : index
    %44 = vector.load %arg11[%c32, %c0_26] : memref<208x128xbf16, #tpu.memory_space<vmem>>, vector<144x128xbf16>
    %c4 = arith.constant 4 : index
    %c0_27 = arith.constant 0 : index
    %c0_28 = arith.constant 0 : index
    %45 = vector.load %arg6[%c4, %c0_27, %c0_28] : memref<9x128x128xbf16, #tpu.memory_space<vmem>>, vector<1x128x128xbf16>
    %46 = vector.shape_cast %45 : vector<1x128x128xbf16> to vector<128x128xbf16>
    %cst_29 = arith.constant dense<0.000000e+00> : vector<144x128xf32>
    %47 = tpu.matmul %44, %46, %cst_29 {dimension_numbers = #tpu.dot_dimension_numbers<[1], [0], [0], [1], [0, 0, 1, 1], [], []>} : vector<144x128xbf16>, vector<128x128xbf16>, vector<144x128xf32> -> vector<144x128xf32>
    %48 = arith.addf %43, %47 : vector<144x128xf32>
    %c33 = arith.constant 33 : index
    %c0_30 = arith.constant 0 : index
    %49 = vector.load %arg11[%c33, %c0_30] : memref<208x128xbf16, #tpu.memory_space<vmem>>, vector<144x128xbf16>
    %c5 = arith.constant 5 : index
    %c0_31 = arith.constant 0 : index
    %c0_32 = arith.constant 0 : index
    %50 = vector.load %arg6[%c5, %c0_31, %c0_32] : memref<9x128x128xbf16, #tpu.memory_space<vmem>>, vector<1x128x128xbf16>
    %51 = vector.shape_cast %50 : vector<1x128x128xbf16> to vector<128x128xbf16>
    %cst_33 = arith.constant dense<0.000000e+00> : vector<144x128xf32>
    %52 = tpu.matmul %49, %51, %cst_33 {dimension_numbers = #tpu.dot_dimension_numbers<[1], [0], [0], [1], [0, 0, 1, 1], [], []>} : vector<144x128xbf16>, vector<128x128xbf16>, vector<144x128xf32> -> vector<144x128xf32>
    %53 = arith.addf %48, %52 : vector<144x128xf32>
    %c49 = arith.constant 49 : index
    %c0_34 = arith.constant 0 : index
    %54 = vector.load %arg11[%c49, %c0_34] : memref<208x128xbf16, #tpu.memory_space<vmem>>, vector<144x128xbf16>
    %c6 = arith.constant 6 : index
    %c0_35 = arith.constant 0 : index
    %c0_36 = arith.constant 0 : index
    %55 = vector.load %arg6[%c6, %c0_35, %c0_36] : memref<9x128x128xbf16, #tpu.memory_space<vmem>>, vector<1x128x128xbf16>
    %56 = vector.shape_cast %55 : vector<1x128x128xbf16> to vector<128x128xbf16>
    %cst_37 = arith.constant dense<0.000000e+00> : vector<144x128xf32>
    %57 = tpu.matmul %54, %56, %cst_37 {dimension_numbers = #tpu.dot_dimension_numbers<[1], [0], [0], [1], [0, 0, 1, 1], [], []>} : vector<144x128xbf16>, vector<128x128xbf16>, vector<144x128xf32> -> vector<144x128xf32>
    %58 = arith.addf %53, %57 : vector<144x128xf32>
    %c50 = arith.constant 50 : index
    %c0_38 = arith.constant 0 : index
    %59 = vector.load %arg11[%c50, %c0_38] : memref<208x128xbf16, #tpu.memory_space<vmem>>, vector<144x128xbf16>
    %c7 = arith.constant 7 : index
    %c0_39 = arith.constant 0 : index
    %c0_40 = arith.constant 0 : index
    %60 = vector.load %arg6[%c7, %c0_39, %c0_40] : memref<9x128x128xbf16, #tpu.memory_space<vmem>>, vector<1x128x128xbf16>
    %61 = vector.shape_cast %60 : vector<1x128x128xbf16> to vector<128x128xbf16>
    %cst_41 = arith.constant dense<0.000000e+00> : vector<144x128xf32>
    %62 = tpu.matmul %59, %61, %cst_41 {dimension_numbers = #tpu.dot_dimension_numbers<[1], [0], [0], [1], [0, 0, 1, 1], [], []>} : vector<144x128xbf16>, vector<128x128xbf16>, vector<144x128xf32> -> vector<144x128xf32>
    %63 = arith.addf %58, %62 : vector<144x128xf32>
    %c51 = arith.constant 51 : index
    %c0_42 = arith.constant 0 : index
    %64 = vector.load %arg11[%c51, %c0_42] : memref<208x128xbf16, #tpu.memory_space<vmem>>, vector<144x128xbf16>
    %c8 = arith.constant 8 : index
    %c0_43 = arith.constant 0 : index
    %c0_44 = arith.constant 0 : index
    %65 = vector.load %arg6[%c8, %c0_43, %c0_44] : memref<9x128x128xbf16, #tpu.memory_space<vmem>>, vector<1x128x128xbf16>
    %66 = vector.shape_cast %65 : vector<1x128x128xbf16> to vector<128x128xbf16>
    %cst_45 = arith.constant dense<0.000000e+00> : vector<144x128xf32>
    %67 = tpu.matmul %64, %66, %cst_45 {dimension_numbers = #tpu.dot_dimension_numbers<[1], [0], [0], [1], [0, 0, 1, 1], [], []>} : vector<144x128xbf16>, vector<128x128xbf16>, vector<144x128xf32> -> vector<144x128xf32>
    %68 = arith.addf %63, %67 : vector<144x128xf32>
    %69 = tpu.iota {dimensions = array<i32: 1>} : vector<1x128xi32>
    %c12_i32 = arith.constant 12 : i32
    %70 = vector.broadcast %c12_i32 : i32 to vector<1x128xi32>
    %71 = arith.cmpi sge, %69, %70 : vector<1x128xi32>
    %c16_i32 = arith.constant 16 : i32
    %72 = vector.broadcast %c16_i32 : i32 to vector<1x128xi32>
    %73 = arith.cmpi slt, %69, %72 : vector<1x128xi32>
    %74 = arith.andi %71, %73 : vector<1x128xi1>
    %c0_46 = arith.constant 0 : index
    %75 = arith.index_cast %3 : i32 to index
    %c0_47 = arith.constant 0 : index
    %76 = vector.load %arg7[%c0_46, %75, %c0_47] : memref<1x352x128xbf16, #tpu.memory_space<vmem>>, vector<1x144x128xbf16>
    %77 = vector.shape_cast %76 : vector<1x144x128xbf16> to vector<144x128xbf16>
    %78 = arith.truncf %68 : vector<144x128xf32> to vector<144x128xbf16>
    %79 = vector.shape_cast %74 : vector<1x128xi1> to vector<1x128xi1>
    %80 = vector.broadcast %79 : vector<1x128xi1> to vector<144x128xi1>
    %81 = arith.select %80, %78, %77 : vector<144x128xi1>, vector<144x128xbf16>
    %c0_48 = arith.constant 0 : index
    %82 = arith.index_cast %3 : i32 to index
    %c0_49 = arith.constant 0 : index
    %83 = vector.load %arg8[%c0_48, %82, %c0_49] : memref<1x352x128xbf16, #tpu.memory_space<vmem>>, vector<1x144x128xbf16>
    %84 = vector.shape_cast %83 : vector<1x144x128xbf16> to vector<144x128xbf16>
    %85 = vector.shape_cast %81 : vector<144x128xbf16> to vector<1x144x128xbf16>
    tpu.vector_store %arg8[%c0_48, %82, %c0_49], %85 {strides = array<i32>} : memref<1x352x128xbf16, #tpu.memory_space<vmem>>, vector<1x144x128xbf16>,
    %86 = arith.index_cast %3 : i32 to index
    %c0_50 = arith.constant 0 : index
    %87 = vector.load %arg3[%86, %c0_50] : memref<352x1xf32, #tpu.memory_space<vmem>>, vector<144x1xf32>
    %88 = vector.broadcast %87 : vector<144x1xf32> to vector<144x128xf32>
    %89 = arith.mulf %68, %88 : vector<144x128xf32>
    %c0_51 = arith.constant 0 : index
    %c0_52 = arith.constant 0 : index
    %c0_53 = arith.constant 0 : index
    %90 = vector.load %arg9[%c0_51, %c0_52, %c0_53] : memref<1x1x128xf32, #tpu.memory_space<vmem>>, vector<1x1x128xf32>
    %91 = vector.shape_cast %90 : vector<1x1x128xf32> to vector<1x128xf32>
    %cst_54 = arith.constant dense<0.000000e+00> : vector<128xf32>
    %92 = vector.multi_reduction <add>, %89, %cst_54 [0] : vector<144x128xf32> to vector<128xf32>
    %93 = vector.shape_cast %92 : vector<128xf32> to vector<1x128xf32>
    %94 = arith.addf %91, %93 : vector<1x128xf32>
    %c0_55 = arith.constant 0 : index
    %c0_56 = arith.constant 0 : index
    %c0_57 = arith.constant 0 : index
    %95 = vector.load %arg9[%c0_55, %c0_56, %c0_57] : memref<1x1x128xf32, #tpu.memory_space<vmem>>, vector<1x1x128xf32>
    %96 = vector.shape_cast %95 : vector<1x1x128xf32> to vector<1x128xf32>
    %97 = vector.shape_cast %94 : vector<1x128xf32> to vector<1x1x128xf32>
    tpu.vector_store %arg9[%c0_55, %c0_56, %c0_57], %97 {strides = array<i32>} : memref<1x1x128xf32, #tpu.memory_space<vmem>>, vector<1x1x128xf32>,
    %c0_58 = arith.constant 0 : index
    %c0_59 = arith.constant 0 : index
    %c0_60 = arith.constant 0 : index
    %98 = vector.load %arg10[%c0_58, %c0_59, %c0_60] : memref<1x1x128xf32, #tpu.memory_space<vmem>>, vector<1x1x128xf32>
    %99 = vector.shape_cast %98 : vector<1x1x128xf32> to vector<1x128xf32>
    %100 = arith.mulf %89, %68 : vector<144x128xf32>
    %cst_61 = arith.constant dense<0.000000e+00> : vector<128xf32>
    %101 = vector.multi_reduction <add>, %100, %cst_61 [0] : vector<144x128xf32> to vector<128xf32>
    %102 = vector.shape_cast %101 : vector<128xf32> to vector<1x128xf32>
    %103 = arith.addf %99, %102 : vector<1x128xf32>
    %c0_62 = arith.constant 0 : index
    %c0_63 = arith.constant 0 : index
    %c0_64 = arith.constant 0 : index
    %104 = vector.load %arg10[%c0_62, %c0_63, %c0_64] : memref<1x1x128xf32, #tpu.memory_space<vmem>>, vector<1x1x128xf32>
    %105 = vector.shape_cast %104 : vector<1x1x128xf32> to vector<1x128xf32>
    %106 = vector.shape_cast %103 : vector<1x128xf32> to vector<1x1x128xf32>
    tpu.vector_store %arg10[%c0_62, %c0_63, %c0_64], %106 {strides = array<i32>} : memref<1x1x128xf32, #tpu.memory_space<vmem>>, vector<1x1x128xf32>,
    return
  }
  func.func @transform_0(%arg0: i32, %arg1: i32) -> (i32, i32, i32) {
    %c0_i32 = arith.constant 0 : i32
    %c0_i32_0 = arith.constant 0 : i32
    %c0_i32_1 = arith.constant 0 : i32
    return %arg0, %c0_i32, %c0_i32_0 : i32, i32, i32
  }
  func.func @transform_1(%arg0: i32, %arg1: i32) -> (i32, i32) {
    %c0_i32 = arith.constant 0 : i32
    %c0_i32_0 = arith.constant 0 : i32
    %c0_i32_1 = arith.constant 0 : i32
    return %c0_i32, %c0_i32_0 : i32, i32
  }
  func.func @transform_2(%arg0: i32, %arg1: i32) -> (i32, i32) {
    %c0_i32 = arith.constant 0 : i32
    %c0_i32_0 = arith.constant 0 : i32
    %c0_i32_1 = arith.constant 0 : i32
    return %c0_i32, %c0_i32_0 : i32, i32
  }
  func.func @transform_3(%arg0: i32, %arg1: i32) -> (i32, i32) {
    %c0_i32 = arith.constant 0 : i32
    %c0_i32_0 = arith.constant 0 : i32
    %c0_i32_1 = arith.constant 0 : i32
    return %c0_i32, %c0_i32_0 : i32, i32
  }
  func.func @transform_4(%arg0: i32, %arg1: i32) -> (i32, i32, i32) {
    %c0_i32 = arith.constant 0 : i32
    %c0_i32_0 = arith.constant 0 : i32
    %c0_i32_1 = arith.constant 0 : i32
    %c0_i32_2 = arith.constant 0 : i32
    return %c0_i32, %c0_i32_0, %c0_i32_1 : i32, i32, i32
  }
  func.func @transform_5(%arg0: i32, %arg1: i32) -> (i32, i32, i32) {
    %c0_i32 = arith.constant 0 : i32
    %c0_i32_0 = arith.constant 0 : i32
    %c0_i32_1 = arith.constant 0 : i32
    return %arg0, %c0_i32, %c0_i32_0 : i32, i32, i32
  }
  func.func @transform_6(%arg0: i32, %arg1: i32) -> (i32, i32, i32) {
    %c0_i32 = arith.constant 0 : i32
    %c0_i32_0 = arith.constant 0 : i32
    %c0_i32_1 = arith.constant 0 : i32
    return %arg0, %c0_i32, %c0_i32_0 : i32, i32, i32
  }
  func.func @transform_7(%arg0: i32, %arg1: i32) -> (i32, i32, i32) {
    %c0_i32 = arith.constant 0 : i32
    %c0_i32_0 = arith.constant 0 : i32
    %c0_i32_1 = arith.constant 0 : i32
    return %arg0, %c0_i32, %c0_i32_0 : i32, i32, i32
  }
  func.func @transform_8(%arg0: i32, %arg1: i32) -> (i32, i32, i32) {
    %c0_i32 = arith.constant 0 : i32
    %c0_i32_0 = arith.constant 0 : i32
    %c0_i32_1 = arith.constant 0 : i32
    return %arg0, %c0_i32, %c0_i32_0 : i32, i32, i32
  }
}

module attributes {stable_mosaic.version = 11 : i64} {
  func.func @_bn_relu_conv3x3_kernel(%arg0: i32, %arg1: i32, %arg2: memref<1x352x128xbf16, #tpu.memory_space<vmem>>, %arg3: memref<352x1xf32, #tpu.memory_space<vmem>>, %arg4: memref<1x128xf32, #tpu.memory_space<vmem>>, %arg5: memref<1x128xf32, #tpu.memory_space<vmem>>, %arg6: memref<9x128x128xbf16, #tpu.memory_space<vmem>>, %arg7: memref<1x352x128xbf16, #tpu.memory_space<vmem>>, %arg8: memref<1x352x128xbf16, #tpu.memory_space<vmem>>, %arg9: memref<1x1x128xf32, #tpu.memory_space<vmem>>, %arg10: memref<1x1x128xf32, #tpu.memory_space<vmem>>, %arg11: memref<208x128xbf16, #tpu.memory_space<vmem>>) attributes {dimension_semantics = [#tpu.dimension_semantics<parallel>, #tpu.dimension_semantics<arbitrary>], iteration_bounds = array<i64: 2, 2>, scalar_prefetch = 0 : i64, scratch_operands = 1 : i64, tpu.core_type = #tpu.core_type<tc>, window_params = [{transform_indices = @transform_0, window_bounds = array<i64: 1, 352, 128>}, {pipeline_mode = #tpu.pipeline_mode<synchronous>, transform_indices = @transform_1, window_bounds = array<i64: 352, 1>}, {pipeline_mode = #tpu.pipeline_mode<synchronous>, transform_indices = @transform_2, window_bounds = array<i64: 1, 128>}, {pipeline_mode = #tpu.pipeline_mode<synchronous>, transform_indices = @transform_3, window_bounds = array<i64: 1, 128>}, {pipeline_mode = #tpu.pipeline_mode<synchronous>, transform_indices = @transform_4, window_bounds = array<i64: 9, 128, 128>}, {transform_indices = @transform_5, window_bounds = array<i64: 1, 352, 128>}, {transform_indices = @transform_6, window_bounds = array<i64: 1, 352, 128>}, {transform_indices = @transform_7, window_bounds = array<i64: 1, 1, 128>}, {transform_indices = @transform_8, window_bounds = array<i64: 1, 1, 128>}]} {
    %c144_i32 = arith.constant 144 : i32
    %0 = arith.muli %arg1, %c144_i32 : i32
    %1 = tpu.assume_multiple %0, 16 : i32
    %c32_i32 = arith.constant 32 : i32
    %2 = arith.addi %1, %c32_i32 : i32
    %3 = tpu.assume_multiple %2, 16 : i32
    %c0_i32 = arith.constant 0 : i32
    %4 = arith.cmpi eq, %arg1, %c0_i32 : i32
    %5 = arith.extui %4 : i1 to i32
    %c0_i32_0 = arith.constant 0 : i32
    %6 = arith.cmpi ne, %5, %c0_i32_0 : i32
    scf.if %6 {
      %cst_65 = arith.constant 0.000000e+00 : f32
      %107 = vector.broadcast %cst_65 : f32 to vector<1x128xf32>
      %c0_66 = arith.constant 0 : index
      %c0_67 = arith.constant 0 : index
      %c0_68 = arith.constant 0 : index
      %108 = vector.load %arg9[%c0_66, %c0_67, %c0_68] : memref<1x1x128xf32, #tpu.memory_space<vmem>>, vector<1x1x128xf32>
      %109 = vector.shape_cast %108 : vector<1x1x128xf32> to vector<1x128xf32>
      %110 = vector.shape_cast %107 : vector<1x128xf32> to vector<1x1x128xf32>
      tpu.vector_store %arg9[%c0_66, %c0_67, %c0_68], %110 {strides = array<i32>} : memref<1x1x128xf32, #tpu.memory_space<vmem>>, vector<1x1x128xf32>,
      %cst_69 = arith.constant 0.000000e+00 : f32
      %111 = vector.broadcast %cst_69 : f32 to vector<1x128xf32>
      %c0_70 = arith.constant 0 : index
      %c0_71 = arith.constant 0 : index
      %c0_72 = arith.constant 0 : index
      %112 = vector.load %arg10[%c0_70, %c0_71, %c0_72] : memref<1x1x128xf32, #tpu.memory_space<vmem>>, vector<1x1x128xf32>
      %113 = vector.shape_cast %112 : vector<1x1x128xf32> to vector<1x128xf32>
      %114 = vector.shape_cast %111 : vector<1x128xf32> to vector<1x1x128xf32>
      tpu.vector_store %arg10[%c0_70, %c0_71, %c0_72], %114 {strides = array<i32>} : memref<1x1x128xf32, #tpu.memory_space<vmem>>, vector<1x1x128xf32>,
      %cst_73 = arith.constant 0.000000e+00 : bf16
      %115 = vector.broadcast %cst_73 : bf16 to vector<32x128xbf16>
      %c0_74 = arith.constant 0 : index
      %c0_75 = arith.constant 0 : index
      %c0_76 = arith.constant 0 : index
      %116 = vector.load %arg8[%c0_74, %c0_75, %c0_76] : memref<1x352x128xbf16, #tpu.memory_space<vmem>>, vector<1x32x128xbf16>
      %117 = vector.shape_cast %116 : vector<1x32x128xbf16> to vector<32x128xbf16>
      %118 = vector.shape_cast %115 : vector<32x128xbf16> to vector<1x32x128xbf16>
      tpu.vector_store %arg8[%c0_74, %c0_75, %c0_76], %118 {strides = array<i32>} : memref<1x352x128xbf16, #tpu.memory_space<vmem>>, vector<1x32x128xbf16>,
      %cst_77 = arith.constant 0.000000e+00 : bf16
      %119 = vector.broadcast %cst_77 : bf16 to vector<32x128xbf16>
      %c0_78 = arith.constant 0 : index
      %c320 = arith.constant 320 : index
      %c0_79 = arith.constant 0 : index
      %120 = vector.load %arg8[%c0_78, %c320, %c0_79] : memref<1x352x128xbf16, #tpu.memory_space<vmem>>, vector<1x32x128xbf16>
      %121 = vector.shape_cast %120 : vector<1x32x128xbf16> to vector<32x128xbf16>
      %122 = vector.shape_cast %119 : vector<32x128xbf16> to vector<1x32x128xbf16>
      tpu.vector_store %arg8[%c0_78, %c320, %c0_79], %122 {strides = array<i32>} : memref<1x352x128xbf16, #tpu.memory_space<vmem>>, vector<1x32x128xbf16>,
    } else {
    }
    %c0 = arith.constant 0 : index
    %7 = arith.index_cast %1 : i32 to index
    %c0_1 = arith.constant 0 : index
    %8 = vector.load %arg2[%c0, %7, %c0_1] : memref<1x352x128xbf16, #tpu.memory_space<vmem>>, vector<1x208x128xbf16>
    %9 = vector.shape_cast %8 : vector<1x208x128xbf16> to vector<208x128xbf16>
    %10 = arith.extf %9 : vector<208x128xbf16> to vector<208x128xf32>
    %c0_2 = arith.constant 0 : index
    %c0_3 = arith.constant 0 : index
    %11 = vector.load %arg4[%c0_2, %c0_3] : memref<1x128xf32, #tpu.memory_space<vmem>>, vector<1x128xf32>
    %12 = vector.broadcast %11 : vector<1x128xf32> to vector<208x128xf32>
    %13 = arith.mulf %10, %12 : vector<208x128xf32>
    %c0_4 = arith.constant 0 : index
    %c0_5 = arith.constant 0 : index
    %14 = vector.load %arg5[%c0_4, %c0_5] : memref<1x128xf32, #tpu.memory_space<vmem>>, vector<1x128xf32>
    %15 = vector.broadcast %14 : vector<1x128xf32> to vector<208x128xf32>
    %16 = arith.addf %13, %15 : vector<208x128xf32>
    %cst = arith.constant 0.000000e+00 : f32
    %17 = vector.broadcast %cst : f32 to vector<208x128xf32>
    %18 = arith.maximumf %16, %17 : vector<208x128xf32>
    %19 = arith.index_cast %1 : i32 to index
    %c0_6 = arith.constant 0 : index
    %20 = vector.load %arg3[%19, %c0_6] : memref<352x1xf32, #tpu.memory_space<vmem>>, vector<208x1xf32>
    %21 = vector.broadcast %20 : vector<208x1xf32> to vector<208x128xf32>
    %22 = arith.mulf %18, %21 : vector<208x128xf32>
    %23 = arith.truncf %22 : vector<208x128xf32> to vector<208x128xbf16>
    %c0_7 = arith.constant 0 : index
    %c0_8 = arith.constant 0 : index
    %24 = vector.load %arg11[%c0_7, %c0_8] : memref<208x128xbf16, #tpu.memory_space<vmem>>, vector<208x128xbf16>
    tpu.vector_store %arg11[%c0_7, %c0_8], %23 {strides = array<i32>} : memref<208x128xbf16, #tpu.memory_space<vmem>>, vector<208x128xbf16>,
    %c13 = arith.constant 13 : index
    %c0_9 = arith.constant 0 : index
    %25 = vector.load %arg11[%c13, %c0_9] : memref<208x128xbf16, #tpu.memory_space<vmem>>, vector<144x128xbf16>
    %c0_10 = arith.constant 0 : index
    %c0_11 = arith.constant 0 : index
    %c0_12 = arith.constant 0 : index
    %26 = vector.load %arg6[%c0_10, %c0_11, %c0_12] : memref<9x128x128xbf16, #tpu.memory_space<vmem>>, vector<1x128x128xbf16>
    %27 = vector.shape_cast %26 : vector<1x128x128xbf16> to vector<128x128xbf16>
    %cst_13 = arith.constant dense<0.000000e+00> : vector<144x128xf32>
    %28 = tpu.matmul %25, %27, %cst_13 {dimension_numbers = #tpu.dot_dimension_numbers<[1], [0], [0], [1], [0, 0, 1, 1], [], []>} : vector<144x128xbf16>, vector<128x128xbf16>, vector<144x128xf32> -> vector<144x128xf32>
    %c14 = arith.constant 14 : index
    %c0_14 = arith.constant 0 : index
    %29 = vector.load %arg11[%c14, %c0_14] : memref<208x128xbf16, #tpu.memory_space<vmem>>, vector<144x128xbf16>
    %c1 = arith.constant 1 : index
    %c0_15 = arith.constant 0 : index
    %c0_16 = arith.constant 0 : index
    %30 = vector.load %arg6[%c1, %c0_15, %c0_16] : memref<9x128x128xbf16, #tpu.memory_space<vmem>>, vector<1x128x128xbf16>
    %31 = vector.shape_cast %30 : vector<1x128x128xbf16> to vector<128x128xbf16>
    %cst_17 = arith.constant dense<0.000000e+00> : vector<144x128xf32>
    %32 = tpu.matmul %29, %31, %cst_17 {dimension_numbers = #tpu.dot_dimension_numbers<[1], [0], [0], [1], [0, 0, 1, 1], [], []>} : vector<144x128xbf16>, vector<128x128xbf16>, vector<144x128xf32> -> vector<144x128xf32>
    %33 = arith.addf %28, %32 : vector<144x128xf32>
    %c15 = arith.constant 15 : index
    %c0_18 = arith.constant 0 : index
    %34 = vector.load %arg11[%c15, %c0_18] : memref<208x128xbf16, #tpu.memory_space<vmem>>, vector<144x128xbf16>
    %c2 = arith.constant 2 : index
    %c0_19 = arith.constant 0 : index
    %c0_20 = arith.constant 0 : index
    %35 = vector.load %arg6[%c2, %c0_19, %c0_20] : memref<9x128x128xbf16, #tpu.memory_space<vmem>>, vector<1x128x128xbf16>
    %36 = vector.shape_cast %35 : vector<1x128x128xbf16> to vector<128x128xbf16>
    %cst_21 = arith.constant dense<0.000000e+00> : vector<144x128xf32>
    %37 = tpu.matmul %34, %36, %cst_21 {dimension_numbers = #tpu.dot_dimension_numbers<[1], [0], [0], [1], [0, 0, 1, 1], [], []>} : vector<144x128xbf16>, vector<128x128xbf16>, vector<144x128xf32> -> vector<144x128xf32>
    %38 = arith.addf %33, %37 : vector<144x128xf32>
    %c31 = arith.constant 31 : index
    %c0_22 = arith.constant 0 : index
    %39 = vector.load %arg11[%c31, %c0_22] : memref<208x128xbf16, #tpu.memory_space<vmem>>, vector<144x128xbf16>
    %c3 = arith.constant 3 : index
    %c0_23 = arith.constant 0 : index
    %c0_24 = arith.constant 0 : index
    %40 = vector.load %arg6[%c3, %c0_23, %c0_24] : memref<9x128x128xbf16, #tpu.memory_space<vmem>>, vector<1x128x128xbf16>
    %41 = vector.shape_cast %40 : vector<1x128x128xbf16> to vector<128x128xbf16>
    %cst_25 = arith.constant dense<0.000000e+00> : vector<144x128xf32>
    %42 = tpu.matmul %39, %41, %cst_25 {dimension_numbers = #tpu.dot_dimension_numbers<[1], [0], [0], [1], [0, 0, 1, 1], [], []>} : vector<144x128xbf16>, vector<128x128xbf16>, vector<144x128xf32> -> vector<144x128xf32>
    %43 = arith.addf %38, %42 : vector<144x128xf32>
    %c32 = arith.constant 32 : index
    %c0_26 = arith.constant 0 : index
    %44 = vector.load %arg11[%c32, %c0_26] : memref<208x128xbf16, #tpu.memory_space<vmem>>, vector<144x128xbf16>
    %c4 = arith.constant 4 : index
    %c0_27 = arith.constant 0 : index
    %c0_28 = arith.constant 0 : index
    %45 = vector.load %arg6[%c4, %c0_27, %c0_28] : memref<9x128x128xbf16, #tpu.memory_space<vmem>>, vector<1x128x128xbf16>
    %46 = vector.shape_cast %45 : vector<1x128x128xbf16> to vector<128x128xbf16>
    %cst_29 = arith.constant dense<0.000000e+00> : vector<144x128xf32>
    %47 = tpu.matmul %44, %46, %cst_29 {dimension_numbers = #tpu.dot_dimension_numbers<[1], [0], [0], [1], [0, 0, 1, 1], [], []>} : vector<144x128xbf16>, vector<128x128xbf16>, vector<144x128xf32> -> vector<144x128xf32>
    %48 = arith.addf %43, %47 : vector<144x128xf32>
    %c33 = arith.constant 33 : index
    %c0_30 = arith.constant 0 : index
    %49 = vector.load %arg11[%c33, %c0_30] : memref<208x128xbf16, #tpu.memory_space<vmem>>, vector<144x128xbf16>
    %c5 = arith.constant 5 : index
    %c0_31 = arith.constant 0 : index
    %c0_32 = arith.constant 0 : index
    %50 = vector.load %arg6[%c5, %c0_31, %c0_32] : memref<9x128x128xbf16, #tpu.memory_space<vmem>>, vector<1x128x128xbf16>
    %51 = vector.shape_cast %50 : vector<1x128x128xbf16> to vector<128x128xbf16>
    %cst_33 = arith.constant dense<0.000000e+00> : vector<144x128xf32>
    %52 = tpu.matmul %49, %51, %cst_33 {dimension_numbers = #tpu.dot_dimension_numbers<[1], [0], [0], [1], [0, 0, 1, 1], [], []>} : vector<144x128xbf16>, vector<128x128xbf16>, vector<144x128xf32> -> vector<144x128xf32>
    %53 = arith.addf %48, %52 : vector<144x128xf32>
    %c49 = arith.constant 49 : index
    %c0_34 = arith.constant 0 : index
    %54 = vector.load %arg11[%c49, %c0_34] : memref<208x128xbf16, #tpu.memory_space<vmem>>, vector<144x128xbf16>
    %c6 = arith.constant 6 : index
    %c0_35 = arith.constant 0 : index
    %c0_36 = arith.constant 0 : index
    %55 = vector.load %arg6[%c6, %c0_35, %c0_36] : memref<9x128x128xbf16, #tpu.memory_space<vmem>>, vector<1x128x128xbf16>
    %56 = vector.shape_cast %55 : vector<1x128x128xbf16> to vector<128x128xbf16>
    %cst_37 = arith.constant dense<0.000000e+00> : vector<144x128xf32>
    %57 = tpu.matmul %54, %56, %cst_37 {dimension_numbers = #tpu.dot_dimension_numbers<[1], [0], [0], [1], [0, 0, 1, 1], [], []>} : vector<144x128xbf16>, vector<128x128xbf16>, vector<144x128xf32> -> vector<144x128xf32>
    %58 = arith.addf %53, %57 : vector<144x128xf32>
    %c50 = arith.constant 50 : index
    %c0_38 = arith.constant 0 : index
    %59 = vector.load %arg11[%c50, %c0_38] : memref<208x128xbf16, #tpu.memory_space<vmem>>, vector<144x128xbf16>
    %c7 = arith.constant 7 : index
    %c0_39 = arith.constant 0 : index
    %c0_40 = arith.constant 0 : index
    %60 = vector.load %arg6[%c7, %c0_39, %c0_40] : memref<9x128x128xbf16, #tpu.memory_space<vmem>>, vector<1x128x128xbf16>
    %61 = vector.shape_cast %60 : vector<1x128x128xbf16> to vector<128x128xbf16>
    %cst_41 = arith.constant dense<0.000000e+00> : vector<144x128xf32>
    %62 = tpu.matmul %59, %61, %cst_41 {dimension_numbers = #tpu.dot_dimension_numbers<[1], [0], [0], [1], [0, 0, 1, 1], [], []>} : vector<144x128xbf16>, vector<128x128xbf16>, vector<144x128xf32> -> vector<144x128xf32>
    %63 = arith.addf %58, %62 : vector<144x128xf32>
    %c51 = arith.constant 51 : index
    %c0_42 = arith.constant 0 : index
    %64 = vector.load %arg11[%c51, %c0_42] : memref<208x128xbf16, #tpu.memory_space<vmem>>, vector<144x128xbf16>
    %c8 = arith.constant 8 : index
    %c0_43 = arith.constant 0 : index
    %c0_44 = arith.constant 0 : index
    %65 = vector.load %arg6[%c8, %c0_43, %c0_44] : memref<9x128x128xbf16, #tpu.memory_space<vmem>>, vector<1x128x128xbf16>
    %66 = vector.shape_cast %65 : vector<1x128x128xbf16> to vector<128x128xbf16>
    %cst_45 = arith.constant dense<0.000000e+00> : vector<144x128xf32>
    %67 = tpu.matmul %64, %66, %cst_45 {dimension_numbers = #tpu.dot_dimension_numbers<[1], [0], [0], [1], [0, 0, 1, 1], [], []>} : vector<144x128xbf16>, vector<128x128xbf16>, vector<144x128xf32> -> vector<144x128xf32>
    %68 = arith.addf %63, %67 : vector<144x128xf32>
    %69 = tpu.iota {dimensions = array<i32: 1>} : vector<1x128xi32>
    %c16_i32 = arith.constant 16 : i32
    %70 = vector.broadcast %c16_i32 : i32 to vector<1x128xi32>
    %71 = arith.cmpi sge, %69, %70 : vector<1x128xi32>
    %c20_i32 = arith.constant 20 : i32
    %72 = vector.broadcast %c20_i32 : i32 to vector<1x128xi32>
    %73 = arith.cmpi slt, %69, %72 : vector<1x128xi32>
    %74 = arith.andi %71, %73 : vector<1x128xi1>
    %c0_46 = arith.constant 0 : index
    %75 = arith.index_cast %3 : i32 to index
    %c0_47 = arith.constant 0 : index
    %76 = vector.load %arg7[%c0_46, %75, %c0_47] : memref<1x352x128xbf16, #tpu.memory_space<vmem>>, vector<1x144x128xbf16>
    %77 = vector.shape_cast %76 : vector<1x144x128xbf16> to vector<144x128xbf16>
    %78 = arith.truncf %68 : vector<144x128xf32> to vector<144x128xbf16>
    %79 = vector.shape_cast %74 : vector<1x128xi1> to vector<1x128xi1>
    %80 = vector.broadcast %79 : vector<1x128xi1> to vector<144x128xi1>
    %81 = arith.select %80, %78, %77 : vector<144x128xi1>, vector<144x128xbf16>
    %c0_48 = arith.constant 0 : index
    %82 = arith.index_cast %3 : i32 to index
    %c0_49 = arith.constant 0 : index
    %83 = vector.load %arg8[%c0_48, %82, %c0_49] : memref<1x352x128xbf16, #tpu.memory_space<vmem>>, vector<1x144x128xbf16>
    %84 = vector.shape_cast %83 : vector<1x144x128xbf16> to vector<144x128xbf16>
    %85 = vector.shape_cast %81 : vector<144x128xbf16> to vector<1x144x128xbf16>
    tpu.vector_store %arg8[%c0_48, %82, %c0_49], %85 {strides = array<i32>} : memref<1x352x128xbf16, #tpu.memory_space<vmem>>, vector<1x144x128xbf16>,
    %86 = arith.index_cast %3 : i32 to index
    %c0_50 = arith.constant 0 : index
    %87 = vector.load %arg3[%86, %c0_50] : memref<352x1xf32, #tpu.memory_space<vmem>>, vector<144x1xf32>
    %88 = vector.broadcast %87 : vector<144x1xf32> to vector<144x128xf32>
    %89 = arith.mulf %68, %88 : vector<144x128xf32>
    %c0_51 = arith.constant 0 : index
    %c0_52 = arith.constant 0 : index
    %c0_53 = arith.constant 0 : index
    %90 = vector.load %arg9[%c0_51, %c0_52, %c0_53] : memref<1x1x128xf32, #tpu.memory_space<vmem>>, vector<1x1x128xf32>
    %91 = vector.shape_cast %90 : vector<1x1x128xf32> to vector<1x128xf32>
    %cst_54 = arith.constant dense<0.000000e+00> : vector<128xf32>
    %92 = vector.multi_reduction <add>, %89, %cst_54 [0] : vector<144x128xf32> to vector<128xf32>
    %93 = vector.shape_cast %92 : vector<128xf32> to vector<1x128xf32>
    %94 = arith.addf %91, %93 : vector<1x128xf32>
    %c0_55 = arith.constant 0 : index
    %c0_56 = arith.constant 0 : index
    %c0_57 = arith.constant 0 : index
    %95 = vector.load %arg9[%c0_55, %c0_56, %c0_57] : memref<1x1x128xf32, #tpu.memory_space<vmem>>, vector<1x1x128xf32>
    %96 = vector.shape_cast %95 : vector<1x1x128xf32> to vector<1x128xf32>
    %97 = vector.shape_cast %94 : vector<1x128xf32> to vector<1x1x128xf32>
    tpu.vector_store %arg9[%c0_55, %c0_56, %c0_57], %97 {strides = array<i32>} : memref<1x1x128xf32, #tpu.memory_space<vmem>>, vector<1x1x128xf32>,
    %c0_58 = arith.constant 0 : index
    %c0_59 = arith.constant 0 : index
    %c0_60 = arith.constant 0 : index
    %98 = vector.load %arg10[%c0_58, %c0_59, %c0_60] : memref<1x1x128xf32, #tpu.memory_space<vmem>>, vector<1x1x128xf32>
    %99 = vector.shape_cast %98 : vector<1x1x128xf32> to vector<1x128xf32>
    %100 = arith.mulf %89, %68 : vector<144x128xf32>
    %cst_61 = arith.constant dense<0.000000e+00> : vector<128xf32>
    %101 = vector.multi_reduction <add>, %100, %cst_61 [0] : vector<144x128xf32> to vector<128xf32>
    %102 = vector.shape_cast %101 : vector<128xf32> to vector<1x128xf32>
    %103 = arith.addf %99, %102 : vector<1x128xf32>
    %c0_62 = arith.constant 0 : index
    %c0_63 = arith.constant 0 : index
    %c0_64 = arith.constant 0 : index
    %104 = vector.load %arg10[%c0_62, %c0_63, %c0_64] : memref<1x1x128xf32, #tpu.memory_space<vmem>>, vector<1x1x128xf32>
    %105 = vector.shape_cast %104 : vector<1x1x128xf32> to vector<1x128xf32>
    %106 = vector.shape_cast %103 : vector<1x128xf32> to vector<1x1x128xf32>
    tpu.vector_store %arg10[%c0_62, %c0_63, %c0_64], %106 {strides = array<i32>} : memref<1x1x128xf32, #tpu.memory_space<vmem>>, vector<1x1x128xf32>,
    return
  }
  func.func @transform_0(%arg0: i32, %arg1: i32) -> (i32, i32, i32) {
    %c0_i32 = arith.constant 0 : i32
    %c0_i32_0 = arith.constant 0 : i32
    %c0_i32_1 = arith.constant 0 : i32
    return %arg0, %c0_i32, %c0_i32_0 : i32, i32, i32
  }
  func.func @transform_1(%arg0: i32, %arg1: i32) -> (i32, i32) {
    %c0_i32 = arith.constant 0 : i32
    %c0_i32_0 = arith.constant 0 : i32
    %c0_i32_1 = arith.constant 0 : i32
    return %c0_i32, %c0_i32_0 : i32, i32
  }
  func.func @transform_2(%arg0: i32, %arg1: i32) -> (i32, i32) {
    %c0_i32 = arith.constant 0 : i32
    %c0_i32_0 = arith.constant 0 : i32
    %c0_i32_1 = arith.constant 0 : i32
    return %c0_i32, %c0_i32_0 : i32, i32
  }
  func.func @transform_3(%arg0: i32, %arg1: i32) -> (i32, i32) {
    %c0_i32 = arith.constant 0 : i32
    %c0_i32_0 = arith.constant 0 : i32
    %c0_i32_1 = arith.constant 0 : i32
    return %c0_i32, %c0_i32_0 : i32, i32
  }
  func.func @transform_4(%arg0: i32, %arg1: i32) -> (i32, i32, i32) {
    %c0_i32 = arith.constant 0 : i32
    %c0_i32_0 = arith.constant 0 : i32
    %c0_i32_1 = arith.constant 0 : i32
    %c0_i32_2 = arith.constant 0 : i32
    return %c0_i32, %c0_i32_0, %c0_i32_1 : i32, i32, i32
  }
  func.func @transform_5(%arg0: i32, %arg1: i32) -> (i32, i32, i32) {
    %c0_i32 = arith.constant 0 : i32
    %c0_i32_0 = arith.constant 0 : i32
    %c0_i32_1 = arith.constant 0 : i32
    return %arg0, %c0_i32, %c0_i32_0 : i32, i32, i32
  }
  func.func @transform_6(%arg0: i32, %arg1: i32) -> (i32, i32, i32) {
    %c0_i32 = arith.constant 0 : i32
    %c0_i32_0 = arith.constant 0 : i32
    %c0_i32_1 = arith.constant 0 : i32
    return %arg0, %c0_i32, %c0_i32_0 : i32, i32, i32
  }
  func.func @transform_7(%arg0: i32, %arg1: i32) -> (i32, i32, i32) {
    %c0_i32 = arith.constant 0 : i32
    %c0_i32_0 = arith.constant 0 : i32
    %c0_i32_1 = arith.constant 0 : i32
    return %arg0, %c0_i32, %c0_i32_0 : i32, i32, i32
  }
  func.func @transform_8(%arg0: i32, %arg1: i32) -> (i32, i32, i32) {
    %c0_i32 = arith.constant 0 : i32
    %c0_i32_0 = arith.constant 0 : i32
    %c0_i32_1 = arith.constant 0 : i32
    return %arg0, %c0_i32, %c0_i32_0 : i32, i32, i32
  }
}

</mosaic_0001>

<bundles_post_ra>
// kernel: dense_block_forward.6
= control target key start
LH: loop header
LB: loop body
LE: loop exit
PB: predicated region body
PF: predicated region fallthrough
CT: control target
= control target key end

     0   :  { %s1376_s24 = smov 0   ;;  %s1378_s25 = smov 0   ;;  %s1618_s0 = inlined_call_operand.vmem [shape: bf16[2,352,128], index: 0, kind: input, shape index: {}]   ;;  %s1619_s1 = inlined_call_operand.vmem [shape: f32[352,1], index: 1, kind: input, shape index: {}]   ;;  %s1620_s2 = inlined_call_operand.vmem [shape: f32[1,128], index: 2, kind: input, shape index: {}]   ;;  %s1621_s3 = inlined_call_operand.vmem [shape: f32[1,128], index: 3, kind: input, shape index: {}]   ;;  %s1622_s4 = inlined_call_operand.vmem [shape: bf16[128,128], index: 4, kind: input, shape index: {}]   ;;  %s1623_s5 = inlined_call_operand.vmem [shape: bf16[2,352,128], index: 5, kind: output, shape index: {0}]   ;;  %s1624_s6 = inlined_call_operand.vmem [shape: f32[2,1,128], index: 6, kind: output, shape index: {1}]   ;;  %s1625_s7 = inlined_call_operand.vmem [shape: f32[2,1,128], index: 7, kind: output, shape index: {2}]  }
   0x1   :  { %1626 = sst [smem:[#allocation3_spill]] %s1624_s6  ;;  %s1380_s26 = smov 0  }
   0x2   :  { %s1382_s27 = smov 0   ;;  %s1384_s28 = smov 0  }
   0x3 LB: > { %s27_s29 = sadd.s32 1, %s1324_s26  ;;  %s30_s30 = sadd.s32 1, %s1328_s27  ;;  %s1332_s28 = sphi %s1384_s28, %s18_s28   ;;  %s1328_s27 = sphi %s1382_s27, %s1633_s27   ;;  %s1324_s26 = sphi %s1380_s26, %s1632_s26   ;;  %s1320_s25 = sphi %s1378_s25, %s1631_s25   ;;  %s1316_s24 = sphi %s1376_s24, %s1630_s24  }
   0x4   : > { %p28_p0 = scmp.ge.s32.totalorder %s27_s29, 2  ;;  %p1056_p1 = scmp.ge.s32.totalorder %s1332_s28, 1 }
   0x5   : > { %p274_p2 = scmp.lt.s32.totalorder %s1332_s28, 5 }
   0x6   : > { %s1635_s29 = smov (%p28_p0, %s27_s29), 0  ;;  %s1637_s30 = smov (!%p28_p0, %s30_s30), %s1328_s27 }
   0x7   : > { %p275_p3 = pnand %p1056_p1, %p274_p2  ;;  %p32_p4 = scmp.ge.s32.totalorder %s1637_s30, 2 }
   0x8   : > { %s325_s8 = smul.u32 (!%p275_p3), 22, %s1316_s24  ;;  %p326_p5 = scmp.lt.s32.totalorder (!%p275_p3), %s1320_s25, 1 }
   0x9   : > { %s1639_s30 = smov (%p32_p4, %s1637_s30), 0  ;;  %278 = sbr.rel (%p275_p3) target bundleno = 269 (0x10d), region = 40 }
   0xa   : > { %1627 = sst [smem:[#allocation2_spill]] %s1639_s30  ;;  %p328_p6 = scmp.lt.s32.totalorder (!%p275_p3), %s325_s8, 43 }
   0xb   : > { %s1628_s6 = sld [smem:[#allocation3_spill]] (!%p275_p3)  ;;  %p1060_p7 = scmp.ne.s32.totalorder (!%p275_p3), %s1316_s24, 0 }
   0xe   : > { %s1641_s25 = smov (!%p326_p5, %s1320_s25), 1  ;;  %s1643_s8 = smov (!%p328_p6, %s325_s8), 43 }
   0xf   : > { %s1246_s9 = smul.u32 44, %s1641_s25  ;;  %s1417_s15 = scalar_lea.vmem %s1625_s7, %s1641_s25 }
  0x10   : > { %s1058_s17 = sshll.u32 %s1643_s8, 3  ;;  %360 = sbr.rel (%p1060_p7) target bundleno = 24 (0x18), region = 44 }
  0x11   : > { %s1412_s12 = scalar_lea.vmem %s1628_s6, %s1641_s25  ;;  %s331_s16 = sadd.s32 %s1246_s9, %s1643_s8 }
  0x12   : > { %s1057_s18 = sshll.u32 %s331_s16, 2  ;;  %s1422_s21 = scalar_lea.vmem %s1619_s1, %s1058_s17 }
  0x13   : > { %s1427_s10 = scalar_lea.vmem %s1618_s0, %s1057_s18  ;;  %s1432_s30 = scalar_lea.vmem %s1623_s5, %s1057_s18 }
  0x15   : > { %v1334_v0 = vmov 0.0  }
  0x16   : > { %361 = vst [vmem:[%s1412_s12] sm:$0x1] %v1334_v0 }
  0x17   : > { %362 = vst [vmem:[%s1417_s15] sm:$0x1] %v1334_v0 }
  0x18 PF: > { %v664_v1 = vld [vmem:[%s1422_s21] sm:$0xff]  ;;  %v1102_v2 = vld [vmem:[%s1622_s4 + $0x38] sm:$0xff]  ;;  %v1335_v3 = vmov 0   ;;  %v666_v4 = vld [vmem:[%s1422_s21 + $0x10] sm:$0xff] }
  0x19   : > { %1289 = vset.pattern.permute.xlu0 %v1335_v3  ;;  %1290 = vset.pattern.permute.xlu1 %v1335_v3  ;;  %v1101_v5 = vld [vmem:[%s1622_s4 + $0x30] sm:$0xff]  ;;  %v1100_v6 = vld [vmem:[%s1622_s4 + $0x28] sm:$0xff]  ;;  %v668_v8 = vld [vmem:[%s1422_s21 + $0x20] sm:$0xff] }
  0x1a   : > { %688 = vperm.xlu0 %1289, %v664_v1   ;;  %556 = vmatpush.bf16.msra.mxu0 %v1102_v2  ;;  %v665_v7 = vld [vmem:[%s1422_s21 + $0x8] sm:$0xff]  ;;  %v667_v9 = vld [vmem:[%s1422_s21 + $0x18] sm:$0xff]  ;;  %v1099_v10 = vld [vmem:[%s1622_s4 + $0x20] sm:$0xff] }
  0x1b   : > { %1222 = vmatpush.bf16.msra.mxu1 %v1102_v2  ;;  %1223 = vmatpush.bf16.msra.mxu2 %v1102_v2  ;;  %v1104_v11 = vld [vmem:[%s1427_s10] sm:$0xff]   ;;  %v1203_v12 = vld [vmem:[%s1427_s10 + $0x10] sm:$0xff]   ;;  %v1206_v13 = vld [vmem:[%s1427_s10 + $0x28] sm:$0xff]  }
  0x1c   : > { %1224 = vmatpush.bf16.msra.mxu3 %v1102_v2  ;;  %698 = vperm.xlu1 %1290, %v666_v4   ;;  %v1209_v14 = vld [vmem:[%s1427_s10 + $0x40] sm:$0xff]   ;;  %v1105_v15 = vunpack.c.l.bf16 %v1104_v11  ;;  %v1106_v16 = vunpack.c.h.bf16 %v1104_v11  ;;  %v1113_v18 = vunpack.c.l.bf16 %v1203_v12  ;;  %v1098_v19 = vld [vmem:[%s1622_s4 + $0x18] sm:$0xff]  ;;  %v1114_v20 = vunpack.c.h.bf16 %v1203_v12  ;;  %v669_v23 = vld [vmem:[%s1422_s21 + $0x28] sm:$0xff] }
  0x1d   : > { %1291 = vset.pattern.permute.xlu2 %v1335_v3  ;;  %v1461_v17 = vld [vmem:[%s1620_s2] ss:$0 sm:$0xff]  ;;  %v1125_v21 = vunpack.c.l.bf16 %v1206_v13  ;;  %v1126_v22 = vunpack.c.h.bf16 %v1206_v13  ;;  %v670_v24 = vld [vmem:[%s1422_s21 + $0x30] sm:$0xff]  ;;  %v1137_v25 = vunpack.c.l.bf16 %v1209_v14  ;;  %v1138_v26 = vunpack.c.h.bf16 %v1209_v14  ;;  %v671_v27 = vld [vmem:[%s1422_s21 + $0x38] sm:$0xff] }
  0x1e   : > { %557 = vmatpush.bf16.msra.mxu0 %v1101_v5  ;;  %708 = vperm.xlu2 %1291, %v668_v8   ;;  %v411_v28 = vmul.f32 %v1461_v17, %v1105_v15  ;;  %v412_v29 = vmul.f32 %v1461_v17, %v1106_v16  ;;  %v1474_v30 = vld [vmem:[%s1621_s3] ss:$0 sm:$0xff]  ;;  %v415_v31 = vmul.f32 %v1461_v17, %v1113_v18  ;;  %v1097_v32 = vld [vmem:[%s1622_s4 + $0x10] sm:$0xff]  ;;  %v1096_v40 = vld [vmem:[%s1622_s4 + $0x8] sm:$0xff] }
  0x1f   : > { %1225 = vmatpush.bf16.msra.mxu1 %v1101_v5  ;;  %1226 = vmatpush.bf16.msra.mxu2 %v1101_v5  ;;  %v416_v33 = vmul.f32 %v1461_v17, %v1114_v20  ;;  %v421_v34 = vmul.f32 %v1461_v17, %v1125_v21  ;;  %v422_v35 = vmul.f32 %v1461_v17, %v1126_v22  ;;  %v672_v45 = vld [vmem:[%s1422_s21 + $0x40] sm:$0xff]  ;;  %v673_v46 = vld [vmem:[%s1422_s21 + $0x48] sm:$0xff]  ;;  %v674_v49 = vld [vmem:[%s1422_s21 + $0x50] sm:$0xff] }
  0x20   : > { %1227 = vmatpush.bf16.msra.mxu3 %v1101_v5  ;;  %v427_v36 = vmul.f32 %v1461_v17, %v1137_v25  ;;  %v428_v37 = vmul.f32 %v1461_v17, %v1138_v26  ;;  %v437_v38 = vadd.f32 %v1474_v30, %v411_v28  ;;  %v438_v39 = vadd.f32 %v1474_v30, %v412_v29  ;;  %v1202_v52 = vld [vmem:[%s1427_s10 + $0x8] sm:$0xff]   ;;  %v1095_v53 = vld [vmem:[%s1622_s4] sm:$0xff]  ;;  %v1204_v58 = vld [vmem:[%s1427_s10 + $0x18] sm:$0xff]  }
  0x21   : > { %v441_v41 = vadd.f32 %v1474_v30, %v415_v31  ;;  %v442_v42 = vadd.f32 %v1474_v30, %v416_v33  ;;  %v447_v43 = vadd.f32 %v1474_v30, %v421_v34  ;;  %v448_v44 = vadd.f32 %v1474_v30, %v422_v35  ;;  %v1207_v61 = vld [vmem:[%s1427_s10 + $0x30] sm:$0xff]   ;;  %v1210_v63 = vld [vmem:[%s1427_s10 + $0x48] sm:$0xff]   ;;  %v676_v8 = vld [vmem:[%s1422_s21 + $0x60] sm:$0xff] }
  0x22   : > { %693 = vperm.xlu0 %1289, %v665_v7   ;;  %558 = vmatpush.bf16.msra.mxu0 %v1100_v6  ;;  %v453_v47 = vadd.f32 %v1474_v30, %v427_v36  ;;  %v454_v48 = vadd.f32 %v1474_v30, %v428_v37  ;;  %v459_v50 = vmax.f32 %v437_v38, 0.0  ;;  %v460_v51 = vmax.f32 %v438_v39, 0.0  ;;  %v675_v7 = vld [vmem:[%s1422_s21 + $0x58] sm:$0xff]  ;;  %v677_v14 = vld [vmem:[%s1422_s21 + $0x68] sm:$0xff]  ;;  %v680_v34 = vld [vmem:[%s1422_s21 + $0x80] sm:$0xff] }
  0x23   : > { %1228 = vmatpush.bf16.msra.mxu1 %v1100_v6  ;;  %1229 = vmatpush.bf16.msra.mxu2 %v1100_v6  ;;  %v463_v54 = vmax.f32 %v441_v41, 0.0  ;;  %v464_v55 = vmax.f32 %v442_v42, 0.0  ;;  %v469_v56 = vmax.f32 %v447_v43, 0.0  ;;  %v470_v57 = vmax.f32 %v448_v44, 0.0  ;;  %v679_v28 = vld [vmem:[%s1422_s21 + $0x78] sm:$0xff]  ;;  %v1205_v43 = vld [vmem:[%s1427_s10 + $0x20] sm:$0xff]  }
  0x24   : > { %1230 = vmatpush.bf16.msra.mxu3 %v1100_v6  ;;  %703 = vperm.xlu1 %1290, %v667_v9   ;;  %v475_v59 = vmax.f32 %v453_v47, 0.0  ;;  %v476_v60 = vmax.f32 %v454_v48, 0.0  ;;  %v1109_v62 = vunpack.c.l.bf16 %v1202_v52  ;;  %v481_v0 = vpack.c.bf16 %v460_v51, %v459_v50  ;;  %v1208_v44 = vld [vmem:[%s1427_s10 + $0x38] sm:$0xff]  }
  0x25   : > { %v1110_v1 = vunpack.c.h.bf16 %v1202_v52  ;;  %v1117_v2 = vunpack.c.l.bf16 %v1204_v58  ;;  %v1118_v3 = vunpack.c.h.bf16 %v1204_v58  ;;  %v483_v4 = vpack.c.bf16 %v464_v55, %v463_v54  ;;  %v681_v52 = vld [vmem:[%s1422_s21 + $0x88] sm:$0xff]  ;;  %v683_v58 = vld [vmem:[%s1422_s21 + $0x98] sm:$0xff] }
  0x26   : > { %559 = vmatpush.bf16.msra.mxu0 %v1099_v10  ;;  %713 = vperm.xlu2 %1291, %v669_v23   ;;  %v486_v5 = vpack.c.bf16 %v470_v57, %v469_v56  ;;  %v1129_v6 = vunpack.c.l.bf16 %v1207_v61  ;;  %v489_v9 = vpack.c.bf16 %v476_v60, %v475_v59  ;;  %v1141_v11 = vunpack.c.l.bf16 %v1210_v63 }
  0x27   : > { %1231 = vmatpush.bf16.msra.mxu1 %v1099_v10  ;;  %1232 = vmatpush.bf16.msra.mxu2 %v1099_v10  ;;  %v1142_v12 = vunpack.c.h.bf16 %v1210_v63  ;;  %v413_v13 = vmul.f32 %v1461_v17, %v1109_v62  ;;  %v414_v15 = vmul.f32 %v1461_v17, %v1110_v1  ;;  %v417_v16 = vmul.f32 %v1461_v17, %v1117_v2 }
  0x28   : > { %1233 = vmatpush.bf16.msra.mxu3 %v1099_v10  ;;  %v1130_v10 = vunpack.c.h.bf16 %v1207_v61  ;;  %v418_v18 = vmul.f32 %v1461_v17, %v1118_v3  ;;  %v429_v21 = vmul.f32 %v1461_v17, %v1141_v11  ;;  %v1121_v48 = vunpack.c.l.bf16 %v1205_v43  ;;  %v684_v3 = vld [vmem:[%s1422_s21 + $0xa0] sm:$0xff] }
  0x29   : > { %v430_v22 = vmul.f32 %v1461_v17, %v1142_v12  ;;  %v439_v23 = vadd.f32 %v1474_v30, %v413_v13  ;;  %v443_v25 = vadd.f32 %v1474_v30, %v417_v16  ;;  %v1133_v50 = vunpack.c.l.bf16 %v1208_v44 }
  0x2a   : > { %718 = vperm.xlu0 %1289, %v670_v24   ;;  %560 = vmatpush.bf16.msra.mxu0 %v1098_v19  ;;  %v424_v20 = vmul.f32 %v1461_v17, %v1130_v10  ;;  %v440_v24 = vadd.f32 %v1474_v30, %v414_v15  ;;  %v444_v26 = vadd.f32 %v1474_v30, %v418_v18  ;;  %v1134_v51 = vunpack.c.h.bf16 %v1208_v44 }
  0x2b   : > { %1234 = vmatpush.bf16.msra.mxu1 %v1098_v19  ;;  %1235 = vmatpush.bf16.msra.mxu2 %v1098_v19  ;;  %v456_v33 = vadd.f32 %v1474_v30, %v430_v22  ;;  %v461_v35 = vmax.f32 %v439_v23, 0.0  ;;  %v465_v37 = vmax.f32 %v443_v25, 0.0  ;;  %v419_v59 = vmul.f32 %v1461_v17, %v1121_v48 }
  0x2c   : > { %1236 = vmatpush.bf16.msra.mxu3 %v1098_v19  ;;  %723 = vperm.xlu1 %1290, %v671_v27   ;;  %v423_v19 = vmul.f32 %v1461_v17, %v1129_v6  ;;  %v678_v27 = vld [vmem:[%s1422_s21 + $0x70] sm:$0xff]  ;;  %v450_v31 = vadd.f32 %v1474_v30, %v424_v20  ;;  %v462_v36 = vmax.f32 %v440_v24, 0.0  ;;  %v466_v38 = vmax.f32 %v444_v26, 0.0 }
  0x2d   : > { %v478_v42 = vmax.f32 %v456_v33, 0.0  ;;  %v425_v61 = vmul.f32 %v1461_v17, %v1133_v50  ;;  %v426_v62 = vmul.f32 %v1461_v17, %v1134_v51  ;;  %v445_v1 = vadd.f32 %v1474_v30, %v419_v59 }
  0x2e   : > { %561 = vmatpush.bf16.msra.mxu0 %v1097_v32  ;;  %728 = vperm.xlu2 %1291, %v672_v45   ;;  %v449_v29 = vadd.f32 %v1474_v30, %v423_v19  ;;  %v1211_v45 = vld [vmem:[%s1427_s10 + $0x50] sm:$0xff]   ;;  %v484_v47 = vpack.c.bf16 %v466_v38, %v465_v37 }
  0x2f   : > { %1237 = vmatpush.bf16.msra.mxu1 %v1097_v32  ;;  %1238 = vmatpush.bf16.msra.mxu2 %v1097_v32  ;;  %v1145_v56 = vunpack.c.l.bf16 %v1211_v45  ;;  %v1146_v57 = vunpack.c.h.bf16 %v1211_v45  ;;  %v452_v6 = vadd.f32 %v1474_v30, %v426_v62 }
  0x30   : > { %1239 = vmatpush.bf16.msra.mxu3 %v1097_v32  ;;  %v455_v32 = vadd.f32 %v1474_v30, %v429_v21  ;;  %v471_v39 = vmax.f32 %v449_v29, 0.0 }
  0x31   : > { %v431_v63 = vmul.f32 %v1461_v17, %v1145_v56  ;;  %v474_v11 = vmax.f32 %v452_v6, 0.0 }
  0x32   : > { %733 = vperm.xlu0 %1289, %v673_v46   ;;  %562 = vmatpush.bf16.msra.mxu0 %v1096_v40  ;;  %v477_v41 = vmax.f32 %v455_v32, 0.0  ;;  %v482_v46 = vpack.c.bf16 %v462_v36, %v461_v35 }
  0x33   : > { %1240 = vmatpush.bf16.msra.mxu1 %v1096_v40  ;;  %1241 = vmatpush.bf16.msra.mxu2 %v1096_v40 }
  0x34   : > { %1242 = vmatpush.bf16.msra.mxu3 %v1096_v40  ;;  %738 = vperm.xlu1 %1290, %v674_v49   ;;  %v472_v40 = vmax.f32 %v450_v31, 0.0  ;;  %v1122_v49 = vunpack.c.h.bf16 %v1205_v43  ;;  %v490_v55 = vpack.c.bf16 %v478_v42, %v477_v41 }
  0x36   : > { %563 = vmatpush.bf16.msra.mxu0 %v1095_v53  ;;  %743 = vperm.xlu2 %1291, %v675_v7   ;;  %v487_v54 = vpack.c.bf16 %v472_v40, %v471_v39  ;;  %v420_v60 = vmul.f32 %v1461_v17, %v1122_v49  ;;  %v457_v7 = vadd.f32 %v1474_v30, %v431_v63 }
  0x37   : > { %1243 = vmatpush.bf16.msra.mxu1 %v1095_v53  ;;  %1244 = vmatpush.bf16.msra.mxu2 %v1095_v53 }
  0x38   : > { %1245 = vmatpush.bf16.msra.mxu3 %v1095_v53  ;;  %v682_v53 = vld [vmem:[%s1422_s21 + $0x90] sm:$0xff]  ;;  %v446_v2 = vadd.f32 %v1474_v30, %v420_v60  ;;  %v479_v12 = vmax.f32 %v457_v7, 0.0 }
  0x39   : > { %564 = vmatmul.bf16.vlgmr.msra.gmra.mxu0 %v481_v0  ;;  %v432_v0 = vmul.f32 %v1461_v17, %v1146_v57 }
  0x3a   : > { %748 = vperm.xlu0 %1289, %v676_v8   ;;  %574 = vmatmul.bf16.vlgmr.msra.gmra.mxu1 %v483_v4  ;;  %v685_v4 = vld [vmem:[%s1422_s21 + $0xa8] sm:$0xff]  ;;  %v468_v10 = vmax.f32 %v446_v2, 0.0 }
  0x3b   : > { %589 = vmatmul.bf16.vlgmr.msra.gmra.mxu2 %v486_v5  ;;  %604 = vmatmul.bf16.vlgmr.msra.gmra.mxu3 %v489_v9  ;;  %v451_v5 = vadd.f32 %v1474_v30, %v425_v61  ;;  %v458_v8 = vadd.f32 %v1474_v30, %v432_v0  ;;  %v467_v9 = vmax.f32 %v445_v1, 0.0 }
  0x3c   : > { %753 = vperm.xlu1 %1290, %v677_v14  }
  0x3d   : > { %v473_v17 = vmax.f32 %v451_v5, 0.0  ;;  %v480_v13 = vmax.f32 %v458_v8, 0.0  ;;  %v485_v14 = vpack.c.bf16 %v468_v10, %v467_v9 }
  0x3e   : > { %758 = vperm.xlu2 %1291, %v678_v27  }
  0x3f   : > { %v488_v15 = vpack.c.bf16 %v474_v11, %v473_v17  ;;  %v491_v16 = vpack.c.bf16 %v480_v13, %v479_v12 }
  0x42   : > { %763 = vperm.xlu0 %1289, %v679_v28  }
  0x44   : > { %768 = vperm.xlu1 %1290, %v680_v34  }
  0x46   : > { %773 = vperm.xlu2 %1291, %v681_v52  }
  0x49   : > { %569 = vmatmul.bf16.gmra.mxu0 %v482_v46 }
  0x4a   : > { %778 = vperm.xlu0 %1289, %v682_v53   ;;  %579 = vmatmul.bf16.gmra.mxu1 %v484_v47 }
  0x4b   : > { %594 = vmatmul.bf16.gmra.mxu2 %v487_v54  ;;  %609 = vmatmul.bf16.gmra.mxu3 %v490_v55 }
  0x4c   : > { %783 = vperm.xlu1 %1290, %v683_v58  }
  0x4e   : > { %788 = vperm.xlu2 %1291, %v684_v3  }
  0x52   : > { %793 = vperm.xlu0 %1289, %v685_v4  }
  0x5a   : > { %584 = vmatmul.bf16.gmra.mxu1 %v485_v14 }
  0x5b   : > { %599 = vmatmul.bf16.gmra.mxu2 %v488_v15  ;;  %614 = vmatmul.bf16.gmra.mxu3 %v491_v16 }
  0x78   : > { %v709_v30 = vpop.permute.xlu2 %708 }
  0x80   : > { %v714_v31 = vpop.permute.xlu2 %713 }
  0x88   : > { %v729_v43 = vpop.permute.xlu2 %728 }
  0x8c   : > { %v689_v18 = vpop.permute.xlu0 %688 }
  0x8e   : > { %v699_v19 = vpop.permute.xlu1 %698 }
  0x90   : > { %v744_v4 = vpop.permute.xlu2 %743 }
  0x94   : > { %v694_v22 = vpop.permute.xlu0 %693 }
  0x96   : > { %v704_v23 = vpop.permute.xlu1 %703 }
  0x9c   : > { %v719_v32 = vpop.permute.xlu0 %718 }
  0x9e   : > { %v724_v40 = vpop.permute.xlu1 %723 }
  0xa4   : > { %v734_v45 = vpop.permute.xlu0 %733 }
  0xa6   : > { %v739_v63 = vpop.permute.xlu1 %738 }
  0xac   : > { %v749_v10 = vpop.permute.xlu0 %748 }
  0xb6   : > { %v565_v20 = vpop.f32.mrf.mxu0 }
  0xb7   : > { %v575_v21 = vpop.f32.mrf.mxu1  ;;  %v796_v41 = vmul.f32 %v689_v18, %v565_v20 }
  0xb8   : > { %v800_v51 = vmul.f32 %v709_v30, %v575_v21 }
  0xb9   : > { %v849_v46 = vmul.f32 %v796_v41, %v565_v20 }
  0xba   : > { %v853_v0 = vmul.f32 %v800_v51, %v575_v21 }
  0xbe   : > { %v1548_v24 = vpop.f32.mrf.mxu2  ;;  %v1550_v25 = vpop.f32.mrf.mxu3 }
  0xbf   : > { %v567_v26 = vpop.f32.mrf.mxu0  ;;  %v577_v27 = vpop.f32.mrf.mxu1 }
  0xc0   : > { %v1150_v28 = vpack.c.bf16 %v567_v26, %v565_v20  ;;  %v1160_v29 = vpack.c.bf16 %v577_v27, %v575_v21  ;;  %v797_v35 = vmul.f32 %v694_v22, %v567_v26  ;;  %v801_v59 = vmul.f32 %v714_v31, %v577_v27  ;;  %v754_v21 = vpop.permute.xlu1 %753 }
  0xc2   : > { %1151 = vst [vmem:[%s1432_s30] sm:$0xff] %v1150_v28   ;;  %v850_v44 = vmul.f32 %v797_v35, %v567_v26  ;;  %v819_v47 = vadd.f32 %v797_v35, %v796_v41  ;;  %v854_v5 = vmul.f32 %v801_v59, %v577_v27  ;;  %v759_v27 = vpop.permute.xlu2 %758  ;;  %v806_v28 = vmul.f32 %v739_v63, %v1548_v24 }
  0xc3   : > { %1213 = vst [vmem:[%s1432_s30 + $0x10] sm:$0xff] %v1160_v29  }
  0xc4   : > { %v871_v52 = vadd.f32 %v850_v44, %v849_v46 }
  0xc6   : > { %v1554_v33 = vpop.f32.mrf.mxu2  ;;  %v1556_v34 = vpop.f32.mrf.mxu3 }
  0xc7   : > { %v1175_v36 = vpack.c.bf16 %v1554_v33, %v1548_v24  ;;  %v1190_v37 = vpack.c.bf16 %v1556_v34, %v1550_v25  ;;  %v570_v38 = vpop.f32.mrf.mxu0  ;;  %v580_v39 = vpop.f32.mrf.mxu1 }
  0xc8   : > { %v798_v42 = vmul.f32 %v699_v19, %v570_v38  ;;  %v802_v1 = vmul.f32 %v719_v32, %v580_v39 }
  0xc9   : > { %1216 = vst [vmem:[%s1432_s30 + $0x28] sm:$0xff] %v1175_v36  }
  0xca   : > { %1219 = vst [vmem:[%s1432_s30 + $0x40] sm:$0xff] %v1190_v37   ;;  %v851_v48 = vmul.f32 %v798_v42, %v570_v38  ;;  %v820_v55 = vadd.f32 %v819_v47, %v798_v42  ;;  %v855_v13 = vmul.f32 %v802_v1, %v580_v39  ;;  %v764_v37 = vpop.permute.xlu0 %763  ;;  %v859_v42 = vmul.f32 %v806_v28, %v1548_v24 }
  0xcc   : > { %v872_v60 = vadd.f32 %v871_v52, %v851_v48 }
  0xce   : > { %v1564_v49 = vpop.f32.mrf.mxu2  ;;  %v1566_v50 = vpop.f32.mrf.mxu3 }
  0xcf   : > { %v572_v53 = vpop.f32.mrf.mxu0  ;;  %v582_v54 = vpop.f32.mrf.mxu1 }
  0xd0   : > { %v1155_v56 = vpack.c.bf16 %v572_v53, %v570_v38  ;;  %v799_v57 = vmul.f32 %v704_v23, %v572_v53  ;;  %v1165_v58 = vpack.c.bf16 %v582_v54, %v580_v39  ;;  %v803_v15 = vmul.f32 %v724_v40, %v582_v54 }
  0xd1   : > { %v807_v38 = vmul.f32 %v744_v4, %v1554_v33 }
  0xd2   : > { %1212 = vst [vmem:[%s1432_s30 + $0x8] sm:$0xff] %v1155_v56   ;;  %v821_v61 = vadd.f32 %v820_v55, %v799_v57  ;;  %v852_v62 = vmul.f32 %v799_v57, %v572_v53  ;;  %v856_v20 = vmul.f32 %v803_v15, %v582_v54  ;;  %v769_v54 = vpop.permute.xlu1 %768 }
  0xd3   : > { %1214 = vst [vmem:[%s1432_s30 + $0x18] sm:$0xff] %v1165_v58   ;;  %v860_v47 = vmul.f32 %v807_v38, %v1554_v33 }
  0xd4   : > { %v822_v2 = vadd.f32 %v821_v61, %v800_v51  ;;  %v873_v3 = vadd.f32 %v872_v60, %v852_v62  ;;  %v774_v60 = vpop.permute.xlu2 %773 }
  0xd6   : > { %v823_v6 = vadd.f32 %v822_v2, %v801_v59  ;;  %v874_v7 = vadd.f32 %v873_v3, %v853_v0  ;;  %v597_v8 = vpop.f32.mrf.mxu2  ;;  %v1570_v9 = vpop.f32.mrf.mxu3 }
  0xd7   : > { %v1180_v17 = vpack.c.bf16 %v597_v8, %v1564_v49  ;;  %v1195_v11 = vpack.c.bf16 %v1570_v9, %v1566_v50  ;;  %v585_v12 = vpop.f32.mrf.mxu1  ;;  %v809_v48 = vmul.f32 %v754_v21, %v597_v8  ;;  %v779_v0 = vpop.permute.xlu0 %778 }
  0xd8   : > { %v875_v14 = vadd.f32 %v874_v7, %v854_v5  ;;  %v824_v16 = vadd.f32 %v823_v6, %v802_v1  ;;  %v804_v30 = vmul.f32 %v729_v43, %v585_v12  ;;  %v808_v43 = vmul.f32 %v749_v10, %v1564_v49 }
  0xd9   : > { %1217 = vst [vmem:[%s1432_s30 + $0x30] sm:$0xff] %v1180_v17   ;;  %v862_v61 = vmul.f32 %v809_v48, %v597_v8  ;;  %v812_v1 = vmul.f32 %v769_v54, %v1550_v25  ;;  %v813_v5 = vmul.f32 %v774_v60, %v1556_v34  ;;  %v814_v17 = vmul.f32 %v779_v0, %v1566_v50 }
  0xda   : > { %v876_v18 = vadd.f32 %v875_v14, %v855_v13  ;;  %1220 = vst [vmem:[%s1432_s30 + $0x48] sm:$0xff] %v1195_v11   ;;  %v825_v19 = vadd.f32 %v824_v16, %v803_v15  ;;  %v857_v32 = vmul.f32 %v804_v30, %v585_v12  ;;  %v861_v57 = vmul.f32 %v808_v43, %v1564_v49 }
  0xdb   : > { %v865_v10 = vmul.f32 %v812_v1, %v1550_v25  ;;  %v866_v13 = vmul.f32 %v813_v5, %v1556_v34 }
  0xdc   : > { %v877_v22 = vadd.f32 %v876_v18, %v856_v20  ;;  %v826_v31 = vadd.f32 %v825_v19, %v804_v30  ;;  %v789_v18 = vpop.permute.xlu2 %788  ;;  %v867_v19 = vmul.f32 %v814_v17, %v1566_v50 }
  0xde   : > { %v600_v23 = vpop.f32.mrf.mxu2  ;;  %v1577_v26 = vpop.f32.mrf.mxu3  ;;  %v878_v39 = vadd.f32 %v877_v22, %v857_v32 }
  0xdf   : > { %v587_v29 = vpop.f32.mrf.mxu1  ;;  %v810_v24 = vmul.f32 %v759_v27, %v600_v23  ;;  %v816_v20 = vmul.f32 %v789_v18, %v1577_v26  ;;  %v794_v22 = vpop.permute.xlu0 %793 }
  0xe0   : > { %v1170_v35 = vpack.c.bf16 %v587_v29, %v585_v12  ;;  %v805_v36 = vmul.f32 %v734_v45, %v587_v29  ;;  %v784_v12 = vpop.permute.xlu1 %783 }
  0xe1   : > { %v863_v2 = vmul.f32 %v810_v24, %v600_v23  ;;  %v815_v14 = vmul.f32 %v784_v12, %v1570_v9 }
  0xe2   : > { %1215 = vst [vmem:[%s1432_s30 + $0x20] sm:$0xff] %v1170_v35   ;;  %v827_v40 = vadd.f32 %v826_v31, %v805_v36  ;;  %v858_v41 = vmul.f32 %v805_v36, %v587_v29  ;;  %v869_v29 = vmul.f32 %v816_v20, %v1577_v26 }
  0xe3   : > { %v868_v25 = vmul.f32 %v815_v14, %v1570_v9 }
  0xe4   : > { %v828_v44 = vadd.f32 %v827_v40, %v806_v28  ;;  %v879_v46 = vadd.f32 %v878_v39, %v858_v41 }
  0xe6   : > { %v829_v51 = vadd.f32 %v828_v44, %v807_v38  ;;  %v880_v52 = vadd.f32 %v879_v46, %v859_v42  ;;  %v602_v45 = vpop.f32.mrf.mxu2  ;;  %v617_v53 = vpop.f32.mrf.mxu3 }
  0xe7   : > { %v1185_v55 = vpack.c.bf16 %v602_v45, %v600_v23  ;;  %v1200_v56 = vpack.c.bf16 %v617_v53, %v1577_v26  ;;  %v811_v62 = vmul.f32 %v764_v37, %v602_v45  ;;  %v817_v23 = vmul.f32 %v794_v22, %v617_v53  ;;  %v818_v26 = vld [vmem:[%s1412_s12] sm:$0x1] }
  0xe8   : > { %v881_v58 = vadd.f32 %v880_v52, %v860_v47  ;;  %v830_v59 = vadd.f32 %v829_v51, %v808_v43 }
  0xe9   : > { %1218 = vst [vmem:[%s1432_s30 + $0x38] sm:$0xff] %v1185_v55   ;;  %v864_v49 = vmul.f32 %v811_v62, %v602_v45  ;;  %v870_v35 = vmul.f32 %v817_v23, %v617_v53 }
  0xea   : > { %v831_v33 = vadd.f32 %v830_v59, %v809_v48  ;;  %v882_v63 = vadd.f32 %v881_v58, %v861_v57  ;;  %1221 = vst [vmem:[%s1432_s30 + $0x50] sm:$0xff] %v1200_v56   ;;  %v848_v48 = vld [vmem:[%s1417_s15] sm:$0x1] }
  0xec   : > { %v832_v3 = vadd.f32 %v831_v33, %v810_v24  ;;  %v883_v4 = vadd.f32 %v882_v63, %v862_v61 }
  0xee   : > { %v833_v6 = vadd.f32 %v832_v3, %v811_v62  ;;  %v884_v7 = vadd.f32 %v883_v4, %v863_v2 }
  0xf0   : > { %v834_v8 = vadd.f32 %v833_v6, %v812_v1  ;;  %v885_v11 = vadd.f32 %v884_v7, %v864_v49 }
  0xf2   : > { %v835_v15 = vadd.f32 %v834_v8, %v813_v5  ;;  %v886_v16 = vadd.f32 %v885_v11, %v865_v10 }
  0xf4   : > { %v887_v30 = vadd.f32 %v886_v16, %v866_v13  ;;  %v836_v21 = vadd.f32 %v835_v15, %v814_v17 }
  0xf6   : > { %v837_v27 = vadd.f32 %v836_v21, %v815_v14  ;;  %v888_v28 = vadd.f32 %v887_v30, %v867_v19 }
  0xf8   : > { %v838_v34 = vadd.f32 %v837_v27, %v816_v20  ;;  %v889_v31 = vadd.f32 %v888_v28, %v868_v25 }
  0xfa   : > { %v839_v32 = vadd.f32 %v838_v34, %v817_v23  ;;  %v890_v36 = vadd.f32 %v889_v31, %v869_v29 }
  0xfc   : > { %v840_v50 = vrot.slane %v839_v32, 4  ;;  %v891_v37 = vadd.f32 %v890_v36, %v870_v35 }
  0xfe   : > { %v841_v38 = vadd.f32 %v840_v50, %v839_v32  ;;  %v892_v39 = vrot.slane %v891_v37, 4 }
 0x100   : > { %v842_v40 = vrot.slane %v841_v38, 2  ;;  %v893_v9 = vadd.f32 %v892_v39, %v891_v37 }
 0x102   : > { %v843_v41 = vadd.f32 %v842_v40, %v841_v38  ;;  %v894_v42 = vrot.slane %v893_v9, 2 }
 0x104   : > { %v844_v43 = vrot.slane %v843_v41, 1  ;;  %v895_v44 = vadd.f32 %v894_v42, %v893_v9 }
 0x106   : > { %v845_v46 = vadd.f32 %v844_v43, %v843_v41  ;;  %v896_v47 = vrot.slane %v895_v44, 1 }
 0x108   : > { %v846_v51 = vadd.f32 %v845_v46, %v818_v26  ;;  %v897_v52 = vadd.f32 %v896_v47, %v895_v44 }
 0x10a   : > { %847 = vst [vmem:[%s1412_s12] sm:$0x1] %v846_v51  ;;  %v898_v45 = vadd.f32 %v897_v52, %v848_v48 }
 0x10c   : > { %899 = vst [vmem:[%s1417_s15] sm:$0x1] %v898_v45 }
 0x10d PF: > { %s18_s28 = sadd.s32 1, %s1332_s28   ;;  %s1629_s30 = sld [smem:[#allocation2_spill]] }
 0x10e   : > { %p15_p8 = scmp.ge.s32.totalorder %s18_s28, 6   ;;  %s1630_s24 = smov %s1324_s26 }
 0x10f   : > { %s1631_s25 = smov %s1328_s27  ;;  %s1632_s26 = smov %s1635_s29 }
 0x110   :  { %17 = sbr.rel (!%p15_p8) target bundleno = 3 (0x3), region = 101 }
 0x113   : > { %s1633_s27 = smov %s1629_s30 }

// kernel: dense_block_forward.7
= control target key start
LH: loop header
LB: loop body
LE: loop exit
PB: predicated region body
PF: predicated region fallthrough
CT: control target
= control target key end

     0   :  { %s4274_s27 = smov 0   ;;  %s4276_s28 = smov 0   ;;  %s5315_s0 = inlined_call_operand.vmem [shape: bf16[2,352,128], index: 0, kind: input, shape index: {}]   ;;  %s5316_s1 = inlined_call_operand.vmem [shape: f32[352,1], index: 1, kind: input, shape index: {}]   ;;  %s5317_s2 = inlined_call_operand.vmem [shape: f32[1,128], index: 2, kind: input, shape index: {}]   ;;  %s5318_s3 = inlined_call_operand.vmem [shape: f32[1,128], index: 3, kind: input, shape index: {}]   ;;  %s5319_s4 = inlined_call_operand.vmem [shape: bf16[9,128,128], index: 4, kind: input, shape index: {}]   ;;  %s5320_s5 = inlined_call_operand.vmem [shape: bf16[2,352,128], index: 5, kind: input, shape index: {}, may-alias: {5,6}]   ;;  %s5321_s6 = inlined_call_operand.vmem [shape: bf16[2,352,128], index: 6, kind: output, shape index: {0}, may-alias: {5,6}]   ;;  %s5322_s7 = inlined_call_operand.vmem [shape: f32[2,1,128], index: 7, kind: output, shape index: {1}]   ;;  %s5323_s8 = inlined_call_operand.vmem [shape: f32[2,1,128], index: 8, kind: output, shape index: {2}]  }
   0x1   :  { %s4278_s29 = smov 0   ;;  %s4280_s30 = smov 0  }
   0x2   :  { %s4282_s9 = smov 0  }
   0x3 LB: > { %s28_s10 = sadd.s32 1, %s4216_s29  ;;  %s31_s11 = sadd.s32 1, %s4220_s30  ;;  %s4224_s9 = sphi %s4282_s9, %s19_s9   ;;  %s4220_s30 = sphi %s4280_s30, %s5330_s30   ;;  %s4216_s29 = sphi %s4278_s29, %s5329_s29   ;;  %s4212_s28 = sphi %s4276_s28, %s5328_s28   ;;  %s4208_s27 = sphi %s4274_s27, %s5327_s27  }
   0x4   : > { %p29_p0 = scmp.ge.s32.totalorder %s28_s10, 2  ;;  %p3217_p1 = scmp.ge.s32.totalorder %s4224_s9, 1 }
   0x5   : > { %p289_p2 = scmp.lt.s32.totalorder %s4224_s9, 5 }
   0x6   : > { %s5332_s10 = smov (%p29_p0, %s28_s10), 0  ;;  %s5334_s11 = smov (!%p29_p0, %s31_s11), %s4220_s30 }
   0x7   : > { %p290_p3 = pnand %p3217_p1, %p289_p2  ;;  %p33_p4 = scmp.ge.s32.totalorder %s5334_s11, 2 }
   0x8   : > { %p334_p5 = scmp.lt.s32.totalorder (!%p290_p3), %s4212_s28, 1  ;;  %s4304_s12 = smul.u32 (!%p290_p3), 144, %s4208_s27 }
   0x9   : > { %s5336_s11 = smov (%p33_p4, %s5334_s11), 0  ;;  %293 = sbr.rel (%p290_p3) target bundleno = 671 (0x29f), region = 44 }
   0xa   : > { %p3221_p6 = scmp.ne.s32.totalorder (!%p290_p3), %s4208_s27, 0 }
   0xe   : > { %s5338_s28 = smov (!%p334_p5, %s4212_s28), 1  ;;  %361 = sbr.rel (%p3221_p6) target bundleno = 30 (0x1e), region = 48 }
   0xf   : > { %s4307_s14 = smul.u32 176, %s5338_s28  ;;  %s4312_s17 = scalar_lea.vmem %s5322_s7, %s5338_s28 }
  0x10   : > { %s4317_s20 = scalar_lea.vmem %s5323_s8, %s5338_s28 }
  0x11   : > { %s338_s23 = scalar_lea.vmem %s5315_s0, %s4307_s14  ;;  %s343_s26 = scalar_lea.vmem %s5320_s5, %s4307_s14 }
  0x12   : > { %s4331_s16 = scalar_lea.vmem %s5321_s6, %s4307_s14 }
  0x13   : > { %v4226_v0 = vmov 0.0   ;;  %v4227_v1 = vmov 0  }
  0x14   : > { %362 = vst [vmem:[%s4312_s17] sm:$0x1] %v4226_v0 }
  0x15   : > { %363 = vst [vmem:[%s4317_s20] sm:$0x1] %v4226_v0 }
  0x16   : > { %364 = vst [vmem:[%s4331_s16] sm:$0xf] %v4227_v1 }
  0x17   : > { %365 = vst [vmem:[%s4331_s16 + $0x4] sm:$0xf] %v4227_v1 }
  0x18   : > { %366 = vst [vmem:[%s4331_s16 + $0x8] sm:$0xf] %v4227_v1 }
  0x19   : > { %367 = vst [vmem:[%s4331_s16 + $0xc] sm:$0xf] %v4227_v1 }
  0x1a   : > { %368 = vst [vmem:[%s4331_s16 + $0xa0] sm:$0xf] %v4227_v1 }
  0x1b   : > { %369 = vst [vmem:[%s4331_s16 + $0xa4] sm:$0xf] %v4227_v1 }
  0x1c   : > { %370 = vst [vmem:[%s4331_s16 + $0xa8] sm:$0xf] %v4227_v1 }
  0x1d   : > { %371 = vst [vmem:[%s4331_s16 + $0xac] sm:$0xf] %v4227_v1 }
  0x1e PF: > { %s4347_s13 = scalar_lea.vmem %s5316_s1, %s4304_s12  ;;  %v4228_v2 = vmov 0   ;;  %s372_s18 = sshra.s32 %s4304_s12, 3  ;;  %v3784_v29 = vld [vmem:[%s5319_s4 + $0x78] sm:$0xff]  ;;  %v3783_v31 = vld [vmem:[%s5319_s4 + $0x70] sm:$0xff]  ;;  %v4430_v33 = vld [vmem:[%s5317_s2] ss:$0 sm:$0xff] }
  0x1f   : > { %4183 = vset.pattern.permute.xlu2 %v4228_v2  ;;  %4182 = vset.pattern.permute.xlu1 %v4228_v2  ;;  %v4350_v3 = vld [vmem:[%s4347_s13 + $0x70] sm:$0xff]  ;;  %v4353_v4 = vld [vmem:[%s4347_s13 + $0x60] sm:$0xff]  ;;  %v4362_v6 = vld [vmem:[%s4347_s13 + $0x78] sm:$0xff]  ;;  %s3222_s19 = sshll.u32 %s372_s18, 2  ;;  %vm850_vm0 = vcmask 1044480   ;;  %vm2442_vm4 = vcmask 1046528  }
  0x20   : > { %v4356_v5 = vld [vmem:[%s4347_s13 + $0x50] sm:$0xff]  ;;  %4181 = vset.pattern.permute.xlu0 %v4228_v2  ;;  %613 = vperm.xlu2 %4183, %v4350_v3   ;;  %v4365_v7 = vld [vmem:[%s4347_s13 + $0x68] sm:$0xff]  ;;  %v4368_v8 = vld [vmem:[%s4347_s13 + $0x58] sm:$0xff]  ;;  %s4417_s24 = scalar_lea.vmem %s338_s23, %s3222_s19  ;;  %vm1206_vm1 = vsmask.f32 4352  ;;  %s5324_s25 = sadd.s32 32, %s4304_s12 }
  0x21   : > { %603 = vperm.xlu1 %4182, %v4353_v4   ;;  %593 = vperm.xlu0 %4181, %v4356_v5   ;;  %v521_v9 = vld [vmem:[%s4347_s13 + $0x30] sm:$0xff]  ;;  %v520_v10 = vld [vmem:[%s4347_s13 + $0x28] sm:$0xff]  ;;  %v519_v11 = vld [vmem:[%s4347_s13 + $0x20] sm:$0xff]  ;;  %vm984_vm2 = vsmask.f32 5376  ;;  %s5150_s15 = sshra.s32 %s5324_s25, 3 }
  0x22   : > { %v524_v12 = vld [vmem:[%s4347_s13 + $0x48] sm:$0xff]  ;;  %v523_v13 = vld [vmem:[%s4347_s13 + $0x40] sm:$0xff]  ;;  %v522_v14 = vld [vmem:[%s4347_s13 + $0x38] sm:$0xff]  ;;  %4097 = vmatpush.bf16.msra.mxu2 %v3784_v29  ;;  %4096 = vmatpush.bf16.msra.mxu1 %v3784_v29  ;;  %vm1926_vm3 = vsmask.f32 7424  ;;  %s3739_s27 = sshll.u32 %s5150_s15, 2 }
  0x23   : > { %v515_v15 = vld [vmem:[%s4347_s13] sm:$0xff]  ;;  %v4381_v16 = vld [vmem:[%s4347_s13 + $0x88] sm:$0xff]  ;;  %v518_v18 = vld [vmem:[%s4347_s13 + $0x18] sm:$0xff]  ;;  %4098 = vmatpush.bf16.msra.mxu3 %v3784_v29  ;;  %927 = vmatpush.bf16.msra.mxu0 %v3784_v29  ;;  %vm2612_vm5 = vsmask.f32 6400  ;;  %s5165_s23 = scalar_lea.vmem %s343_s26, %s3739_s27  ;;  %s5194_s14 = scalar_lea.vmem %s4331_s16, %s3739_s27 }
  0x24   : > { %v4384_v17 = vld [vmem:[%s4347_s13 + $0x80] sm:$0xff]  ;;  %v517_v19 = vld [vmem:[%s4347_s13 + $0x10] sm:$0xff]  ;;  %v516_v20 = vld [vmem:[%s4347_s13 + $0x8] sm:$0xff] }
  0x25   : > { %v4392_v21 = vld [vmem:[%s4347_s13 + $0xa0] sm:$0xff]  ;;  %v4395_v22 = vld [vmem:[%s4347_s13 + $0x98] sm:$0xff]  ;;  %v4398_v23 = vld [vmem:[%s4347_s13 + $0x90] sm:$0xff] }
  0x26   : > { %v538_v24 = vld [vmem:[%s4347_s13 + $0xb8] sm:$0xff]  ;;  %v537_v25 = vld [vmem:[%s4347_s13 + $0xb0] sm:$0xff]  ;;  %v4406_v26 = vld [vmem:[%s4347_s13 + $0xa8] sm:$0xff]  ;;  %4100 = vmatpush.bf16.msra.mxu2 %v3783_v31  ;;  %4099 = vmatpush.bf16.msra.mxu1 %v3783_v31 }
  0x27   : > { %v540_v27 = vld [vmem:[%s4347_s13 + $0xc8] sm:$0xff]  ;;  %v539_v28 = vld [vmem:[%s4347_s13 + $0xc0] sm:$0xff]  ;;  %v4021_v30 = vld [vmem:[%s4417_s24 + $0x38] sm:$0xff]   ;;  %4101 = vmatpush.bf16.msra.mxu3 %v3783_v31  ;;  %928 = vmatpush.bf16.msra.mxu0 %v3783_v31 }
  0x28   : > { %618 = vperm.xlu2 %4183, %v4362_v6   ;;  %v3888_v32 = vunpack.c.l.bf16 %v4021_v30  ;;  %v3889_v34 = vunpack.c.h.bf16 %v4021_v30  ;;  %v3782_v35 = vld [vmem:[%s5319_s4 + $0x68] sm:$0xff]  ;;  %v4439_v37 = vld [vmem:[%s5318_s3] ss:$0 sm:$0xff]  ;;  %v3780_v43 = vld [vmem:[%s5319_s4 + $0x58] sm:$0xff] }
  0x29   : > { %608 = vperm.xlu1 %4182, %v4365_v7   ;;  %598 = vperm.xlu0 %4181, %v4368_v8   ;;  %v3781_v38 = vld [vmem:[%s5319_s4 + $0x60] sm:$0xff]  ;;  %v3779_v46 = vld [vmem:[%s5319_s4 + $0x50] sm:$0xff]  ;;  %v3778_v50 = vld [vmem:[%s5319_s4 + $0x48] sm:$0xff] }
  0x2a   : > { %v446_v36 = vmul.f32 %v4430_v33, %v3888_v32  ;;  %4103 = vmatpush.bf16.msra.mxu2 %v3782_v35  ;;  %4102 = vmatpush.bf16.msra.mxu1 %v3782_v35  ;;  %v447_v39 = vmul.f32 %v4430_v33, %v3889_v34  ;;  %v3777_v52 = vld [vmem:[%s5319_s4 + $0x40] sm:$0xff]  ;;  %v4020_v53 = vld [vmem:[%s4417_s24 + $0x30] sm:$0xff]   ;;  %v4019_v54 = vld [vmem:[%s4417_s24 + $0x28] sm:$0xff]  }
  0x2b   : > { %4104 = vmatpush.bf16.msra.mxu3 %v3782_v35  ;;  %929 = vmatpush.bf16.msra.mxu0 %v3782_v35  ;;  %v3884_v55 = vunpack.c.l.bf16 %v4020_v53  ;;  %v3880_v56 = vunpack.c.l.bf16 %v4019_v54  ;;  %v3885_v57 = vunpack.c.h.bf16 %v4020_v53  ;;  %v3881_v58 = vunpack.c.h.bf16 %v4019_v54  ;;  %v4016_v63 = vld [vmem:[%s4417_s24 + $0x10] sm:$0xff]   ;;  %v4022_v35 = vld [vmem:[%s4417_s24 + $0x40] sm:$0xff]  }
  0x2c   : > { %v476_v40 = vadd.f32 %v4439_v37, %v446_v36  ;;  %v477_v42 = vadd.f32 %v4439_v37, %v447_v39  ;;  %v3869_v2 = vunpack.c.h.bf16 %v4016_v63 }
  0x2d   : > { %v444_v59 = vmul.f32 %v4430_v33, %v3884_v55  ;;  %v442_v60 = vmul.f32 %v4430_v33, %v3880_v56  ;;  %v445_v61 = vmul.f32 %v4430_v33, %v3885_v57  ;;  %v443_v62 = vmul.f32 %v4430_v33, %v3881_v58  ;;  %v3859_v56 = vld [vmem:[%s4417_s24] sm:$0xff]   ;;  %v4015_v58 = vld [vmem:[%s4417_s24 + $0x8] sm:$0xff]  }
  0x2e   : > { %4106 = vmatpush.bf16.msra.mxu2 %v3781_v38  ;;  %4105 = vmatpush.bf16.msra.mxu1 %v3781_v38  ;;  %v502_v44 = vmax.f32 %v476_v40, 0.0  ;;  %v503_v45 = vmax.f32 %v477_v42, 0.0  ;;  %v3776_v42 = vld [vmem:[%s5319_s4 + $0x38] sm:$0xff] }
  0x2f   : > { %4107 = vmatpush.bf16.msra.mxu3 %v3781_v38  ;;  %930 = vmatpush.bf16.msra.mxu0 %v3781_v38 }
  0x30   : > { %573 = vperm.xlu2 %4183, %v521_v9  }
  0x31   : > { %568 = vperm.xlu1 %4182, %v520_v10   ;;  %563 = vperm.xlu0 %4181, %v519_v11  }
  0x32   : > { %4109 = vmatpush.bf16.msra.mxu2 %v3780_v43  ;;  %4108 = vmatpush.bf16.msra.mxu1 %v3780_v43 }
  0x33   : > { %4110 = vmatpush.bf16.msra.mxu3 %v3780_v43  ;;  %931 = vmatpush.bf16.msra.mxu0 %v3780_v43  ;;  %v3791_v43 = vld [vmem:[%s5319_s4 + $0xb0] sm:$0xff] }
  0x36   : > { %4112 = vmatpush.bf16.msra.mxu2 %v3779_v46  ;;  %4111 = vmatpush.bf16.msra.mxu1 %v3779_v46 }
  0x37   : > { %4113 = vmatpush.bf16.msra.mxu3 %v3779_v46  ;;  %932 = vmatpush.bf16.msra.mxu0 %v3779_v46 }
  0x38   : > { %588 = vperm.xlu2 %4183, %v524_v12  }
  0x39   : > { %583 = vperm.xlu1 %4182, %v523_v13   ;;  %578 = vperm.xlu0 %4181, %v522_v14  }
  0x3a   : > { %4115 = vmatpush.bf16.msra.mxu2 %v3778_v50  ;;  %4114 = vmatpush.bf16.msra.mxu1 %v3778_v50 }
  0x3b   : > { %4116 = vmatpush.bf16.msra.mxu3 %v3778_v50  ;;  %933 = vmatpush.bf16.msra.mxu0 %v3778_v50  ;;  %v3775_v50 = vld [vmem:[%s5319_s4 + $0x30] sm:$0xff] }
  0x3e   : > { %4118 = vmatpush.bf16.msra.mxu2 %v3777_v52  ;;  %4117 = vmatpush.bf16.msra.mxu1 %v3777_v52 }
  0x3f   : > { %4119 = vmatpush.bf16.msra.mxu3 %v3777_v52  ;;  %934 = vmatpush.bf16.msra.mxu0 %v3777_v52 }
  0x40   : > { %543 = vperm.xlu2 %4183, %v515_v15  }
  0x41   : > { %628 = vperm.xlu1 %4182, %v4381_v16   ;;  %623 = vperm.xlu0 %4181, %v4384_v17  }
  0x42   : > { %1131 = vmatpush.bf16.msrb.mxu1 %v3776_v42  ;;  %v3788_v42 = vld [vmem:[%s5319_s4 + $0x98] sm:$0xff] }
  0x46   : > { %1132 = vmatpush.bf16.msrb.mxu1 %v3775_v50 }
  0x48   : > { %558 = vperm.xlu2 %4183, %v518_v18  }
  0x49   : > { %553 = vperm.xlu1 %4182, %v517_v19   ;;  %548 = vperm.xlu0 %4181, %v516_v20  }
  0x50   : > { %643 = vperm.xlu2 %4183, %v4392_v21  }
  0x51   : > { %638 = vperm.xlu1 %4182, %v4395_v22   ;;  %633 = vperm.xlu0 %4181, %v4398_v23  }
  0x58   : > { %658 = vperm.xlu2 %4183, %v538_v24  }
  0x59   : > { %653 = vperm.xlu1 %4182, %v537_v25   ;;  %648 = vperm.xlu0 %4181, %v4406_v26  }
  0x60   : > { %2898 = vperm.xlu2 %4183, %v519_v11   ;;  %v437_v11 = vmul.f32 %v4430_v33, %v3869_v2 }
  0x61   : > { %668 = vperm.xlu1 %4182, %v540_v27   ;;  %663 = vperm.xlu0 %4181, %v539_v28  }
  0x68   : > { %2913 = vperm.xlu2 %4183, %v522_v14  }
  0x69   : > { %2908 = vperm.xlu1 %4182, %v521_v9   ;;  %2903 = vperm.xlu0 %4181, %v520_v10   ;;  %v4017_v9 = vld [vmem:[%s4417_s24 + $0x18] sm:$0xff]   ;;  %v4018_v10 = vld [vmem:[%s4417_s24 + $0x20] sm:$0xff]  }
  0x6a   : > { %v3872_v18 = vunpack.c.l.bf16 %v4017_v9  ;;  %v3877_v19 = vunpack.c.h.bf16 %v4018_v10  ;;  %v3876_v24 = vunpack.c.l.bf16 %v4018_v10  ;;  %v3873_v25 = vunpack.c.h.bf16 %v4017_v9 }
  0x6c   : > { %v438_v30 = vmul.f32 %v4430_v33, %v3872_v18  ;;  %v441_v34 = vmul.f32 %v4430_v33, %v3877_v19  ;;  %v440_v40 = vmul.f32 %v4430_v33, %v3876_v24  ;;  %v3861_v18 = vunpack.c.h.bf16 %v3859_v56 }
  0x6e   : > { %v471_v46 = vadd.f32 %v4439_v37, %v441_v34  ;;  %v470_v53 = vadd.f32 %v4439_v37, %v440_v40 }
  0x70   : > { %2928 = vperm.xlu2 %4183, %v4356_v5   ;;  %v472_v5 = vadd.f32 %v4439_v37, %v442_v60  ;;  %v497_v60 = vmax.f32 %v471_v46, 0.0 }
  0x71   : > { %2923 = vperm.xlu1 %4182, %v524_v12   ;;  %2918 = vperm.xlu0 %4181, %v523_v13  }
  0x72   : > { %v498_v14 = vmax.f32 %v472_v5, 0.0  ;;  %v3860_v5 = vunpack.c.l.bf16 %v3859_v56 }
  0x78   : > { %2943 = vperm.xlu2 %4183, %v4365_v7   ;;  %v473_v7 = vadd.f32 %v4439_v37, %v443_v62 }
  0x79   : > { %2938 = vperm.xlu1 %4182, %v4353_v4   ;;  %2933 = vperm.xlu0 %4181, %v4368_v8   ;;  %v474_v4 = vadd.f32 %v4439_v37, %v444_v59 }
  0x7a   : > { %v614_v41 = vpop.permute.xlu2 %613 }
  0x7b   : > { %v685_v47 = vmul.f32 %v614_v41, %v502_v44  ;;  %v500_v13 = vmax.f32 %v474_v4, 0.0  ;;  %v439_v41 = vmul.f32 %v4430_v33, %v3873_v25  ;;  %v468_v44 = vadd.f32 %v4439_v37, %v438_v30  ;;  %v3774_v4 = vld [vmem:[%s5319_s4 + $0x28] sm:$0xff] }
  0x7c   : > { %1133 = vmatpush.bf16.msrb.mxu1 %v3774_v4  ;;  %v432_v25 = vmul.f32 %v4430_v33, %v3860_v5  ;;  %v433_v30 = vmul.f32 %v4430_v33, %v3861_v18  ;;  %v4024_v5 = vld [vmem:[%s4417_s24 + $0x50] sm:$0xff]  }
  0x7d   : > { %v469_v54 = vadd.f32 %v4439_v37, %v439_v41  ;;  %v494_v55 = vmax.f32 %v468_v44, 0.0  ;;  %v3773_v41 = vld [vmem:[%s5319_s4 + $0x20] sm:$0xff] }
  0x7e   : > { %v462_v40 = vadd.f32 %v4439_v37, %v432_v25  ;;  %v3787_v25 = vld [vmem:[%s5319_s4 + $0x90] sm:$0xff] }
  0x80   : > { %2958 = vperm.xlu2 %4183, %v4384_v17   ;;  %v3792_v17 = vld [vmem:[%s5319_s4 + $0xb8] sm:$0xff]  ;;  %1134 = vmatpush.bf16.msrb.mxu1 %v3773_v41  ;;  %v488_v4 = vmax.f32 %v462_v40, 0.0 }
  0x81   : > { %2953 = vperm.xlu1 %4182, %v4362_v6   ;;  %2948 = vperm.xlu0 %4181, %v4350_v3   ;;  %v3868_v3 = vunpack.c.l.bf16 %v4016_v63  ;;  %v475_v6 = vadd.f32 %v4439_v37, %v445_v61  ;;  %v3800_v63 = vld [vmem:[%s5319_s4 + $0xf8] sm:$0xff] }
  0x82   : > { %v619_v48 = vpop.permute.xlu2 %618  ;;  %1313 = vmatpush.bf16.msrb.mxu2 %v3792_v17  ;;  %1615 = vmatpush.bf16.msrb.mxu3 %v3800_v63 }
  0x83   : > { %v686_v49 = vmul.f32 %v619_v48, %v503_v45  ;;  %v436_v12 = vmul.f32 %v4430_v33, %v3868_v3  ;;  %v501_v15 = vmax.f32 %v475_v6, 0.0  ;;  %v3893_v45 = vunpack.c.h.bf16 %v4022_v35  ;;  %v3790_v3 = vld [vmem:[%s5319_s4 + $0xa8] sm:$0xff] }
  0x84   : > { %v3865_v6 = vunpack.c.h.bf16 %v4015_v58 }
  0x85   : > { %v3948_v51 = vpack.c.bf16 %v686_v49, %v685_v47  ;;  %v3892_v49 = vunpack.c.l.bf16 %v4022_v35  ;;  %v449_v59 = vmul.f32 %v4430_v33, %v3893_v45 }
  0x86   : > { %1314 = vmatpush.bf16.msrb.mxu2 %v3791_v43 }
  0x87   : > { %4033 = vst [vmem:[#allocation2 + $0x38] sm:$0xff] %v3948_v51   ;;  %v448_v62 = vmul.f32 %v4430_v33, %v3892_v49 }
  0x88   : > { %2973 = vperm.xlu2 %4183, %v4395_v22   ;;  %v467_v22 = vadd.f32 %v4439_v37, %v437_v11 }
  0x89   : > { %2968 = vperm.xlu1 %4182, %v4398_v23   ;;  %2963 = vperm.xlu0 %4181, %v4381_v16   ;;  %v499_v16 = vmax.f32 %v473_v7, 0.0  ;;  %v466_v23 = vadd.f32 %v4439_v37, %v436_v12  ;;  %v479_v12 = vadd.f32 %v4439_v37, %v449_v59  ;;  %v478_v17 = vadd.f32 %v4439_v37, %v448_v62 }
  0x8a   : > { %v4481_v8 = vpop.permute.xlu2 %573  ;;  %v493_v38 = vmax.f32 %v467_v22, 0.0  ;;  %1315 = vmatpush.bf16.msrb.mxu2 %v3790_v3 }
  0x8b   : > { %v492_v39 = vmax.f32 %v466_v23, 0.0  ;;  %v677_v9 = vmul.f32 %v4481_v8, %v494_v55  ;;  %v3799_v8 = vld [vmem:[%s5319_s4 + $0xf0] sm:$0xff] }
  0x8c   : > { %1616 = vmatpush.bf16.msrb.mxu3 %v3799_v8  ;;  %v3807_v55 = vld [vmem:[%s5319_s4 + $0x130] sm:$0xff] }
  0x91   : > { %2983 = vperm.xlu1 %4182, %v4406_v26   ;;  %2978 = vperm.xlu0 %4181, %v4392_v21  }
  0x92   : > { %v589_v36 = vpop.permute.xlu2 %588 }
  0x93   : > { %v604_v0 = vpop.permute.xlu1 %603  ;;  %v594_v1 = vpop.permute.xlu0 %593 }
  0x94   : > { %v683_v26 = vmul.f32 %v604_v0, %v500_v13  ;;  %v681_v27 = vmul.f32 %v594_v1, %v498_v14  ;;  %v496_v0 = vmax.f32 %v470_v53, 0.0  ;;  %v495_v1 = vmax.f32 %v469_v54, 0.0  ;;  %v3789_v14 = vld [vmem:[%s5319_s4 + $0xa0] sm:$0xff] }
  0x95   : > { %v3864_v13 = vunpack.c.l.bf16 %v4015_v58  ;;  %1316 = vmatpush.bf16.msrb.mxu2 %v3789_v14  ;;  %v3797_v54 = vld [vmem:[%s5319_s4 + $0xe0] sm:$0xff] }
  0x99   : > { %1317 = vmatpush.bf16.msrb.mxu2 %v3788_v42  ;;  %v3805_v42 = vld [vmem:[%s5319_s4 + $0x120] sm:$0xff] }
  0x9a   : > { %v4532_v10 = vpop.permute.xlu2 %543 }
  0x9b   : > { %v609_v20 = vpop.permute.xlu1 %608  ;;  %v599_v21 = vpop.permute.xlu0 %598 }
  0x9c   : > { %v684_v28 = vmul.f32 %v609_v20, %v501_v15  ;;  %v682_v29 = vmul.f32 %v599_v21, %v499_v16  ;;  %v680_v21 = vmul.f32 %v589_v36, %v497_v60  ;;  %v505_v36 = vmax.f32 %v479_v12, 0.0 }
  0x9d   : > { %1318 = vmatpush.bf16.msrb.mxu2 %v3787_v25 }
  0x9e   : > { %v3943_v31 = vpack.c.bf16 %v684_v28, %v683_v26  ;;  %v3938_v32 = vpack.c.bf16 %v682_v29, %v681_v27  ;;  %v435_v26 = vmul.f32 %v4430_v33, %v3865_v6  ;;  %v434_v29 = vmul.f32 %v4430_v33, %v3864_v13  ;;  %v4025_v13 = vld [vmem:[%s4417_s24 + $0x58] sm:$0xff]  }
  0x9f   : > { %v3904_v41 = vunpack.c.l.bf16 %v4025_v13 }
  0xa0   : > { %4032 = vst [vmem:[#allocation2 + $0x30] sm:$0xff] %v3943_v31   ;;  %v3798_v31 = vld [vmem:[%s5319_s4 + $0xe8] sm:$0xff]  ;;  %v465_v45 = vadd.f32 %v4439_v37, %v435_v26  ;;  %v4576_v46 = vadd.f32 %v4439_v37, %v434_v29  ;;  %v671_v29 = vmul.f32 %v4532_v10, %v488_v4  ;;  %v3795_v10 = vld [vmem:[%s5319_s4 + $0xd0] sm:$0xff] }
  0xa1   : > { %4031 = vst [vmem:[#allocation2 + $0x28] sm:$0xff] %v3938_v32   ;;  %v3808_v32 = vld [vmem:[%s5319_s4 + $0x138] sm:$0xff]  ;;  %1617 = vmatpush.bf16.msrb.mxu3 %v3798_v31 }
  0xa2   : > { %1770 = vmatpush.bf16.msrb.mxu0 %v3808_v32  ;;  %v559_v58 = vpop.permute.xlu2 %558  ;;  %v491_v12 = vmax.f32 %v465_v45, 0.0  ;;  %v490_v8 = vmax.f32 %v4576_v46, 0.0  ;;  %v3901_v46 = vunpack.c.h.bf16 %v4024_v5 }
  0xa3   : > { %v569_v47 = vpop.permute.xlu1 %568  ;;  %v564_v48 = vpop.permute.xlu0 %563 }
  0xa4   : > { %v676_v51 = vmul.f32 %v569_v47, %v493_v38  ;;  %v675_v52 = vmul.f32 %v564_v48, %v492_v39  ;;  %v504_v38 = vmax.f32 %v478_v17, 0.0  ;;  %v4023_v39 = vld [vmem:[%s4417_s24 + $0x48] sm:$0xff]  }
  0xa5   : > { %v3896_v53 = vunpack.c.l.bf16 %v4023_v39  ;;  %1618 = vmatpush.bf16.msrb.mxu3 %v3797_v54  ;;  %v3806_v17 = vld [vmem:[%s5319_s4 + $0x128] sm:$0xff] }
  0xa6   : > { %v4511_v57 = vpack.c.bf16 %v676_v51, %v675_v52  ;;  %v463_v51 = vadd.f32 %v4439_v37, %v433_v30  ;;  %v3897_v52 = vunpack.c.h.bf16 %v4023_v39  ;;  %1771 = vmatpush.bf16.msrb.mxu0 %v3807_v55  ;;  %v3905_v30 = vunpack.c.h.bf16 %v4025_v13 }
  0xa7   : > { %v4515_v61 = vld [vmem:[#allocation2 + $0x34] sm:$0xff]  ;;  %v454_v55 = vmul.f32 %v4430_v33, %v3904_v41 }
  0xa8   : > { %4028 = vst [vmem:[#allocation2 + $0x10] sm:$0xff] %v4511_v57   ;;  %v4522_v2 = vld [vmem:[#allocation2 + $0x2c] sm:$0xff]  ;;  %v862_v7 = vrot.slane %v4515_v61, 3  ;;  %v1039_v47 = vshrl.u32 %v4515_v61, 16  ;;  %v1042_v48 = vshll.u32 %v4515_v61, 16  ;;  %v451_v14 = vmul.f32 %v4430_v33, %v3897_v52  ;;  %v4026_v52 = vld [vmem:[%s4417_s24 + $0x60] sm:$0xff]  }
  0xa9   : > { %v860_v11 = vrot.slane %v4522_v2, 3  ;;  %v1030_v19 = vshrl.u32 %v4522_v2, 16  ;;  %v1033_v20 = vshll.u32 %v4522_v2, 16  ;;  %v3908_v13 = vunpack.c.l.bf16 %v4026_v52  ;;  %v3769_v61 = vld [vmem:[%s5319_s4] sm:$0xff]  ;;  %v3849_v2 = vld [vmem:[%s5319_s4 + $0x1f8] sm:$0xff] }
  0xaa   : > { %v1235_v62 = vrot.slane %v1039_v47, 3  ;;  %v1236_v63 = vrot.slane %v1042_v48, 4  ;;  %v1044_v3 = vrot.slane %v1042_v48, 3  ;;  %1772 = vmatpush.bf16.msrb.mxu0 %v3806_v17  ;;  %v481_v39 = vadd.f32 %v4439_v37, %v451_v14 }
  0xab   : > { %v584_v15 = vpop.permute.xlu1 %583  ;;  %v579_v16 = vpop.permute.xlu0 %578  ;;  %v863_v24 = vsel %vm850_vm0, %v860_v11, %v862_v7  ;;  %v1231_v34 = vrot.slane %v1030_v19, 3  ;;  %v1232_v35 = vrot.slane %v1033_v20, 4  ;;  %v1032_v43 = vrot.slane %v1030_v19, 2 }
  0xac   : > { %v679_v22 = vmul.f32 %v584_v15, %v496_v0  ;;  %v678_v23 = vmul.f32 %v579_v16, %v495_v1  ;;  %960 = vmatmul.bf16.vlgmr.msra.gmra.mxu2 %v863_v24  ;;  %v1035_v44 = vrot.slane %v1033_v20, 3  ;;  %v1041_v1 = vrot.slane %v1039_v47, 2  ;;  %v3796_v16 = vld [vmem:[%s5319_s4 + $0xd8] sm:$0xff]  ;;  %v3786_v47 = vld [vmem:[%s5319_s4 + $0x88] sm:$0xff] }
  0xad   : > { %v4587_v56 = vor.u32 %v1232_v35, %v1231_v34  ;;  %v450_v15 = vmul.f32 %v4430_v33, %v3896_v53  ;;  %v489_v19 = vmax.f32 %v463_v51, 0.0  ;;  %v3900_v24 = vunpack.c.l.bf16 %v4024_v5  ;;  %1619 = vmatpush.bf16.msrb.mxu3 %v3796_v16  ;;  %v3771_v34 = vld [vmem:[%s5319_s4 + $0x10] sm:$0xff]  ;;  %1319 = vmatpush.bf16.msrb.mxu2 %v3786_v47 }
  0xae   : > { %v4552_v27 = vpack.c.bf16 %v680_v21, %v679_v22  ;;  %v4554_v28 = vpack.c.bf16 %v678_v23, %v677_v9  ;;  %v4589_v0 = vor.u32 %v1035_v44, %v1032_v43  ;;  %v4592_v9 = vor.u32 %v1236_v63, %v1235_v62  ;;  %v3772_v22 = vld [vmem:[%s5319_s4 + $0x18] sm:$0xff]  ;;  %1773 = vmatpush.bf16.msrb.mxu0 %v3805_v42 }
  0xaf   : > { %v4603_v18 = vor.u32 %v1044_v3, %v1041_v1  ;;  %1135 = vmatpush.bf16.msrb.mxu1 %v3772_v22  ;;  %v674_v35 = vmul.f32 %v559_v58, %v491_v12  ;;  %v480_v40 = vadd.f32 %v4439_v37, %v450_v15  ;;  %v452_v48 = vmul.f32 %v4430_v33, %v3900_v24  ;;  %v3794_v58 = vld [vmem:[%s5319_s4 + $0xc8] sm:$0xff]  ;;  %v3785_v3 = vld [vmem:[%s5319_s4 + $0x80] sm:$0xff]  ;;  %v3803_v22 = vld [vmem:[%s5319_s4 + $0x110] sm:$0xff] }
  0xb0   : > { %4030 = vst [vmem:[#allocation2 + $0x20] sm:$0xff] %v4552_v27   ;;  %v4616_v23 = vsel %vm1206_vm1, %v4587_v56, %v4592_v9  ;;  %v455_v53 = vmul.f32 %v4430_v33, %v3905_v30  ;;  %v453_v63 = vmul.f32 %v4430_v33, %v3901_v46  ;;  %v3770_v1 = vld [vmem:[%s5319_s4 + $0x8] sm:$0xff]  ;;  %v3909_v12 = vunpack.c.h.bf16 %v4026_v52 }
  0xb1   : > { %4029 = vst [vmem:[#allocation2 + $0x18] sm:$0xff] %v4554_v28   ;;  %v4624_v26 = vsel %vm984_vm2, %v4589_v0, %v4603_v18  ;;  %1620 = vmatpush.bf16.msrb.mxu3 %v3795_v10  ;;  %v506_v62 = vmax.f32 %v480_v40, 0.0  ;;  %v482_v4 = vadd.f32 %v4439_v37, %v452_v48  ;;  %1320 = vmatpush.bf16.msrb.mxu2 %v3785_v3  ;;  %v3802_v48 = vld [vmem:[%s5319_s4 + $0x108] sm:$0xff] }
  0xb2   : > { %v485_v14 = vadd.f32 %v4439_v37, %v455_v53  ;;  %v457_v30 = vmul.f32 %v4430_v33, %v3909_v12 }
  0xb3   : > { %v629_v49 = vpop.permute.xlu1 %628  ;;  %v624_v50 = vpop.permute.xlu0 %623  ;;  %1136 = vmatpush.bf16.msrb.mxu1 %v3771_v34  ;;  %v456_v34 = vmul.f32 %v4430_v33, %v3908_v13  ;;  %v3801_v13 = vld [vmem:[%s5319_s4 + $0x100] sm:$0xff] }
  0xb4   : > { %v688_v59 = vmul.f32 %v629_v49, %v505_v36  ;;  %v687_v60 = vmul.f32 %v624_v50, %v504_v38  ;;  %v4649_v49 = vpop.permute.xlu2 %643  ;;  %v511_v41 = vmax.f32 %v485_v14, 0.0 }
  0xb5   : > { %1621 = vmatpush.bf16.msrb.mxu3 %v3794_v58  ;;  %v486_v58 = vadd.f32 %v4439_v37, %v456_v34 }
  0xb6   : > { %v3953_v6 = vpack.c.bf16 %v688_v59, %v687_v60  ;;  %v3804_v59 = vld [vmem:[%s5319_s4 + $0x118] sm:$0xff]  ;;  %v507_v60 = vmax.f32 %v481_v39, 0.0 }
  0xb7   : > { %1774 = vmatpush.bf16.msrb.mxu0 %v3804_v59  ;;  %1137 = vmatpush.bf16.msrb.mxu1 %v3770_v1 }
  0xb8   : > { %4034 = vst [vmem:[#allocation2 + $0x40] sm:$0xff] %v3953_v6   ;;  %v4606_v20 = vld [vmem:[#allocation2 + $0x14] sm:$0xff]  ;;  %v4608_v21 = vld [vmem:[#allocation2 + $0x1c] sm:$0xff]  ;;  %v4671_v6 = vld [vmem:[#allocation2 + $0x24] sm:$0xff] }
  0xb9   : > { %v854_v31 = vrot.slane %v4606_v20, 3  ;;  %v856_v32 = vrot.slane %v4608_v21, 3  ;;  %v1015_v39 = vshll.u32 %v4608_v21, 16  ;;  %v1024_v40 = vshll.u32 %v4671_v6, 16 }
  0xba   : > { %v858_v42 = vrot.slane %v4671_v6, 3 }
  0xbb   : > { %v554_v36 = vpop.permute.xlu1 %553  ;;  %v549_v38 = vpop.permute.xlu0 %548  ;;  %v857_v45 = vsel %vm850_vm0, %v854_v31, %v856_v32  ;;  %1775 = vmatpush.bf16.msrb.mxu0 %v3803_v22  ;;  %1138 = vmatpush.bf16.msrb.mxu1 %v3769_v61  ;;  %v1026_v22 = vrot.slane %v1024_v40, 3 }
  0xbc   : > { %v673_v43 = vmul.f32 %v554_v36, %v490_v8  ;;  %v672_v44 = vmul.f32 %v549_v38, %v489_v19  ;;  %945 = vmatmul.bf16.vlgmr.msra.gmra.mxu1 %v857_v45  ;;  %v484_v8 = vadd.f32 %v4439_v37, %v454_v55  ;;  %v3793_v19 = vld [vmem:[%s5319_s4 + $0xc0] sm:$0xff]  ;;  %v1012_v38 = vshrl.u32 %v4608_v21, 16  ;;  %v659_v33 = vpop.permute.xlu2 %658 }
  0xbd   : > { %1622 = vmatpush.bf16.msrb.mxu3 %v3793_v19  ;;  %v487_v55 = vadd.f32 %v4439_v37, %v457_v30  ;;  %v694_v1 = vmul.f32 %v659_v33, %v511_v41 }
  0xbe   : > { %v3918_v50 = vpack.c.bf16 %v674_v35, %v673_v43  ;;  %v3913_v51 = vpack.c.bf16 %v672_v44, %v671_v29  ;;  %v483_v29 = vadd.f32 %v4439_v37, %v453_v63  ;;  %v1021_v35 = vshrl.u32 %v4671_v6, 16  ;;  %v4699_v44 = vld [vmem:[#allocation2 + $0x14] sm:$0xff]  }
  0xbf   : > { %v4653_v54 = vld [vmem:[#allocation2 + $0x3c] sm:$0xff]  ;;  %v510_v10 = vmax.f32 %v484_v8, 0.0  ;;  %1776 = vmatpush.bf16.msrb.mxu0 %v3802_v48  ;;  %v1223_v59 = vrot.slane %v1012_v38, 3  ;;  %v1228_v63 = vrot.slane %v1024_v40, 4  ;;  %v1478_v37 = vshrl.u32 %v4699_v44, 16 }
  0xc0   : > { %4027 = vst [vmem:[#allocation2 + $0x8] sm:$0xff] %v3918_v50   ;;  %v864_v5 = vrot.slane %v4653_v54, 3  ;;  %v509_v45 = vmax.f32 %v483_v29, 0.0  ;;  %v3841_v50 = vld [vmem:[%s5319_s4 + $0x1b8] sm:$0xff]  ;;  %v1023_v19 = vrot.slane %v1021_v35, 2 }
  0xc1   : > { %3914 = vst [vmem:[#allocation2] sm:$0xff] %v3913_v51   ;;  %2349 = vmatpush.bf16.msra.mxu2 %v3841_v50 }
  0xc2   : > { %v865_v17 = vsel %vm850_vm0, %v862_v7, %v864_v5  ;;  %v508_v7 = vmax.f32 %v482_v4, 0.0 }
  0xc3   : > { %v639_v15 = vpop.permute.xlu1 %638  ;;  %v634_v16 = vpop.permute.xlu0 %633  ;;  %965 = vmatmul.bf16.gmra.mxu2 %v865_v17  ;;  %v1017_v17 = vrot.slane %v1015_v39, 3  ;;  %1777 = vmatpush.bf16.msrb.mxu0 %v3801_v13 }
  0xc4   : > { %v690_v24 = vmul.f32 %v639_v15, %v507_v60  ;;  %v689_v25 = vmul.f32 %v634_v16, %v506_v62  ;;  %v691_v51 = vmul.f32 %v4649_v49, %v508_v7  ;;  %v1224_v60 = vrot.slane %v1015_v39, 4 }
  0xc5   : > { %v1227_v62 = vrot.slane %v1021_v35, 3  ;;  %v859_v49 = vsel %vm850_vm0, %v856_v32, %v858_v42  ;;  %v1014_v16 = vrot.slane %v1012_v38, 2  ;;  %v3825_v32 = vld [vmem:[%s5319_s4 + $0x178] sm:$0xff]  ;;  %v1481_v38 = vshll.u32 %v4699_v44, 16 }
  0xc6   : > { %v3958_v36 = vpack.c.bf16 %v690_v24, %v689_v25  ;;  %v4731_v29 = vor.u32 %v1224_v60, %v1223_v59  ;;  %2060 = vmatpush.bf16.msra.mxu1 %v3825_v32  ;;  %v513_v39 = vmax.f32 %v487_v55, 0.0  ;;  %v512_v35 = vmax.f32 %v486_v58, 0.0 }
  0xc7   : > { %v4697_v43 = vld [vmem:[#allocation2 + $0x8] sm:$0xf]  ;;  %v4709_v52 = vld [vmem:[#allocation2 + $0xc] sm:$0xff]  ;;  %v1229_v61 = vor.u32 %v1228_v63, %v1227_v62  ;;  %v4738_v33 = vor.u32 %v1017_v17, %v1014_v16  ;;  %v861_v58 = vsel %vm850_vm0, %v858_v42, %v860_v11  ;;  %v4754_v59 = vrot.slane %v1478_v37, 3  ;;  %v3857_v62 = vld [vmem:[%s5319_s4 + $0x238] sm:$0xff] }
  0xc8   : > { %4035 = vst [vmem:[#allocation2 + $0x48] sm:$0xff] %v3958_v36   ;;  %v784_v46 = vld [vmem:[#allocation2 + $0x4] sm:$0x8]  ;;  %v822_v47 = vunpack.c.l.b16 %v4697_v43  ;;  %v852_v21 = vrot.slane %v4709_v52, 3  ;;  %v4054_v36 = vld [vmem:[#allocation2 + $0xc] sm:$0x8] }
  0xc9   : > { %v821_v53 = vunpack.c.l.b16 %v784_v46  ;;  %v749_v50 = vld [vmem:[#allocation2 + $0x4] sm:$0xc]  ;;  %v4744_v44 = vsel %vm1206_vm1, %v4731_v29, %v1229_v61  ;;  %v4756_v60 = vrot.slane %v1481_v38, 4  ;;  %v4772_v42 = vsel %vm1206_vm1, %v1229_v61, %v4587_v56 }
  0xca   : > { %v982_v11 = vunpack.c.l.b16 %v749_v50  ;;  %v997_v13 = vshll.u32 %v4709_v52, 16  ;;  %v1048_v17 = vshrl.u32 %v4653_v54, 16  ;;  %v1051_v56 = vshll.u32 %v4653_v54, 16 }
  0xcb   : > { %v654_v3 = vpop.permute.xlu1 %653  ;;  %v649_v4 = vpop.permute.xlu0 %648  ;;  %v4720_v12 = vpack.c.b16 %v822_v47, %v821_v53 }
  0xcc   : > { %v693_v14 = vmul.f32 %v654_v3, %v510_v10  ;;  %v692_v15 = vmul.f32 %v649_v4, %v509_v45  ;;  %950 = vmatmul.bf16.gmra.mxu1 %v859_v49  ;;  %v4121_v10 = vld [vmem:[#allocation2 + $0xc] sm:$0xf0]   ;;  %v1027_v45 = vor.u32 %v1026_v22, %v1023_v19  ;;  %v1240_v54 = vrot.slane %v1051_v56, 4 }
  0xcd   : > { %v851_v8 = vrot.slane %v4720_v12, 3  ;;  %v4055_v48 = vor.u32 %v4121_v10, %v4054_v36  ;;  %v1211_v16 = vshll.u32 %v4720_v12, 16  ;;  %v1050_v61 = vrot.slane %v1048_v17, 2 }
  0xce   : > { %v3968_v24 = vpack.c.bf16 %v694_v1, %v693_v14  ;;  %v3963_v25 = vpack.c.bf16 %v692_v15, %v691_v51  ;;  %v4768_v6 = vsel %vm984_vm2, %v4738_v33, %v1027_v45  ;;  %v4776_v4 = vsel %vm984_vm2, %v1027_v45, %v4589_v0  ;;  %v3848_v45 = vld [vmem:[%s5319_s4 + $0x1f0] sm:$0xff] }
  0xcf   : > { %v853_v7 = vsel %vm850_vm0, %v851_v8, %v852_v21  ;;  %v4734_v30 = vld [vmem:[#allocation2 + $0x44] sm:$0xff]  ;;  %v767_v34 = vld [vmem:[#allocation2 + $0x4c] sm:$0x7]  ;;  %v1470_v14 = vshrl.u32 %v4055_v48, 16  ;;  %v1208_v15 = vshrl.u32 %v4720_v12, 16  ;;  %v855_v0 = vsel %vm850_vm0, %v852_v21, %v854_v31  ;;  %v3840_v21 = vld [vmem:[%s5319_s4 + $0x1b0] sm:$0xff] }
  0xd0   : > { %4037 = vst [vmem:[#allocation2 + $0x58] sm:$0xff] %v3968_v24   ;;  %935 = vmatmul.bf16.vlgmr.msra.gmra.mxu0 %v853_v7  ;;  %v839_v40 = vunpack.c.l.b16 %v767_v34  ;;  %v866_v41 = vrot.slane %v4734_v30, 3  ;;  %v1185_v8 = vld [vmem:[#allocation2 + $0x4c] sm:$0xf]  ;;  %v1473_v32 = vshll.u32 %v4055_v48, 16  ;;  %v1057_v19 = vshrl.u32 %v4734_v30, 16  ;;  %2350 = vmatpush.bf16.msra.mxu2 %v3840_v21 }
  0xd1   : > { %4036 = vst [vmem:[#allocation2 + $0x50] sm:$0xff] %v3963_v25   ;;  %2719 = vmatpush.bf16.msra.mxu0 %v3857_v62  ;;  %v1060_v22 = vshll.u32 %v4734_v30, 16  ;;  %v983_v12 = vpack.c.b16 %v822_v47, %v982_v11  ;;  %v1239_v25 = vrot.slane %v1048_v17, 3  ;;  %v1053_v7 = vrot.slane %v1051_v56, 3 }
  0xd2   : > { %v4740_v46 = vpack.c.b16 %v839_v40, %v839_v40  ;;  %v867_v55 = vsel %vm850_vm0, %v864_v5, %v866_v41  ;;  %v994_v5 = vshrl.u32 %v4709_v52, 16  ;;  %v1243_v34 = vrot.slane %v1057_v19, 3 }
  0xd3   : > { %v669_v51 = vpop.permute.xlu1 %668  ;;  %v664_v53 = vpop.permute.xlu0 %663  ;;  %970 = vmatmul.bf16.gmra.mxu2 %v867_v55  ;;  %v1204_v36 = vunpack.c.l.b16 %v1185_v8  ;;  %v1210_v38 = vrot.slane %v1208_v15, 3  ;;  %v1213_v31 = vrot.slane %v1211_v16, 4  ;;  %v1244_v30 = vrot.slane %v1060_v22, 4 }
  0xd4   : > { %v696_v63 = vmul.f32 %v669_v51, %v513_v39  ;;  %v695_v1 = vmul.f32 %v664_v53, %v512_v35  ;;  %v868_v3 = vrot.slane %v4740_v46, 3  ;;  %v1215_v24 = vrot.slane %v994_v5, 3 }
  0xd5   : > { %v1241_v39 = vor.u32 %v1240_v54, %v1239_v25  ;;  %v1216_v35 = vrot.slane %v997_v13, 4  ;;  %v1054_v40 = vor.u32 %v1053_v7, %v1050_v61  ;;  %v1059_v43 = vrot.slane %v1057_v19, 2  ;;  %v4125_v7 = vld [vmem:[#allocation2 + $0x1c] sm:$0xff]  }
  0xd6   : > { %v3973_v49 = vpack.c.bf16 %v696_v63, %v695_v1  ;;  %v869_v37 = vsel %vm850_vm0, %v866_v41, %v868_v3  ;;  %v1062_v47 = vrot.slane %v1060_v22, 3  ;;  %v1472_v41 = vrot.slane %v1470_v14, 3  ;;  %v3856_v22 = vld [vmem:[%s5319_s4 + $0x230] sm:$0xff] }
  0xd7   : > { %975 = vmatmul.bf16.vlgmr.msra.gmra.mxu3 %v869_v37  ;;  %v1475_v10 = vrot.slane %v1473_v32, 4  ;;  %v4803_v48 = vsel %vm1206_vm1, %v4592_v9, %v1241_v39  ;;  %v1245_v50 = vor.u32 %v1244_v30, %v1243_v34  ;;  %v986_v51 = vshrl.u32 %v983_v12, 16  ;;  %2720 = vmatpush.bf16.msra.mxu0 %v3856_v22  ;;  %v4131_v22 = vld [vmem:[#allocation2 + $0x34] sm:$0xff]  }
  0xd8   : > { %4038 = vst [vmem:[#allocation2 + $0x60] sm:$0xff] %v3973_v49   ;;  %2519 = vmatpush.bf16.msra.mxu3 %v3849_v2  ;;  %v4807_v53 = vsel %vm984_vm2, %v4603_v18, %v1054_v40  ;;  %v1063_v55 = vor.u32 %v1062_v47, %v1059_v43  ;;  %v1205_v62 = vpack.c.b16 %v1204_v36, %v1204_v36  ;;  %v1066_v1 = vshrl.u32 %v4740_v46, 16  ;;  %v3824_v2 = vld [vmem:[%s5319_s4 + $0x170] sm:$0xff] }
  0xd9   : > { %v4810_v63 = vsel %vm1206_vm1, %v1241_v39, %v1245_v50  ;;  %v1069_v3 = vshll.u32 %v4740_v46, 16  ;;  %v989_v9 = vshll.u32 %v983_v12, 16  ;;  %v1217_v37 = vor.u32 %v1216_v35, %v1215_v24  ;;  %2061 = vmatpush.bf16.msra.mxu1 %v3824_v2  ;;  %v3838_v2 = vld [vmem:[%s5319_s4 + $0x1a0] sm:$0xff] }
  0xda   : > { %v4818_v18 = vsel %vm984_vm2, %v1054_v40, %v1063_v55  ;;  %v1248_v11 = vshrl.u32 %v1205_v62, 16  ;;  %v1251_v49 = vshll.u32 %v1205_v62, 16  ;;  %v1068_v14 = vrot.slane %v1066_v1, 2  ;;  %v3823_v40 = vld [vmem:[%s5319_s4 + $0x168] sm:$0xff] }
  0xdb   : > { %v1071_v15 = vrot.slane %v1069_v3, 3  ;;  %v1476_v16 = vor.u32 %v1475_v10, %v1472_v41  ;;  %v988_v32 = vrot.slane %v986_v51, 2  ;;  %v991_v19 = vrot.slane %v989_v9, 3  ;;  %v3855_v51 = vld [vmem:[%s5319_s4 + $0x228] sm:$0xff] }
  0xdc   : > { %955 = vmatmul.bf16.gmra.mxu1 %v861_v58  ;;  %v1214_v58 = vor.u32 %v1213_v31, %v1210_v38  ;;  %2520 = vmatpush.bf16.msra.mxu3 %v3848_v45  ;;  %v1250_v17 = vrot.slane %v1248_v11, 3  ;;  %v1253_v56 = vrot.slane %v1251_v49, 4  ;;  %v996_v54 = vrot.slane %v994_v5, 2  ;;  %v3846_v11 = vld [vmem:[%s5319_s4 + $0x1e0] sm:$0xff] }
  0xdd   : > { %v1072_v8 = vor.u32 %v1071_v15, %v1068_v14  ;;  %v999_v61 = vrot.slane %v997_v13, 3  ;;  %v1003_v34 = vshrl.u32 %v4606_v20, 16  ;;  %v1006_v36 = vshll.u32 %v4606_v20, 16  ;;  %v3839_v13 = vld [vmem:[%s5319_s4 + $0x1a8] sm:$0xff]  ;;  %2062 = vmatpush.bf16.msra.mxu1 %v3823_v40  ;;  %2721 = vmatpush.bf16.msra.mxu0 %v3855_v51  ;;  %v3822_v49 = vld [vmem:[%s5319_s4 + $0x160] sm:$0xff]  ;;  %v4044_v51 = vld [vmem:[#allocation2 + $0x38] sm:$0xff]  }
  0xde   : > { %v1218_v46 = vsel %vm1206_vm1, %v1214_v58, %v1217_v37  ;;  %v1254_v24 = vor.u32 %v1253_v56, %v1250_v17  ;;  %v1487_v31 = vshrl.u32 %v4125_v7, 16  ;;  %v1490_v21 = vshll.u32 %v4125_v7, 16  ;;  %2351 = vmatpush.bf16.msra.mxu2 %v3839_v13  ;;  %v3847_v20 = vld [vmem:[%s5319_s4 + $0x1e8] sm:$0xff]  ;;  %v3854_v15 = vld [vmem:[%s5319_s4 + $0x220] sm:$0xff]  ;;  %v4043_v13 = vld [vmem:[#allocation2 + $0x30] sm:$0xff]  }
  0xdf   : > { %v4827_v12 = vsel %vm984_vm2, %v1063_v55, %v1072_v8  ;;  %v1000_v38 = vor.u32 %v999_v61, %v996_v54  ;;  %v1219_v5 = vrot.slane %v1003_v34, 3  ;;  %v1220_v52 = vrot.slane %v1006_v36, 4  ;;  %v3853_v54 = vld [vmem:[%s5319_s4 + $0x218] sm:$0xff]  ;;  %v4042_v7 = vld [vmem:[#allocation2 + $0x28] sm:$0xff]  }
  0xe0   : > { %940 = vmatmul.bf16.gmra.mxu0 %v855_v0  ;;  %v1484_v0 = vor.u32 %v4756_v60, %v4754_v59  ;;  %v4835_v59 = vsel %vm1206_vm1, %v1245_v50, %v1254_v24  ;;  %v992_v60 = vor.u32 %v991_v19, %v988_v32  ;;  %v1489_v30 = vrot.slane %v1487_v31, 3  ;;  %2521 = vmatpush.bf16.msra.mxu3 %v3847_v20  ;;  %v3845_v32 = vld [vmem:[%s5319_s4 + $0x1d8] sm:$0xff]  ;;  %v3835_v20 = vld [vmem:[%s5319_s4 + $0x188] sm:$0xff] }
  0xe1   : > { %v1492_v35 = vrot.slane %v1490_v21, 4  ;;  %v1221_v43 = vor.u32 %v1220_v52, %v1219_v5  ;;  %v1005_v45 = vrot.slane %v1003_v34, 2  ;;  %v1008_v50 = vrot.slane %v1006_v36, 3  ;;  %2063 = vmatpush.bf16.msra.mxu1 %v3822_v49  ;;  %2722 = vmatpush.bf16.msra.mxu0 %v3854_v15  ;;  %v3821_v19 = vld [vmem:[%s5319_s4 + $0x158] sm:$0xff]  ;;  %v3836_v34 = vld [vmem:[%s5319_s4 + $0x190] sm:$0xff]  ;;  %v4135_v40 = vld [vmem:[#allocation2 + $0x44] sm:$0xff]  }
  0xe2   : > { %v1485_v25 = vsel %vm1206_vm1, %v1476_v16, %v1484_v0  ;;  %v1001_v39 = vsel %vm984_vm2, %v992_v60, %v1000_v38  ;;  %2352 = vmatpush.bf16.msra.mxu2 %v3838_v2  ;;  %v4129_v16 = vld [vmem:[#allocation2 + $0x2c] sm:$0xff]   ;;  %v1514_v24 = vshrl.u32 %v4131_v22, 16  ;;  %v4133_v31 = vld [vmem:[#allocation2 + $0x3c] sm:$0xff]  }
  0xe3   : > { %1321 = vmatmul.bf16.vlgmr.msrb.gmra.mxu2 %v1218_v46  ;;  %v1493_v47 = vor.u32 %v1492_v35, %v1489_v30  ;;  %v1222_v41 = vsel %vm1206_vm1, %v1217_v37, %v1221_v43  ;;  %v1009_v55 = vor.u32 %v1008_v50, %v1005_v45  ;;  %v1226_v14 = vsel %vm1206_vm1, %v1221_v43, %v4731_v29  ;;  %v3844_v36 = vld [vmem:[%s5319_s4 + $0x1d0] sm:$0xff]  ;;  %v3843_v43 = vld [vmem:[%s5319_s4 + $0x1c8] sm:$0xff]  ;;  %v3842_v2 = vld [vmem:[%s5319_s4 + $0x1c0] sm:$0xff] }
  0xe4   : > { %2522 = vmatpush.bf16.msra.mxu3 %v3846_v11  ;;  %v1505_v56 = vshrl.u32 %v4129_v16, 16  ;;  %v1508_v46 = vshll.u32 %v4129_v16, 16  ;;  %v1523_v21 = vshrl.u32 %v4133_v31, 16  ;;  %v4045_v15 = vld [vmem:[#allocation2 + $0x40] sm:$0xff]  }
  0xe5   : > { %v1494_v10 = vsel %vm1206_vm1, %v1484_v0, %v1493_v47  ;;  %v1010_v1 = vsel %vm984_vm2, %v1000_v38, %v1009_v55  ;;  %v1019_v17 = vsel %vm984_vm2, %v1009_v55, %v4738_v33  ;;  %v3837_v0 = vld [vmem:[%s5319_s4 + $0x198] sm:$0xff]  ;;  %2064 = vmatpush.bf16.msra.mxu1 %v3821_v19  ;;  %2723 = vmatpush.bf16.msra.mxu0 %v3853_v54  ;;  %v3851_v55 = vld [vmem:[%s5319_s4 + $0x208] sm:$0xff] }
  0xe6   : > { %v1507_v29 = vrot.slane %v1505_v56, 3  ;;  %v1510_v8 = vrot.slane %v1508_v46, 4  ;;  %2353 = vmatpush.bf16.msra.mxu2 %v3837_v0  ;;  %v1525_v5 = vrot.slane %v1523_v21, 3  ;;  %v3818_v56 = vld [vmem:[%s5319_s4 + $0x140] sm:$0xff] }
  0xe7   : > { %1623 = vmatmul.bf16.vlgmr.msrb.gmra.mxu3 %v1485_v25  ;;  %v1517_v25 = vshll.u32 %v4131_v22, 16  ;;  %v3850_v46 = vld [vmem:[%s5319_s4 + $0x200] sm:$0xff] }
  0xe8   : > { %2523 = vmatpush.bf16.msra.mxu3 %v3845_v32  ;;  %v1511_v33 = vor.u32 %v1510_v8, %v1507_v29  ;;  %v4972_v21 = vld [vmem:[#allocation2 + $0x20] sm:$0xff] }
  0xe9   : > { %v1519_v61 = vrot.slane %v1517_v25, 4 }
  0xea   : > { %2354 = vmatpush.bf16.msra.mxu2 %v3836_v34 }
  0xec   : > { %1139 = vmatmul.bf16.vlgmr.msrb.gmra.mxu1 %v1001_v39  ;;  %2524 = vmatpush.bf16.msra.mxu3 %v3844_v36  ;;  %v1526_v39 = vshll.u32 %v4133_v31, 16 }
  0xee   : > { %v1528_v52 = vrot.slane %v1526_v39, 4  ;;  %2355 = vmatpush.bf16.msra.mxu2 %v3835_v20  ;;  %v4049_v20 = vld [vmem:[#allocation2 + $0x18] sm:$0xf0] }
  0xf0   : > { %1778 = vmatmul.bf16.vlgmr.msrb.gmra.mxu0 %v4511_v57  ;;  %v4127_v57 = vld [vmem:[#allocation2 + $0x24] sm:$0xff]   ;;  %v1529_v30 = vor.u32 %v1528_v52, %v1525_v5  ;;  %2525 = vmatpush.bf16.msra.mxu3 %v3843_v43 }
  0xf1   : > { %v1496_v62 = vshrl.u32 %v4127_v57, 16  ;;  %v1499_v58 = vshll.u32 %v4127_v57, 16 }
  0xf3   : > { %1326 = vmatmul.bf16.gmra.mxu2 %v1222_v41  ;;  %v1498_v3 = vrot.slane %v1496_v62, 3  ;;  %v1501_v9 = vrot.slane %v1499_v58, 4  ;;  %v1532_v41 = vshrl.u32 %v4135_v40, 16 }
  0xf4   : > { %2526 = vmatpush.bf16.msra.mxu3 %v3842_v2  ;;  %v2444_v2 = vrot.slane %v4972_v21, 1 }
  0xf5   : > { %v1502_v37 = vor.u32 %v1501_v9, %v1498_v3  ;;  %v1534_v45 = vrot.slane %v1532_v41, 3  ;;  %v4136_v3 = vld [vmem:[#allocation2 + $0x4c] sm:$0xff]   ;;  %v3834_v9 = vld [vmem:[%s5319_s4 + $0x180] sm:$0xff] }
  0xf6   : > { %2356 = vmatpush.bf16.msra.mxu2 %v3834_v9  ;;  %v1541_v49 = vshrl.u32 %v4136_v3, 16  ;;  %v3809_v41 = vld [vmem:[#allocation2 + $0x10] sm:$0xff] }
  0xf7   : > { %1628 = vmatmul.bf16.gmra.mxu3 %v1494_v10  ;;  %v1535_v10 = vshll.u32 %v4135_v40, 16 }
  0xf9   : > { %v1537_v50 = vrot.slane %v1535_v10, 4 }
  0xfb   : > { %v1538_v58 = vor.u32 %v1537_v50, %v1534_v45 }
  0xfc   : > { %1144 = vmatmul.bf16.gmra.mxu1 %v1010_v1 }
  0xfd   : > { %v1539_v1 = vsel %vm1206_vm1, %v1529_v30, %v1538_v58 }
 0x100   : > { %1783 = vmatmul.bf16.gmra.mxu0 %v4554_v28  ;;  %v1503_v28 = vsel %vm1206_vm1, %v1493_v47, %v1502_v37  ;;  %v3819_v47 = vld [vmem:[%s5319_s4 + $0x148] sm:$0xff] }
 0x103   : > { %1331 = vmatmul.bf16.gmra.mxu2 %v1226_v14  ;;  %v1543_v14 = vrot.slane %v1541_v49, 3  ;;  %v1930_v49 = vshll.u32 %v3809_v41, 16 }
 0x107   : > { %1633 = vmatmul.bf16.gmra.mxu3 %v1503_v28 }
 0x10c   : > { %1149 = vmatmul.bf16.gmra.mxu1 %v1019_v17  ;;  %v4047_v17 = vld [vmem:[#allocation2 + $0x50] sm:$0xff]  }
 0x110   : > { %1788 = vmatmul.bf16.gmra.mxu0 %v4552_v27  ;;  %v1512_v27 = vsel %vm1206_vm1, %v1502_v37, %v1511_v33 }
 0x113   : > { %1336 = vmatmul.bf16.gmra.mxu2 %v4744_v44  ;;  %v1516_v44 = vrot.slane %v1514_v24, 3 }
 0x115   : > { %v1520_v60 = vor.u32 %v1519_v61, %v1516_v44 }
 0x117   : > { %1638 = vmatmul.bf16.gmra.mxu3 %v1512_v27  ;;  %v1521_v38 = vsel %vm1206_vm1, %v1511_v33, %v1520_v60 }
 0x11c   : > { %1154 = vmatmul.bf16.gmra.mxu1 %v4768_v6  ;;  %v3820_v6 = vld [vmem:[%s5319_s4 + $0x150] sm:$0xff] }
 0x11d   : > { %2065 = vmatpush.bf16.msra.mxu1 %v3820_v6 }
 0x120   : > { %1793 = vmatmul.bf16.gmra.mxu0 %v4042_v7 }
 0x121   : > { %2066 = vmatpush.bf16.msra.mxu1 %v3819_v47 }
 0x123   : > { %1341 = vmatmul.bf16.gmra.mxu2 %v4772_v42  ;;  %v3852_v42 = vld [vmem:[%s5319_s4 + $0x210] sm:$0xff] }
 0x124   : > { %2724 = vmatpush.bf16.msra.mxu0 %v3852_v42 }
 0x125   : > { %2067 = vmatpush.bf16.msra.mxu1 %v3818_v56 }
 0x127   : > { %1643 = vmatmul.bf16.gmra.mxu3 %v1521_v38  ;;  %v4048_v38 = vld [vmem:[#allocation2 + $0x18] sm:$0xff]  }
 0x128   : > { %2725 = vmatpush.bf16.msra.mxu0 %v3851_v55  ;;  %v2219_v39 = vshll.u32 %v4048_v38, 16  ;;  %v2217_v43 = vshrl.u32 %v4048_v38, 16  ;;  %v4976_v55 = vld [vmem:[#allocation2 + $0x18] sm:$0xff] }
 0x12c   : > { %1159 = vmatmul.bf16.gmra.mxu1 %v4776_v4  ;;  %v1530_v4 = vsel %vm1206_vm1, %v1520_v60, %v1529_v30  ;;  %2726 = vmatpush.bf16.msra.mxu0 %v3850_v46  ;;  %v2224_v30 = vshll.u32 %v4972_v21, 16 }
 0x12f   : > { %v4906_v35 = vpop.f32.mrf.mxu2 }
 0x130   : > { %1798 = vmatmul.bf16.gmra.mxu0 %v4043_v13  ;;  %v2221_v13 = vrot.slane %v2219_v39, 1 }
 0x132   : > { %v2222_v50 = vor.u32 %v2221_v13, %v2217_v43 }
 0x133   : > { %1346 = vmatmul.bf16.gmra.mxu2 %v4616_v23 }
 0x137   : > { %1648 = vmatmul.bf16.gmra.mxu3 %v1530_v4  ;;  %v4921_v57 = vpop.f32.mrf.mxu2  ;;  %v4050_v4 = vld [vmem:[#allocation2 + $0x18] sm:$0xe] }
 0x138   : > { %v4051_v47 = vor.u32 %v4050_v4, %v4049_v20 }
 0x139   : > { %v4918_v23 = vpop.f32.mrf.mxu1 }
 0x13a   : > { %v2443_v9 = vrot.slane %v4051_v47, 1 }
 0x13c   : > { %1164 = vmatmul.bf16.gmra.mxu1 %v4624_v26  ;;  %v2445_v46 = vsel %vm2442_vm4, %v2443_v9, %v2444_v2 }
 0x140   : > { %1803 = vmatmul.bf16.gmra.mxu0 %v4044_v51  ;;  %v2226_v51 = vrot.slane %v2224_v30, 1 }
 0x141   : > { %v4926_v62 = vpop.f32.mrf.mxu1 }
 0x143   : > { %1351 = vmatmul.bf16.gmra.mxu2 %v4803_v48  ;;  %v1544_v48 = vshll.u32 %v4136_v3, 16 }
 0x145   : > { %v1546_v28 = vrot.slane %v1544_v48, 4 }
 0x146   : > { %v4930_v26 = vpop.f32.mrf.mxu2 }
 0x147   : > { %1653 = vmatmul.bf16.gmra.mxu3 %v1539_v1  ;;  %v1547_v8 = vor.u32 %v1546_v28, %v1543_v14  ;;  %v2228_v14 = vshrl.u32 %v4972_v21, 16  ;;  %v2617_v28 = vshll.u32 %v4051_v47, 16 }
 0x149   : > { %v4938_v11 = vpop.f32.mrf.mxu1  ;;  %v1548_v32 = vsel %vm1206_vm1, %v1538_v58, %v1547_v8 }
 0x14c   : > { %1169 = vmatmul.bf16.gmra.mxu1 %v4807_v53  ;;  %v4010_v53 = vunpack.c.h.b16 %v4047_v17 }
 0x14d   : > { %v936_v37 = vpop.f32.mrf.mxu0 }
 0x14e   : > { %v4941_v16 = vpop.f32.mrf.mxu2  ;;  %v1468_v33 = vpack.c.b16 %v4010_v53, %v4010_v53 }
 0x150   : > { %1808 = vmatmul.bf16.gmra.mxu0 %v4045_v15  ;;  %v1550_v24 = vshrl.u32 %v1468_v33, 16  ;;  %v1553_v25 = vshll.u32 %v1468_v33, 16  ;;  %v1935_v15 = vshll.u32 %v4976_v55, 16 }
 0x151   : > { %v4949_v29 = vpop.f32.mrf.mxu1 }
 0x152   : > { %v1552_v44 = vrot.slane %v1550_v24, 3  ;;  %v1555_v61 = vrot.slane %v1553_v25, 4  ;;  %v2619_v24 = vrot.slane %v2617_v28, 2  ;;  %v2622_v25 = vrot.slane %v2224_v30, 2 }
 0x153   : > { %1356 = vmatmul.bf16.gmra.mxu2 %v4810_v63  ;;  %v4046_v63 = vld [vmem:[#allocation2 + $0x48] sm:$0xff]  }
 0x154   : > { %v1556_v36 = vor.u32 %v1555_v61, %v1552_v44  ;;  %v1928_v44 = vshrl.u32 %v3809_v41, 16  ;;  %v1937_v61 = vrot.slane %v1935_v15, 1 }
 0x155   : > { %v938_v0 = vpop.f32.mrf.mxu0 }
 0x156   : > { %v4953_v19 = vpop.f32.mrf.mxu2  ;;  %v1557_v6 = vsel %vm1206_vm1, %v1547_v8, %v1556_v36  ;;  %v1932_v8 = vrot.slane %v1930_v49, 1  ;;  %v4987_v36 = vld [vmem:[#allocation2 + $0x28] sm:$0xff] }
 0x157   : > { %1658 = vmatmul.bf16.gmra.mxu3 %v1548_v32  ;;  %v2232_v30 = vshll.u32 %v4987_v36, 16  ;;  %v2236_v49 = vshrl.u32 %v4987_v36, 16 }
 0x159   : > { %v4955_v27 = vpop.f32.mrf.mxu1 }
 0x15a   : > { %v4957_v22 = vpop.f32.mrf.mxu3 }
 0x15c   : > { %1174 = vmatmul.bf16.gmra.mxu1 %v4818_v18 }
 0x15d   : > { %v4959_v54 = vpop.f32.mrf.mxu0 }
 0x15e   : > { %v4962_v7 = vpop.f32.mrf.mxu2 }
 0x160   : > { %1813 = vmatmul.bf16.gmra.mxu0 %v4046_v63 }
 0x161   : > { %v4964_v60 = vpop.f32.mrf.mxu1 }
 0x162   : > { %v4966_v34 = vpop.f32.mrf.mxu3 }
 0x163   : > { %1361 = vmatmul.bf16.gmra.mxu2 %v4835_v59 }
 0x165   : > { %v4969_v31 = vpop.f32.mrf.mxu0 }
 0x166   : > { %v1322_v18 = vpop.f32.mrf.mxu2 }
 0x167   : > { %1663 = vmatmul.bf16.gmra.mxu3 %v1557_v6 }
 0x169   : > { %v1140_v42 = vpop.f32.mrf.mxu1 }
 0x16a   : > { %v1624_v5 = vpop.f32.mrf.mxu3  ;;  %v1141_v52 = vadd.f32 %v1140_v42, %v936_v37  ;;  %v2227_v37 = vsel %vm1926_vm3, %v2222_v50, %v2226_v51 }
 0x16c   : > { %v1367_v40 = vadd.f32 %v1322_v18, %v1141_v52  ;;  %1179 = vmatmul.bf16.gmra.mxu1 %v4827_v12  ;;  %v2614_v12 = vshrl.u32 %v4051_v47, 16  ;;  %v1933_v18 = vor.u32 %v1932_v8, %v1928_v44  ;;  %v2234_v47 = vrot.slane %v2232_v30, 1 }
 0x16d   : > { %v1779_v59 = vpop.f32.mrf.mxu0 }
 0x16e   : > { %v1669_v10 = vadd.f32 %v1624_v5, %v1367_v40  ;;  %v1324_v45 = vpop.f32.mrf.mxu2  ;;  %v2616_v53 = vrot.slane %v2614_v12, 1  ;;  %v1938_v5 = vsel %vm1926_vm3, %v1933_v18, %v1937_v61  ;;  %v1939_v12 = vshrl.u32 %v4976_v55, 16 }
 0x170   : > { %1818 = vmatmul.bf16.gmra.mxu0 %v4047_v17  ;;  %v4978_v58 = vadd.f32 %v1779_v59, %v1669_v10  ;;  %v2620_v39 = vor.u32 %v2619_v24, %v2616_v53  ;;  %v2230_v59 = vor.u32 %v2228_v14, %v2226_v51  ;;  %v3811_v10 = vld [vmem:[#allocation2 + $0x20] sm:$0xff]  ;;  %v1941_v28 = vor.u32 %v1939_v12, %v1937_v61 }
 0x171   : > { %v1142_v1 = vpop.f32.mrf.mxu1 }
 0x172   : > { %v1626_v3 = vpop.f32.mrf.mxu3  ;;  %v1143_v48 = vadd.f32 %v1142_v1, %v938_v0  ;;  %v2621_v0 = vrot.slane %v2228_v14, 1  ;;  %v2235_v50 = vsel %vm1926_vm3, %v2230_v59, %v2234_v47  ;;  %v2446_v1 = vrot.slane %v4987_v36, 1 }
 0x173   : > { %2357 = vmatmul.bf16.vlgmr.msra.gmra.mxu2 %v2227_v37  ;;  %v2238_v36 = vor.u32 %v2236_v49, %v2234_v47 }
 0x174   : > { %v1368_v17 = vadd.f32 %v1324_v45, %v1143_v48  ;;  %v2623_v42 = vor.u32 %v2622_v25, %v2621_v0  ;;  %v2447_v51 = vsel %vm2442_vm4, %v2444_v2, %v2446_v1  ;;  %v1943_v48 = vshll.u32 %v3811_v10, 16 }
 0x175   : > { %v1781_v56 = vpop.f32.mrf.mxu0 }
 0x176   : > { %v1670_v32 = vadd.f32 %v1626_v3, %v1368_v17  ;;  %v1327_v33 = vpop.f32.mrf.mxu2  ;;  %v2624_v4 = vsel %vm2612_vm5, %v2620_v39, %v2623_v42  ;;  %v2626_v17 = vrot.slane %v2232_v30, 2  ;;  %v1945_v53 = vrot.slane %v1943_v48, 1  ;;  %v3812_v39 = vld [vmem:[#allocation2 + $0x28] sm:$0xff] }
 0x177   : > { %2527 = vmatmul.bf16.vlgmr.msra.gmra.mxu3 %v2445_v46 }
 0x178   : > { %v4985_v63 = vadd.f32 %v1781_v56, %v1670_v32  ;;  %v5003_v56 = vld [vmem:[#allocation2 + $0x30] sm:$0xff]  ;;  %v1946_v2 = vsel %vm1926_vm3, %v1941_v28, %v1945_v53 }
 0x179   : > { %v1145_v38 = vpop.f32.mrf.mxu1  ;;  %v2240_v0 = vshll.u32 %v5003_v56, 16 }
 0x17a   : > { %v1629_v6 = vpop.f32.mrf.mxu3  ;;  %v1146_v21 = vadd.f32 %v1145_v38, %v4959_v54 }
 0x17c   : > { %v1369_v52 = vadd.f32 %v1327_v33, %v1146_v21  ;;  %2068 = vmatmul.bf16.vlgmr.msra.gmra.mxu1 %v1938_v5 }
 0x17d   : > { %v1784_v13 = vpop.f32.mrf.mxu0 }
 0x17e   : > { %v1671_v20 = vadd.f32 %v1629_v6, %v1369_v52  ;;  %v1329_v40 = vpop.f32.mrf.mxu2  ;;  %v2242_v6 = vrot.slane %v2240_v0, 1 }
 0x180   : > { %2727 = vmatmul.bf16.vlgmr.msra.gmra.mxu0 %v2624_v4  ;;  %v4993_v43 = vadd.f32 %v1784_v13, %v1671_v20  ;;  %v2243_v52 = vsel %vm1926_vm3, %v2238_v36, %v2242_v6  ;;  %v2244_v13 = vshrl.u32 %v5003_v56, 16  ;;  %v1947_v4 = vshrl.u32 %v3811_v10, 16 }
 0x181   : > { %v1147_v54 = vpop.f32.mrf.mxu1 }
 0x182   : > { %v1631_v41 = vpop.f32.mrf.mxu3  ;;  %v1148_v45 = vadd.f32 %v1147_v54, %v4969_v31  ;;  %v2625_v31 = vrot.slane %v2236_v49, 1  ;;  %v2629_v54 = vrot.slane %v2244_v13, 1 }
 0x183   : > { %2362 = vmatmul.bf16.gmra.mxu2 %v2235_v50 }
 0x184   : > { %v1370_v3 = vadd.f32 %v1329_v40, %v1148_v45  ;;  %v2627_v24 = vor.u32 %v2626_v17, %v2625_v31  ;;  %v1951_v40 = vshll.u32 %v3812_v39, 16  ;;  %v1949_v45 = vor.u32 %v1947_v4, %v1945_v53 }
 0x185   : > { %v1786_v9 = vpop.f32.mrf.mxu0  ;;  %v2246_v17 = vor.u32 %v2244_v13, %v2242_v6 }
 0x186   : > { %v1672_v37 = vadd.f32 %v1631_v41, %v1370_v3  ;;  %v1332_v14 = vpop.f32.mrf.mxu2  ;;  %v2628_v44 = vsel %vm2612_vm5, %v2623_v42, %v2627_v24  ;;  %v2630_v41 = vrot.slane %v2240_v0, 2  ;;  %v1953_v49 = vrot.slane %v1951_v40, 1 }
 0x187   : > { %2532 = vmatmul.bf16.gmra.mxu3 %v2447_v51 }
 0x188   : > { %v5001_v15 = vadd.f32 %v1786_v9, %v1672_v37  ;;  %v2631_v12 = vor.u32 %v2630_v41, %v2629_v54 }
 0x189   : > { %v1150_v46 = vpop.f32.mrf.mxu1 }
 0x18a   : > { %v1634_v8 = vpop.f32.mrf.mxu3  ;;  %v1151_v32 = vadd.f32 %v1150_v46, %v4918_v23  ;;  %v2448_v23 = vrot.slane %v5003_v56, 1  ;;  %v2632_v28 = vsel %vm2612_vm5, %v2627_v24, %v2631_v12 }
 0x18c   : > { %v1371_v33 = vadd.f32 %v1332_v14, %v1151_v32  ;;  %2073 = vmatmul.bf16.gmra.mxu1 %v1946_v2  ;;  %v2449_v20 = vsel %vm2442_vm4, %v2446_v1, %v2448_v23  ;;  %v1954_v1 = vsel %vm1926_vm3, %v1949_v45, %v1953_v49 }
 0x18d   : > { %v1789_v55 = vpop.f32.mrf.mxu0 }
 0x18e   : > { %v1673_v25 = vadd.f32 %v1634_v8, %v1371_v33  ;;  %v1334_v61 = vpop.f32.mrf.mxu2 }
 0x190   : > { %2732 = vmatmul.bf16.gmra.mxu0 %v2628_v44  ;;  %v5009_v38 = vadd.f32 %v1789_v55, %v1673_v25  ;;  %v1955_v44 = vshrl.u32 %v3812_v39, 16 }
 0x191   : > { %v1152_v18 = vpop.f32.mrf.mxu1 }
 0x192   : > { %v1636_v21 = vpop.f32.mrf.mxu3  ;;  %v1153_v5 = vadd.f32 %v1152_v18, %v4926_v62  ;;  %v5018_v62 = vld [vmem:[#allocation2 + $0x38] sm:$0xff]  ;;  %v5031_v18 = vld [vmem:[#allocation2 + $0x40] sm:$0xff] }
 0x193   : > { %2367 = vmatmul.bf16.gmra.mxu2 %v2243_v52  ;;  %v2248_v37 = vshll.u32 %v5018_v62, 16  ;;  %v2450_v33 = vrot.slane %v5018_v62, 1  ;;  %v2252_v24 = vshrl.u32 %v5018_v62, 16  ;;  %v2256_v4 = vshll.u32 %v5031_v18, 16 }
 0x194   : > { %v1372_v30 = vadd.f32 %v1334_v61, %v1153_v5 }
 0x195   : > { %v1791_v42 = vpop.f32.mrf.mxu0  ;;  %v2250_v46 = vrot.slane %v2248_v37, 1  ;;  %v2451_v25 = vsel %vm2442_vm4, %v2448_v23, %v2450_v33  ;;  %v2633_v5 = vrot.slane %v2252_v24, 1  ;;  %v2634_v52 = vrot.slane %v2248_v37, 2 }
 0x196   : > { %v1674_v59 = vadd.f32 %v1636_v21, %v1372_v30  ;;  %v1337_v47 = vpop.f32.mrf.mxu2  ;;  %v1957_v21 = vor.u32 %v1955_v44, %v1953_v49  ;;  %v2258_v45 = vrot.slane %v2256_v4, 1 }
 0x197   : > { %2537 = vmatmul.bf16.gmra.mxu3 %v2449_v20  ;;  %v2251_v2 = vsel %vm1926_vm3, %v2246_v17, %v2250_v46 }
 0x198   : > { %v5016_v50 = vadd.f32 %v1791_v42, %v1674_v59  ;;  %v2635_v59 = vor.u32 %v2634_v52, %v2633_v5  ;;  %v5054_v52 = vld [vmem:[#allocation2 + $0x40] sm:$0xff] }
 0x199   : > { %v1155_v3 = vpop.f32.mrf.mxu1 }
 0x19a   : > { %v1639_v9 = vpop.f32.mrf.mxu3  ;;  %v1156_v51 = vadd.f32 %v1155_v3, %v4938_v11  ;;  %v3813_v11 = vld [vmem:[#allocation2 + $0x30] sm:$0xff]  ;;  %v2636_v54 = vsel %vm2612_vm5, %v2631_v12, %v2635_v59  ;;  %v2254_v3 = vor.u32 %v2252_v24, %v2250_v46 }
 0x19b   : > { %v1959_v61 = vshll.u32 %v3813_v11, 16 }
 0x19c   : > { %v1373_v10 = vadd.f32 %v1337_v47, %v1156_v51  ;;  %2078 = vmatmul.bf16.gmra.mxu1 %v1954_v1  ;;  %v3814_v51 = vld [vmem:[#allocation2 + $0x38] sm:$0xff] }
 0x19d   : > { %v1794_v48 = vpop.f32.mrf.mxu0  ;;  %v1961_v42 = vrot.slane %v1959_v61, 1 }
 0x19e   : > { %v1675_v14 = vadd.f32 %v1639_v9, %v1373_v10  ;;  %v1339_v31 = vpop.f32.mrf.mxu2  ;;  %v2259_v10 = vsel %vm1926_vm3, %v2254_v3, %v2258_v45 }
 0x19f   : > { %v1962_v23 = vsel %vm1926_vm3, %v1957_v21, %v1961_v42 }
 0x1a0   : > { %2737 = vmatmul.bf16.gmra.mxu0 %v2632_v28  ;;  %v5024_v56 = vadd.f32 %v1794_v48, %v1675_v14  ;;  %v2260_v48 = vshrl.u32 %v5031_v18, 16  ;;  %v1963_v28 = vshrl.u32 %v3813_v11, 16 }
 0x1a1   : > { %v1157_v8 = vpop.f32.mrf.mxu1 }
 0x1a2   : > { %v1641_v53 = vpop.f32.mrf.mxu3  ;;  %v1158_v32 = vadd.f32 %v1157_v8, %v4949_v29  ;;  %v2637_v8 = vrot.slane %v2260_v48, 1 }
 0x1a3   : > { %2372 = vmatmul.bf16.gmra.mxu2 %v2251_v2  ;;  %v1965_v2 = vor.u32 %v1963_v28, %v1961_v42 }
 0x1a4   : > { %v1374_v55 = vadd.f32 %v1339_v31, %v1158_v32  ;;  %v1967_v31 = vshll.u32 %v3814_v51, 16  ;;  %v5046_v32 = vld [vmem:[#allocation2 + $0x48] sm:$0xff] }
 0x1a5   : > { %v1796_v0 = vpop.f32.mrf.mxu0 }
 0x1a6   : > { %v1676_v36 = vadd.f32 %v1641_v53, %v1374_v55  ;;  %v1342_v6 = vpop.f32.mrf.mxu2  ;;  %v2638_v53 = vrot.slane %v2256_v4, 2  ;;  %v1969_v24 = vrot.slane %v1967_v31, 1 }
 0x1a7   : > { %2542 = vmatmul.bf16.gmra.mxu3 %v2451_v25 }
 0x1a8   : > { %v5033_v29 = vadd.f32 %v1796_v0, %v1676_v36  ;;  %v2639_v44 = vor.u32 %v2638_v53, %v2637_v8  ;;  %v1970_v11 = vsel %vm1926_vm3, %v1965_v2, %v1969_v24  ;;  %v5072_v2 = vld [vmem:[#allocation2 + $0x48] sm:$0xff] }
 0x1a9   : > { %v1160_v13 = vpop.f32.mrf.mxu1 }
 0x1aa   : > { %v1644_v30 = vpop.f32.mrf.mxu3  ;;  %v1161_v20 = vadd.f32 %v1160_v13, %v4955_v27  ;;  %v2452_v27 = vrot.slane %v5031_v18, 1  ;;  %v2640_v18 = vsel %vm2612_vm5, %v2635_v59, %v2639_v44 }
 0x1ac   : > { %v1375_v39 = vadd.f32 %v1342_v6, %v1161_v20  ;;  %2083 = vmatmul.bf16.gmra.mxu1 %v1962_v23  ;;  %v2453_v14 = vsel %vm2442_vm4, %v2450_v33, %v2452_v27  ;;  %v2264_v33 = vshll.u32 %v5046_v32, 16  ;;  %v2454_v20 = vrot.slane %v5046_v32, 1 }
 0x1ad   : > { %v1799_v40 = vpop.f32.mrf.mxu0 }
 0x1ae   : > { %v1677_v47 = vadd.f32 %v1644_v30, %v1375_v39  ;;  %v1344_v41 = vpop.f32.mrf.mxu2  ;;  %v2266_v5 = vrot.slane %v2264_v33, 1  ;;  %v2262_v30 = vor.u32 %v2260_v48, %v2258_v45  ;;  %v2268_v39 = vshrl.u32 %v5046_v32, 16 }
 0x1b0   : > { %2742 = vmatmul.bf16.gmra.mxu0 %v2636_v54  ;;  %v5039_v62 = vadd.f32 %v1799_v40, %v1677_v47  ;;  %v2267_v23 = vsel %vm1926_vm3, %v2262_v30, %v2266_v5  ;;  %v1975_v40 = vshll.u32 %v5054_v52, 16  ;;  %v2455_v54 = vsel %vm2442_vm4, %v2452_v27, %v2454_v20 }
 0x1b1   : > { %v1162_v9 = vpop.f32.mrf.mxu1 }
 0x1b2   : > { %v1646_v49 = vpop.f32.mrf.mxu3  ;;  %v1163_v1 = vadd.f32 %v1162_v9, %v4964_v60  ;;  %v2641_v9 = vrot.slane %v2268_v39, 1 }
 0x1b3   : > { %2377 = vmatmul.bf16.gmra.mxu2 %v2259_v10 }
 0x1b4   : > { %v1376_v37 = vadd.f32 %v1344_v41, %v1163_v1  ;;  %v1971_v41 = vshrl.u32 %v3814_v51, 16  ;;  %v5064_v1 = vld [vmem:[#allocation2 + $0x50] sm:$0xff] }
 0x1b5   : > { %v1801_v12 = vpop.f32.mrf.mxu0  ;;  %v2272_v31 = vshll.u32 %v5064_v1, 16 }
 0x1b6   : > { %v1678_v17 = vadd.f32 %v1646_v49, %v1376_v37  ;;  %v1347_v46 = vpop.f32.mrf.mxu2  ;;  %v2642_v49 = vrot.slane %v2264_v33, 2 }
 0x1b7   : > { %2547 = vmatmul.bf16.gmra.mxu3 %v2453_v14  ;;  %v2274_v32 = vrot.slane %v2272_v31, 1 }
 0x1b8   : > { %v5048_v60 = vadd.f32 %v1801_v12, %v1678_v17  ;;  %v1973_v12 = vor.u32 %v1971_v41, %v1969_v24  ;;  %v2643_v28 = vor.u32 %v2642_v49, %v2641_v9 }
 0x1b9   : > { %v1165_v55 = vpop.f32.mrf.mxu1 }
 0x1ba   : > { %v1649_v0 = vpop.f32.mrf.mxu3  ;;  %v1166_v25 = vadd.f32 %v1165_v55, %v4906_v35  ;;  %v2644_v8 = vsel %vm2612_vm5, %v2639_v44, %v2643_v28  ;;  %v1983_v44 = vshll.u32 %v5072_v2, 16 }
 0x1bc   : > { %v1377_v61 = vadd.f32 %v1347_v46, %v1166_v25  ;;  %2088 = vmatmul.bf16.gmra.mxu1 %v1970_v11  ;;  %v2456_v25 = vrot.slane %v5064_v1, 1 }
 0x1bd   : > { %v1804_v36 = vpop.f32.mrf.mxu0 }
 0x1be   : > { %v1679_v6 = vadd.f32 %v1649_v0, %v1377_v61  ;;  %v1349_v21 = vpop.f32.mrf.mxu2  ;;  %v2270_v0 = vor.u32 %v2268_v39, %v2266_v5  ;;  %v2276_v61 = vshrl.u32 %v5064_v1, 16 }
 0x1c0   : > { %2747 = vmatmul.bf16.gmra.mxu0 %v2640_v18  ;;  %v5056_v13 = vadd.f32 %v1804_v36, %v1679_v6  ;;  %v2275_v11 = vsel %vm1926_vm3, %v2270_v0, %v2274_v32  ;;  %v2457_v18 = vsel %vm2442_vm4, %v2454_v20, %v2456_v25  ;;  %v2645_v30 = vrot.slane %v2276_v61, 1 }
 0x1c1   : > { %v1167_v35 = vpop.f32.mrf.mxu1  ;;  %v2278_v1 = vor.u32 %v2276_v61, %v2274_v32 }
 0x1c2   : > { %v1651_v42 = vpop.f32.mrf.mxu3  ;;  %v1168_v4 = vadd.f32 %v1167_v35, %v4921_v57  ;;  %v1977_v57 = vrot.slane %v1975_v40, 1  ;;  %v2646_v35 = vrot.slane %v2272_v31, 2 }
 0x1c3   : > { %2382 = vmatmul.bf16.gmra.mxu2 %v2267_v23  ;;  %v5085_v23 = vld [vmem:[#allocation2 + $0x58] sm:$0xff] }
 0x1c4   : > { %v1378_v59 = vadd.f32 %v1349_v21, %v1168_v4  ;;  %v1978_v27 = vsel %vm1926_vm3, %v1973_v12, %v1977_v57  ;;  %v1985_v4 = vrot.slane %v1983_v44, 1  ;;  %v2458_v31 = vrot.slane %v5085_v23, 1  ;;  %v2591_v44 = vld [vmem:[#allocation2 + $0x60] sm:$0x3] }
 0x1c5   : > { %v1806_v47 = vpop.f32.mrf.mxu0 }
 0x1c6   : > { %v1680_v3 = vadd.f32 %v1651_v42, %v1378_v59  ;;  %v1352_v45 = vpop.f32.mrf.mxu2  ;;  %v1979_v42 = vshrl.u32 %v5054_v52, 16  ;;  %v2459_v32 = vsel %vm2442_vm4, %v2456_v25, %v2458_v31 }
 0x1c7   : > { %2552 = vmatmul.bf16.gmra.mxu3 %v2455_v54  ;;  %v2647_v54 = vor.u32 %v2646_v35, %v2645_v30 }
 0x1c8   : > { %v5066_v10 = vadd.f32 %v1806_v47, %v1680_v3  ;;  %v1981_v59 = vor.u32 %v1979_v42, %v1977_v57  ;;  %v2610_v42 = vunpack.c.l.b16 %v2591_v44 }
 0x1c9   : > { %v1170_v48 = vpop.f32.mrf.mxu1  ;;  %v2648_v52 = vsel %vm2612_vm5, %v2643_v28, %v2647_v54 }
 0x1ca   : > { %v1654_v37 = vpop.f32.mrf.mxu3  ;;  %v1171_v14 = vadd.f32 %v1170_v48, %v4930_v26  ;;  %v1986_v20 = vsel %vm1926_vm3, %v1981_v59, %v1985_v4  ;;  %v5091_v48 = vld [vmem:[#allocation2 + $0x50] sm:$0xff] }
 0x1cc   : > { %v1379_v51 = vadd.f32 %v1352_v45, %v1171_v14  ;;  %2093 = vmatmul.bf16.gmra.mxu1 %v1978_v27  ;;  %v2280_v45 = vshll.u32 %v5085_v23, 16 }
 0x1cd   : > { %v1809_v17 = vpop.f32.mrf.mxu0 }
 0x1ce   : > { %v1681_v46 = vadd.f32 %v1654_v37, %v1379_v51  ;;  %v1354_v53 = vpop.f32.mrf.mxu2  ;;  %v2150_v37 = vld [vmem:[#allocation2 + $0x60] sm:$0x1] }
 0x1cf   : > { %v2205_v28 = vunpack.c.l.b16 %v2150_v37 }
 0x1d0   : > { %2752 = vmatmul.bf16.gmra.mxu0 %v2644_v8  ;;  %v5074_v55 = vadd.f32 %v1809_v17, %v1681_v46  ;;  %v2284_v17 = vshrl.u32 %v5085_v23, 16  ;;  %v1991_v46 = vshll.u32 %v5091_v48, 16 }
 0x1d1   : > { %v1172_v26 = vpop.f32.mrf.mxu1 }
 0x1d2   : > { %v1656_v24 = vpop.f32.mrf.mxu3  ;;  %v1173_v33 = vadd.f32 %v1172_v26, %v4941_v16  ;;  %v1993_v61 = vrot.slane %v1991_v46, 1  ;;  %v1995_v46 = vshrl.u32 %v5091_v48, 16 }
 0x1d3   : > { %2387 = vmatmul.bf16.gmra.mxu2 %v2275_v11  ;;  %v2215_v11 = vpack.c.b16 %v2205_v28, %v2205_v28 }
 0x1d4   : > { %v1380_v36 = vadd.f32 %v1354_v53, %v1173_v33  ;;  %v2650_v33 = vrot.slane %v2280_v45, 2 }
 0x1d5   : > { %v1811_v6 = vpop.f32.mrf.mxu0  ;;  %v2288_v25 = vshll.u32 %v2215_v11, 16 }
 0x1d6   : > { %v1682_v21 = vadd.f32 %v1656_v24, %v1380_v36  ;;  %v1357_v5 = vpop.f32.mrf.mxu2  ;;  %v2649_v24 = vrot.slane %v2284_v17, 1 }
 0x1d7   : > { %2557 = vmatmul.bf16.gmra.mxu3 %v2457_v18 }
 0x1d8   : > { %v5083_v16 = vadd.f32 %v1811_v6, %v1682_v21  ;;  %v1860_v6 = vld [vmem:[#allocation2 + $0x58] sm:$0x1]  ;;  %v2651_v35 = vor.u32 %v2650_v33, %v2649_v24 }
 0x1d9   : > { %v1175_v39 = vpop.f32.mrf.mxu1 }
 0x1da   : > { %v1659_v40 = vpop.f32.mrf.mxu3  ;;  %v1176_v47 = vadd.f32 %v1175_v39, %v4953_v19  ;;  %v2282_v19 = vrot.slane %v2280_v45, 1  ;;  %v1915_v39 = vunpack.c.l.b16 %v1860_v6 }
 0x1dc   : > { %v1381_v41 = vadd.f32 %v1357_v5, %v1176_v47  ;;  %2098 = vmatmul.bf16.gmra.mxu1 %v1986_v20  ;;  %v2283_v51 = vsel %vm1926_vm3, %v2278_v1, %v2282_v19  ;;  %v2652_v47 = vsel %vm2612_vm5, %v2647_v54, %v2651_v35  ;;  %v1925_v45 = vpack.c.b16 %v1915_v39, %v1915_v39  ;;  %v2899_v39 = vpop.permute.xlu2 %2898 }
 0x1dd   : > { %v1814_v3 = vpop.f32.mrf.mxu0 }
 0x1de   : > { %v1683_v9 = vadd.f32 %v1659_v40, %v1381_v41  ;;  %v1359_v49 = vpop.f32.mrf.mxu2  ;;  %v2290_v41 = vrot.slane %v2288_v25, 1 }
 0x1e0   : > { %2757 = vmatmul.bf16.gmra.mxu0 %v2648_v52  ;;  %v5093_v57 = vadd.f32 %v1814_v3, %v1683_v9  ;;  %v2611_v3 = vpack.c.b16 %v2610_v42, %v2610_v42 }
 0x1e1   : > { %v1177_v12 = vpop.f32.mrf.mxu1 }
 0x1e2   : > { %v1661_v14 = vpop.f32.mrf.mxu3  ;;  %v1178_v27 = vadd.f32 %v1177_v12, %v4962_v7  ;;  %v1987_v7 = vshrl.u32 %v5072_v2, 16  ;;  %v2654_v12 = vshrl.u32 %v2611_v3, 16 }
 0x1e3   : > { %2392 = vmatmul.bf16.gmra.mxu2 %v2283_v51 }
 0x1e4   : > { %v1382_v8 = vadd.f32 %v1359_v49, %v1178_v27  ;;  %v1989_v5 = vor.u32 %v1987_v7, %v1985_v4  ;;  %v2460_v49 = vrot.slane %v2215_v11, 1  ;;  %v1999_v27 = vshll.u32 %v1925_v45, 16 }
 0x1e5   : > { %v1816_v53 = vpop.f32.mrf.mxu0 }
 0x1e6   : > { %v1684_v0 = vadd.f32 %v1661_v14, %v1382_v8  ;;  %v1362_v26 = vpop.f32.mrf.mxu2  ;;  %v1994_v23 = vsel %vm1926_vm3, %v1989_v5, %v1993_v61  ;;  %v2657_v14 = vshll.u32 %v2611_v3, 16  ;;  %v2461_v28 = vsel %vm2442_vm4, %v2458_v31, %v2460_v49 }
 0x1e7   : > { %2562 = vmatmul.bf16.gmra.mxu3 %v2459_v32  ;;  %v1997_v32 = vor.u32 %v1995_v46, %v1993_v61 }
 0x1e8   : > { %v5102_v36 = vadd.f32 %v1816_v53, %v1684_v0  ;;  %v2659_v53 = vrot.slane %v2657_v14, 2  ;;  %v2001_v0 = vrot.slane %v1999_v27, 1 }
 0x1e9   : > { %v1180_v18 = vpop.f32.mrf.mxu1 }
 0x1ea   : > { %v1664_v21 = vpop.f32.mrf.mxu3  ;;  %v1181_v30 = vadd.f32 %v1180_v18, %v4957_v22  ;;  %v2286_v22 = vor.u32 %v2284_v17, %v2282_v19  ;;  %v2656_v17 = vrot.slane %v2654_v12, 1  ;;  %v2002_v7 = vsel %vm1926_vm3, %v1997_v32, %v2001_v0  ;;  %v2914_v32 = vpop.permute.xlu2 %2913 }
 0x1ec   : > { %v1383_v40 = vadd.f32 %v1362_v26, %v1181_v30  ;;  %2103 = vmatmul.bf16.gmra.mxu1 %v1994_v23  ;;  %v2291_v37 = vsel %vm1926_vm3, %v2286_v22, %v2290_v41  ;;  %v2660_v11 = vor.u32 %v2659_v53, %v2656_v17 }
 0x1ed   : > { %v1819_v59 = vpop.f32.mrf.mxu0 }
 0x1ee   : > { %v1685_v2 = vadd.f32 %v1664_v21, %v1383_v40  ;;  %v1364_v20 = vpop.f32.mrf.mxu2  ;;  %v2661_v48 = vsel %vm2612_vm5, %v2651_v35, %v2660_v11  ;;  %v2904_v40 = vpop.permute.xlu0 %2903 }
 0x1f0   : > { %2762 = vmatmul.bf16.gmra.mxu0 %v2652_v47  ;;  %v5107_v4 = vadd.f32 %v1819_v59, %v1685_v2 }
 0x1f1   : > { %v1182_v9 = vpop.f32.mrf.mxu1 }
 0x1f2   : > { %v1666_v52 = vpop.f32.mrf.mxu3  ;;  %v1183_v1 = vadd.f32 %v1182_v9, %v4966_v34 }
 0x1f3   : > { %2397 = vmatmul.bf16.gmra.mxu2 %v2291_v37  ;;  %v2909_v37 = vpop.permute.xlu1 %2908 }
 0x1f4   : > { %v1384_v54 = vadd.f32 %v1364_v20, %v1183_v1 }
 0x1f5   : > { %v1821_v51 = vpop.f32.mrf.mxu0 }
 0x1f6   : > { %v1686_v8 = vadd.f32 %v1666_v52, %v1384_v54  ;;  %v2358_v19 = vpop.f32.mrf.mxu2 }
 0x1f7   : > { %2567 = vmatmul.bf16.gmra.mxu3 %v2461_v28 }
 0x1f8   : > { %v5113_v34 = vadd.f32 %v1821_v51, %v1686_v8 }
 0x1f9   : > { %v2069_v26 = vpop.f32.mrf.mxu1 }
 0x1fa   : > { %v2528_v24 = vpop.f32.mrf.mxu3  ;;  %v2114_v33 = vadd.f32 %v2069_v26, %v4978_v58 }
 0x1fc   : > { %v2403_v44 = vadd.f32 %v2358_v19, %v2114_v33  ;;  %2108 = vmatmul.bf16.gmra.mxu1 %v2002_v7 }
 0x1fd   : > { %v2728_v31 = vpop.f32.mrf.mxu0 }
 0x1fe   : > { %v2360_v6 = vpop.f32.mrf.mxu2  ;;  %v2573_v18 = vadd.f32 %v2528_v24, %v2403_v44 }
 0x200   : > { %2767 = vmatmul.bf16.gmra.mxu0 %v2661_v48  ;;  %v5119_v30 = vadd.f32 %v2728_v31, %v2573_v18 }
 0x201   : > { %v2071_v21 = vpop.f32.mrf.mxu1 }
 0x202   : > { %v2530_v61 = vpop.f32.mrf.mxu3  ;;  %v2115_v5 = vadd.f32 %v2071_v21, %v4985_v63  ;;  %v2986_v59 = vmul.f32 %v2899_v39, %v5119_v30  ;;  %v2919_v21 = vpop.permute.xlu0 %2918 }
 0x204   : > { %v2404_v25 = vadd.f32 %v2360_v6, %v2115_v5  ;;  %v3031_v63 = vmul.f32 %v2986_v59, %v5119_v30 }
 0x205   : > { %v2730_v42 = vpop.f32.mrf.mxu0 }
 0x206   : > { %v2574_v58 = vadd.f32 %v2530_v61, %v2404_v25  ;;  %v2363_v23 = vpop.f32.mrf.mxu2 }
 0x208   : > { %v5122_v2 = vadd.f32 %v2730_v42, %v2574_v58 }
 0x209   : > { %v2074_v35 = vpop.f32.mrf.mxu1 }
 0x20a   : > { %v2533_v47 = vpop.f32.mrf.mxu3  ;;  %v2987_v20 = vmul.f32 %v2904_v40, %v5122_v2  ;;  %v2116_v41 = vadd.f32 %v2074_v35, %v4993_v43 }
 0x20c   : > { %v3005_v3 = vadd.f32 %v2987_v20, %v2986_v59  ;;  %v3032_v45 = vmul.f32 %v2987_v20, %v5122_v2  ;;  %v2405_v22 = vadd.f32 %v2363_v23, %v2116_v41  ;;  %v2924_v20 = vpop.permute.xlu1 %2923 }
 0x20d   : > { %v2733_v9 = vpop.f32.mrf.mxu0 }
 0x20e   : > { %v3049_v52 = vadd.f32 %v3032_v45, %v3031_v63  ;;  %v2575_v49 = vadd.f32 %v2533_v47, %v2405_v22  ;;  %v2365_v1 = vpop.f32.mrf.mxu2  ;;  %v2791_v45 = vlaneseq }
 0x210   : > { %v5128_v12 = vadd.f32 %v2733_v9, %v2575_v49 }
 0x211   : > { %v2076_v14 = vpop.f32.mrf.mxu1 }
 0x212   : > { %v2535_v27 = vpop.f32.mrf.mxu3  ;;  %v2988_v54 = vmul.f32 %v2909_v37, %v5128_v12  ;;  %v2117_v51 = vadd.f32 %v2076_v14, %v5001_v15  ;;  %v2792_v37 = vand.u32 127, %v2791_v45 }
 0x214   : > { %v3006_v43 = vadd.f32 %v3005_v3, %v2988_v54  ;;  %v3033_v28 = vmul.f32 %v2988_v54, %v5128_v12  ;;  %v2406_v46 = vadd.f32 %v2365_v1, %v2117_v51  ;;  %v2929_v51 = vpop.permute.xlu2 %2928  ;;  %vm2793_vm6 = vcmp.ge.s32.totalorder %v2792_v37, 8 }
 0x215   : > { %v2735_v8 = vpop.f32.mrf.mxu0  ;;  %vm2794_vm7 = vcmp.lt.s32.totalorder %v2792_v37, 12  ;;  %v5229_v37 = vld [vmem:[%s5165_s23 + $0x44] sm:$0xf] }
 0x216   : > { %v3050_v19 = vadd.f32 %v3049_v52, %v3033_v28  ;;  %v2576_v17 = vadd.f32 %v2535_v27, %v2406_v46  ;;  %v2368_v53 = vpop.f32.mrf.mxu2  ;;  %vm2795_vm8 = vmand %vm2793_vm6, %vm2794_vm7 }
 0x217   : > { %vm5172_vm9 = vmpackc.low %vm2795_vm8, %vm2795_vm8 }
 0x218   : > { %v5133_v0 = vadd.f32 %v2735_v8, %v2576_v17 }
 0x219   : > { %v2079_v26 = vpop.f32.mrf.mxu1 }
 0x21a   : > { %v2538_v24 = vpop.f32.mrf.mxu3  ;;  %v2989_v33 = vmul.f32 %v2914_v32, %v5133_v0  ;;  %v2118_v11 = vadd.f32 %v2079_v26, %v5009_v38 }
 0x21c   : > { %v3007_v7 = vadd.f32 %v3006_v43, %v2989_v33  ;;  %v3034_v15 = vmul.f32 %v2989_v33, %v5133_v0  ;;  %v2407_v44 = vadd.f32 %v2368_v53, %v2118_v11  ;;  %v2818_v33 = vpack.c.bf16 %v5119_v30, %v5119_v30  ;;  %v2803_v30 = vld [vmem:[%s5165_s23 + $0xc] sm:$0xf] }
 0x21d   : > { %v2738_v31 = vpop.f32.mrf.mxu0  ;;  %v2819_v11 = vpack.c.bf16 %v5122_v2, %v5122_v2  ;;  %v2805_v2 = vld [vmem:[%s5165_s23 + $0x14] sm:$0xf] }
 0x21e   : > { %v3051_v48 = vadd.f32 %v3050_v19, %v3034_v15  ;;  %v2577_v6 = vadd.f32 %v2538_v24, %v2407_v44  ;;  %v2370_v18 = vpop.f32.mrf.mxu2  ;;  %v2800_v15 = vld [vmem:[%s5165_s23] sm:$0xf] }
 0x220   : > { %v5138_v61 = vadd.f32 %v2738_v31, %v2577_v6  ;;  %v2801_v31 = vld [vmem:[%s5165_s23 + $0x4] sm:$0xf]  ;;  %v2802_v6 = vld [vmem:[%s5165_s23 + $0x8] sm:$0xf] }
 0x221   : > { %v2081_v5 = vpop.f32.mrf.mxu1 }
 0x222   : > { %v2540_v25 = vpop.f32.mrf.mxu3  ;;  %v2990_v42 = vmul.f32 %v2919_v21, %v5138_v61  ;;  %v2119_v58 = vadd.f32 %v2081_v5, %v5016_v50  ;;  %v2804_v21 = vld [vmem:[%s5165_s23 + $0x10] sm:$0xf] }
 0x224   : > { %v3008_v23 = vadd.f32 %v3007_v7, %v2990_v42  ;;  %v3035_v38 = vmul.f32 %v2990_v42, %v5138_v61  ;;  %v2408_v39 = vadd.f32 %v2370_v18, %v2119_v58  ;;  %v2934_v7 = vpop.permute.xlu0 %2933  ;;  %v2820_v18 = vpack.c.bf16 %v5128_v12, %v5128_v12  ;;  %v2806_v58 = vld [vmem:[%s5165_s23 + $0x18] sm:$0xf]  ;;  %v2808_v12 = vld [vmem:[%s5165_s23 + $0x20] sm:$0xf] }
 0x225   : > { %v2740_v40 = vpop.f32.mrf.mxu0  ;;  %v2821_v42 = vpack.c.bf16 %v5133_v0, %v5133_v0  ;;  %v2822_v0 = vpack.c.bf16 %v5138_v61, %v5138_v61  ;;  %v5216_v61 = vld [vmem:[%s5165_s23 + $0x38] sm:$0xf] }
 0x226   : > { %v3052_v59 = vadd.f32 %v3051_v48, %v3035_v38  ;;  %v2578_v35 = vadd.f32 %v2540_v25, %v2408_v39  ;;  %v2373_v47 = vpop.f32.mrf.mxu2 }
 0x228   : > { %v5143_v41 = vadd.f32 %v2740_v40, %v2578_v35  ;;  %v2839_v40 = vsel %vm5172_vm9, %v2818_v33, %v2800_v15  ;;  %v2809_v35 = vld [vmem:[%s5165_s23 + $0x24] sm:$0xf] }
 0x229   : > { %v2084_v63 = vpop.f32.mrf.mxu1 }
 0x22a   : > { %v2543_v3 = vpop.f32.mrf.mxu3  ;;  %v2991_v22 = vmul.f32 %v2924_v20, %v5143_v41  ;;  %v2120_v9 = vadd.f32 %v2084_v63, %v5024_v56  ;;  %v2823_v20 = vpack.c.bf16 %v5143_v41, %v5143_v41 }
 0x22c   : > { %v3009_v50 = vadd.f32 %v3008_v23, %v2991_v22  ;;  %v3036_v52 = vmul.f32 %v2991_v22, %v5143_v41  ;;  %v2409_v49 = vadd.f32 %v2373_v47, %v2120_v9  ;;  %v2807_v23 = vld [vmem:[%s5165_s23 + $0x1c] sm:$0xf]  ;;  %v5202_v47 = vld [vmem:[%s5165_s23 + $0x28] sm:$0xf]  ;;  %v5210_v9 = vld [vmem:[%s5165_s23 + $0x30] sm:$0xf] }
 0x22d   : > { %v2743_v1 = vpop.f32.mrf.mxu0  ;;  %v5223_v41 = vld [vmem:[%s5165_s23 + $0x3c] sm:$0xf] }
 0x22e   : > { %v3053_v14 = vadd.f32 %v3052_v59, %v3036_v52  ;;  %v2579_v27 = vadd.f32 %v2543_v3, %v2409_v49  ;;  %v2375_v54 = vpop.f32.mrf.mxu2  ;;  %v2840_v59 = vsel %vm5172_vm9, %v2819_v11, %v2801_v31  ;;  %v2841_v52 = vsel %vm5172_vm9, %v2820_v18, %v2802_v6 }
 0x230   : > { %v5152_v43 = vadd.f32 %v2743_v1, %v2579_v27  ;;  %v5226_v1 = vld [vmem:[%s5165_s23 + $0x40] sm:$0xf] }
 0x231   : > { %v2086_v28 = vpop.f32.mrf.mxu1 }
 0x232   : > { %v2545_v56 = vpop.f32.mrf.mxu3  ;;  %v2992_v46 = vmul.f32 %v2929_v51, %v5152_v43  ;;  %v2121_v8 = vadd.f32 %v2086_v28, %v5033_v29  ;;  %v2824_v49 = vpack.c.bf16 %v5152_v43, %v5152_v43 }
 0x234   : > { %v3010_v19 = vadd.f32 %v3009_v50, %v2992_v46  ;;  %v3037_v17 = vmul.f32 %v2992_v46, %v5152_v43  ;;  %v2410_v53 = vadd.f32 %v2375_v54, %v2121_v8  ;;  %v5213_v50 = vld [vmem:[%s5165_s23 + $0x34] sm:$0xf]  ;;  %v2843_v43 = vsel %vm5172_vm9, %v2822_v0, %v2804_v21 }
 0x235   : > { %v2745_v32 = vpop.f32.mrf.mxu0  ;;  %v2844_v46 = vsel %vm5172_vm9, %v2823_v20, %v2805_v2  ;;  %v2949_v20 = vpop.permute.xlu0 %2948 }
 0x236   : > { %v3054_v29 = vadd.f32 %v3053_v14, %v3037_v17  ;;  %v2580_v26 = vadd.f32 %v2545_v56, %v2410_v53  ;;  %v2378_v24 = vpop.f32.mrf.mxu2  ;;  %v2842_v14 = vsel %vm5172_vm9, %v2821_v42, %v2803_v30  ;;  %v2939_v56 = vpop.permute.xlu1 %2938 }
 0x237   : > { %v2944_v30 = vpop.permute.xlu2 %2943 }
 0x238   : > { %v2780_v48 = vadd.f32 %v2745_v32, %v2580_v26 }
 0x239   : > { %v2089_v5 = vpop.f32.mrf.mxu1 }
 0x23a   : > { %v2548_v25 = vpop.f32.mrf.mxu3  ;;  %v2993_v38 = vmul.f32 %v2934_v7, %v2780_v48  ;;  %v2122_v39 = vadd.f32 %v2089_v5, %v5039_v62  ;;  %v5205_v62 = vld [vmem:[%s5165_s23 + $0x2c] sm:$0xf]  ;;  %v2825_v27 = vpack.c.bf16 %v2780_v48, %v2780_v48 }
 0x23b   : > { %2859 = vst [vmem:[%s5194_s14] sm:$0xf] %v2839_v40 }
 0x23c   : > { %v3011_v63 = vadd.f32 %v3010_v19, %v2993_v38  ;;  %v3038_v3 = vmul.f32 %v2993_v38, %v2780_v48  ;;  %v2411_v45 = vadd.f32 %v2378_v24, %v2122_v39  ;;  %2860 = vst [vmem:[%s5194_s14 + $0x4] sm:$0xf] %v2840_v59  ;;  %v2845_v19 = vsel %vm5172_vm9, %v2824_v49, %v2806_v58 }
 0x23d   : > { %v2748_v22 = vpop.f32.mrf.mxu0  ;;  %2861 = vst [vmem:[%s5194_s14 + $0x8] sm:$0xf] %v2841_v52  ;;  %v2846_v32 = vsel %vm5172_vm9, %v2825_v27, %v2807_v23 }
 0x23e   : > { %v3055_v54 = vadd.f32 %v3054_v29, %v3038_v3  ;;  %v2581_v51 = vadd.f32 %v2548_v25, %v2411_v45  ;;  %v2380_v28 = vpop.f32.mrf.mxu2  ;;  %2862 = vst [vmem:[%s5194_s14 + $0xc] sm:$0xf] %v2842_v14 }
 0x23f   : > { %2863 = vst [vmem:[%s5194_s14 + $0x10] sm:$0xf] %v2843_v43 }
 0x240   : > { %v2781_v8 = vadd.f32 %v2748_v22, %v2581_v51  ;;  %2864 = vst [vmem:[%s5194_s14 + $0x14] sm:$0xf] %v2844_v46 }
 0x241   : > { %v2091_v17 = vpop.f32.mrf.mxu1  ;;  %2865 = vst [vmem:[%s5194_s14 + $0x18] sm:$0xf] %v2845_v19 }
 0x242   : > { %v2550_v53 = vpop.f32.mrf.mxu3  ;;  %v2826_v29 = vpack.c.bf16 %v2781_v8, %v2781_v8  ;;  %v2994_v26 = vmul.f32 %v2939_v56, %v2781_v8  ;;  %v2123_v24 = vadd.f32 %v2091_v17, %v5048_v60  ;;  %2866 = vst [vmem:[%s5194_s14 + $0x1c] sm:$0xf] %v2846_v32  ;;  %v2954_v56 = vpop.permute.xlu1 %2953 }
 0x244   : > { %v2847_v33 = vsel %vm5172_vm9, %v2826_v29, %v2808_v12  ;;  %v3012_v11 = vadd.f32 %v3011_v63, %v2994_v26  ;;  %v3039_v7 = vmul.f32 %v2994_v26, %v2781_v8  ;;  %v2412_v15 = vadd.f32 %v2380_v28, %v2123_v24 }
 0x245   : > { %v2750_v31 = vpop.f32.mrf.mxu0  ;;  %2867 = vst [vmem:[%s5194_s14 + $0x20] sm:$0xf] %v2847_v33 }
 0x246   : > { %v3056_v48 = vadd.f32 %v3055_v54, %v3039_v7  ;;  %v2582_v6 = vadd.f32 %v2550_v53, %v2412_v15  ;;  %v2383_v18 = vpop.f32.mrf.mxu2  ;;  %v2959_v15 = vpop.permute.xlu2 %2958 }
 0x248   : > { %v2782_v21 = vadd.f32 %v2750_v31, %v2582_v6 }
 0x249   : > { %v2094_v2 = vpop.f32.mrf.mxu1 }
 0x24a   : > { %v2553_v60 = vpop.f32.mrf.mxu3  ;;  %v2827_v5 = vpack.c.bf16 %v2782_v21, %v2782_v21  ;;  %v2995_v25 = vmul.f32 %v2944_v30, %v2782_v21  ;;  %v2124_v42 = vadd.f32 %v2094_v2, %v5056_v13 }
 0x24c   : > { %v2848_v58 = vsel %vm5172_vm9, %v2827_v5, %v2809_v35  ;;  %v3013_v23 = vadd.f32 %v3012_v11, %v2995_v25  ;;  %v3040_v38 = vmul.f32 %v2995_v25, %v2782_v21  ;;  %v2413_v39 = vadd.f32 %v2383_v18, %v2124_v42 }
 0x24d   : > { %v2753_v12 = vpop.f32.mrf.mxu0  ;;  %2868 = vst [vmem:[%s5194_s14 + $0x24] sm:$0xf] %v2848_v58 }
 0x24e   : > { %v3057_v40 = vadd.f32 %v3056_v48, %v3040_v38  ;;  %v2583_v59 = vadd.f32 %v2553_v60, %v2413_v39  ;;  %v2385_v0 = vpop.f32.mrf.mxu2 }
 0x250   : > { %v2783_v63 = vadd.f32 %v2753_v12, %v2583_v59 }
 0x251   : > { %v2096_v3 = vpop.f32.mrf.mxu1 }
 0x252   : > { %v2555_v45 = vpop.f32.mrf.mxu3  ;;  %v2828_v22 = vpack.c.bf16 %v2783_v63, %v2783_v63  ;;  %v2996_v52 = vmul.f32 %v2949_v20, %v2783_v63  ;;  %v2125_v13 = vadd.f32 %v2096_v3, %v5066_v10 }
 0x254   : > { %v2849_v35 = vsel %vm5172_vm9, %v2828_v22, %v5202_v47  ;;  %v3014_v49 = vadd.f32 %v3013_v23, %v2996_v52  ;;  %v3041_v14 = vmul.f32 %v2996_v52, %v2783_v63  ;;  %v2414_v27 = vadd.f32 %v2385_v0, %v2125_v13  ;;  %v2964_v23 = vpop.permute.xlu0 %2963  ;;  %v2969_v13 = vpop.permute.xlu1 %2968 }
 0x255   : > { %v2755_v54 = vpop.f32.mrf.mxu0  ;;  %2869 = vst [vmem:[%s5194_s14 + $0x28] sm:$0xf] %v2849_v35 }
 0x256   : > { %v3058_v51 = vadd.f32 %v3057_v40, %v3041_v14  ;;  %v2584_v28 = vadd.f32 %v2555_v45, %v2414_v27  ;;  %v2388_v43 = vpop.f32.mrf.mxu2 }
 0x258   : > { %v2784_v46 = vadd.f32 %v2755_v54, %v2584_v28 }
 0x259   : > { %v2099_v8 = vpop.f32.mrf.mxu1 }
 0x25a   : > { %v2558_v19 = vpop.f32.mrf.mxu3  ;;  %v2829_v17 = vpack.c.bf16 %v2784_v46, %v2784_v46  ;;  %v2997_v53 = vmul.f32 %v2954_v56, %v2784_v46  ;;  %v2126_v10 = vadd.f32 %v2099_v8, %v5074_v55 }
 0x25c   : > { %v2850_v47 = vsel %vm5172_vm9, %v2829_v17, %v5205_v62  ;;  %v3015_v32 = vadd.f32 %v3014_v49, %v2997_v53  ;;  %v3042_v29 = vmul.f32 %v2997_v53, %v2784_v46  ;;  %v2415_v26 = vadd.f32 %v2388_v43, %v2126_v10 }
 0x25d   : > { %v2758_v24 = vpop.f32.mrf.mxu0  ;;  %2870 = vst [vmem:[%s5194_s14 + $0x2c] sm:$0xf] %v2850_v47 }
 0x25e   : > { %v3059_v33 = vadd.f32 %v3058_v51, %v3042_v29  ;;  %v2585_v11 = vadd.f32 %v2558_v19, %v2415_v26  ;;  %v2390_v7 = vpop.f32.mrf.mxu2  ;;  %v2974_v19 = vpop.permute.xlu2 %2973 }
 0x260   : > { %v2785_v31 = vadd.f32 %v2758_v24, %v2585_v11 }
 0x261   : > { %v2101_v48 = vpop.f32.mrf.mxu1 }
 0x262   : > { %v2560_v6 = vpop.f32.mrf.mxu3  ;;  %v2830_v18 = vpack.c.bf16 %v2785_v31, %v2785_v31  ;;  %v2998_v30 = vmul.f32 %v2959_v15, %v2785_v31  ;;  %v2127_v55 = vadd.f32 %v2101_v48, %v5083_v16  ;;  %v2979_v48 = vpop.permute.xlu0 %2978 }
 0x264   : > { %v2851_v62 = vsel %vm5172_vm9, %v2830_v18, %v5210_v9  ;;  %v3016_v21 = vadd.f32 %v3015_v32, %v2998_v30  ;;  %v3043_v2 = vmul.f32 %v2998_v30, %v2785_v31  ;;  %v2416_v60 = vadd.f32 %v2390_v7, %v2127_v55 }
 0x265   : > { %v2760_v5 = vpop.f32.mrf.mxu0  ;;  %2871 = vst [vmem:[%s5194_s14 + $0x30] sm:$0xf] %v2851_v62 }
 0x266   : > { %v3060_v25 = vadd.f32 %v3059_v33, %v3043_v2  ;;  %v2586_v42 = vadd.f32 %v2560_v6, %v2416_v60  ;;  %v2393_v58 = vpop.f32.mrf.mxu2 }
 0x268   : > { %v2786_v38 = vadd.f32 %v2760_v5, %v2586_v42 }
 0x269   : > { %v2104_v39 = vpop.f32.mrf.mxu1 }
 0x26a   : > { %v2563_v12 = vpop.f32.mrf.mxu3  ;;  %v2831_v40 = vpack.c.bf16 %v2786_v38, %v2786_v38  ;;  %v2999_v59 = vmul.f32 %v2964_v23, %v2786_v38  ;;  %v2128_v16 = vadd.f32 %v2104_v39, %v5093_v57  ;;  %v2984_v23 = vpop.permute.xlu1 %2983 }
 0x26c   : > { %v2852_v9 = vsel %vm5172_vm9, %v2831_v40, %v5213_v50  ;;  %v3017_v0 = vadd.f32 %v3016_v21, %v2999_v59  ;;  %v3044_v20 = vmul.f32 %v2999_v59, %v2786_v38  ;;  %v2417_v63 = vadd.f32 %v2393_v58, %v2128_v16 }
 0x26d   : > { %v2763_v3 = vpop.f32.mrf.mxu0  ;;  %2872 = vst [vmem:[%s5194_s14 + $0x34] sm:$0xf] %v2852_v9 }
 0x26e   : > { %v3061_v45 = vadd.f32 %v3060_v25, %v3044_v20  ;;  %v2587_v22 = vadd.f32 %v2563_v12, %v2417_v63  ;;  %v2395_v52 = vpop.f32.mrf.mxu2 }
 0x270   : > { %v2787_v35 = vadd.f32 %v2763_v3, %v2587_v22 }
 0x271   : > { %v2106_v49 = vpop.f32.mrf.mxu1 }
 0x272   : > { %v2565_v14 = vpop.f32.mrf.mxu3  ;;  %v2832_v27 = vpack.c.bf16 %v2787_v35, %v2787_v35  ;;  %v3000_v54 = vmul.f32 %v2969_v13, %v2787_v35  ;;  %v2129_v57 = vadd.f32 %v2106_v49, %v5102_v36 }
 0x274   : > { %v2853_v50 = vsel %vm5172_vm9, %v2832_v27, %v5216_v61  ;;  %v3018_v51 = vadd.f32 %v3017_v0, %v3000_v54  ;;  %v3045_v28 = vmul.f32 %v3000_v54, %v2787_v35  ;;  %v2418_v43 = vadd.f32 %v2395_v52, %v2129_v57  ;;  %v3004_v52 = vld [vmem:[%s4312_s17] sm:$0x1] }
 0x275   : > { %v2765_v56 = vpop.f32.mrf.mxu0  ;;  %2873 = vst [vmem:[%s5194_s14 + $0x38] sm:$0xf] %v2853_v50 }
 0x276   : > { %v3062_v46 = vadd.f32 %v3061_v45, %v3045_v28  ;;  %v2588_v8 = vadd.f32 %v2565_v14, %v2418_v43  ;;  %v2398_v53 = vpop.f32.mrf.mxu2 }
 0x278   : > { %v2788_v17 = vadd.f32 %v2765_v56, %v2588_v8 }
 0x279   : > { %v2109_v10 = vpop.f32.mrf.mxu1 }
 0x27a   : > { %v2833_v47 = vpack.c.bf16 %v2788_v17, %v2788_v17  ;;  %v3001_v32 = vmul.f32 %v2974_v19, %v2788_v17  ;;  %v2130_v36 = vadd.f32 %v2109_v10, %v5107_v4  ;;  %v2568_v29 = vpop.f32.mrf.mxu3 }
 0x27c   : > { %v2854_v61 = vsel %vm5172_vm9, %v2833_v47, %v5223_v41  ;;  %v3019_v26 = vadd.f32 %v3018_v51, %v3001_v32  ;;  %v3046_v24 = vmul.f32 %v3001_v32, %v2788_v17  ;;  %v2419_v33 = vadd.f32 %v2398_v53, %v2130_v36 }
 0x27d   : > { %v2768_v11 = vpop.f32.mrf.mxu0  ;;  %2874 = vst [vmem:[%s5194_s14 + $0x3c] sm:$0xf] %v2854_v61 }
 0x27e   : > { %v3063_v7 = vadd.f32 %v3062_v46, %v3046_v24  ;;  %v2589_v15 = vadd.f32 %v2568_v29, %v2419_v33  ;;  %v2400_v55 = vpop.f32.mrf.mxu2 }
 0x280   : > { %v2789_v31 = vadd.f32 %v2768_v11, %v2589_v15 }
 0x281   : > { %v2111_v6 = vpop.f32.mrf.mxu1 }
 0x282   : > { %v2834_v18 = vpack.c.bf16 %v2789_v31, %v2789_v31  ;;  %v3002_v30 = vmul.f32 %v2979_v48, %v2789_v31  ;;  %v2131_v4 = vadd.f32 %v2111_v6, %v5113_v34  ;;  %v2570_v60 = vpop.f32.mrf.mxu3 }
 0x284   : > { %v2855_v41 = vsel %vm5172_vm9, %v2834_v18, %v5226_v1  ;;  %v3020_v62 = vadd.f32 %v3019_v26, %v3002_v30  ;;  %v3047_v21 = vmul.f32 %v3002_v30, %v2789_v31  ;;  %v2420_v2 = vadd.f32 %v2400_v55, %v2131_v4 }
 0x285   : > { %2875 = vst [vmem:[%s5194_s14 + $0x40] sm:$0xf] %v2855_v41  ;;  %v2770_v42 = vpop.f32.mrf.mxu0 }
 0x286   : > { %v3064_v5 = vadd.f32 %v3063_v7, %v3047_v21  ;;  %v2590_v25 = vadd.f32 %v2570_v60, %v2420_v2 }
 0x288   : > { %v2790_v58 = vadd.f32 %v2770_v42, %v2590_v25 }
 0x28a   : > { %v2835_v38 = vpack.c.bf16 %v2790_v58, %v2790_v58  ;;  %v3003_v39 = vmul.f32 %v2984_v23, %v2790_v58 }
 0x28c   : > { %v2856_v34 = vsel %vm5172_vm9, %v2835_v38, %v5229_v37  ;;  %v3021_v12 = vadd.f32 %v3020_v62, %v3003_v39  ;;  %v3048_v1 = vmul.f32 %v3003_v39, %v2790_v58  ;;  %v3030_v37 = vld [vmem:[%s4317_s20] sm:$0x1] }
 0x28d   : > { %2876 = vst [vmem:[%s5194_s14 + $0x44] sm:$0xf] %v2856_v34 }
 0x28e   : > { %v3022_v40 = vrot.slane %v3021_v12, 4  ;;  %v3065_v59 = vadd.f32 %v3064_v5, %v3048_v1 }
 0x290   : > { %v3023_v16 = vadd.f32 %v3022_v40, %v3021_v12  ;;  %v3066_v9 = vrot.slane %v3065_v59, 4 }
 0x292   : > { %v3024_v0 = vrot.slane %v3023_v16, 2  ;;  %v3067_v20 = vadd.f32 %v3066_v9, %v3065_v59 }
 0x294   : > { %v3025_v63 = vadd.f32 %v3024_v0, %v3023_v16  ;;  %v3068_v3 = vrot.slane %v3067_v20, 2 }
 0x296   : > { %v3026_v45 = vrot.slane %v3025_v63, 1  ;;  %v3069_v22 = vadd.f32 %v3068_v3, %v3067_v20 }
 0x298   : > { %v3027_v13 = vadd.f32 %v3026_v45, %v3025_v63  ;;  %v3070_v44 = vrot.slane %v3069_v22, 1 }
 0x29a   : > { %v3028_v35 = vadd.f32 %v3027_v13, %v3004_v52  ;;  %v3071_v49 = vadd.f32 %v3070_v44, %v3069_v22 }
 0x29c   : > { %3029 = vst [vmem:[%s4312_s17] sm:$0x1] %v3028_v35  ;;  %v3072_v14 = vadd.f32 %v3071_v49, %v3030_v37 }
 0x29e   : > { %3073 = vst [vmem:[%s4317_s20] sm:$0x1] %v3072_v14 }
 0x29f PF: > { %s19_s9 = sadd.s32 1, %s4224_s9   ;;  %s5327_s27 = smov %s4216_s29 }
 0x2a0   : > { %p16_p7 = scmp.ge.s32.totalorder %s19_s9, 6   ;;  %s5328_s28 = smov %s4220_s30 }
 0x2a1   : > { %s5329_s29 = smov %s5332_s10  ;;  %s5330_s30 = smov %s5336_s11 }
 0x2a2   :  { %18 = sbr.rel (!%p16_p7) target bundleno = 3 (0x3), region = 118 }

// kernel: dense_block_forward.9
= control target key start
LH: loop header
LB: loop body
LE: loop exit
PB: predicated region body
PF: predicated region fallthrough
CT: control target
= control target key end

     0   :  { %s4274_s27 = smov 0   ;;  %s4276_s28 = smov 0   ;;  %s5315_s0 = inlined_call_operand.vmem [shape: bf16[2,352,128], index: 0, kind: input, shape index: {}]   ;;  %s5316_s1 = inlined_call_operand.vmem [shape: f32[352,1], index: 1, kind: input, shape index: {}]   ;;  %s5317_s2 = inlined_call_operand.vmem [shape: f32[1,128], index: 2, kind: input, shape index: {}]   ;;  %s5318_s3 = inlined_call_operand.vmem [shape: f32[1,128], index: 3, kind: input, shape index: {}]   ;;  %s5319_s4 = inlined_call_operand.vmem [shape: bf16[9,128,128], index: 4, kind: input, shape index: {}]   ;;  %s5320_s5 = inlined_call_operand.vmem [shape: bf16[2,352,128], index: 5, kind: input, shape index: {}, may-alias: {5,6}]   ;;  %s5321_s6 = inlined_call_operand.vmem [shape: bf16[2,352,128], index: 6, kind: output, shape index: {0}, may-alias: {5,6}]   ;;  %s5322_s7 = inlined_call_operand.vmem [shape: f32[2,1,128], index: 7, kind: output, shape index: {1}]   ;;  %s5323_s8 = inlined_call_operand.vmem [shape: f32[2,1,128], index: 8, kind: output, shape index: {2}]  }
   0x1   :  { %s4278_s29 = smov 0   ;;  %s4280_s30 = smov 0  }
   0x2   :  { %s4282_s9 = smov 0  }
   0x3 LB: > { %s28_s10 = sadd.s32 1, %s4216_s29  ;;  %s31_s11 = sadd.s32 1, %s4220_s30  ;;  %s4224_s9 = sphi %s4282_s9, %s19_s9   ;;  %s4220_s30 = sphi %s4280_s30, %s5330_s30   ;;  %s4216_s29 = sphi %s4278_s29, %s5329_s29   ;;  %s4212_s28 = sphi %s4276_s28, %s5328_s28   ;;  %s4208_s27 = sphi %s4274_s27, %s5327_s27  }
   0x4   : > { %p29_p0 = scmp.ge.s32.totalorder %s28_s10, 2  ;;  %p3217_p1 = scmp.ge.s32.totalorder %s4224_s9, 1 }
   0x5   : > { %p289_p2 = scmp.lt.s32.totalorder %s4224_s9, 5 }
   0x6   : > { %s5332_s10 = smov (%p29_p0, %s28_s10), 0  ;;  %s5334_s11 = smov (!%p29_p0, %s31_s11), %s4220_s30 }
   0x7   : > { %p290_p3 = pnand %p3217_p1, %p289_p2  ;;  %p33_p4 = scmp.ge.s32.totalorder %s5334_s11, 2 }
   0x8   : > { %p334_p5 = scmp.lt.s32.totalorder (!%p290_p3), %s4212_s28, 1  ;;  %s4304_s12 = smul.u32 (!%p290_p3), 144, %s4208_s27 }
   0x9   : > { %s5336_s11 = smov (%p33_p4, %s5334_s11), 0  ;;  %293 = sbr.rel (%p290_p3) target bundleno = 671 (0x29f), region = 44 }
   0xa   : > { %p3221_p6 = scmp.ne.s32.totalorder (!%p290_p3), %s4208_s27, 0 }
   0xe   : > { %s5338_s28 = smov (!%p334_p5, %s4212_s28), 1  ;;  %361 = sbr.rel (%p3221_p6) target bundleno = 30 (0x1e), region = 48 }
   0xf   : > { %s4307_s14 = smul.u32 176, %s5338_s28  ;;  %s4312_s17 = scalar_lea.vmem %s5322_s7, %s5338_s28 }
  0x10   : > { %s4317_s20 = scalar_lea.vmem %s5323_s8, %s5338_s28 }
  0x11   : > { %s338_s23 = scalar_lea.vmem %s5315_s0, %s4307_s14  ;;  %s343_s26 = scalar_lea.vmem %s5320_s5, %s4307_s14 }
  0x12   : > { %s4331_s16 = scalar_lea.vmem %s5321_s6, %s4307_s14 }
  0x13   : > { %v4226_v0 = vmov 0.0   ;;  %v4227_v1 = vmov 0  }
  0x14   : > { %362 = vst [vmem:[%s4312_s17] sm:$0x1] %v4226_v0 }
  0x15   : > { %363 = vst [vmem:[%s4317_s20] sm:$0x1] %v4226_v0 }
  0x16   : > { %364 = vst [vmem:[%s4331_s16] sm:$0xf] %v4227_v1 }
  0x17   : > { %365 = vst [vmem:[%s4331_s16 + $0x4] sm:$0xf] %v4227_v1 }
  0x18   : > { %366 = vst [vmem:[%s4331_s16 + $0x8] sm:$0xf] %v4227_v1 }
  0x19   : > { %367 = vst [vmem:[%s4331_s16 + $0xc] sm:$0xf] %v4227_v1 }
  0x1a   : > { %368 = vst [vmem:[%s4331_s16 + $0xa0] sm:$0xf] %v4227_v1 }
  0x1b   : > { %369 = vst [vmem:[%s4331_s16 + $0xa4] sm:$0xf] %v4227_v1 }
  0x1c   : > { %370 = vst [vmem:[%s4331_s16 + $0xa8] sm:$0xf] %v4227_v1 }
  0x1d   : > { %371 = vst [vmem:[%s4331_s16 + $0xac] sm:$0xf] %v4227_v1 }
  0x1e PF: > { %s4347_s13 = scalar_lea.vmem %s5316_s1, %s4304_s12  ;;  %v4228_v2 = vmov 0   ;;  %s372_s18 = sshra.s32 %s4304_s12, 3  ;;  %v3784_v29 = vld [vmem:[%s5319_s4 + $0x78] sm:$0xff]  ;;  %v3783_v31 = vld [vmem:[%s5319_s4 + $0x70] sm:$0xff]  ;;  %v4430_v33 = vld [vmem:[%s5317_s2] ss:$0 sm:$0xff] }
  0x1f   : > { %4183 = vset.pattern.permute.xlu2 %v4228_v2  ;;  %4182 = vset.pattern.permute.xlu1 %v4228_v2  ;;  %v4350_v3 = vld [vmem:[%s4347_s13 + $0x70] sm:$0xff]  ;;  %v4353_v4 = vld [vmem:[%s4347_s13 + $0x60] sm:$0xff]  ;;  %v4362_v6 = vld [vmem:[%s4347_s13 + $0x78] sm:$0xff]  ;;  %s3222_s19 = sshll.u32 %s372_s18, 2  ;;  %vm850_vm0 = vcmask 1044480   ;;  %vm2442_vm4 = vcmask 1046528  }
  0x20   : > { %v4356_v5 = vld [vmem:[%s4347_s13 + $0x50] sm:$0xff]  ;;  %4181 = vset.pattern.permute.xlu0 %v4228_v2  ;;  %613 = vperm.xlu2 %4183, %v4350_v3   ;;  %v4365_v7 = vld [vmem:[%s4347_s13 + $0x68] sm:$0xff]  ;;  %v4368_v8 = vld [vmem:[%s4347_s13 + $0x58] sm:$0xff]  ;;  %s4417_s24 = scalar_lea.vmem %s338_s23, %s3222_s19  ;;  %vm1206_vm1 = vsmask.f32 4352  ;;  %s5324_s25 = sadd.s32 32, %s4304_s12 }
  0x21   : > { %603 = vperm.xlu1 %4182, %v4353_v4   ;;  %593 = vperm.xlu0 %4181, %v4356_v5   ;;  %v521_v9 = vld [vmem:[%s4347_s13 + $0x30] sm:$0xff]  ;;  %v520_v10 = vld [vmem:[%s4347_s13 + $0x28] sm:$0xff]  ;;  %v519_v11 = vld [vmem:[%s4347_s13 + $0x20] sm:$0xff]  ;;  %vm984_vm2 = vsmask.f32 5376  ;;  %s5150_s15 = sshra.s32 %s5324_s25, 3 }
  0x22   : > { %v524_v12 = vld [vmem:[%s4347_s13 + $0x48] sm:$0xff]  ;;  %v523_v13 = vld [vmem:[%s4347_s13 + $0x40] sm:$0xff]  ;;  %v522_v14 = vld [vmem:[%s4347_s13 + $0x38] sm:$0xff]  ;;  %4097 = vmatpush.bf16.msra.mxu2 %v3784_v29  ;;  %4096 = vmatpush.bf16.msra.mxu1 %v3784_v29  ;;  %vm1926_vm3 = vsmask.f32 7424  ;;  %s3739_s27 = sshll.u32 %s5150_s15, 2 }
  0x23   : > { %v515_v15 = vld [vmem:[%s4347_s13] sm:$0xff]  ;;  %v4381_v16 = vld [vmem:[%s4347_s13 + $0x88] sm:$0xff]  ;;  %v518_v18 = vld [vmem:[%s4347_s13 + $0x18] sm:$0xff]  ;;  %4098 = vmatpush.bf16.msra.mxu3 %v3784_v29  ;;  %927 = vmatpush.bf16.msra.mxu0 %v3784_v29  ;;  %vm2612_vm5 = vsmask.f32 6400  ;;  %s5165_s23 = scalar_lea.vmem %s343_s26, %s3739_s27  ;;  %s5194_s14 = scalar_lea.vmem %s4331_s16, %s3739_s27 }
  0x24   : > { %v4384_v17 = vld [vmem:[%s4347_s13 + $0x80] sm:$0xff]  ;;  %v517_v19 = vld [vmem:[%s4347_s13 + $0x10] sm:$0xff]  ;;  %v516_v20 = vld [vmem:[%s4347_s13 + $0x8] sm:$0xff] }
  0x25   : > { %v4392_v21 = vld [vmem:[%s4347_s13 + $0xa0] sm:$0xff]  ;;  %v4395_v22 = vld [vmem:[%s4347_s13 + $0x98] sm:$0xff]  ;;  %v4398_v23 = vld [vmem:[%s4347_s13 + $0x90] sm:$0xff] }
  0x26   : > { %v538_v24 = vld [vmem:[%s4347_s13 + $0xb8] sm:$0xff]  ;;  %v537_v25 = vld [vmem:[%s4347_s13 + $0xb0] sm:$0xff]  ;;  %v4406_v26 = vld [vmem:[%s4347_s13 + $0xa8] sm:$0xff]  ;;  %4100 = vmatpush.bf16.msra.mxu2 %v3783_v31  ;;  %4099 = vmatpush.bf16.msra.mxu1 %v3783_v31 }
  0x27   : > { %v540_v27 = vld [vmem:[%s4347_s13 + $0xc8] sm:$0xff]  ;;  %v539_v28 = vld [vmem:[%s4347_s13 + $0xc0] sm:$0xff]  ;;  %v4021_v30 = vld [vmem:[%s4417_s24 + $0x38] sm:$0xff]   ;;  %4101 = vmatpush.bf16.msra.mxu3 %v3783_v31  ;;  %928 = vmatpush.bf16.msra.mxu0 %v3783_v31 }
  0x28   : > { %618 = vperm.xlu2 %4183, %v4362_v6   ;;  %v3888_v32 = vunpack.c.l.bf16 %v4021_v30  ;;  %v3889_v34 = vunpack.c.h.bf16 %v4021_v30  ;;  %v3782_v35 = vld [vmem:[%s5319_s4 + $0x68] sm:$0xff]  ;;  %v4439_v37 = vld [vmem:[%s5318_s3] ss:$0 sm:$0xff]  ;;  %v3780_v43 = vld [vmem:[%s5319_s4 + $0x58] sm:$0xff] }
  0x29   : > { %608 = vperm.xlu1 %4182, %v4365_v7   ;;  %598 = vperm.xlu0 %4181, %v4368_v8   ;;  %v3781_v38 = vld [vmem:[%s5319_s4 + $0x60] sm:$0xff]  ;;  %v3779_v46 = vld [vmem:[%s5319_s4 + $0x50] sm:$0xff]  ;;  %v3778_v50 = vld [vmem:[%s5319_s4 + $0x48] sm:$0xff] }
  0x2a   : > { %v446_v36 = vmul.f32 %v4430_v33, %v3888_v32  ;;  %4103 = vmatpush.bf16.msra.mxu2 %v3782_v35  ;;  %4102 = vmatpush.bf16.msra.mxu1 %v3782_v35  ;;  %v447_v39 = vmul.f32 %v4430_v33, %v3889_v34  ;;  %v3777_v52 = vld [vmem:[%s5319_s4 + $0x40] sm:$0xff]  ;;  %v4020_v53 = vld [vmem:[%s4417_s24 + $0x30] sm:$0xff]   ;;  %v4019_v54 = vld [vmem:[%s4417_s24 + $0x28] sm:$0xff]  }
  0x2b   : > { %4104 = vmatpush.bf16.msra.mxu3 %v3782_v35  ;;  %929 = vmatpush.bf16.msra.mxu0 %v3782_v35  ;;  %v3884_v55 = vunpack.c.l.bf16 %v4020_v53  ;;  %v3880_v56 = vunpack.c.l.bf16 %v4019_v54  ;;  %v3885_v57 = vunpack.c.h.bf16 %v4020_v53  ;;  %v3881_v58 = vunpack.c.h.bf16 %v4019_v54  ;;  %v4016_v63 = vld [vmem:[%s4417_s24 + $0x10] sm:$0xff]   ;;  %v4022_v35 = vld [vmem:[%s4417_s24 + $0x40] sm:$0xff]  }
  0x2c   : > { %v476_v40 = vadd.f32 %v4439_v37, %v446_v36  ;;  %v477_v42 = vadd.f32 %v4439_v37, %v447_v39  ;;  %v3869_v2 = vunpack.c.h.bf16 %v4016_v63 }
  0x2d   : > { %v444_v59 = vmul.f32 %v4430_v33, %v3884_v55  ;;  %v442_v60 = vmul.f32 %v4430_v33, %v3880_v56  ;;  %v445_v61 = vmul.f32 %v4430_v33, %v3885_v57  ;;  %v443_v62 = vmul.f32 %v4430_v33, %v3881_v58  ;;  %v3859_v56 = vld [vmem:[%s4417_s24] sm:$0xff]   ;;  %v4015_v58 = vld [vmem:[%s4417_s24 + $0x8] sm:$0xff]  }
  0x2e   : > { %4106 = vmatpush.bf16.msra.mxu2 %v3781_v38  ;;  %4105 = vmatpush.bf16.msra.mxu1 %v3781_v38  ;;  %v502_v44 = vmax.f32 %v476_v40, 0.0  ;;  %v503_v45 = vmax.f32 %v477_v42, 0.0  ;;  %v3776_v42 = vld [vmem:[%s5319_s4 + $0x38] sm:$0xff] }
  0x2f   : > { %4107 = vmatpush.bf16.msra.mxu3 %v3781_v38  ;;  %930 = vmatpush.bf16.msra.mxu0 %v3781_v38 }
  0x30   : > { %573 = vperm.xlu2 %4183, %v521_v9  }
  0x31   : > { %568 = vperm.xlu1 %4182, %v520_v10   ;;  %563 = vperm.xlu0 %4181, %v519_v11  }
  0x32   : > { %4109 = vmatpush.bf16.msra.mxu2 %v3780_v43  ;;  %4108 = vmatpush.bf16.msra.mxu1 %v3780_v43 }
  0x33   : > { %4110 = vmatpush.bf16.msra.mxu3 %v3780_v43  ;;  %931 = vmatpush.bf16.msra.mxu0 %v3780_v43  ;;  %v3791_v43 = vld [vmem:[%s5319_s4 + $0xb0] sm:$0xff] }
  0x36   : > { %4112 = vmatpush.bf16.msra.mxu2 %v3779_v46  ;;  %4111 = vmatpush.bf16.msra.mxu1 %v3779_v46 }
  0x37   : > { %4113 = vmatpush.bf16.msra.mxu3 %v3779_v46  ;;  %932 = vmatpush.bf16.msra.mxu0 %v3779_v46 }
  0x38   : > { %588 = vperm.xlu2 %4183, %v524_v12  }
  0x39   : > { %583 = vperm.xlu1 %4182, %v523_v13   ;;  %578 = vperm.xlu0 %4181, %v522_v14  }
  0x3a   : > { %4115 = vmatpush.bf16.msra.mxu2 %v3778_v50  ;;  %4114 = vmatpush.bf16.msra.mxu1 %v3778_v50 }
  0x3b   : > { %4116 = vmatpush.bf16.msra.mxu3 %v3778_v50  ;;  %933 = vmatpush.bf16.msra.mxu0 %v3778_v50  ;;  %v3775_v50 = vld [vmem:[%s5319_s4 + $0x30] sm:$0xff] }
  0x3e   : > { %4118 = vmatpush.bf16.msra.mxu2 %v3777_v52  ;;  %4117 = vmatpush.bf16.msra.mxu1 %v3777_v52 }
  0x3f   : > { %4119 = vmatpush.bf16.msra.mxu3 %v3777_v52  ;;  %934 = vmatpush.bf16.msra.mxu0 %v3777_v52 }
  0x40   : > { %543 = vperm.xlu2 %4183, %v515_v15  }
  0x41   : > { %628 = vperm.xlu1 %4182, %v4381_v16   ;;  %623 = vperm.xlu0 %4181, %v4384_v17  }
  0x42   : > { %1131 = vmatpush.bf16.msrb.mxu1 %v3776_v42  ;;  %v3788_v42 = vld [vmem:[%s5319_s4 + $0x98] sm:$0xff] }
  0x46   : > { %1132 = vmatpush.bf16.msrb.mxu1 %v3775_v50 }
  0x48   : > { %558 = vperm.xlu2 %4183, %v518_v18  }
  0x49   : > { %553 = vperm.xlu1 %4182, %v517_v19   ;;  %548 = vperm.xlu0 %4181, %v516_v20  }
  0x50   : > { %643 = vperm.xlu2 %4183, %v4392_v21  }
  0x51   : > { %638 = vperm.xlu1 %4182, %v4395_v22   ;;  %633 = vperm.xlu0 %4181, %v4398_v23  }
  0x58   : > { %658 = vperm.xlu2 %4183, %v538_v24  }
  0x59   : > { %653 = vperm.xlu1 %4182, %v537_v25   ;;  %648 = vperm.xlu0 %4181, %v4406_v26  }
  0x60   : > { %2898 = vperm.xlu2 %4183, %v519_v11   ;;  %v437_v11 = vmul.f32 %v4430_v33, %v3869_v2 }
  0x61   : > { %668 = vperm.xlu1 %4182, %v540_v27   ;;  %663 = vperm.xlu0 %4181, %v539_v28  }
  0x68   : > { %2913 = vperm.xlu2 %4183, %v522_v14  }
  0x69   : > { %2908 = vperm.xlu1 %4182, %v521_v9   ;;  %2903 = vperm.xlu0 %4181, %v520_v10   ;;  %v4017_v9 = vld [vmem:[%s4417_s24 + $0x18] sm:$0xff]   ;;  %v4018_v10 = vld [vmem:[%s4417_s24 + $0x20] sm:$0xff]  }
  0x6a   : > { %v3872_v18 = vunpack.c.l.bf16 %v4017_v9  ;;  %v3877_v19 = vunpack.c.h.bf16 %v4018_v10  ;;  %v3876_v24 = vunpack.c.l.bf16 %v4018_v10  ;;  %v3873_v25 = vunpack.c.h.bf16 %v4017_v9 }
  0x6c   : > { %v438_v30 = vmul.f32 %v4430_v33, %v3872_v18  ;;  %v441_v34 = vmul.f32 %v4430_v33, %v3877_v19  ;;  %v440_v40 = vmul.f32 %v4430_v33, %v3876_v24  ;;  %v3861_v18 = vunpack.c.h.bf16 %v3859_v56 }
  0x6e   : > { %v471_v46 = vadd.f32 %v4439_v37, %v441_v34  ;;  %v470_v53 = vadd.f32 %v4439_v37, %v440_v40 }
  0x70   : > { %2928 = vperm.xlu2 %4183, %v4356_v5   ;;  %v472_v5 = vadd.f32 %v4439_v37, %v442_v60  ;;  %v497_v60 = vmax.f32 %v471_v46, 0.0 }
  0x71   : > { %2923 = vperm.xlu1 %4182, %v524_v12   ;;  %2918 = vperm.xlu0 %4181, %v523_v13  }
  0x72   : > { %v498_v14 = vmax.f32 %v472_v5, 0.0  ;;  %v3860_v5 = vunpack.c.l.bf16 %v3859_v56 }
  0x78   : > { %2943 = vperm.xlu2 %4183, %v4365_v7   ;;  %v473_v7 = vadd.f32 %v4439_v37, %v443_v62 }
  0x79   : > { %2938 = vperm.xlu1 %4182, %v4353_v4   ;;  %2933 = vperm.xlu0 %4181, %v4368_v8   ;;  %v474_v4 = vadd.f32 %v4439_v37, %v444_v59 }
  0x7a   : > { %v614_v41 = vpop.permute.xlu2 %613 }
  0x7b   : > { %v685_v47 = vmul.f32 %v614_v41, %v502_v44  ;;  %v500_v13 = vmax.f32 %v474_v4, 0.0  ;;  %v439_v41 = vmul.f32 %v4430_v33, %v3873_v25  ;;  %v468_v44 = vadd.f32 %v4439_v37, %v438_v30  ;;  %v3774_v4 = vld [vmem:[%s5319_s4 + $0x28] sm:$0xff] }
  0x7c   : > { %1133 = vmatpush.bf16.msrb.mxu1 %v3774_v4  ;;  %v432_v25 = vmul.f32 %v4430_v33, %v3860_v5  ;;  %v433_v30 = vmul.f32 %v4430_v33, %v3861_v18  ;;  %v4024_v5 = vld [vmem:[%s4417_s24 + $0x50] sm:$0xff]  }
  0x7d   : > { %v469_v54 = vadd.f32 %v4439_v37, %v439_v41  ;;  %v494_v55 = vmax.f32 %v468_v44, 0.0  ;;  %v3773_v41 = vld [vmem:[%s5319_s4 + $0x20] sm:$0xff] }
  0x7e   : > { %v462_v40 = vadd.f32 %v4439_v37, %v432_v25  ;;  %v3787_v25 = vld [vmem:[%s5319_s4 + $0x90] sm:$0xff] }
  0x80   : > { %2958 = vperm.xlu2 %4183, %v4384_v17   ;;  %v3792_v17 = vld [vmem:[%s5319_s4 + $0xb8] sm:$0xff]  ;;  %1134 = vmatpush.bf16.msrb.mxu1 %v3773_v41  ;;  %v488_v4 = vmax.f32 %v462_v40, 0.0 }
  0x81   : > { %2953 = vperm.xlu1 %4182, %v4362_v6   ;;  %2948 = vperm.xlu0 %4181, %v4350_v3   ;;  %v3868_v3 = vunpack.c.l.bf16 %v4016_v63  ;;  %v475_v6 = vadd.f32 %v4439_v37, %v445_v61  ;;  %v3800_v63 = vld [vmem:[%s5319_s4 + $0xf8] sm:$0xff] }
  0x82   : > { %v619_v48 = vpop.permute.xlu2 %618  ;;  %1313 = vmatpush.bf16.msrb.mxu2 %v3792_v17  ;;  %1615 = vmatpush.bf16.msrb.mxu3 %v3800_v63 }
  0x83   : > { %v686_v49 = vmul.f32 %v619_v48, %v503_v45  ;;  %v436_v12 = vmul.f32 %v4430_v33, %v3868_v3  ;;  %v501_v15 = vmax.f32 %v475_v6, 0.0  ;;  %v3893_v45 = vunpack.c.h.bf16 %v4022_v35  ;;  %v3790_v3 = vld [vmem:[%s5319_s4 + $0xa8] sm:$0xff] }
  0x84   : > { %v3865_v6 = vunpack.c.h.bf16 %v4015_v58 }
  0x85   : > { %v3948_v51 = vpack.c.bf16 %v686_v49, %v685_v47  ;;  %v3892_v49 = vunpack.c.l.bf16 %v4022_v35  ;;  %v449_v59 = vmul.f32 %v4430_v33, %v3893_v45 }
  0x86   : > { %1314 = vmatpush.bf16.msrb.mxu2 %v3791_v43 }
  0x87   : > { %4033 = vst [vmem:[#allocation2 + $0x38] sm:$0xff] %v3948_v51   ;;  %v448_v62 = vmul.f32 %v4430_v33, %v3892_v49 }
  0x88   : > { %2973 = vperm.xlu2 %4183, %v4395_v22   ;;  %v467_v22 = vadd.f32 %v4439_v37, %v437_v11 }
  0x89   : > { %2968 = vperm.xlu1 %4182, %v4398_v23   ;;  %2963 = vperm.xlu0 %4181, %v4381_v16   ;;  %v499_v16 = vmax.f32 %v473_v7, 0.0  ;;  %v466_v23 = vadd.f32 %v4439_v37, %v436_v12  ;;  %v479_v12 = vadd.f32 %v4439_v37, %v449_v59  ;;  %v478_v17 = vadd.f32 %v4439_v37, %v448_v62 }
  0x8a   : > { %v4481_v8 = vpop.permute.xlu2 %573  ;;  %v493_v38 = vmax.f32 %v467_v22, 0.0  ;;  %1315 = vmatpush.bf16.msrb.mxu2 %v3790_v3 }
  0x8b   : > { %v492_v39 = vmax.f32 %v466_v23, 0.0  ;;  %v677_v9 = vmul.f32 %v4481_v8, %v494_v55  ;;  %v3799_v8 = vld [vmem:[%s5319_s4 + $0xf0] sm:$0xff] }
  0x8c   : > { %1616 = vmatpush.bf16.msrb.mxu3 %v3799_v8  ;;  %v3807_v55 = vld [vmem:[%s5319_s4 + $0x130] sm:$0xff] }
  0x91   : > { %2983 = vperm.xlu1 %4182, %v4406_v26   ;;  %2978 = vperm.xlu0 %4181, %v4392_v21  }
  0x92   : > { %v589_v36 = vpop.permute.xlu2 %588 }
  0x93   : > { %v604_v0 = vpop.permute.xlu1 %603  ;;  %v594_v1 = vpop.permute.xlu0 %593 }
  0x94   : > { %v683_v26 = vmul.f32 %v604_v0, %v500_v13  ;;  %v681_v27 = vmul.f32 %v594_v1, %v498_v14  ;;  %v496_v0 = vmax.f32 %v470_v53, 0.0  ;;  %v495_v1 = vmax.f32 %v469_v54, 0.0  ;;  %v3789_v14 = vld [vmem:[%s5319_s4 + $0xa0] sm:$0xff] }
  0x95   : > { %v3864_v13 = vunpack.c.l.bf16 %v4015_v58  ;;  %1316 = vmatpush.bf16.msrb.mxu2 %v3789_v14  ;;  %v3797_v54 = vld [vmem:[%s5319_s4 + $0xe0] sm:$0xff] }
  0x99   : > { %1317 = vmatpush.bf16.msrb.mxu2 %v3788_v42  ;;  %v3805_v42 = vld [vmem:[%s5319_s4 + $0x120] sm:$0xff] }
  0x9a   : > { %v4532_v10 = vpop.permute.xlu2 %543 }
  0x9b   : > { %v609_v20 = vpop.permute.xlu1 %608  ;;  %v599_v21 = vpop.permute.xlu0 %598 }
  0x9c   : > { %v684_v28 = vmul.f32 %v609_v20, %v501_v15  ;;  %v682_v29 = vmul.f32 %v599_v21, %v499_v16  ;;  %v680_v21 = vmul.f32 %v589_v36, %v497_v60  ;;  %v505_v36 = vmax.f32 %v479_v12, 0.0 }
  0x9d   : > { %1318 = vmatpush.bf16.msrb.mxu2 %v3787_v25 }
  0x9e   : > { %v3943_v31 = vpack.c.bf16 %v684_v28, %v683_v26  ;;  %v3938_v32 = vpack.c.bf16 %v682_v29, %v681_v27  ;;  %v435_v26 = vmul.f32 %v4430_v33, %v3865_v6  ;;  %v434_v29 = vmul.f32 %v4430_v33, %v3864_v13  ;;  %v4025_v13 = vld [vmem:[%s4417_s24 + $0x58] sm:$0xff]  }
  0x9f   : > { %v3904_v41 = vunpack.c.l.bf16 %v4025_v13 }
  0xa0   : > { %4032 = vst [vmem:[#allocation2 + $0x30] sm:$0xff] %v3943_v31   ;;  %v3798_v31 = vld [vmem:[%s5319_s4 + $0xe8] sm:$0xff]  ;;  %v465_v45 = vadd.f32 %v4439_v37, %v435_v26  ;;  %v4576_v46 = vadd.f32 %v4439_v37, %v434_v29  ;;  %v671_v29 = vmul.f32 %v4532_v10, %v488_v4  ;;  %v3795_v10 = vld [vmem:[%s5319_s4 + $0xd0] sm:$0xff] }
  0xa1   : > { %4031 = vst [vmem:[#allocation2 + $0x28] sm:$0xff] %v3938_v32   ;;  %v3808_v32 = vld [vmem:[%s5319_s4 + $0x138] sm:$0xff]  ;;  %1617 = vmatpush.bf16.msrb.mxu3 %v3798_v31 }
  0xa2   : > { %1770 = vmatpush.bf16.msrb.mxu0 %v3808_v32  ;;  %v559_v58 = vpop.permute.xlu2 %558  ;;  %v491_v12 = vmax.f32 %v465_v45, 0.0  ;;  %v490_v8 = vmax.f32 %v4576_v46, 0.0  ;;  %v3901_v46 = vunpack.c.h.bf16 %v4024_v5 }
  0xa3   : > { %v569_v47 = vpop.permute.xlu1 %568  ;;  %v564_v48 = vpop.permute.xlu0 %563 }
  0xa4   : > { %v676_v51 = vmul.f32 %v569_v47, %v493_v38  ;;  %v675_v52 = vmul.f32 %v564_v48, %v492_v39  ;;  %v504_v38 = vmax.f32 %v478_v17, 0.0  ;;  %v4023_v39 = vld [vmem:[%s4417_s24 + $0x48] sm:$0xff]  }
  0xa5   : > { %v3896_v53 = vunpack.c.l.bf16 %v4023_v39  ;;  %1618 = vmatpush.bf16.msrb.mxu3 %v3797_v54  ;;  %v3806_v17 = vld [vmem:[%s5319_s4 + $0x128] sm:$0xff] }
  0xa6   : > { %v4511_v57 = vpack.c.bf16 %v676_v51, %v675_v52  ;;  %v463_v51 = vadd.f32 %v4439_v37, %v433_v30  ;;  %v3897_v52 = vunpack.c.h.bf16 %v4023_v39  ;;  %1771 = vmatpush.bf16.msrb.mxu0 %v3807_v55  ;;  %v3905_v30 = vunpack.c.h.bf16 %v4025_v13 }
  0xa7   : > { %v4515_v61 = vld [vmem:[#allocation2 + $0x34] sm:$0xff]  ;;  %v454_v55 = vmul.f32 %v4430_v33, %v3904_v41 }
  0xa8   : > { %4028 = vst [vmem:[#allocation2 + $0x10] sm:$0xff] %v4511_v57   ;;  %v4522_v2 = vld [vmem:[#allocation2 + $0x2c] sm:$0xff]  ;;  %v862_v7 = vrot.slane %v4515_v61, 3  ;;  %v1039_v47 = vshrl.u32 %v4515_v61, 16  ;;  %v1042_v48 = vshll.u32 %v4515_v61, 16  ;;  %v451_v14 = vmul.f32 %v4430_v33, %v3897_v52  ;;  %v4026_v52 = vld [vmem:[%s4417_s24 + $0x60] sm:$0xff]  }
  0xa9   : > { %v860_v11 = vrot.slane %v4522_v2, 3  ;;  %v1030_v19 = vshrl.u32 %v4522_v2, 16  ;;  %v1033_v20 = vshll.u32 %v4522_v2, 16  ;;  %v3908_v13 = vunpack.c.l.bf16 %v4026_v52  ;;  %v3769_v61 = vld [vmem:[%s5319_s4] sm:$0xff]  ;;  %v3849_v2 = vld [vmem:[%s5319_s4 + $0x1f8] sm:$0xff] }
  0xaa   : > { %v1235_v62 = vrot.slane %v1039_v47, 3  ;;  %v1236_v63 = vrot.slane %v1042_v48, 4  ;;  %v1044_v3 = vrot.slane %v1042_v48, 3  ;;  %1772 = vmatpush.bf16.msrb.mxu0 %v3806_v17  ;;  %v481_v39 = vadd.f32 %v4439_v37, %v451_v14 }
  0xab   : > { %v584_v15 = vpop.permute.xlu1 %583  ;;  %v579_v16 = vpop.permute.xlu0 %578  ;;  %v863_v24 = vsel %vm850_vm0, %v860_v11, %v862_v7  ;;  %v1231_v34 = vrot.slane %v1030_v19, 3  ;;  %v1232_v35 = vrot.slane %v1033_v20, 4  ;;  %v1032_v43 = vrot.slane %v1030_v19, 2 }
  0xac   : > { %v679_v22 = vmul.f32 %v584_v15, %v496_v0  ;;  %v678_v23 = vmul.f32 %v579_v16, %v495_v1  ;;  %960 = vmatmul.bf16.vlgmr.msra.gmra.mxu2 %v863_v24  ;;  %v1035_v44 = vrot.slane %v1033_v20, 3  ;;  %v1041_v1 = vrot.slane %v1039_v47, 2  ;;  %v3796_v16 = vld [vmem:[%s5319_s4 + $0xd8] sm:$0xff]  ;;  %v3786_v47 = vld [vmem:[%s5319_s4 + $0x88] sm:$0xff] }
  0xad   : > { %v4587_v56 = vor.u32 %v1232_v35, %v1231_v34  ;;  %v450_v15 = vmul.f32 %v4430_v33, %v3896_v53  ;;  %v489_v19 = vmax.f32 %v463_v51, 0.0  ;;  %v3900_v24 = vunpack.c.l.bf16 %v4024_v5  ;;  %1619 = vmatpush.bf16.msrb.mxu3 %v3796_v16  ;;  %v3771_v34 = vld [vmem:[%s5319_s4 + $0x10] sm:$0xff]  ;;  %1319 = vmatpush.bf16.msrb.mxu2 %v3786_v47 }
  0xae   : > { %v4552_v27 = vpack.c.bf16 %v680_v21, %v679_v22  ;;  %v4554_v28 = vpack.c.bf16 %v678_v23, %v677_v9  ;;  %v4589_v0 = vor.u32 %v1035_v44, %v1032_v43  ;;  %v4592_v9 = vor.u32 %v1236_v63, %v1235_v62  ;;  %v3772_v22 = vld [vmem:[%s5319_s4 + $0x18] sm:$0xff]  ;;  %1773 = vmatpush.bf16.msrb.mxu0 %v3805_v42 }
  0xaf   : > { %v4603_v18 = vor.u32 %v1044_v3, %v1041_v1  ;;  %1135 = vmatpush.bf16.msrb.mxu1 %v3772_v22  ;;  %v674_v35 = vmul.f32 %v559_v58, %v491_v12  ;;  %v480_v40 = vadd.f32 %v4439_v37, %v450_v15  ;;  %v452_v48 = vmul.f32 %v4430_v33, %v3900_v24  ;;  %v3794_v58 = vld [vmem:[%s5319_s4 + $0xc8] sm:$0xff]  ;;  %v3785_v3 = vld [vmem:[%s5319_s4 + $0x80] sm:$0xff]  ;;  %v3803_v22 = vld [vmem:[%s5319_s4 + $0x110] sm:$0xff] }
  0xb0   : > { %4030 = vst [vmem:[#allocation2 + $0x20] sm:$0xff] %v4552_v27   ;;  %v4616_v23 = vsel %vm1206_vm1, %v4587_v56, %v4592_v9  ;;  %v455_v53 = vmul.f32 %v4430_v33, %v3905_v30  ;;  %v453_v63 = vmul.f32 %v4430_v33, %v3901_v46  ;;  %v3770_v1 = vld [vmem:[%s5319_s4 + $0x8] sm:$0xff]  ;;  %v3909_v12 = vunpack.c.h.bf16 %v4026_v52 }
  0xb1   : > { %4029 = vst [vmem:[#allocation2 + $0x18] sm:$0xff] %v4554_v28   ;;  %v4624_v26 = vsel %vm984_vm2, %v4589_v0, %v4603_v18  ;;  %1620 = vmatpush.bf16.msrb.mxu3 %v3795_v10  ;;  %v506_v62 = vmax.f32 %v480_v40, 0.0  ;;  %v482_v4 = vadd.f32 %v4439_v37, %v452_v48  ;;  %1320 = vmatpush.bf16.msrb.mxu2 %v3785_v3  ;;  %v3802_v48 = vld [vmem:[%s5319_s4 + $0x108] sm:$0xff] }
  0xb2   : > { %v485_v14 = vadd.f32 %v4439_v37, %v455_v53  ;;  %v457_v30 = vmul.f32 %v4430_v33, %v3909_v12 }
  0xb3   : > { %v629_v49 = vpop.permute.xlu1 %628  ;;  %v624_v50 = vpop.permute.xlu0 %623  ;;  %1136 = vmatpush.bf16.msrb.mxu1 %v3771_v34  ;;  %v456_v34 = vmul.f32 %v4430_v33, %v3908_v13  ;;  %v3801_v13 = vld [vmem:[%s5319_s4 + $0x100] sm:$0xff] }
  0xb4   : > { %v688_v59 = vmul.f32 %v629_v49, %v505_v36  ;;  %v687_v60 = vmul.f32 %v624_v50, %v504_v38  ;;  %v4649_v49 = vpop.permute.xlu2 %643  ;;  %v511_v41 = vmax.f32 %v485_v14, 0.0 }
  0xb5   : > { %1621 = vmatpush.bf16.msrb.mxu3 %v3794_v58  ;;  %v486_v58 = vadd.f32 %v4439_v37, %v456_v34 }
  0xb6   : > { %v3953_v6 = vpack.c.bf16 %v688_v59, %v687_v60  ;;  %v3804_v59 = vld [vmem:[%s5319_s4 + $0x118] sm:$0xff]  ;;  %v507_v60 = vmax.f32 %v481_v39, 0.0 }
  0xb7   : > { %1774 = vmatpush.bf16.msrb.mxu0 %v3804_v59  ;;  %1137 = vmatpush.bf16.msrb.mxu1 %v3770_v1 }
  0xb8   : > { %4034 = vst [vmem:[#allocation2 + $0x40] sm:$0xff] %v3953_v6   ;;  %v4606_v20 = vld [vmem:[#allocation2 + $0x14] sm:$0xff]  ;;  %v4608_v21 = vld [vmem:[#allocation2 + $0x1c] sm:$0xff]  ;;  %v4671_v6 = vld [vmem:[#allocation2 + $0x24] sm:$0xff] }
  0xb9   : > { %v854_v31 = vrot.slane %v4606_v20, 3  ;;  %v856_v32 = vrot.slane %v4608_v21, 3  ;;  %v1015_v39 = vshll.u32 %v4608_v21, 16  ;;  %v1024_v40 = vshll.u32 %v4671_v6, 16 }
  0xba   : > { %v858_v42 = vrot.slane %v4671_v6, 3 }
  0xbb   : > { %v554_v36 = vpop.permute.xlu1 %553  ;;  %v549_v38 = vpop.permute.xlu0 %548  ;;  %v857_v45 = vsel %vm850_vm0, %v854_v31, %v856_v32  ;;  %1775 = vmatpush.bf16.msrb.mxu0 %v3803_v22  ;;  %1138 = vmatpush.bf16.msrb.mxu1 %v3769_v61  ;;  %v1026_v22 = vrot.slane %v1024_v40, 3 }
  0xbc   : > { %v673_v43 = vmul.f32 %v554_v36, %v490_v8  ;;  %v672_v44 = vmul.f32 %v549_v38, %v489_v19  ;;  %945 = vmatmul.bf16.vlgmr.msra.gmra.mxu1 %v857_v45  ;;  %v484_v8 = vadd.f32 %v4439_v37, %v454_v55  ;;  %v3793_v19 = vld [vmem:[%s5319_s4 + $0xc0] sm:$0xff]  ;;  %v1012_v38 = vshrl.u32 %v4608_v21, 16  ;;  %v659_v33 = vpop.permute.xlu2 %658 }
  0xbd   : > { %1622 = vmatpush.bf16.msrb.mxu3 %v3793_v19  ;;  %v487_v55 = vadd.f32 %v4439_v37, %v457_v30  ;;  %v694_v1 = vmul.f32 %v659_v33, %v511_v41 }
  0xbe   : > { %v3918_v50 = vpack.c.bf16 %v674_v35, %v673_v43  ;;  %v3913_v51 = vpack.c.bf16 %v672_v44, %v671_v29  ;;  %v483_v29 = vadd.f32 %v4439_v37, %v453_v63  ;;  %v1021_v35 = vshrl.u32 %v4671_v6, 16  ;;  %v4699_v44 = vld [vmem:[#allocation2 + $0x14] sm:$0xff]  }
  0xbf   : > { %v4653_v54 = vld [vmem:[#allocation2 + $0x3c] sm:$0xff]  ;;  %v510_v10 = vmax.f32 %v484_v8, 0.0  ;;  %1776 = vmatpush.bf16.msrb.mxu0 %v3802_v48  ;;  %v1223_v59 = vrot.slane %v1012_v38, 3  ;;  %v1228_v63 = vrot.slane %v1024_v40, 4  ;;  %v1478_v37 = vshrl.u32 %v4699_v44, 16 }
  0xc0   : > { %4027 = vst [vmem:[#allocation2 + $0x8] sm:$0xff] %v3918_v50   ;;  %v864_v5 = vrot.slane %v4653_v54, 3  ;;  %v509_v45 = vmax.f32 %v483_v29, 0.0  ;;  %v3841_v50 = vld [vmem:[%s5319_s4 + $0x1b8] sm:$0xff]  ;;  %v1023_v19 = vrot.slane %v1021_v35, 2 }
  0xc1   : > { %3914 = vst [vmem:[#allocation2] sm:$0xff] %v3913_v51   ;;  %2349 = vmatpush.bf16.msra.mxu2 %v3841_v50 }
  0xc2   : > { %v865_v17 = vsel %vm850_vm0, %v862_v7, %v864_v5  ;;  %v508_v7 = vmax.f32 %v482_v4, 0.0 }
  0xc3   : > { %v639_v15 = vpop.permute.xlu1 %638  ;;  %v634_v16 = vpop.permute.xlu0 %633  ;;  %965 = vmatmul.bf16.gmra.mxu2 %v865_v17  ;;  %v1017_v17 = vrot.slane %v1015_v39, 3  ;;  %1777 = vmatpush.bf16.msrb.mxu0 %v3801_v13 }
  0xc4   : > { %v690_v24 = vmul.f32 %v639_v15, %v507_v60  ;;  %v689_v25 = vmul.f32 %v634_v16, %v506_v62  ;;  %v691_v51 = vmul.f32 %v4649_v49, %v508_v7  ;;  %v1224_v60 = vrot.slane %v1015_v39, 4 }
  0xc5   : > { %v1227_v62 = vrot.slane %v1021_v35, 3  ;;  %v859_v49 = vsel %vm850_vm0, %v856_v32, %v858_v42  ;;  %v1014_v16 = vrot.slane %v1012_v38, 2  ;;  %v3825_v32 = vld [vmem:[%s5319_s4 + $0x178] sm:$0xff]  ;;  %v1481_v38 = vshll.u32 %v4699_v44, 16 }
  0xc6   : > { %v3958_v36 = vpack.c.bf16 %v690_v24, %v689_v25  ;;  %v4731_v29 = vor.u32 %v1224_v60, %v1223_v59  ;;  %2060 = vmatpush.bf16.msra.mxu1 %v3825_v32  ;;  %v513_v39 = vmax.f32 %v487_v55, 0.0  ;;  %v512_v35 = vmax.f32 %v486_v58, 0.0 }
  0xc7   : > { %v4697_v43 = vld [vmem:[#allocation2 + $0x8] sm:$0xf]  ;;  %v4709_v52 = vld [vmem:[#allocation2 + $0xc] sm:$0xff]  ;;  %v1229_v61 = vor.u32 %v1228_v63, %v1227_v62  ;;  %v4738_v33 = vor.u32 %v1017_v17, %v1014_v16  ;;  %v861_v58 = vsel %vm850_vm0, %v858_v42, %v860_v11  ;;  %v4754_v59 = vrot.slane %v1478_v37, 3  ;;  %v3857_v62 = vld [vmem:[%s5319_s4 + $0x238] sm:$0xff] }
  0xc8   : > { %4035 = vst [vmem:[#allocation2 + $0x48] sm:$0xff] %v3958_v36   ;;  %v784_v46 = vld [vmem:[#allocation2 + $0x4] sm:$0x8]  ;;  %v822_v47 = vunpack.c.l.b16 %v4697_v43  ;;  %v852_v21 = vrot.slane %v4709_v52, 3  ;;  %v4054_v36 = vld [vmem:[#allocation2 + $0xc] sm:$0x8] }
  0xc9   : > { %v821_v53 = vunpack.c.l.b16 %v784_v46  ;;  %v749_v50 = vld [vmem:[#allocation2 + $0x4] sm:$0xc]  ;;  %v4744_v44 = vsel %vm1206_vm1, %v4731_v29, %v1229_v61  ;;  %v4756_v60 = vrot.slane %v1481_v38, 4  ;;  %v4772_v42 = vsel %vm1206_vm1, %v1229_v61, %v4587_v56 }
  0xca   : > { %v982_v11 = vunpack.c.l.b16 %v749_v50  ;;  %v997_v13 = vshll.u32 %v4709_v52, 16  ;;  %v1048_v17 = vshrl.u32 %v4653_v54, 16  ;;  %v1051_v56 = vshll.u32 %v4653_v54, 16 }
  0xcb   : > { %v654_v3 = vpop.permute.xlu1 %653  ;;  %v649_v4 = vpop.permute.xlu0 %648  ;;  %v4720_v12 = vpack.c.b16 %v822_v47, %v821_v53 }
  0xcc   : > { %v693_v14 = vmul.f32 %v654_v3, %v510_v10  ;;  %v692_v15 = vmul.f32 %v649_v4, %v509_v45  ;;  %950 = vmatmul.bf16.gmra.mxu1 %v859_v49  ;;  %v4121_v10 = vld [vmem:[#allocation2 + $0xc] sm:$0xf0]   ;;  %v1027_v45 = vor.u32 %v1026_v22, %v1023_v19  ;;  %v1240_v54 = vrot.slane %v1051_v56, 4 }
  0xcd   : > { %v851_v8 = vrot.slane %v4720_v12, 3  ;;  %v4055_v48 = vor.u32 %v4121_v10, %v4054_v36  ;;  %v1211_v16 = vshll.u32 %v4720_v12, 16  ;;  %v1050_v61 = vrot.slane %v1048_v17, 2 }
  0xce   : > { %v3968_v24 = vpack.c.bf16 %v694_v1, %v693_v14  ;;  %v3963_v25 = vpack.c.bf16 %v692_v15, %v691_v51  ;;  %v4768_v6 = vsel %vm984_vm2, %v4738_v33, %v1027_v45  ;;  %v4776_v4 = vsel %vm984_vm2, %v1027_v45, %v4589_v0  ;;  %v3848_v45 = vld [vmem:[%s5319_s4 + $0x1f0] sm:$0xff] }
  0xcf   : > { %v853_v7 = vsel %vm850_vm0, %v851_v8, %v852_v21  ;;  %v4734_v30 = vld [vmem:[#allocation2 + $0x44] sm:$0xff]  ;;  %v767_v34 = vld [vmem:[#allocation2 + $0x4c] sm:$0x7]  ;;  %v1470_v14 = vshrl.u32 %v4055_v48, 16  ;;  %v1208_v15 = vshrl.u32 %v4720_v12, 16  ;;  %v855_v0 = vsel %vm850_vm0, %v852_v21, %v854_v31  ;;  %v3840_v21 = vld [vmem:[%s5319_s4 + $0x1b0] sm:$0xff] }
  0xd0   : > { %4037 = vst [vmem:[#allocation2 + $0x58] sm:$0xff] %v3968_v24   ;;  %935 = vmatmul.bf16.vlgmr.msra.gmra.mxu0 %v853_v7  ;;  %v839_v40 = vunpack.c.l.b16 %v767_v34  ;;  %v866_v41 = vrot.slane %v4734_v30, 3  ;;  %v1185_v8 = vld [vmem:[#allocation2 + $0x4c] sm:$0xf]  ;;  %v1473_v32 = vshll.u32 %v4055_v48, 16  ;;  %v1057_v19 = vshrl.u32 %v4734_v30, 16  ;;  %2350 = vmatpush.bf16.msra.mxu2 %v3840_v21 }
  0xd1   : > { %4036 = vst [vmem:[#allocation2 + $0x50] sm:$0xff] %v3963_v25   ;;  %2719 = vmatpush.bf16.msra.mxu0 %v3857_v62  ;;  %v1060_v22 = vshll.u32 %v4734_v30, 16  ;;  %v983_v12 = vpack.c.b16 %v822_v47, %v982_v11  ;;  %v1239_v25 = vrot.slane %v1048_v17, 3  ;;  %v1053_v7 = vrot.slane %v1051_v56, 3 }
  0xd2   : > { %v4740_v46 = vpack.c.b16 %v839_v40, %v839_v40  ;;  %v867_v55 = vsel %vm850_vm0, %v864_v5, %v866_v41  ;;  %v994_v5 = vshrl.u32 %v4709_v52, 16  ;;  %v1243_v34 = vrot.slane %v1057_v19, 3 }
  0xd3   : > { %v669_v51 = vpop.permute.xlu1 %668  ;;  %v664_v53 = vpop.permute.xlu0 %663  ;;  %970 = vmatmul.bf16.gmra.mxu2 %v867_v55  ;;  %v1204_v36 = vunpack.c.l.b16 %v1185_v8  ;;  %v1210_v38 = vrot.slane %v1208_v15, 3  ;;  %v1213_v31 = vrot.slane %v1211_v16, 4  ;;  %v1244_v30 = vrot.slane %v1060_v22, 4 }
  0xd4   : > { %v696_v63 = vmul.f32 %v669_v51, %v513_v39  ;;  %v695_v1 = vmul.f32 %v664_v53, %v512_v35  ;;  %v868_v3 = vrot.slane %v4740_v46, 3  ;;  %v1215_v24 = vrot.slane %v994_v5, 3 }
  0xd5   : > { %v1241_v39 = vor.u32 %v1240_v54, %v1239_v25  ;;  %v1216_v35 = vrot.slane %v997_v13, 4  ;;  %v1054_v40 = vor.u32 %v1053_v7, %v1050_v61  ;;  %v1059_v43 = vrot.slane %v1057_v19, 2  ;;  %v4125_v7 = vld [vmem:[#allocation2 + $0x1c] sm:$0xff]  }
  0xd6   : > { %v3973_v49 = vpack.c.bf16 %v696_v63, %v695_v1  ;;  %v869_v37 = vsel %vm850_vm0, %v866_v41, %v868_v3  ;;  %v1062_v47 = vrot.slane %v1060_v22, 3  ;;  %v1472_v41 = vrot.slane %v1470_v14, 3  ;;  %v3856_v22 = vld [vmem:[%s5319_s4 + $0x230] sm:$0xff] }
  0xd7   : > { %975 = vmatmul.bf16.vlgmr.msra.gmra.mxu3 %v869_v37  ;;  %v1475_v10 = vrot.slane %v1473_v32, 4  ;;  %v4803_v48 = vsel %vm1206_vm1, %v4592_v9, %v1241_v39  ;;  %v1245_v50 = vor.u32 %v1244_v30, %v1243_v34  ;;  %v986_v51 = vshrl.u32 %v983_v12, 16  ;;  %2720 = vmatpush.bf16.msra.mxu0 %v3856_v22  ;;  %v4131_v22 = vld [vmem:[#allocation2 + $0x34] sm:$0xff]  }
  0xd8   : > { %4038 = vst [vmem:[#allocation2 + $0x60] sm:$0xff] %v3973_v49   ;;  %2519 = vmatpush.bf16.msra.mxu3 %v3849_v2  ;;  %v4807_v53 = vsel %vm984_vm2, %v4603_v18, %v1054_v40  ;;  %v1063_v55 = vor.u32 %v1062_v47, %v1059_v43  ;;  %v1205_v62 = vpack.c.b16 %v1204_v36, %v1204_v36  ;;  %v1066_v1 = vshrl.u32 %v4740_v46, 16  ;;  %v3824_v2 = vld [vmem:[%s5319_s4 + $0x170] sm:$0xff] }
  0xd9   : > { %v4810_v63 = vsel %vm1206_vm1, %v1241_v39, %v1245_v50  ;;  %v1069_v3 = vshll.u32 %v4740_v46, 16  ;;  %v989_v9 = vshll.u32 %v983_v12, 16  ;;  %v1217_v37 = vor.u32 %v1216_v35, %v1215_v24  ;;  %2061 = vmatpush.bf16.msra.mxu1 %v3824_v2  ;;  %v3838_v2 = vld [vmem:[%s5319_s4 + $0x1a0] sm:$0xff] }
  0xda   : > { %v4818_v18 = vsel %vm984_vm2, %v1054_v40, %v1063_v55  ;;  %v1248_v11 = vshrl.u32 %v1205_v62, 16  ;;  %v1251_v49 = vshll.u32 %v1205_v62, 16  ;;  %v1068_v14 = vrot.slane %v1066_v1, 2  ;;  %v3823_v40 = vld [vmem:[%s5319_s4 + $0x168] sm:$0xff] }
  0xdb   : > { %v1071_v15 = vrot.slane %v1069_v3, 3  ;;  %v1476_v16 = vor.u32 %v1475_v10, %v1472_v41  ;;  %v988_v32 = vrot.slane %v986_v51, 2  ;;  %v991_v19 = vrot.slane %v989_v9, 3  ;;  %v3855_v51 = vld [vmem:[%s5319_s4 + $0x228] sm:$0xff] }
  0xdc   : > { %955 = vmatmul.bf16.gmra.mxu1 %v861_v58  ;;  %v1214_v58 = vor.u32 %v1213_v31, %v1210_v38  ;;  %2520 = vmatpush.bf16.msra.mxu3 %v3848_v45  ;;  %v1250_v17 = vrot.slane %v1248_v11, 3  ;;  %v1253_v56 = vrot.slane %v1251_v49, 4  ;;  %v996_v54 = vrot.slane %v994_v5, 2  ;;  %v3846_v11 = vld [vmem:[%s5319_s4 + $0x1e0] sm:$0xff] }
  0xdd   : > { %v1072_v8 = vor.u32 %v1071_v15, %v1068_v14  ;;  %v999_v61 = vrot.slane %v997_v13, 3  ;;  %v1003_v34 = vshrl.u32 %v4606_v20, 16  ;;  %v1006_v36 = vshll.u32 %v4606_v20, 16  ;;  %v3839_v13 = vld [vmem:[%s5319_s4 + $0x1a8] sm:$0xff]  ;;  %2062 = vmatpush.bf16.msra.mxu1 %v3823_v40  ;;  %2721 = vmatpush.bf16.msra.mxu0 %v3855_v51  ;;  %v3822_v49 = vld [vmem:[%s5319_s4 + $0x160] sm:$0xff]  ;;  %v4044_v51 = vld [vmem:[#allocation2 + $0x38] sm:$0xff]  }
  0xde   : > { %v1218_v46 = vsel %vm1206_vm1, %v1214_v58, %v1217_v37  ;;  %v1254_v24 = vor.u32 %v1253_v56, %v1250_v17  ;;  %v1487_v31 = vshrl.u32 %v4125_v7, 16  ;;  %v1490_v21 = vshll.u32 %v4125_v7, 16  ;;  %2351 = vmatpush.bf16.msra.mxu2 %v3839_v13  ;;  %v3847_v20 = vld [vmem:[%s5319_s4 + $0x1e8] sm:$0xff]  ;;  %v3854_v15 = vld [vmem:[%s5319_s4 + $0x220] sm:$0xff]  ;;  %v4043_v13 = vld [vmem:[#allocation2 + $0x30] sm:$0xff]  }
  0xdf   : > { %v4827_v12 = vsel %vm984_vm2, %v1063_v55, %v1072_v8  ;;  %v1000_v38 = vor.u32 %v999_v61, %v996_v54  ;;  %v1219_v5 = vrot.slane %v1003_v34, 3  ;;  %v1220_v52 = vrot.slane %v1006_v36, 4  ;;  %v3853_v54 = vld [vmem:[%s5319_s4 + $0x218] sm:$0xff]  ;;  %v4042_v7 = vld [vmem:[#allocation2 + $0x28] sm:$0xff]  }
  0xe0   : > { %940 = vmatmul.bf16.gmra.mxu0 %v855_v0  ;;  %v1484_v0 = vor.u32 %v4756_v60, %v4754_v59  ;;  %v4835_v59 = vsel %vm1206_vm1, %v1245_v50, %v1254_v24  ;;  %v992_v60 = vor.u32 %v991_v19, %v988_v32  ;;  %v1489_v30 = vrot.slane %v1487_v31, 3  ;;  %2521 = vmatpush.bf16.msra.mxu3 %v3847_v20  ;;  %v3845_v32 = vld [vmem:[%s5319_s4 + $0x1d8] sm:$0xff]  ;;  %v3835_v20 = vld [vmem:[%s5319_s4 + $0x188] sm:$0xff] }
  0xe1   : > { %v1492_v35 = vrot.slane %v1490_v21, 4  ;;  %v1221_v43 = vor.u32 %v1220_v52, %v1219_v5  ;;  %v1005_v45 = vrot.slane %v1003_v34, 2  ;;  %v1008_v50 = vrot.slane %v1006_v36, 3  ;;  %2063 = vmatpush.bf16.msra.mxu1 %v3822_v49  ;;  %2722 = vmatpush.bf16.msra.mxu0 %v3854_v15  ;;  %v3821_v19 = vld [vmem:[%s5319_s4 + $0x158] sm:$0xff]  ;;  %v3836_v34 = vld [vmem:[%s5319_s4 + $0x190] sm:$0xff]  ;;  %v4135_v40 = vld [vmem:[#allocation2 + $0x44] sm:$0xff]  }
  0xe2   : > { %v1485_v25 = vsel %vm1206_vm1, %v1476_v16, %v1484_v0  ;;  %v1001_v39 = vsel %vm984_vm2, %v992_v60, %v1000_v38  ;;  %2352 = vmatpush.bf16.msra.mxu2 %v3838_v2  ;;  %v4129_v16 = vld [vmem:[#allocation2 + $0x2c] sm:$0xff]   ;;  %v1514_v24 = vshrl.u32 %v4131_v22, 16  ;;  %v4133_v31 = vld [vmem:[#allocation2 + $0x3c] sm:$0xff]  }
  0xe3   : > { %1321 = vmatmul.bf16.vlgmr.msrb.gmra.mxu2 %v1218_v46  ;;  %v1493_v47 = vor.u32 %v1492_v35, %v1489_v30  ;;  %v1222_v41 = vsel %vm1206_vm1, %v1217_v37, %v1221_v43  ;;  %v1009_v55 = vor.u32 %v1008_v50, %v1005_v45  ;;  %v1226_v14 = vsel %vm1206_vm1, %v1221_v43, %v4731_v29  ;;  %v3844_v36 = vld [vmem:[%s5319_s4 + $0x1d0] sm:$0xff]  ;;  %v3843_v43 = vld [vmem:[%s5319_s4 + $0x1c8] sm:$0xff]  ;;  %v3842_v2 = vld [vmem:[%s5319_s4 + $0x1c0] sm:$0xff] }
  0xe4   : > { %2522 = vmatpush.bf16.msra.mxu3 %v3846_v11  ;;  %v1505_v56 = vshrl.u32 %v4129_v16, 16  ;;  %v1508_v46 = vshll.u32 %v4129_v16, 16  ;;  %v1523_v21 = vshrl.u32 %v4133_v31, 16  ;;  %v4045_v15 = vld [vmem:[#allocation2 + $0x40] sm:$0xff]  }
  0xe5   : > { %v1494_v10 = vsel %vm1206_vm1, %v1484_v0, %v1493_v47  ;;  %v1010_v1 = vsel %vm984_vm2, %v1000_v38, %v1009_v55  ;;  %v1019_v17 = vsel %vm984_vm2, %v1009_v55, %v4738_v33  ;;  %v3837_v0 = vld [vmem:[%s5319_s4 + $0x198] sm:$0xff]  ;;  %2064 = vmatpush.bf16.msra.mxu1 %v3821_v19  ;;  %2723 = vmatpush.bf16.msra.mxu0 %v3853_v54  ;;  %v3851_v55 = vld [vmem:[%s5319_s4 + $0x208] sm:$0xff] }
  0xe6   : > { %v1507_v29 = vrot.slane %v1505_v56, 3  ;;  %v1510_v8 = vrot.slane %v1508_v46, 4  ;;  %2353 = vmatpush.bf16.msra.mxu2 %v3837_v0  ;;  %v1525_v5 = vrot.slane %v1523_v21, 3  ;;  %v3818_v56 = vld [vmem:[%s5319_s4 + $0x140] sm:$0xff] }
  0xe7   : > { %1623 = vmatmul.bf16.vlgmr.msrb.gmra.mxu3 %v1485_v25  ;;  %v1517_v25 = vshll.u32 %v4131_v22, 16  ;;  %v3850_v46 = vld [vmem:[%s5319_s4 + $0x200] sm:$0xff] }
  0xe8   : > { %2523 = vmatpush.bf16.msra.mxu3 %v3845_v32  ;;  %v1511_v33 = vor.u32 %v1510_v8, %v1507_v29  ;;  %v4972_v21 = vld [vmem:[#allocation2 + $0x20] sm:$0xff] }
  0xe9   : > { %v1519_v61 = vrot.slane %v1517_v25, 4 }
  0xea   : > { %2354 = vmatpush.bf16.msra.mxu2 %v3836_v34 }
  0xec   : > { %1139 = vmatmul.bf16.vlgmr.msrb.gmra.mxu1 %v1001_v39  ;;  %2524 = vmatpush.bf16.msra.mxu3 %v3844_v36  ;;  %v1526_v39 = vshll.u32 %v4133_v31, 16 }
  0xee   : > { %v1528_v52 = vrot.slane %v1526_v39, 4  ;;  %2355 = vmatpush.bf16.msra.mxu2 %v3835_v20  ;;  %v4049_v20 = vld [vmem:[#allocation2 + $0x18] sm:$0xf0] }
  0xf0   : > { %1778 = vmatmul.bf16.vlgmr.msrb.gmra.mxu0 %v4511_v57  ;;  %v4127_v57 = vld [vmem:[#allocation2 + $0x24] sm:$0xff]   ;;  %v1529_v30 = vor.u32 %v1528_v52, %v1525_v5  ;;  %2525 = vmatpush.bf16.msra.mxu3 %v3843_v43 }
  0xf1   : > { %v1496_v62 = vshrl.u32 %v4127_v57, 16  ;;  %v1499_v58 = vshll.u32 %v4127_v57, 16 }
  0xf3   : > { %1326 = vmatmul.bf16.gmra.mxu2 %v1222_v41  ;;  %v1498_v3 = vrot.slane %v1496_v62, 3  ;;  %v1501_v9 = vrot.slane %v1499_v58, 4  ;;  %v1532_v41 = vshrl.u32 %v4135_v40, 16 }
  0xf4   : > { %2526 = vmatpush.bf16.msra.mxu3 %v3842_v2  ;;  %v2444_v2 = vrot.slane %v4972_v21, 1 }
  0xf5   : > { %v1502_v37 = vor.u32 %v1501_v9, %v1498_v3  ;;  %v1534_v45 = vrot.slane %v1532_v41, 3  ;;  %v4136_v3 = vld [vmem:[#allocation2 + $0x4c] sm:$0xff]   ;;  %v3834_v9 = vld [vmem:[%s5319_s4 + $0x180] sm:$0xff] }
  0xf6   : > { %2356 = vmatpush.bf16.msra.mxu2 %v3834_v9  ;;  %v1541_v49 = vshrl.u32 %v4136_v3, 16  ;;  %v3809_v41 = vld [vmem:[#allocation2 + $0x10] sm:$0xff] }
  0xf7   : > { %1628 = vmatmul.bf16.gmra.mxu3 %v1494_v10  ;;  %v1535_v10 = vshll.u32 %v4135_v40, 16 }
  0xf9   : > { %v1537_v50 = vrot.slane %v1535_v10, 4 }
  0xfb   : > { %v1538_v58 = vor.u32 %v1537_v50, %v1534_v45 }
  0xfc   : > { %1144 = vmatmul.bf16.gmra.mxu1 %v1010_v1 }
  0xfd   : > { %v1539_v1 = vsel %vm1206_vm1, %v1529_v30, %v1538_v58 }
 0x100   : > { %1783 = vmatmul.bf16.gmra.mxu0 %v4554_v28  ;;  %v1503_v28 = vsel %vm1206_vm1, %v1493_v47, %v1502_v37  ;;  %v3819_v47 = vld [vmem:[%s5319_s4 + $0x148] sm:$0xff] }
 0x103   : > { %1331 = vmatmul.bf16.gmra.mxu2 %v1226_v14  ;;  %v1543_v14 = vrot.slane %v1541_v49, 3  ;;  %v1930_v49 = vshll.u32 %v3809_v41, 16 }
 0x107   : > { %1633 = vmatmul.bf16.gmra.mxu3 %v1503_v28 }
 0x10c   : > { %1149 = vmatmul.bf16.gmra.mxu1 %v1019_v17  ;;  %v4047_v17 = vld [vmem:[#allocation2 + $0x50] sm:$0xff]  }
 0x110   : > { %1788 = vmatmul.bf16.gmra.mxu0 %v4552_v27  ;;  %v1512_v27 = vsel %vm1206_vm1, %v1502_v37, %v1511_v33 }
 0x113   : > { %1336 = vmatmul.bf16.gmra.mxu2 %v4744_v44  ;;  %v1516_v44 = vrot.slane %v1514_v24, 3 }
 0x115   : > { %v1520_v60 = vor.u32 %v1519_v61, %v1516_v44 }
 0x117   : > { %1638 = vmatmul.bf16.gmra.mxu3 %v1512_v27  ;;  %v1521_v38 = vsel %vm1206_vm1, %v1511_v33, %v1520_v60 }
 0x11c   : > { %1154 = vmatmul.bf16.gmra.mxu1 %v4768_v6  ;;  %v3820_v6 = vld [vmem:[%s5319_s4 + $0x150] sm:$0xff] }
 0x11d   : > { %2065 = vmatpush.bf16.msra.mxu1 %v3820_v6 }
 0x120   : > { %1793 = vmatmul.bf16.gmra.mxu0 %v4042_v7 }
 0x121   : > { %2066 = vmatpush.bf16.msra.mxu1 %v3819_v47 }
 0x123   : > { %1341 = vmatmul.bf16.gmra.mxu2 %v4772_v42  ;;  %v3852_v42 = vld [vmem:[%s5319_s4 + $0x210] sm:$0xff] }
 0x124   : > { %2724 = vmatpush.bf16.msra.mxu0 %v3852_v42 }
 0x125   : > { %2067 = vmatpush.bf16.msra.mxu1 %v3818_v56 }
 0x127   : > { %1643 = vmatmul.bf16.gmra.mxu3 %v1521_v38  ;;  %v4048_v38 = vld [vmem:[#allocation2 + $0x18] sm:$0xff]  }
 0x128   : > { %2725 = vmatpush.bf16.msra.mxu0 %v3851_v55  ;;  %v2219_v39 = vshll.u32 %v4048_v38, 16  ;;  %v2217_v43 = vshrl.u32 %v4048_v38, 16  ;;  %v4976_v55 = vld [vmem:[#allocation2 + $0x18] sm:$0xff] }
 0x12c   : > { %1159 = vmatmul.bf16.gmra.mxu1 %v4776_v4  ;;  %v1530_v4 = vsel %vm1206_vm1, %v1520_v60, %v1529_v30  ;;  %2726 = vmatpush.bf16.msra.mxu0 %v3850_v46  ;;  %v2224_v30 = vshll.u32 %v4972_v21, 16 }
 0x12f   : > { %v4906_v35 = vpop.f32.mrf.mxu2 }
 0x130   : > { %1798 = vmatmul.bf16.gmra.mxu0 %v4043_v13  ;;  %v2221_v13 = vrot.slane %v2219_v39, 1 }
 0x132   : > { %v2222_v50 = vor.u32 %v2221_v13, %v2217_v43 }
 0x133   : > { %1346 = vmatmul.bf16.gmra.mxu2 %v4616_v23 }
 0x137   : > { %1648 = vmatmul.bf16.gmra.mxu3 %v1530_v4  ;;  %v4921_v57 = vpop.f32.mrf.mxu2  ;;  %v4050_v4 = vld [vmem:[#allocation2 + $0x18] sm:$0xe] }
 0x138   : > { %v4051_v47 = vor.u32 %v4050_v4, %v4049_v20 }
 0x139   : > { %v4918_v23 = vpop.f32.mrf.mxu1 }
 0x13a   : > { %v2443_v9 = vrot.slane %v4051_v47, 1 }
 0x13c   : > { %1164 = vmatmul.bf16.gmra.mxu1 %v4624_v26  ;;  %v2445_v46 = vsel %vm2442_vm4, %v2443_v9, %v2444_v2 }
 0x140   : > { %1803 = vmatmul.bf16.gmra.mxu0 %v4044_v51  ;;  %v2226_v51 = vrot.slane %v2224_v30, 1 }
 0x141   : > { %v4926_v62 = vpop.f32.mrf.mxu1 }
 0x143   : > { %1351 = vmatmul.bf16.gmra.mxu2 %v4803_v48  ;;  %v1544_v48 = vshll.u32 %v4136_v3, 16 }
 0x145   : > { %v1546_v28 = vrot.slane %v1544_v48, 4 }
 0x146   : > { %v4930_v26 = vpop.f32.mrf.mxu2 }
 0x147   : > { %1653 = vmatmul.bf16.gmra.mxu3 %v1539_v1  ;;  %v1547_v8 = vor.u32 %v1546_v28, %v1543_v14  ;;  %v2228_v14 = vshrl.u32 %v4972_v21, 16  ;;  %v2617_v28 = vshll.u32 %v4051_v47, 16 }
 0x149   : > { %v4938_v11 = vpop.f32.mrf.mxu1  ;;  %v1548_v32 = vsel %vm1206_vm1, %v1538_v58, %v1547_v8 }
 0x14c   : > { %1169 = vmatmul.bf16.gmra.mxu1 %v4807_v53  ;;  %v4010_v53 = vunpack.c.h.b16 %v4047_v17 }
 0x14d   : > { %v936_v37 = vpop.f32.mrf.mxu0 }
 0x14e   : > { %v4941_v16 = vpop.f32.mrf.mxu2  ;;  %v1468_v33 = vpack.c.b16 %v4010_v53, %v4010_v53 }
 0x150   : > { %1808 = vmatmul.bf16.gmra.mxu0 %v4045_v15  ;;  %v1550_v24 = vshrl.u32 %v1468_v33, 16  ;;  %v1553_v25 = vshll.u32 %v1468_v33, 16  ;;  %v1935_v15 = vshll.u32 %v4976_v55, 16 }
 0x151   : > { %v4949_v29 = vpop.f32.mrf.mxu1 }
 0x152   : > { %v1552_v44 = vrot.slane %v1550_v24, 3  ;;  %v1555_v61 = vrot.slane %v1553_v25, 4  ;;  %v2619_v24 = vrot.slane %v2617_v28, 2  ;;  %v2622_v25 = vrot.slane %v2224_v30, 2 }
 0x153   : > { %1356 = vmatmul.bf16.gmra.mxu2 %v4810_v63  ;;  %v4046_v63 = vld [vmem:[#allocation2 + $0x48] sm:$0xff]  }
 0x154   : > { %v1556_v36 = vor.u32 %v1555_v61, %v1552_v44  ;;  %v1928_v44 = vshrl.u32 %v3809_v41, 16  ;;  %v1937_v61 = vrot.slane %v1935_v15, 1 }
 0x155   : > { %v938_v0 = vpop.f32.mrf.mxu0 }
 0x156   : > { %v4953_v19 = vpop.f32.mrf.mxu2  ;;  %v1557_v6 = vsel %vm1206_vm1, %v1547_v8, %v1556_v36  ;;  %v1932_v8 = vrot.slane %v1930_v49, 1  ;;  %v4987_v36 = vld [vmem:[#allocation2 + $0x28] sm:$0xff] }
 0x157   : > { %1658 = vmatmul.bf16.gmra.mxu3 %v1548_v32  ;;  %v2232_v30 = vshll.u32 %v4987_v36, 16  ;;  %v2236_v49 = vshrl.u32 %v4987_v36, 16 }
 0x159   : > { %v4955_v27 = vpop.f32.mrf.mxu1 }
 0x15a   : > { %v4957_v22 = vpop.f32.mrf.mxu3 }
 0x15c   : > { %1174 = vmatmul.bf16.gmra.mxu1 %v4818_v18 }
 0x15d   : > { %v4959_v54 = vpop.f32.mrf.mxu0 }
 0x15e   : > { %v4962_v7 = vpop.f32.mrf.mxu2 }
 0x160   : > { %1813 = vmatmul.bf16.gmra.mxu0 %v4046_v63 }
 0x161   : > { %v4964_v60 = vpop.f32.mrf.mxu1 }
 0x162   : > { %v4966_v34 = vpop.f32.mrf.mxu3 }
 0x163   : > { %1361 = vmatmul.bf16.gmra.mxu2 %v4835_v59 }
 0x165   : > { %v4969_v31 = vpop.f32.mrf.mxu0 }
 0x166   : > { %v1322_v18 = vpop.f32.mrf.mxu2 }
 0x167   : > { %1663 = vmatmul.bf16.gmra.mxu3 %v1557_v6 }
 0x169   : > { %v1140_v42 = vpop.f32.mrf.mxu1 }
 0x16a   : > { %v1624_v5 = vpop.f32.mrf.mxu3  ;;  %v1141_v52 = vadd.f32 %v1140_v42, %v936_v37  ;;  %v2227_v37 = vsel %vm1926_vm3, %v2222_v50, %v2226_v51 }
 0x16c   : > { %v1367_v40 = vadd.f32 %v1322_v18, %v1141_v52  ;;  %1179 = vmatmul.bf16.gmra.mxu1 %v4827_v12  ;;  %v2614_v12 = vshrl.u32 %v4051_v47, 16  ;;  %v1933_v18 = vor.u32 %v1932_v8, %v1928_v44  ;;  %v2234_v47 = vrot.slane %v2232_v30, 1 }
 0x16d   : > { %v1779_v59 = vpop.f32.mrf.mxu0 }
 0x16e   : > { %v1669_v10 = vadd.f32 %v1624_v5, %v1367_v40  ;;  %v1324_v45 = vpop.f32.mrf.mxu2  ;;  %v2616_v53 = vrot.slane %v2614_v12, 1  ;;  %v1938_v5 = vsel %vm1926_vm3, %v1933_v18, %v1937_v61  ;;  %v1939_v12 = vshrl.u32 %v4976_v55, 16 }
 0x170   : > { %1818 = vmatmul.bf16.gmra.mxu0 %v4047_v17  ;;  %v4978_v58 = vadd.f32 %v1779_v59, %v1669_v10  ;;  %v2620_v39 = vor.u32 %v2619_v24, %v2616_v53  ;;  %v2230_v59 = vor.u32 %v2228_v14, %v2226_v51  ;;  %v3811_v10 = vld [vmem:[#allocation2 + $0x20] sm:$0xff]  ;;  %v1941_v28 = vor.u32 %v1939_v12, %v1937_v61 }
 0x171   : > { %v1142_v1 = vpop.f32.mrf.mxu1 }
 0x172   : > { %v1626_v3 = vpop.f32.mrf.mxu3  ;;  %v1143_v48 = vadd.f32 %v1142_v1, %v938_v0  ;;  %v2621_v0 = vrot.slane %v2228_v14, 1  ;;  %v2235_v50 = vsel %vm1926_vm3, %v2230_v59, %v2234_v47  ;;  %v2446_v1 = vrot.slane %v4987_v36, 1 }
 0x173   : > { %2357 = vmatmul.bf16.vlgmr.msra.gmra.mxu2 %v2227_v37  ;;  %v2238_v36 = vor.u32 %v2236_v49, %v2234_v47 }
 0x174   : > { %v1368_v17 = vadd.f32 %v1324_v45, %v1143_v48  ;;  %v2623_v42 = vor.u32 %v2622_v25, %v2621_v0  ;;  %v2447_v51 = vsel %vm2442_vm4, %v2444_v2, %v2446_v1  ;;  %v1943_v48 = vshll.u32 %v3811_v10, 16 }
 0x175   : > { %v1781_v56 = vpop.f32.mrf.mxu0 }
 0x176   : > { %v1670_v32 = vadd.f32 %v1626_v3, %v1368_v17  ;;  %v1327_v33 = vpop.f32.mrf.mxu2  ;;  %v2624_v4 = vsel %vm2612_vm5, %v2620_v39, %v2623_v42  ;;  %v2626_v17 = vrot.slane %v2232_v30, 2  ;;  %v1945_v53 = vrot.slane %v1943_v48, 1  ;;  %v3812_v39 = vld [vmem:[#allocation2 + $0x28] sm:$0xff] }
 0x177   : > { %2527 = vmatmul.bf16.vlgmr.msra.gmra.mxu3 %v2445_v46 }
 0x178   : > { %v4985_v63 = vadd.f32 %v1781_v56, %v1670_v32  ;;  %v5003_v56 = vld [vmem:[#allocation2 + $0x30] sm:$0xff]  ;;  %v1946_v2 = vsel %vm1926_vm3, %v1941_v28, %v1945_v53 }
 0x179   : > { %v1145_v38 = vpop.f32.mrf.mxu1  ;;  %v2240_v0 = vshll.u32 %v5003_v56, 16 }
 0x17a   : > { %v1629_v6 = vpop.f32.mrf.mxu3  ;;  %v1146_v21 = vadd.f32 %v1145_v38, %v4959_v54 }
 0x17c   : > { %v1369_v52 = vadd.f32 %v1327_v33, %v1146_v21  ;;  %2068 = vmatmul.bf16.vlgmr.msra.gmra.mxu1 %v1938_v5 }
 0x17d   : > { %v1784_v13 = vpop.f32.mrf.mxu0 }
 0x17e   : > { %v1671_v20 = vadd.f32 %v1629_v6, %v1369_v52  ;;  %v1329_v40 = vpop.f32.mrf.mxu2  ;;  %v2242_v6 = vrot.slane %v2240_v0, 1 }
 0x180   : > { %2727 = vmatmul.bf16.vlgmr.msra.gmra.mxu0 %v2624_v4  ;;  %v4993_v43 = vadd.f32 %v1784_v13, %v1671_v20  ;;  %v2243_v52 = vsel %vm1926_vm3, %v2238_v36, %v2242_v6  ;;  %v2244_v13 = vshrl.u32 %v5003_v56, 16  ;;  %v1947_v4 = vshrl.u32 %v3811_v10, 16 }
 0x181   : > { %v1147_v54 = vpop.f32.mrf.mxu1 }
 0x182   : > { %v1631_v41 = vpop.f32.mrf.mxu3  ;;  %v1148_v45 = vadd.f32 %v1147_v54, %v4969_v31  ;;  %v2625_v31 = vrot.slane %v2236_v49, 1  ;;  %v2629_v54 = vrot.slane %v2244_v13, 1 }
 0x183   : > { %2362 = vmatmul.bf16.gmra.mxu2 %v2235_v50 }
 0x184   : > { %v1370_v3 = vadd.f32 %v1329_v40, %v1148_v45  ;;  %v2627_v24 = vor.u32 %v2626_v17, %v2625_v31  ;;  %v1951_v40 = vshll.u32 %v3812_v39, 16  ;;  %v1949_v45 = vor.u32 %v1947_v4, %v1945_v53 }
 0x185   : > { %v1786_v9 = vpop.f32.mrf.mxu0  ;;  %v2246_v17 = vor.u32 %v2244_v13, %v2242_v6 }
 0x186   : > { %v1672_v37 = vadd.f32 %v1631_v41, %v1370_v3  ;;  %v1332_v14 = vpop.f32.mrf.mxu2  ;;  %v2628_v44 = vsel %vm2612_vm5, %v2623_v42, %v2627_v24  ;;  %v2630_v41 = vrot.slane %v2240_v0, 2  ;;  %v1953_v49 = vrot.slane %v1951_v40, 1 }
 0x187   : > { %2532 = vmatmul.bf16.gmra.mxu3 %v2447_v51 }
 0x188   : > { %v5001_v15 = vadd.f32 %v1786_v9, %v1672_v37  ;;  %v2631_v12 = vor.u32 %v2630_v41, %v2629_v54 }
 0x189   : > { %v1150_v46 = vpop.f32.mrf.mxu1 }
 0x18a   : > { %v1634_v8 = vpop.f32.mrf.mxu3  ;;  %v1151_v32 = vadd.f32 %v1150_v46, %v4918_v23  ;;  %v2448_v23 = vrot.slane %v5003_v56, 1  ;;  %v2632_v28 = vsel %vm2612_vm5, %v2627_v24, %v2631_v12 }
 0x18c   : > { %v1371_v33 = vadd.f32 %v1332_v14, %v1151_v32  ;;  %2073 = vmatmul.bf16.gmra.mxu1 %v1946_v2  ;;  %v2449_v20 = vsel %vm2442_vm4, %v2446_v1, %v2448_v23  ;;  %v1954_v1 = vsel %vm1926_vm3, %v1949_v45, %v1953_v49 }
 0x18d   : > { %v1789_v55 = vpop.f32.mrf.mxu0 }
 0x18e   : > { %v1673_v25 = vadd.f32 %v1634_v8, %v1371_v33  ;;  %v1334_v61 = vpop.f32.mrf.mxu2 }
 0x190   : > { %2732 = vmatmul.bf16.gmra.mxu0 %v2628_v44  ;;  %v5009_v38 = vadd.f32 %v1789_v55, %v1673_v25  ;;  %v1955_v44 = vshrl.u32 %v3812_v39, 16 }
 0x191   : > { %v1152_v18 = vpop.f32.mrf.mxu1 }
 0x192   : > { %v1636_v21 = vpop.f32.mrf.mxu3  ;;  %v1153_v5 = vadd.f32 %v1152_v18, %v4926_v62  ;;  %v5018_v62 = vld [vmem:[#allocation2 + $0x38] sm:$0xff]  ;;  %v5031_v18 = vld [vmem:[#allocation2 + $0x40] sm:$0xff] }
 0x193   : > { %2367 = vmatmul.bf16.gmra.mxu2 %v2243_v52  ;;  %v2248_v37 = vshll.u32 %v5018_v62, 16  ;;  %v2450_v33 = vrot.slane %v5018_v62, 1  ;;  %v2252_v24 = vshrl.u32 %v5018_v62, 16  ;;  %v2256_v4 = vshll.u32 %v5031_v18, 16 }
 0x194   : > { %v1372_v30 = vadd.f32 %v1334_v61, %v1153_v5 }
 0x195   : > { %v1791_v42 = vpop.f32.mrf.mxu0  ;;  %v2250_v46 = vrot.slane %v2248_v37, 1  ;;  %v2451_v25 = vsel %vm2442_vm4, %v2448_v23, %v2450_v33  ;;  %v2633_v5 = vrot.slane %v2252_v24, 1  ;;  %v2634_v52 = vrot.slane %v2248_v37, 2 }
 0x196   : > { %v1674_v59 = vadd.f32 %v1636_v21, %v1372_v30  ;;  %v1337_v47 = vpop.f32.mrf.mxu2  ;;  %v1957_v21 = vor.u32 %v1955_v44, %v1953_v49  ;;  %v2258_v45 = vrot.slane %v2256_v4, 1 }
 0x197   : > { %2537 = vmatmul.bf16.gmra.mxu3 %v2449_v20  ;;  %v2251_v2 = vsel %vm1926_vm3, %v2246_v17, %v2250_v46 }
 0x198   : > { %v5016_v50 = vadd.f32 %v1791_v42, %v1674_v59  ;;  %v2635_v59 = vor.u32 %v2634_v52, %v2633_v5  ;;  %v5054_v52 = vld [vmem:[#allocation2 + $0x40] sm:$0xff] }
 0x199   : > { %v1155_v3 = vpop.f32.mrf.mxu1 }
 0x19a   : > { %v1639_v9 = vpop.f32.mrf.mxu3  ;;  %v1156_v51 = vadd.f32 %v1155_v3, %v4938_v11  ;;  %v3813_v11 = vld [vmem:[#allocation2 + $0x30] sm:$0xff]  ;;  %v2636_v54 = vsel %vm2612_vm5, %v2631_v12, %v2635_v59  ;;  %v2254_v3 = vor.u32 %v2252_v24, %v2250_v46 }
 0x19b   : > { %v1959_v61 = vshll.u32 %v3813_v11, 16 }
 0x19c   : > { %v1373_v10 = vadd.f32 %v1337_v47, %v1156_v51  ;;  %2078 = vmatmul.bf16.gmra.mxu1 %v1954_v1  ;;  %v3814_v51 = vld [vmem:[#allocation2 + $0x38] sm:$0xff] }
 0x19d   : > { %v1794_v48 = vpop.f32.mrf.mxu0  ;;  %v1961_v42 = vrot.slane %v1959_v61, 1 }
 0x19e   : > { %v1675_v14 = vadd.f32 %v1639_v9, %v1373_v10  ;;  %v1339_v31 = vpop.f32.mrf.mxu2  ;;  %v2259_v10 = vsel %vm1926_vm3, %v2254_v3, %v2258_v45 }
 0x19f   : > { %v1962_v23 = vsel %vm1926_vm3, %v1957_v21, %v1961_v42 }
 0x1a0   : > { %2737 = vmatmul.bf16.gmra.mxu0 %v2632_v28  ;;  %v5024_v56 = vadd.f32 %v1794_v48, %v1675_v14  ;;  %v2260_v48 = vshrl.u32 %v5031_v18, 16  ;;  %v1963_v28 = vshrl.u32 %v3813_v11, 16 }
 0x1a1   : > { %v1157_v8 = vpop.f32.mrf.mxu1 }
 0x1a2   : > { %v1641_v53 = vpop.f32.mrf.mxu3  ;;  %v1158_v32 = vadd.f32 %v1157_v8, %v4949_v29  ;;  %v2637_v8 = vrot.slane %v2260_v48, 1 }
 0x1a3   : > { %2372 = vmatmul.bf16.gmra.mxu2 %v2251_v2  ;;  %v1965_v2 = vor.u32 %v1963_v28, %v1961_v42 }
 0x1a4   : > { %v1374_v55 = vadd.f32 %v1339_v31, %v1158_v32  ;;  %v1967_v31 = vshll.u32 %v3814_v51, 16  ;;  %v5046_v32 = vld [vmem:[#allocation2 + $0x48] sm:$0xff] }
 0x1a5   : > { %v1796_v0 = vpop.f32.mrf.mxu0 }
 0x1a6   : > { %v1676_v36 = vadd.f32 %v1641_v53, %v1374_v55  ;;  %v1342_v6 = vpop.f32.mrf.mxu2  ;;  %v2638_v53 = vrot.slane %v2256_v4, 2  ;;  %v1969_v24 = vrot.slane %v1967_v31, 1 }
 0x1a7   : > { %2542 = vmatmul.bf16.gmra.mxu3 %v2451_v25 }
 0x1a8   : > { %v5033_v29 = vadd.f32 %v1796_v0, %v1676_v36  ;;  %v2639_v44 = vor.u32 %v2638_v53, %v2637_v8  ;;  %v1970_v11 = vsel %vm1926_vm3, %v1965_v2, %v1969_v24  ;;  %v5072_v2 = vld [vmem:[#allocation2 + $0x48] sm:$0xff] }
 0x1a9   : > { %v1160_v13 = vpop.f32.mrf.mxu1 }
 0x1aa   : > { %v1644_v30 = vpop.f32.mrf.mxu3  ;;  %v1161_v20 = vadd.f32 %v1160_v13, %v4955_v27  ;;  %v2452_v27 = vrot.slane %v5031_v18, 1  ;;  %v2640_v18 = vsel %vm2612_vm5, %v2635_v59, %v2639_v44 }
 0x1ac   : > { %v1375_v39 = vadd.f32 %v1342_v6, %v1161_v20  ;;  %2083 = vmatmul.bf16.gmra.mxu1 %v1962_v23  ;;  %v2453_v14 = vsel %vm2442_vm4, %v2450_v33, %v2452_v27  ;;  %v2264_v33 = vshll.u32 %v5046_v32, 16  ;;  %v2454_v20 = vrot.slane %v5046_v32, 1 }
 0x1ad   : > { %v1799_v40 = vpop.f32.mrf.mxu0 }
 0x1ae   : > { %v1677_v47 = vadd.f32 %v1644_v30, %v1375_v39  ;;  %v1344_v41 = vpop.f32.mrf.mxu2  ;;  %v2266_v5 = vrot.slane %v2264_v33, 1  ;;  %v2262_v30 = vor.u32 %v2260_v48, %v2258_v45  ;;  %v2268_v39 = vshrl.u32 %v5046_v32, 16 }
 0x1b0   : > { %2742 = vmatmul.bf16.gmra.mxu0 %v2636_v54  ;;  %v5039_v62 = vadd.f32 %v1799_v40, %v1677_v47  ;;  %v2267_v23 = vsel %vm1926_vm3, %v2262_v30, %v2266_v5  ;;  %v1975_v40 = vshll.u32 %v5054_v52, 16  ;;  %v2455_v54 = vsel %vm2442_vm4, %v2452_v27, %v2454_v20 }
 0x1b1   : > { %v1162_v9 = vpop.f32.mrf.mxu1 }
 0x1b2   : > { %v1646_v49 = vpop.f32.mrf.mxu3  ;;  %v1163_v1 = vadd.f32 %v1162_v9, %v4964_v60  ;;  %v2641_v9 = vrot.slane %v2268_v39, 1 }
 0x1b3   : > { %2377 = vmatmul.bf16.gmra.mxu2 %v2259_v10 }
 0x1b4   : > { %v1376_v37 = vadd.f32 %v1344_v41, %v1163_v1  ;;  %v1971_v41 = vshrl.u32 %v3814_v51, 16  ;;  %v5064_v1 = vld [vmem:[#allocation2 + $0x50] sm:$0xff] }
 0x1b5   : > { %v1801_v12 = vpop.f32.mrf.mxu0  ;;  %v2272_v31 = vshll.u32 %v5064_v1, 16 }
 0x1b6   : > { %v1678_v17 = vadd.f32 %v1646_v49, %v1376_v37  ;;  %v1347_v46 = vpop.f32.mrf.mxu2  ;;  %v2642_v49 = vrot.slane %v2264_v33, 2 }
 0x1b7   : > { %2547 = vmatmul.bf16.gmra.mxu3 %v2453_v14  ;;  %v2274_v32 = vrot.slane %v2272_v31, 1 }
 0x1b8   : > { %v5048_v60 = vadd.f32 %v1801_v12, %v1678_v17  ;;  %v1973_v12 = vor.u32 %v1971_v41, %v1969_v24  ;;  %v2643_v28 = vor.u32 %v2642_v49, %v2641_v9 }
 0x1b9   : > { %v1165_v55 = vpop.f32.mrf.mxu1 }
 0x1ba   : > { %v1649_v0 = vpop.f32.mrf.mxu3  ;;  %v1166_v25 = vadd.f32 %v1165_v55, %v4906_v35  ;;  %v2644_v8 = vsel %vm2612_vm5, %v2639_v44, %v2643_v28  ;;  %v1983_v44 = vshll.u32 %v5072_v2, 16 }
 0x1bc   : > { %v1377_v61 = vadd.f32 %v1347_v46, %v1166_v25  ;;  %2088 = vmatmul.bf16.gmra.mxu1 %v1970_v11  ;;  %v2456_v25 = vrot.slane %v5064_v1, 1 }
 0x1bd   : > { %v1804_v36 = vpop.f32.mrf.mxu0 }
 0x1be   : > { %v1679_v6 = vadd.f32 %v1649_v0, %v1377_v61  ;;  %v1349_v21 = vpop.f32.mrf.mxu2  ;;  %v2270_v0 = vor.u32 %v2268_v39, %v2266_v5  ;;  %v2276_v61 = vshrl.u32 %v5064_v1, 16 }
 0x1c0   : > { %2747 = vmatmul.bf16.gmra.mxu0 %v2640_v18  ;;  %v5056_v13 = vadd.f32 %v1804_v36, %v1679_v6  ;;  %v2275_v11 = vsel %vm1926_vm3, %v2270_v0, %v2274_v32  ;;  %v2457_v18 = vsel %vm2442_vm4, %v2454_v20, %v2456_v25  ;;  %v2645_v30 = vrot.slane %v2276_v61, 1 }
 0x1c1   : > { %v1167_v35 = vpop.f32.mrf.mxu1  ;;  %v2278_v1 = vor.u32 %v2276_v61, %v2274_v32 }
 0x1c2   : > { %v1651_v42 = vpop.f32.mrf.mxu3  ;;  %v1168_v4 = vadd.f32 %v1167_v35, %v4921_v57  ;;  %v1977_v57 = vrot.slane %v1975_v40, 1  ;;  %v2646_v35 = vrot.slane %v2272_v31, 2 }
 0x1c3   : > { %2382 = vmatmul.bf16.gmra.mxu2 %v2267_v23  ;;  %v5085_v23 = vld [vmem:[#allocation2 + $0x58] sm:$0xff] }
 0x1c4   : > { %v1378_v59 = vadd.f32 %v1349_v21, %v1168_v4  ;;  %v1978_v27 = vsel %vm1926_vm3, %v1973_v12, %v1977_v57  ;;  %v1985_v4 = vrot.slane %v1983_v44, 1  ;;  %v2458_v31 = vrot.slane %v5085_v23, 1  ;;  %v2591_v44 = vld [vmem:[#allocation2 + $0x60] sm:$0x3] }
 0x1c5   : > { %v1806_v47 = vpop.f32.mrf.mxu0 }
 0x1c6   : > { %v1680_v3 = vadd.f32 %v1651_v42, %v1378_v59  ;;  %v1352_v45 = vpop.f32.mrf.mxu2  ;;  %v1979_v42 = vshrl.u32 %v5054_v52, 16  ;;  %v2459_v32 = vsel %vm2442_vm4, %v2456_v25, %v2458_v31 }
 0x1c7   : > { %2552 = vmatmul.bf16.gmra.mxu3 %v2455_v54  ;;  %v2647_v54 = vor.u32 %v2646_v35, %v2645_v30 }
 0x1c8   : > { %v5066_v10 = vadd.f32 %v1806_v47, %v1680_v3  ;;  %v1981_v59 = vor.u32 %v1979_v42, %v1977_v57  ;;  %v2610_v42 = vunpack.c.l.b16 %v2591_v44 }
 0x1c9   : > { %v1170_v48 = vpop.f32.mrf.mxu1  ;;  %v2648_v52 = vsel %vm2612_vm5, %v2643_v28, %v2647_v54 }
 0x1ca   : > { %v1654_v37 = vpop.f32.mrf.mxu3  ;;  %v1171_v14 = vadd.f32 %v1170_v48, %v4930_v26  ;;  %v1986_v20 = vsel %vm1926_vm3, %v1981_v59, %v1985_v4  ;;  %v5091_v48 = vld [vmem:[#allocation2 + $0x50] sm:$0xff] }
 0x1cc   : > { %v1379_v51 = vadd.f32 %v1352_v45, %v1171_v14  ;;  %2093 = vmatmul.bf16.gmra.mxu1 %v1978_v27  ;;  %v2280_v45 = vshll.u32 %v5085_v23, 16 }
 0x1cd   : > { %v1809_v17 = vpop.f32.mrf.mxu0 }
 0x1ce   : > { %v1681_v46 = vadd.f32 %v1654_v37, %v1379_v51  ;;  %v1354_v53 = vpop.f32.mrf.mxu2  ;;  %v2150_v37 = vld [vmem:[#allocation2 + $0x60] sm:$0x1] }
 0x1cf   : > { %v2205_v28 = vunpack.c.l.b16 %v2150_v37 }
 0x1d0   : > { %2752 = vmatmul.bf16.gmra.mxu0 %v2644_v8  ;;  %v5074_v55 = vadd.f32 %v1809_v17, %v1681_v46  ;;  %v2284_v17 = vshrl.u32 %v5085_v23, 16  ;;  %v1991_v46 = vshll.u32 %v5091_v48, 16 }
 0x1d1   : > { %v1172_v26 = vpop.f32.mrf.mxu1 }
 0x1d2   : > { %v1656_v24 = vpop.f32.mrf.mxu3  ;;  %v1173_v33 = vadd.f32 %v1172_v26, %v4941_v16  ;;  %v1993_v61 = vrot.slane %v1991_v46, 1  ;;  %v1995_v46 = vshrl.u32 %v5091_v48, 16 }
 0x1d3   : > { %2387 = vmatmul.bf16.gmra.mxu2 %v2275_v11  ;;  %v2215_v11 = vpack.c.b16 %v2205_v28, %v2205_v28 }
 0x1d4   : > { %v1380_v36 = vadd.f32 %v1354_v53, %v1173_v33  ;;  %v2650_v33 = vrot.slane %v2280_v45, 2 }
 0x1d5   : > { %v1811_v6 = vpop.f32.mrf.mxu0  ;;  %v2288_v25 = vshll.u32 %v2215_v11, 16 }
 0x1d6   : > { %v1682_v21 = vadd.f32 %v1656_v24, %v1380_v36  ;;  %v1357_v5 = vpop.f32.mrf.mxu2  ;;  %v2649_v24 = vrot.slane %v2284_v17, 1 }
 0x1d7   : > { %2557 = vmatmul.bf16.gmra.mxu3 %v2457_v18 }
 0x1d8   : > { %v5083_v16 = vadd.f32 %v1811_v6, %v1682_v21  ;;  %v1860_v6 = vld [vmem:[#allocation2 + $0x58] sm:$0x1]  ;;  %v2651_v35 = vor.u32 %v2650_v33, %v2649_v24 }
 0x1d9   : > { %v1175_v39 = vpop.f32.mrf.mxu1 }
 0x1da   : > { %v1659_v40 = vpop.f32.mrf.mxu3  ;;  %v1176_v47 = vadd.f32 %v1175_v39, %v4953_v19  ;;  %v2282_v19 = vrot.slane %v2280_v45, 1  ;;  %v1915_v39 = vunpack.c.l.b16 %v1860_v6 }
 0x1dc   : > { %v1381_v41 = vadd.f32 %v1357_v5, %v1176_v47  ;;  %2098 = vmatmul.bf16.gmra.mxu1 %v1986_v20  ;;  %v2283_v51 = vsel %vm1926_vm3, %v2278_v1, %v2282_v19  ;;  %v2652_v47 = vsel %vm2612_vm5, %v2647_v54, %v2651_v35  ;;  %v1925_v45 = vpack.c.b16 %v1915_v39, %v1915_v39  ;;  %v2899_v39 = vpop.permute.xlu2 %2898 }
 0x1dd   : > { %v1814_v3 = vpop.f32.mrf.mxu0 }
 0x1de   : > { %v1683_v9 = vadd.f32 %v1659_v40, %v1381_v41  ;;  %v1359_v49 = vpop.f32.mrf.mxu2  ;;  %v2290_v41 = vrot.slane %v2288_v25, 1 }
 0x1e0   : > { %2757 = vmatmul.bf16.gmra.mxu0 %v2648_v52  ;;  %v5093_v57 = vadd.f32 %v1814_v3, %v1683_v9  ;;  %v2611_v3 = vpack.c.b16 %v2610_v42, %v2610_v42 }
 0x1e1   : > { %v1177_v12 = vpop.f32.mrf.mxu1 }
 0x1e2   : > { %v1661_v14 = vpop.f32.mrf.mxu3  ;;  %v1178_v27 = vadd.f32 %v1177_v12, %v4962_v7  ;;  %v1987_v7 = vshrl.u32 %v5072_v2, 16  ;;  %v2654_v12 = vshrl.u32 %v2611_v3, 16 }
 0x1e3   : > { %2392 = vmatmul.bf16.gmra.mxu2 %v2283_v51 }
 0x1e4   : > { %v1382_v8 = vadd.f32 %v1359_v49, %v1178_v27  ;;  %v1989_v5 = vor.u32 %v1987_v7, %v1985_v4  ;;  %v2460_v49 = vrot.slane %v2215_v11, 1  ;;  %v1999_v27 = vshll.u32 %v1925_v45, 16 }
 0x1e5   : > { %v1816_v53 = vpop.f32.mrf.mxu0 }
 0x1e6   : > { %v1684_v0 = vadd.f32 %v1661_v14, %v1382_v8  ;;  %v1362_v26 = vpop.f32.mrf.mxu2  ;;  %v1994_v23 = vsel %vm1926_vm3, %v1989_v5, %v1993_v61  ;;  %v2657_v14 = vshll.u32 %v2611_v3, 16  ;;  %v2461_v28 = vsel %vm2442_vm4, %v2458_v31, %v2460_v49 }
 0x1e7   : > { %2562 = vmatmul.bf16.gmra.mxu3 %v2459_v32  ;;  %v1997_v32 = vor.u32 %v1995_v46, %v1993_v61 }
 0x1e8   : > { %v5102_v36 = vadd.f32 %v1816_v53, %v1684_v0  ;;  %v2659_v53 = vrot.slane %v2657_v14, 2  ;;  %v2001_v0 = vrot.slane %v1999_v27, 1 }
 0x1e9   : > { %v1180_v18 = vpop.f32.mrf.mxu1 }
 0x1ea   : > { %v1664_v21 = vpop.f32.mrf.mxu3  ;;  %v1181_v30 = vadd.f32 %v1180_v18, %v4957_v22  ;;  %v2286_v22 = vor.u32 %v2284_v17, %v2282_v19  ;;  %v2656_v17 = vrot.slane %v2654_v12, 1  ;;  %v2002_v7 = vsel %vm1926_vm3, %v1997_v32, %v2001_v0  ;;  %v2914_v32 = vpop.permute.xlu2 %2913 }
 0x1ec   : > { %v1383_v40 = vadd.f32 %v1362_v26, %v1181_v30  ;;  %2103 = vmatmul.bf16.gmra.mxu1 %v1994_v23  ;;  %v2291_v37 = vsel %vm1926_vm3, %v2286_v22, %v2290_v41  ;;  %v2660_v11 = vor.u32 %v2659_v53, %v2656_v17 }
 0x1ed   : > { %v1819_v59 = vpop.f32.mrf.mxu0 }
 0x1ee   : > { %v1685_v2 = vadd.f32 %v1664_v21, %v1383_v40  ;;  %v1364_v20 = vpop.f32.mrf.mxu2  ;;  %v2661_v48 = vsel %vm2612_vm5, %v2651_v35, %v2660_v11  ;;  %v2904_v40 = vpop.permute.xlu0 %2903 }
 0x1f0   : > { %2762 = vmatmul.bf16.gmra.mxu0 %v2652_v47  ;;  %v5107_v4 = vadd.f32 %v1819_v59, %v1685_v2 }
 0x1f1   : > { %v1182_v9 = vpop.f32.mrf.mxu1 }
 0x1f2   : > { %v1666_v52 = vpop.f32.mrf.mxu3  ;;  %v1183_v1 = vadd.f32 %v1182_v9, %v4966_v34 }
 0x1f3   : > { %2397 = vmatmul.bf16.gmra.mxu2 %v2291_v37  ;;  %v2909_v37 = vpop.permute.xlu1 %2908 }
 0x1f4   : > { %v1384_v54 = vadd.f32 %v1364_v20, %v1183_v1 }
 0x1f5   : > { %v1821_v51 = vpop.f32.mrf.mxu0 }
 0x1f6   : > { %v1686_v8 = vadd.f32 %v1666_v52, %v1384_v54  ;;  %v2358_v19 = vpop.f32.mrf.mxu2 }
 0x1f7   : > { %2567 = vmatmul.bf16.gmra.mxu3 %v2461_v28 }
 0x1f8   : > { %v5113_v34 = vadd.f32 %v1821_v51, %v1686_v8 }
 0x1f9   : > { %v2069_v26 = vpop.f32.mrf.mxu1 }
 0x1fa   : > { %v2528_v24 = vpop.f32.mrf.mxu3  ;;  %v2114_v33 = vadd.f32 %v2069_v26, %v4978_v58 }
 0x1fc   : > { %v2403_v44 = vadd.f32 %v2358_v19, %v2114_v33  ;;  %2108 = vmatmul.bf16.gmra.mxu1 %v2002_v7 }
 0x1fd   : > { %v2728_v31 = vpop.f32.mrf.mxu0 }
 0x1fe   : > { %v2360_v6 = vpop.f32.mrf.mxu2  ;;  %v2573_v18 = vadd.f32 %v2528_v24, %v2403_v44 }
 0x200   : > { %2767 = vmatmul.bf16.gmra.mxu0 %v2661_v48  ;;  %v5119_v30 = vadd.f32 %v2728_v31, %v2573_v18 }
 0x201   : > { %v2071_v21 = vpop.f32.mrf.mxu1 }
 0x202   : > { %v2530_v61 = vpop.f32.mrf.mxu3  ;;  %v2115_v5 = vadd.f32 %v2071_v21, %v4985_v63  ;;  %v2986_v59 = vmul.f32 %v2899_v39, %v5119_v30  ;;  %v2919_v21 = vpop.permute.xlu0 %2918 }
 0x204   : > { %v2404_v25 = vadd.f32 %v2360_v6, %v2115_v5  ;;  %v3031_v63 = vmul.f32 %v2986_v59, %v5119_v30 }
 0x205   : > { %v2730_v42 = vpop.f32.mrf.mxu0 }
 0x206   : > { %v2574_v58 = vadd.f32 %v2530_v61, %v2404_v25  ;;  %v2363_v23 = vpop.f32.mrf.mxu2 }
 0x208   : > { %v5122_v2 = vadd.f32 %v2730_v42, %v2574_v58 }
 0x209   : > { %v2074_v35 = vpop.f32.mrf.mxu1 }
 0x20a   : > { %v2533_v47 = vpop.f32.mrf.mxu3  ;;  %v2987_v20 = vmul.f32 %v2904_v40, %v5122_v2  ;;  %v2116_v41 = vadd.f32 %v2074_v35, %v4993_v43 }
 0x20c   : > { %v3005_v3 = vadd.f32 %v2987_v20, %v2986_v59  ;;  %v3032_v45 = vmul.f32 %v2987_v20, %v5122_v2  ;;  %v2405_v22 = vadd.f32 %v2363_v23, %v2116_v41  ;;  %v2924_v20 = vpop.permute.xlu1 %2923 }
 0x20d   : > { %v2733_v9 = vpop.f32.mrf.mxu0 }
 0x20e   : > { %v3049_v52 = vadd.f32 %v3032_v45, %v3031_v63  ;;  %v2575_v49 = vadd.f32 %v2533_v47, %v2405_v22  ;;  %v2365_v1 = vpop.f32.mrf.mxu2  ;;  %v2791_v45 = vlaneseq }
 0x210   : > { %v5128_v12 = vadd.f32 %v2733_v9, %v2575_v49 }
 0x211   : > { %v2076_v14 = vpop.f32.mrf.mxu1 }
 0x212   : > { %v2535_v27 = vpop.f32.mrf.mxu3  ;;  %v2988_v54 = vmul.f32 %v2909_v37, %v5128_v12  ;;  %v2117_v51 = vadd.f32 %v2076_v14, %v5001_v15  ;;  %v2792_v37 = vand.u32 127, %v2791_v45 }
 0x214   : > { %v3006_v43 = vadd.f32 %v3005_v3, %v2988_v54  ;;  %v3033_v28 = vmul.f32 %v2988_v54, %v5128_v12  ;;  %v2406_v46 = vadd.f32 %v2365_v1, %v2117_v51  ;;  %v2929_v51 = vpop.permute.xlu2 %2928  ;;  %vm2793_vm6 = vcmp.ge.s32.totalorder %v2792_v37, 12 }
 0x215   : > { %v2735_v8 = vpop.f32.mrf.mxu0  ;;  %vm2794_vm7 = vcmp.lt.s32.totalorder %v2792_v37, 16  ;;  %v5229_v37 = vld [vmem:[%s5165_s23 + $0x44] sm:$0xf] }
 0x216   : > { %v3050_v19 = vadd.f32 %v3049_v52, %v3033_v28  ;;  %v2576_v17 = vadd.f32 %v2535_v27, %v2406_v46  ;;  %v2368_v53 = vpop.f32.mrf.mxu2  ;;  %vm2795_vm8 = vmand %vm2793_vm6, %vm2794_vm7 }
 0x217   : > { %vm5172_vm9 = vmpackc.low %vm2795_vm8, %vm2795_vm8 }
 0x218   : > { %v5133_v0 = vadd.f32 %v2735_v8, %v2576_v17 }
 0x219   : > { %v2079_v26 = vpop.f32.mrf.mxu1 }
 0x21a   : > { %v2538_v24 = vpop.f32.mrf.mxu3  ;;  %v2989_v33 = vmul.f32 %v2914_v32, %v5133_v0  ;;  %v2118_v11 = vadd.f32 %v2079_v26, %v5009_v38 }
 0x21c   : > { %v3007_v7 = vadd.f32 %v3006_v43, %v2989_v33  ;;  %v3034_v15 = vmul.f32 %v2989_v33, %v5133_v0  ;;  %v2407_v44 = vadd.f32 %v2368_v53, %v2118_v11  ;;  %v2818_v33 = vpack.c.bf16 %v5119_v30, %v5119_v30  ;;  %v2803_v30 = vld [vmem:[%s5165_s23 + $0xc] sm:$0xf] }
 0x21d   : > { %v2738_v31 = vpop.f32.mrf.mxu0  ;;  %v2819_v11 = vpack.c.bf16 %v5122_v2, %v5122_v2  ;;  %v2805_v2 = vld [vmem:[%s5165_s23 + $0x14] sm:$0xf] }
 0x21e   : > { %v3051_v48 = vadd.f32 %v3050_v19, %v3034_v15  ;;  %v2577_v6 = vadd.f32 %v2538_v24, %v2407_v44  ;;  %v2370_v18 = vpop.f32.mrf.mxu2  ;;  %v2800_v15 = vld [vmem:[%s5165_s23] sm:$0xf] }
 0x220   : > { %v5138_v61 = vadd.f32 %v2738_v31, %v2577_v6  ;;  %v2801_v31 = vld [vmem:[%s5165_s23 + $0x4] sm:$0xf]  ;;  %v2802_v6 = vld [vmem:[%s5165_s23 + $0x8] sm:$0xf] }
 0x221   : > { %v2081_v5 = vpop.f32.mrf.mxu1 }
 0x222   : > { %v2540_v25 = vpop.f32.mrf.mxu3  ;;  %v2990_v42 = vmul.f32 %v2919_v21, %v5138_v61  ;;  %v2119_v58 = vadd.f32 %v2081_v5, %v5016_v50  ;;  %v2804_v21 = vld [vmem:[%s5165_s23 + $0x10] sm:$0xf] }
 0x224   : > { %v3008_v23 = vadd.f32 %v3007_v7, %v2990_v42  ;;  %v3035_v38 = vmul.f32 %v2990_v42, %v5138_v61  ;;  %v2408_v39 = vadd.f32 %v2370_v18, %v2119_v58  ;;  %v2934_v7 = vpop.permute.xlu0 %2933  ;;  %v2820_v18 = vpack.c.bf16 %v5128_v12, %v5128_v12  ;;  %v2806_v58 = vld [vmem:[%s5165_s23 + $0x18] sm:$0xf]  ;;  %v2808_v12 = vld [vmem:[%s5165_s23 + $0x20] sm:$0xf] }
 0x225   : > { %v2740_v40 = vpop.f32.mrf.mxu0  ;;  %v2821_v42 = vpack.c.bf16 %v5133_v0, %v5133_v0  ;;  %v2822_v0 = vpack.c.bf16 %v5138_v61, %v5138_v61  ;;  %v5216_v61 = vld [vmem:[%s5165_s23 + $0x38] sm:$0xf] }
 0x226   : > { %v3052_v59 = vadd.f32 %v3051_v48, %v3035_v38  ;;  %v2578_v35 = vadd.f32 %v2540_v25, %v2408_v39  ;;  %v2373_v47 = vpop.f32.mrf.mxu2 }
 0x228   : > { %v5143_v41 = vadd.f32 %v2740_v40, %v2578_v35  ;;  %v2839_v40 = vsel %vm5172_vm9, %v2818_v33, %v2800_v15  ;;  %v2809_v35 = vld [vmem:[%s5165_s23 + $0x24] sm:$0xf] }
 0x229   : > { %v2084_v63 = vpop.f32.mrf.mxu1 }
 0x22a   : > { %v2543_v3 = vpop.f32.mrf.mxu3  ;;  %v2991_v22 = vmul.f32 %v2924_v20, %v5143_v41  ;;  %v2120_v9 = vadd.f32 %v2084_v63, %v5024_v56  ;;  %v2823_v20 = vpack.c.bf16 %v5143_v41, %v5143_v41 }
 0x22c   : > { %v3009_v50 = vadd.f32 %v3008_v23, %v2991_v22  ;;  %v3036_v52 = vmul.f32 %v2991_v22, %v5143_v41  ;;  %v2409_v49 = vadd.f32 %v2373_v47, %v2120_v9  ;;  %v2807_v23 = vld [vmem:[%s5165_s23 + $0x1c] sm:$0xf]  ;;  %v5202_v47 = vld [vmem:[%s5165_s23 + $0x28] sm:$0xf]  ;;  %v5210_v9 = vld [vmem:[%s5165_s23 + $0x30] sm:$0xf] }
 0x22d   : > { %v2743_v1 = vpop.f32.mrf.mxu0  ;;  %v5223_v41 = vld [vmem:[%s5165_s23 + $0x3c] sm:$0xf] }
 0x22e   : > { %v3053_v14 = vadd.f32 %v3052_v59, %v3036_v52  ;;  %v2579_v27 = vadd.f32 %v2543_v3, %v2409_v49  ;;  %v2375_v54 = vpop.f32.mrf.mxu2  ;;  %v2840_v59 = vsel %vm5172_vm9, %v2819_v11, %v2801_v31  ;;  %v2841_v52 = vsel %vm5172_vm9, %v2820_v18, %v2802_v6 }
 0x230   : > { %v5152_v43 = vadd.f32 %v2743_v1, %v2579_v27  ;;  %v5226_v1 = vld [vmem:[%s5165_s23 + $0x40] sm:$0xf] }
 0x231   : > { %v2086_v28 = vpop.f32.mrf.mxu1 }
 0x232   : > { %v2545_v56 = vpop.f32.mrf.mxu3  ;;  %v2992_v46 = vmul.f32 %v2929_v51, %v5152_v43  ;;  %v2121_v8 = vadd.f32 %v2086_v28, %v5033_v29  ;;  %v2824_v49 = vpack.c.bf16 %v5152_v43, %v5152_v43 }
 0x234   : > { %v3010_v19 = vadd.f32 %v3009_v50, %v2992_v46  ;;  %v3037_v17 = vmul.f32 %v2992_v46, %v5152_v43  ;;  %v2410_v53 = vadd.f32 %v2375_v54, %v2121_v8  ;;  %v5213_v50 = vld [vmem:[%s5165_s23 + $0x34] sm:$0xf]  ;;  %v2843_v43 = vsel %vm5172_vm9, %v2822_v0, %v2804_v21 }
 0x235   : > { %v2745_v32 = vpop.f32.mrf.mxu0  ;;  %v2844_v46 = vsel %vm5172_vm9, %v2823_v20, %v2805_v2  ;;  %v2949_v20 = vpop.permute.xlu0 %2948 }
 0x236   : > { %v3054_v29 = vadd.f32 %v3053_v14, %v3037_v17  ;;  %v2580_v26 = vadd.f32 %v2545_v56, %v2410_v53  ;;  %v2378_v24 = vpop.f32.mrf.mxu2  ;;  %v2842_v14 = vsel %vm5172_vm9, %v2821_v42, %v2803_v30  ;;  %v2939_v56 = vpop.permute.xlu1 %2938 }
 0x237   : > { %v2944_v30 = vpop.permute.xlu2 %2943 }
 0x238   : > { %v2780_v48 = vadd.f32 %v2745_v32, %v2580_v26 }
 0x239   : > { %v2089_v5 = vpop.f32.mrf.mxu1 }
 0x23a   : > { %v2548_v25 = vpop.f32.mrf.mxu3  ;;  %v2993_v38 = vmul.f32 %v2934_v7, %v2780_v48  ;;  %v2122_v39 = vadd.f32 %v2089_v5, %v5039_v62  ;;  %v5205_v62 = vld [vmem:[%s5165_s23 + $0x2c] sm:$0xf]  ;;  %v2825_v27 = vpack.c.bf16 %v2780_v48, %v2780_v48 }
 0x23b   : > { %2859 = vst [vmem:[%s5194_s14] sm:$0xf] %v2839_v40 }
 0x23c   : > { %v3011_v63 = vadd.f32 %v3010_v19, %v2993_v38  ;;  %v3038_v3 = vmul.f32 %v2993_v38, %v2780_v48  ;;  %v2411_v45 = vadd.f32 %v2378_v24, %v2122_v39  ;;  %2860 = vst [vmem:[%s5194_s14 + $0x4] sm:$0xf] %v2840_v59  ;;  %v2845_v19 = vsel %vm5172_vm9, %v2824_v49, %v2806_v58 }
 0x23d   : > { %v2748_v22 = vpop.f32.mrf.mxu0  ;;  %2861 = vst [vmem:[%s5194_s14 + $0x8] sm:$0xf] %v2841_v52  ;;  %v2846_v32 = vsel %vm5172_vm9, %v2825_v27, %v2807_v23 }
 0x23e   : > { %v3055_v54 = vadd.f32 %v3054_v29, %v3038_v3  ;;  %v2581_v51 = vadd.f32 %v2548_v25, %v2411_v45  ;;  %v2380_v28 = vpop.f32.mrf.mxu2  ;;  %2862 = vst [vmem:[%s5194_s14 + $0xc] sm:$0xf] %v2842_v14 }
 0x23f   : > { %2863 = vst [vmem:[%s5194_s14 + $0x10] sm:$0xf] %v2843_v43 }
 0x240   : > { %v2781_v8 = vadd.f32 %v2748_v22, %v2581_v51  ;;  %2864 = vst [vmem:[%s5194_s14 + $0x14] sm:$0xf] %v2844_v46 }
 0x241   : > { %v2091_v17 = vpop.f32.mrf.mxu1  ;;  %2865 = vst [vmem:[%s5194_s14 + $0x18] sm:$0xf] %v2845_v19 }
 0x242   : > { %v2550_v53 = vpop.f32.mrf.mxu3  ;;  %v2826_v29 = vpack.c.bf16 %v2781_v8, %v2781_v8  ;;  %v2994_v26 = vmul.f32 %v2939_v56, %v2781_v8  ;;  %v2123_v24 = vadd.f32 %v2091_v17, %v5048_v60  ;;  %2866 = vst [vmem:[%s5194_s14 + $0x1c] sm:$0xf] %v2846_v32  ;;  %v2954_v56 = vpop.permute.xlu1 %2953 }
 0x244   : > { %v2847_v33 = vsel %vm5172_vm9, %v2826_v29, %v2808_v12  ;;  %v3012_v11 = vadd.f32 %v3011_v63, %v2994_v26  ;;  %v3039_v7 = vmul.f32 %v2994_v26, %v2781_v8  ;;  %v2412_v15 = vadd.f32 %v2380_v28, %v2123_v24 }
 0x245   : > { %v2750_v31 = vpop.f32.mrf.mxu0  ;;  %2867 = vst [vmem:[%s5194_s14 + $0x20] sm:$0xf] %v2847_v33 }
 0x246   : > { %v3056_v48 = vadd.f32 %v3055_v54, %v3039_v7  ;;  %v2582_v6 = vadd.f32 %v2550_v53, %v2412_v15  ;;  %v2383_v18 = vpop.f32.mrf.mxu2  ;;  %v2959_v15 = vpop.permute.xlu2 %2958 }
 0x248   : > { %v2782_v21 = vadd.f32 %v2750_v31, %v2582_v6 }
 0x249   : > { %v2094_v2 = vpop.f32.mrf.mxu1 }
 0x24a   : > { %v2553_v60 = vpop.f32.mrf.mxu3  ;;  %v2827_v5 = vpack.c.bf16 %v2782_v21, %v2782_v21  ;;  %v2995_v25 = vmul.f32 %v2944_v30, %v2782_v21  ;;  %v2124_v42 = vadd.f32 %v2094_v2, %v5056_v13 }
 0x24c   : > { %v2848_v58 = vsel %vm5172_vm9, %v2827_v5, %v2809_v35  ;;  %v3013_v23 = vadd.f32 %v3012_v11, %v2995_v25  ;;  %v3040_v38 = vmul.f32 %v2995_v25, %v2782_v21  ;;  %v2413_v39 = vadd.f32 %v2383_v18, %v2124_v42 }
 0x24d   : > { %v2753_v12 = vpop.f32.mrf.mxu0  ;;  %2868 = vst [vmem:[%s5194_s14 + $0x24] sm:$0xf] %v2848_v58 }
 0x24e   : > { %v3057_v40 = vadd.f32 %v3056_v48, %v3040_v38  ;;  %v2583_v59 = vadd.f32 %v2553_v60, %v2413_v39  ;;  %v2385_v0 = vpop.f32.mrf.mxu2 }
 0x250   : > { %v2783_v63 = vadd.f32 %v2753_v12, %v2583_v59 }
 0x251   : > { %v2096_v3 = vpop.f32.mrf.mxu1 }
 0x252   : > { %v2555_v45 = vpop.f32.mrf.mxu3  ;;  %v2828_v22 = vpack.c.bf16 %v2783_v63, %v2783_v63  ;;  %v2996_v52 = vmul.f32 %v2949_v20, %v2783_v63  ;;  %v2125_v13 = vadd.f32 %v2096_v3, %v5066_v10 }
 0x254   : > { %v2849_v35 = vsel %vm5172_vm9, %v2828_v22, %v5202_v47  ;;  %v3014_v49 = vadd.f32 %v3013_v23, %v2996_v52  ;;  %v3041_v14 = vmul.f32 %v2996_v52, %v2783_v63  ;;  %v2414_v27 = vadd.f32 %v2385_v0, %v2125_v13  ;;  %v2964_v23 = vpop.permute.xlu0 %2963  ;;  %v2969_v13 = vpop.permute.xlu1 %2968 }
 0x255   : > { %v2755_v54 = vpop.f32.mrf.mxu0  ;;  %2869 = vst [vmem:[%s5194_s14 + $0x28] sm:$0xf] %v2849_v35 }
 0x256   : > { %v3058_v51 = vadd.f32 %v3057_v40, %v3041_v14  ;;  %v2584_v28 = vadd.f32 %v2555_v45, %v2414_v27  ;;  %v2388_v43 = vpop.f32.mrf.mxu2 }
 0x258   : > { %v2784_v46 = vadd.f32 %v2755_v54, %v2584_v28 }
 0x259   : > { %v2099_v8 = vpop.f32.mrf.mxu1 }
 0x25a   : > { %v2558_v19 = vpop.f32.mrf.mxu3  ;;  %v2829_v17 = vpack.c.bf16 %v2784_v46, %v2784_v46  ;;  %v2997_v53 = vmul.f32 %v2954_v56, %v2784_v46  ;;  %v2126_v10 = vadd.f32 %v2099_v8, %v5074_v55 }
 0x25c   : > { %v2850_v47 = vsel %vm5172_vm9, %v2829_v17, %v5205_v62  ;;  %v3015_v32 = vadd.f32 %v3014_v49, %v2997_v53  ;;  %v3042_v29 = vmul.f32 %v2997_v53, %v2784_v46  ;;  %v2415_v26 = vadd.f32 %v2388_v43, %v2126_v10 }
 0x25d   : > { %v2758_v24 = vpop.f32.mrf.mxu0  ;;  %2870 = vst [vmem:[%s5194_s14 + $0x2c] sm:$0xf] %v2850_v47 }
 0x25e   : > { %v3059_v33 = vadd.f32 %v3058_v51, %v3042_v29  ;;  %v2585_v11 = vadd.f32 %v2558_v19, %v2415_v26  ;;  %v2390_v7 = vpop.f32.mrf.mxu2  ;;  %v2974_v19 = vpop.permute.xlu2 %2973 }
 0x260   : > { %v2785_v31 = vadd.f32 %v2758_v24, %v2585_v11 }
 0x261   : > { %v2101_v48 = vpop.f32.mrf.mxu1 }
 0x262   : > { %v2560_v6 = vpop.f32.mrf.mxu3  ;;  %v2830_v18 = vpack.c.bf16 %v2785_v31, %v2785_v31  ;;  %v2998_v30 = vmul.f32 %v2959_v15, %v2785_v31  ;;  %v2127_v55 = vadd.f32 %v2101_v48, %v5083_v16  ;;  %v2979_v48 = vpop.permute.xlu0 %2978 }
 0x264   : > { %v2851_v62 = vsel %vm5172_vm9, %v2830_v18, %v5210_v9  ;;  %v3016_v21 = vadd.f32 %v3015_v32, %v2998_v30  ;;  %v3043_v2 = vmul.f32 %v2998_v30, %v2785_v31  ;;  %v2416_v60 = vadd.f32 %v2390_v7, %v2127_v55 }
 0x265   : > { %v2760_v5 = vpop.f32.mrf.mxu0  ;;  %2871 = vst [vmem:[%s5194_s14 + $0x30] sm:$0xf] %v2851_v62 }
 0x266   : > { %v3060_v25 = vadd.f32 %v3059_v33, %v3043_v2  ;;  %v2586_v42 = vadd.f32 %v2560_v6, %v2416_v60  ;;  %v2393_v58 = vpop.f32.mrf.mxu2 }
 0x268   : > { %v2786_v38 = vadd.f32 %v2760_v5, %v2586_v42 }
 0x269   : > { %v2104_v39 = vpop.f32.mrf.mxu1 }
 0x26a   : > { %v2563_v12 = vpop.f32.mrf.mxu3  ;;  %v2831_v40 = vpack.c.bf16 %v2786_v38, %v2786_v38  ;;  %v2999_v59 = vmul.f32 %v2964_v23, %v2786_v38  ;;  %v2128_v16 = vadd.f32 %v2104_v39, %v5093_v57  ;;  %v2984_v23 = vpop.permute.xlu1 %2983 }
 0x26c   : > { %v2852_v9 = vsel %vm5172_vm9, %v2831_v40, %v5213_v50  ;;  %v3017_v0 = vadd.f32 %v3016_v21, %v2999_v59  ;;  %v3044_v20 = vmul.f32 %v2999_v59, %v2786_v38  ;;  %v2417_v63 = vadd.f32 %v2393_v58, %v2128_v16 }
 0x26d   : > { %v2763_v3 = vpop.f32.mrf.mxu0  ;;  %2872 = vst [vmem:[%s5194_s14 + $0x34] sm:$0xf] %v2852_v9 }
 0x26e   : > { %v3061_v45 = vadd.f32 %v3060_v25, %v3044_v20  ;;  %v2587_v22 = vadd.f32 %v2563_v12, %v2417_v63  ;;  %v2395_v52 = vpop.f32.mrf.mxu2 }
 0x270   : > { %v2787_v35 = vadd.f32 %v2763_v3, %v2587_v22 }
 0x271   : > { %v2106_v49 = vpop.f32.mrf.mxu1 }
 0x272   : > { %v2565_v14 = vpop.f32.mrf.mxu3  ;;  %v2832_v27 = vpack.c.bf16 %v2787_v35, %v2787_v35  ;;  %v3000_v54 = vmul.f32 %v2969_v13, %v2787_v35  ;;  %v2129_v57 = vadd.f32 %v2106_v49, %v5102_v36 }
 0x274   : > { %v2853_v50 = vsel %vm5172_vm9, %v2832_v27, %v5216_v61  ;;  %v3018_v51 = vadd.f32 %v3017_v0, %v3000_v54  ;;  %v3045_v28 = vmul.f32 %v3000_v54, %v2787_v35  ;;  %v2418_v43 = vadd.f32 %v2395_v52, %v2129_v57  ;;  %v3004_v52 = vld [vmem:[%s4312_s17] sm:$0x1] }
 0x275   : > { %v2765_v56 = vpop.f32.mrf.mxu0  ;;  %2873 = vst [vmem:[%s5194_s14 + $0x38] sm:$0xf] %v2853_v50 }
 0x276   : > { %v3062_v46 = vadd.f32 %v3061_v45, %v3045_v28  ;;  %v2588_v8 = vadd.f32 %v2565_v14, %v2418_v43  ;;  %v2398_v53 = vpop.f32.mrf.mxu2 }
 0x278   : > { %v2788_v17 = vadd.f32 %v2765_v56, %v2588_v8 }
 0x279   : > { %v2109_v10 = vpop.f32.mrf.mxu1 }
 0x27a   : > { %v2833_v47 = vpack.c.bf16 %v2788_v17, %v2788_v17  ;;  %v3001_v32 = vmul.f32 %v2974_v19, %v2788_v17  ;;  %v2130_v36 = vadd.f32 %v2109_v10, %v5107_v4  ;;  %v2568_v29 = vpop.f32.mrf.mxu3 }
 0x27c   : > { %v2854_v61 = vsel %vm5172_vm9, %v2833_v47, %v5223_v41  ;;  %v3019_v26 = vadd.f32 %v3018_v51, %v3001_v32  ;;  %v3046_v24 = vmul.f32 %v3001_v32, %v2788_v17  ;;  %v2419_v33 = vadd.f32 %v2398_v53, %v2130_v36 }
 0x27d   : > { %v2768_v11 = vpop.f32.mrf.mxu0  ;;  %2874 = vst [vmem:[%s5194_s14 + $0x3c] sm:$0xf] %v2854_v61 }
 0x27e   : > { %v3063_v7 = vadd.f32 %v3062_v46, %v3046_v24  ;;  %v2589_v15 = vadd.f32 %v2568_v29, %v2419_v33  ;;  %v2400_v55 = vpop.f32.mrf.mxu2 }
 0x280   : > { %v2789_v31 = vadd.f32 %v2768_v11, %v2589_v15 }
 0x281   : > { %v2111_v6 = vpop.f32.mrf.mxu1 }
 0x282   : > { %v2834_v18 = vpack.c.bf16 %v2789_v31, %v2789_v31  ;;  %v3002_v30 = vmul.f32 %v2979_v48, %v2789_v31  ;;  %v2131_v4 = vadd.f32 %v2111_v6, %v5113_v34  ;;  %v2570_v60 = vpop.f32.mrf.mxu3 }
 0x284   : > { %v2855_v41 = vsel %vm5172_vm9, %v2834_v18, %v5226_v1  ;;  %v3020_v62 = vadd.f32 %v3019_v26, %v3002_v30  ;;  %v3047_v21 = vmul.f32 %v3002_v30, %v2789_v31  ;;  %v2420_v2 = vadd.f32 %v2400_v55, %v2131_v4 }
 0x285   : > { %2875 = vst [vmem:[%s5194_s14 + $0x40] sm:$0xf] %v2855_v41  ;;  %v2770_v42 = vpop.f32.mrf.mxu0 }
 0x286   : > { %v3064_v5 = vadd.f32 %v3063_v7, %v3047_v21  ;;  %v2590_v25 = vadd.f32 %v2570_v60, %v2420_v2 }
 0x288   : > { %v2790_v58 = vadd.f32 %v2770_v42, %v2590_v25 }
 0x28a   : > { %v2835_v38 = vpack.c.bf16 %v2790_v58, %v2790_v58  ;;  %v3003_v39 = vmul.f32 %v2984_v23, %v2790_v58 }
 0x28c   : > { %v2856_v34 = vsel %vm5172_vm9, %v2835_v38, %v5229_v37  ;;  %v3021_v12 = vadd.f32 %v3020_v62, %v3003_v39  ;;  %v3048_v1 = vmul.f32 %v3003_v39, %v2790_v58  ;;  %v3030_v37 = vld [vmem:[%s4317_s20] sm:$0x1] }
 0x28d   : > { %2876 = vst [vmem:[%s5194_s14 + $0x44] sm:$0xf] %v2856_v34 }
 0x28e   : > { %v3022_v40 = vrot.slane %v3021_v12, 4  ;;  %v3065_v59 = vadd.f32 %v3064_v5, %v3048_v1 }
 0x290   : > { %v3023_v16 = vadd.f32 %v3022_v40, %v3021_v12  ;;  %v3066_v9 = vrot.slane %v3065_v59, 4 }
 0x292   : > { %v3024_v0 = vrot.slane %v3023_v16, 2  ;;  %v3067_v20 = vadd.f32 %v3066_v9, %v3065_v59 }
 0x294   : > { %v3025_v63 = vadd.f32 %v3024_v0, %v3023_v16  ;;  %v3068_v3 = vrot.slane %v3067_v20, 2 }
 0x296   : > { %v3026_v45 = vrot.slane %v3025_v63, 1  ;;  %v3069_v22 = vadd.f32 %v3068_v3, %v3067_v20 }
 0x298   : > { %v3027_v13 = vadd.f32 %v3026_v45, %v3025_v63  ;;  %v3070_v44 = vrot.slane %v3069_v22, 1 }
 0x29a   : > { %v3028_v35 = vadd.f32 %v3027_v13, %v3004_v52  ;;  %v3071_v49 = vadd.f32 %v3070_v44, %v3069_v22 }
 0x29c   : > { %3029 = vst [vmem:[%s4312_s17] sm:$0x1] %v3028_v35  ;;  %v3072_v14 = vadd.f32 %v3071_v49, %v3030_v37 }
 0x29e   : > { %3073 = vst [vmem:[%s4317_s20] sm:$0x1] %v3072_v14 }
 0x29f PF: > { %s19_s9 = sadd.s32 1, %s4224_s9   ;;  %s5327_s27 = smov %s4216_s29 }
 0x2a0   : > { %p16_p7 = scmp.ge.s32.totalorder %s19_s9, 6   ;;  %s5328_s28 = smov %s4220_s30 }
 0x2a1   : > { %s5329_s29 = smov %s5332_s10  ;;  %s5330_s30 = smov %s5336_s11 }
 0x2a2   :  { %18 = sbr.rel (!%p16_p7) target bundleno = 3 (0x3), region = 118 }

// kernel: dense_block_forward.11
= control target key start
LH: loop header
LB: loop body
LE: loop exit
PB: predicated region body
PF: predicated region fallthrough
CT: control target
= control target key end

     0   :  { %14 = vsyncpa [#allocation4], 0  ;;  %s5582_s0 = inlined_call_operand.vmem [shape: bf16[2,352,128], index: 0, kind: input, shape index: {}]   ;;  %s5583_s1 = inlined_call_operand.vmem [shape: f32[352,1], index: 1, kind: input, shape index: {}]   ;;  %s5584_s2 = inlined_call_operand.vmem [shape: f32[1,128], index: 2, kind: input, shape index: {}]   ;;  %s5585_s3 = inlined_call_operand.vmem [shape: f32[1,128], index: 3, kind: input, shape index: {}]   ;;  %s5586_s4 = inlined_call_operand.vmem [shape: bf16[9,128,128], index: 4, kind: input, shape index: {}]   ;;  %s5587_s5 = inlined_call_operand.vmem [shape: bf16[2,352,128], index: 5, kind: input, shape index: {}, may-alias: {5,6}]   ;;  %s5588_s6 = inlined_call_operand.vmem [shape: bf16[2,352,128], index: 6, kind: output, shape index: {0}, may-alias: {5,6}]   ;;  %s5589_s7 = inlined_call_operand.hbm [shape: f32[2,1,128], index: 7, kind: output, shape index: {1}]   ;;  %s5590_s8 = inlined_call_operand.hbm [shape: f32[2,1,128], index: 8, kind: output, shape index: {2}]  }
   0x1   :  { %16 = vsyncpa [#allocation4 + $0x1], 0 }
   0x2   :  { %17 = vsyncpa [#allocation6], 0 }
   0x3   :  { %19 = vsyncpa [#allocation6 + $0x1], 0  ;;  %s4441_s27 = smov 0   ;;  %s4443_s28 = smov 0  }
   0x4   :  { %s4445_s29 = smov 0   ;;  %s4447_s30 = smov 0  }
   0x5   :  { %s4449_s9 = smov 0   ;;  %s4451_s10 = smov 0  }
   0x6   :  { %s4453_s11 = smov 0   ;;  %s4455_s12 = smov 0  }
   0x7 LB: > { %5595 = sst [smem:[#allocation9_spill]] %s4371_s29  ;;  %s3256_s13 = sadd.s32 4294967295, %s4391_s12   ;;  %s4391_s12 = sphi %s4455_s12, %s25_s12   ;;  %s4387_s11 = sphi %s4453_s11, %s5611_s11   ;;  %s4383_s10 = sphi %s4451_s10, %s5610_s10   ;;  %s4379_s9 = sphi %s4449_s9, %s5609_s9   ;;  %s4375_s30 = sphi %s4447_s30, %s5608_s30   ;;  %s4371_s29 = sphi %s4445_s29, %s5607_s29   ;;  %s4367_s28 = sphi %s4443_s28, %s5613_s28   ;;  %s4363_s27 = sphi %s4441_s27, %s5612_s27  }
   0x8   : > { %5596 = sst [smem:[#allocation10_spill]] %s4383_s10  ;;  %s3257_s14 = sadd.s32 4294967294, %s4391_s12  }
   0x9   : > { %5597 = sst [smem:[#allocation11_spill]] %s4387_s11  ;;  %s34_s15 = sadd.s32 1, %s4383_s10 }
   0xa   : > { %p35_p0 = scmp.ge.s32.totalorder %s34_s15, 2  ;;  %s37_s16 = sadd.s32 1, %s4387_s11 }
   0xb   : > { %p216_p1 = scmp.ne.s32.totalorder %s4371_s29, %s4367_s28  ;;  %p217_p2 = scmp.eq.s32.totalorder %s3256_s13, 3 }
   0xc   : > { %s5615_s15 = smov (%p35_p0, %s34_s15), 0  ;;  %s5617_s16 = smov (!%p35_p0, %s37_s16), %s4387_s11 }
   0xd   : > { %5598 = sst [smem:[#allocation12_spill]] %s5615_s15  ;;  %p4490_p3 = por %p217_p2, %p216_p1 }
   0xe   : > { %p222_p4 = scmp.ne.s32.totalorder %s4367_s28, %s4363_s27  ;;  %p39_p5 = scmp.ge.s32.totalorder %s5617_s16, 2 }
   0xf   : > { %p223_p6 = scmp.eq.s32.totalorder %s3257_s14, 3  ;;  %p3260_p7 = scmp.ge.s32.totalorder %s4391_s12, 1 }
  0x10   : > { %p295_p8 = scmp.lt.s32.totalorder %s4391_s12, 5  ;;  %s5619_s16 = smov (%p39_p5, %s5617_s16), 0 }
  0x11   : > { %5600 = sst [smem:[#allocation13_spill]] %s5619_s16  ;;  %p4500_p9 = por %p223_p6, %p222_p4 }
  0x12   : > { %p296_p10 = pnand %p3260_p7, %p295_p8  ;;  %s203_s19 = ssub.s32 %s4387_s11, %s5619_s16 }
  0x13   : > { %s206_s20 = sadd.s32 1, %s4371_s29  ;;  %p204_p11 = scmp.eq.s32.totalorder %s203_s19, 0 }
  0x14   : > { %299 = sbr.rel (%p296_p10) target bundleno = 695 (0x2b7), region = 44  ;;  %s4511_s22 = sand.u32 (!%p296_p10), 1, %s4367_s28  }
  0x15   : > { %s4508_s21 = scalar_select %p204_p11, %s4371_s29, %s206_s20  }
  0x16   : > { %p342_p12 = scmp.lt.s32.totalorder (!%p296_p10), %s4379_s9, 1  ;;  %s4516_s24 = smul.u32 (!%p296_p10), 144, %s4375_s30 }
  0x17   : > { %5602 = sst [smem:[#allocation14_spill]] %s4508_s21  ;;  %s4536_s29 = scalar_lea.vmem (!%p296_p10), [#allocation3], %s4511_s22 }
  0x18   : > { %s359_s26 = sadd.s32 (!%p296_p10), 32, %s4516_s24  ;;  %p3264_p13 = scmp.ne.s32.totalorder (!%p296_p10), %s4375_s30, 0 }
  0x19   : > { %s343_s23 = scalar_select %p342_p12, %s4379_s9, 1 }
  0x1a   : > { %363 = sbr.rel (%p3264_p13) target bundleno = 42 (0x2a), region = 48 }
  0x1b   : > { %s4518_s25 = smul.u32 176, %s343_s23  ;;  %s4539_s23 = scalar_lea.vmem [#allocation5], %s4511_s22 }
  0x1d   : > { %s346_s19 = scalar_lea.vmem %s5582_s0, %s4518_s25  ;;  %s4533_s21 = scalar_lea.vmem %s5588_s6, %s4518_s25 }
  0x1f   : > { %v4393_v0 = vmov 0.0   ;;  %v4394_v1 = vmov 0  }
  0x20   : > { %364 = vst [vmem:[%s4536_s29] sm:$0x1] %v4393_v0 }
  0x21   : > { %365 = vst [vmem:[%s4539_s23] sm:$0x1] %v4393_v0 }
  0x22   : > { %366 = vst [vmem:[%s4533_s21] sm:$0xf] %v4394_v1 }
  0x23   : > { %367 = vst [vmem:[%s4533_s21 + $0x4] sm:$0xf] %v4394_v1 }
  0x24   : > { %368 = vst [vmem:[%s4533_s21 + $0x8] sm:$0xf] %v4394_v1 }
  0x25   : > { %369 = vst [vmem:[%s4533_s21 + $0xc] sm:$0xf] %v4394_v1 }
  0x26   : > { %370 = vst [vmem:[%s4533_s21 + $0xa0] sm:$0xf] %v4394_v1 }
  0x27   : > { %371 = vst [vmem:[%s4533_s21 + $0xa4] sm:$0xf] %v4394_v1 }
  0x28   : > { %372 = vst [vmem:[%s4533_s21 + $0xa8] sm:$0xf] %v4394_v1 }
  0x29   : > { %373 = vst [vmem:[%s4533_s21 + $0xac] sm:$0xf] %v4394_v1 }
  0x2a PF: > { %s4556_s11 = scalar_lea.vmem %s5583_s1, %s4516_s24  ;;  %v4395_v2 = vmov 0   ;;  %s374_s16 = sshra.s32 %s4516_s24, 3  ;;  %v3827_v29 = vld [vmem:[%s5586_s4 + $0x78] sm:$0xff]  ;;  %v3826_v31 = vld [vmem:[%s5586_s4 + $0x70] sm:$0xff]  ;;  %v4639_v33 = vld [vmem:[%s5584_s2] ss:$0 sm:$0xff] }
  0x2b   : > { %4262 = vset.pattern.permute.xlu2 %v4395_v2  ;;  %4261 = vset.pattern.permute.xlu1 %v4395_v2  ;;  %v4559_v3 = vld [vmem:[%s4556_s11 + $0x70] sm:$0xff]  ;;  %v4562_v4 = vld [vmem:[%s4556_s11 + $0x60] sm:$0xff]  ;;  %v4571_v6 = vld [vmem:[%s4556_s11 + $0x78] sm:$0xff]  ;;  %s3265_s13 = sshll.u32 %s374_s16, 2  ;;  %vm852_vm0 = vcmask 1044480   ;;  %vm2444_vm4 = vcmask 1046528   ;;  %s3097_s14 = scalar_lea.hbm %s5589_s7, %s4379_s9 }
  0x2c   : > { %v4565_v5 = vld [vmem:[%s4556_s11 + $0x50] sm:$0xff]  ;;  %4260 = vset.pattern.permute.xlu0 %v4395_v2  ;;  %615 = vperm.xlu2 %4262, %v4559_v3   ;;  %v4574_v7 = vld [vmem:[%s4556_s11 + $0x68] sm:$0xff]  ;;  %v4577_v8 = vld [vmem:[%s4556_s11 + $0x58] sm:$0xff]  ;;  %s4626_s30 = scalar_lea.vmem %s346_s19, %s3265_s13  ;;  %vm1208_vm1 = vsmask.f32 4352  ;;  %s5359_s16 = sshra.s32 %s359_s26, 3 }
  0x2d   : > { %605 = vperm.xlu1 %4261, %v4562_v4   ;;  %595 = vperm.xlu0 %4260, %v4565_v5   ;;  %v523_v9 = vld [vmem:[%s4556_s11 + $0x30] sm:$0xff]  ;;  %v522_v10 = vld [vmem:[%s4556_s11 + $0x28] sm:$0xff]  ;;  %v521_v11 = vld [vmem:[%s4556_s11 + $0x20] sm:$0xff]  ;;  %vm986_vm2 = vsmask.f32 5376  ;;  %s3782_s19 = sshll.u32 %s5359_s16, 2  ;;  %s5603_s13 = scalar_lea.vmem %s5587_s5, %s4518_s25 }
  0x2e   : > { %v526_v12 = vld [vmem:[%s4556_s11 + $0x48] sm:$0xff]  ;;  %v525_v13 = vld [vmem:[%s4556_s11 + $0x40] sm:$0xff]  ;;  %v524_v14 = vld [vmem:[%s4556_s11 + $0x38] sm:$0xff]  ;;  %4140 = vmatpush.bf16.msra.mxu2 %v3827_v29  ;;  %4139 = vmatpush.bf16.msra.mxu1 %v3827_v29  ;;  %vm1928_vm3 = vsmask.f32 7424  ;;  %s5403_s25 = scalar_lea.vmem %s4533_s21, %s3782_s19  ;;  %s3099_s16 = sshll.u32 %s4536_s29, 4  ;;  %s3100_s16 = int_to_ptr.vmem [resolvable:$true] %s3099_s16 }
  0x2f   : > { %v517_v15 = vld [vmem:[%s4556_s11] sm:$0xff]  ;;  %v4590_v16 = vld [vmem:[%s4556_s11 + $0x88] sm:$0xff]  ;;  %v520_v18 = vld [vmem:[%s4556_s11 + $0x18] sm:$0xff]  ;;  %4141 = vmatpush.bf16.msra.mxu3 %v3827_v29  ;;  %929 = vmatpush.bf16.msra.mxu0 %v3827_v29  ;;  %vm2614_vm5 = vsmask.f32 6400  ;;  %s3112_s24 = sshll.u32 %s4539_s23, 4  ;;  %s5523_s24 = int_to_ptr.vmem [resolvable:$true] %s3112_s24 }
  0x30   : > { %v4593_v17 = vld [vmem:[%s4556_s11 + $0x80] sm:$0xff]  ;;  %v519_v19 = vld [vmem:[%s4556_s11 + $0x10] sm:$0xff]  ;;  %v518_v20 = vld [vmem:[%s4556_s11 + $0x8] sm:$0xff]  ;;  %s4285_s15 = scalar_lea.hbm %s5589_s7, 2 }
  0x31   : > { %v4601_v21 = vld [vmem:[%s4556_s11 + $0xa0] sm:$0xff]  ;;  %v4604_v22 = vld [vmem:[%s4556_s11 + $0x98] sm:$0xff]  ;;  %v4607_v23 = vld [vmem:[%s4556_s11 + $0x90] sm:$0xff] }
  0x32   : > { %v540_v24 = vld [vmem:[%s4556_s11 + $0xb8] sm:$0xff]  ;;  %v539_v25 = vld [vmem:[%s4556_s11 + $0xb0] sm:$0xff]  ;;  %v4615_v26 = vld [vmem:[%s4556_s11 + $0xa8] sm:$0xff]  ;;  %4143 = vmatpush.bf16.msra.mxu2 %v3826_v31  ;;  %4142 = vmatpush.bf16.msra.mxu1 %v3826_v31 }
  0x33   : > { %v542_v27 = vld [vmem:[%s4556_s11 + $0xc8] sm:$0xff]  ;;  %v541_v28 = vld [vmem:[%s4556_s11 + $0xc0] sm:$0xff]  ;;  %v4064_v30 = vld [vmem:[%s4626_s30 + $0x38] sm:$0xff]   ;;  %4144 = vmatpush.bf16.msra.mxu3 %v3826_v31  ;;  %930 = vmatpush.bf16.msra.mxu0 %v3826_v31  ;;  %s3110_s11 = scalar_lea.hbm %s5590_s8, %s4379_s9  ;;  %s3082_s9 = scalar_lea.sflag [#allocation4], %s4511_s22 }
  0x34   : > { %620 = vperm.xlu2 %4262, %v4571_v6   ;;  %v3931_v32 = vunpack.c.l.bf16 %v4064_v30  ;;  %v3932_v34 = vunpack.c.h.bf16 %v4064_v30  ;;  %v3825_v35 = vld [vmem:[%s5586_s4 + $0x68] sm:$0xff]  ;;  %v4648_v37 = vld [vmem:[%s5585_s3] ss:$0 sm:$0xff]  ;;  %v3823_v43 = vld [vmem:[%s5586_s4 + $0x58] sm:$0xff]  ;;  %s5519_s26 = sshll.u32 %s3110_s11, 4  ;;  %s3115_s26 = int_to_ptr.hbm [resolvable:$true] %s5519_s26 }
  0x35   : > { %610 = vperm.xlu1 %4261, %v4574_v7   ;;  %600 = vperm.xlu0 %4260, %v4577_v8   ;;  %v3824_v38 = vld [vmem:[%s5586_s4 + $0x60] sm:$0xff]  ;;  %v3822_v46 = vld [vmem:[%s5586_s4 + $0x50] sm:$0xff]  ;;  %v3821_v50 = vld [vmem:[%s5586_s4 + $0x48] sm:$0xff] }
  0x36   : > { %v448_v36 = vmul.f32 %v4639_v33, %v3931_v32  ;;  %4146 = vmatpush.bf16.msra.mxu2 %v3825_v35  ;;  %4145 = vmatpush.bf16.msra.mxu1 %v3825_v35  ;;  %v449_v39 = vmul.f32 %v4639_v33, %v3932_v34  ;;  %v3820_v52 = vld [vmem:[%s5586_s4 + $0x40] sm:$0xff]  ;;  %v4063_v53 = vld [vmem:[%s4626_s30 + $0x30] sm:$0xff]   ;;  %v4062_v54 = vld [vmem:[%s4626_s30 + $0x28] sm:$0xff]  }
  0x37   : > { %4147 = vmatpush.bf16.msra.mxu3 %v3825_v35  ;;  %931 = vmatpush.bf16.msra.mxu0 %v3825_v35  ;;  %v3927_v55 = vunpack.c.l.bf16 %v4063_v53  ;;  %v3923_v56 = vunpack.c.l.bf16 %v4062_v54  ;;  %v3928_v57 = vunpack.c.h.bf16 %v4063_v53  ;;  %v3924_v58 = vunpack.c.h.bf16 %v4062_v54  ;;  %v4059_v63 = vld [vmem:[%s4626_s30 + $0x10] sm:$0xff]   ;;  %v4065_v35 = vld [vmem:[%s4626_s30 + $0x40] sm:$0xff]  }
  0x38   : > { %v478_v40 = vadd.f32 %v4648_v37, %v448_v36  ;;  %v479_v42 = vadd.f32 %v4648_v37, %v449_v39  ;;  %v3912_v2 = vunpack.c.h.bf16 %v4059_v63 }
  0x39   : > { %v446_v59 = vmul.f32 %v4639_v33, %v3927_v55  ;;  %v444_v60 = vmul.f32 %v4639_v33, %v3923_v56  ;;  %v447_v61 = vmul.f32 %v4639_v33, %v3928_v57  ;;  %v445_v62 = vmul.f32 %v4639_v33, %v3924_v58  ;;  %v3902_v56 = vld [vmem:[%s4626_s30] sm:$0xff]   ;;  %v4058_v58 = vld [vmem:[%s4626_s30 + $0x8] sm:$0xff]  }
  0x3a   : > { %4149 = vmatpush.bf16.msra.mxu2 %v3824_v38  ;;  %4148 = vmatpush.bf16.msra.mxu1 %v3824_v38  ;;  %v504_v44 = vmax.f32 %v478_v40, 0.0  ;;  %v505_v45 = vmax.f32 %v479_v42, 0.0  ;;  %v3819_v42 = vld [vmem:[%s5586_s4 + $0x38] sm:$0xff] }
  0x3b   : > { %4150 = vmatpush.bf16.msra.mxu3 %v3824_v38  ;;  %932 = vmatpush.bf16.msra.mxu0 %v3824_v38 }
  0x3c   : > { %575 = vperm.xlu2 %4262, %v523_v9  }
  0x3d   : > { %570 = vperm.xlu1 %4261, %v522_v10   ;;  %565 = vperm.xlu0 %4260, %v521_v11  }
  0x3e   : > { %4152 = vmatpush.bf16.msra.mxu2 %v3823_v43  ;;  %4151 = vmatpush.bf16.msra.mxu1 %v3823_v43 }
  0x3f   : > { %4153 = vmatpush.bf16.msra.mxu3 %v3823_v43  ;;  %933 = vmatpush.bf16.msra.mxu0 %v3823_v43  ;;  %v3834_v43 = vld [vmem:[%s5586_s4 + $0xb0] sm:$0xff] }
  0x42   : > { %4155 = vmatpush.bf16.msra.mxu2 %v3822_v46  ;;  %4154 = vmatpush.bf16.msra.mxu1 %v3822_v46 }
  0x43   : > { %4156 = vmatpush.bf16.msra.mxu3 %v3822_v46  ;;  %934 = vmatpush.bf16.msra.mxu0 %v3822_v46 }
  0x44   : > { %590 = vperm.xlu2 %4262, %v526_v12  }
  0x45   : > { %585 = vperm.xlu1 %4261, %v525_v13   ;;  %580 = vperm.xlu0 %4260, %v524_v14  }
  0x46   : > { %4158 = vmatpush.bf16.msra.mxu2 %v3821_v50  ;;  %4157 = vmatpush.bf16.msra.mxu1 %v3821_v50 }
  0x47   : > { %4159 = vmatpush.bf16.msra.mxu3 %v3821_v50  ;;  %935 = vmatpush.bf16.msra.mxu0 %v3821_v50  ;;  %v3818_v50 = vld [vmem:[%s5586_s4 + $0x30] sm:$0xff] }
  0x4a   : > { %4161 = vmatpush.bf16.msra.mxu2 %v3820_v52  ;;  %4160 = vmatpush.bf16.msra.mxu1 %v3820_v52 }
  0x4b   : > { %4162 = vmatpush.bf16.msra.mxu3 %v3820_v52  ;;  %936 = vmatpush.bf16.msra.mxu0 %v3820_v52 }
  0x4c   : > { %545 = vperm.xlu2 %4262, %v517_v15  }
  0x4d   : > { %630 = vperm.xlu1 %4261, %v4590_v16   ;;  %625 = vperm.xlu0 %4260, %v4593_v17  }
  0x4e   : > { %1133 = vmatpush.bf16.msrb.mxu1 %v3819_v42  ;;  %v3831_v42 = vld [vmem:[%s5586_s4 + $0x98] sm:$0xff] }
  0x52   : > { %1134 = vmatpush.bf16.msrb.mxu1 %v3818_v50 }
  0x54   : > { %560 = vperm.xlu2 %4262, %v520_v18  }
  0x55   : > { %555 = vperm.xlu1 %4261, %v519_v19   ;;  %550 = vperm.xlu0 %4260, %v518_v20  }
  0x5c   : > { %645 = vperm.xlu2 %4262, %v4601_v21  }
  0x5d   : > { %640 = vperm.xlu1 %4261, %v4604_v22   ;;  %635 = vperm.xlu0 %4260, %v4607_v23  }
  0x64   : > { %660 = vperm.xlu2 %4262, %v540_v24  }
  0x65   : > { %655 = vperm.xlu1 %4261, %v539_v25   ;;  %650 = vperm.xlu0 %4260, %v4615_v26  }
  0x6c   : > { %2900 = vperm.xlu2 %4262, %v521_v11   ;;  %v439_v11 = vmul.f32 %v4639_v33, %v3912_v2 }
  0x6d   : > { %670 = vperm.xlu1 %4261, %v542_v27   ;;  %665 = vperm.xlu0 %4260, %v541_v28  }
  0x74   : > { %2915 = vperm.xlu2 %4262, %v524_v14  }
  0x75   : > { %2910 = vperm.xlu1 %4261, %v523_v9   ;;  %2905 = vperm.xlu0 %4260, %v522_v10   ;;  %v4060_v9 = vld [vmem:[%s4626_s30 + $0x18] sm:$0xff]   ;;  %v4061_v10 = vld [vmem:[%s4626_s30 + $0x20] sm:$0xff]  }
  0x76   : > { %v3915_v18 = vunpack.c.l.bf16 %v4060_v9  ;;  %v3920_v19 = vunpack.c.h.bf16 %v4061_v10  ;;  %v3919_v24 = vunpack.c.l.bf16 %v4061_v10  ;;  %v3916_v25 = vunpack.c.h.bf16 %v4060_v9 }
  0x78   : > { %v440_v30 = vmul.f32 %v4639_v33, %v3915_v18  ;;  %v443_v34 = vmul.f32 %v4639_v33, %v3920_v19  ;;  %v442_v40 = vmul.f32 %v4639_v33, %v3919_v24  ;;  %v3904_v18 = vunpack.c.h.bf16 %v3902_v56 }
  0x7a   : > { %v473_v46 = vadd.f32 %v4648_v37, %v443_v34  ;;  %v472_v53 = vadd.f32 %v4648_v37, %v442_v40 }
  0x7c   : > { %2930 = vperm.xlu2 %4262, %v4565_v5   ;;  %v474_v5 = vadd.f32 %v4648_v37, %v444_v60  ;;  %v499_v60 = vmax.f32 %v473_v46, 0.0 }
  0x7d   : > { %2925 = vperm.xlu1 %4261, %v526_v12   ;;  %2920 = vperm.xlu0 %4260, %v525_v13  }
  0x7e   : > { %v500_v14 = vmax.f32 %v474_v5, 0.0  ;;  %v3903_v5 = vunpack.c.l.bf16 %v3902_v56 }
  0x84   : > { %2945 = vperm.xlu2 %4262, %v4574_v7   ;;  %v475_v7 = vadd.f32 %v4648_v37, %v445_v62 }
  0x85   : > { %2940 = vperm.xlu1 %4261, %v4562_v4   ;;  %2935 = vperm.xlu0 %4260, %v4577_v8   ;;  %v476_v4 = vadd.f32 %v4648_v37, %v446_v59 }
  0x86   : > { %v616_v41 = vpop.permute.xlu2 %615 }
  0x87   : > { %v687_v47 = vmul.f32 %v616_v41, %v504_v44  ;;  %v502_v13 = vmax.f32 %v476_v4, 0.0  ;;  %v441_v41 = vmul.f32 %v4639_v33, %v3916_v25  ;;  %v470_v44 = vadd.f32 %v4648_v37, %v440_v30  ;;  %v3817_v4 = vld [vmem:[%s5586_s4 + $0x28] sm:$0xff] }
  0x88   : > { %1135 = vmatpush.bf16.msrb.mxu1 %v3817_v4  ;;  %v434_v25 = vmul.f32 %v4639_v33, %v3903_v5  ;;  %v435_v30 = vmul.f32 %v4639_v33, %v3904_v18  ;;  %v4067_v5 = vld [vmem:[%s4626_s30 + $0x50] sm:$0xff]  }
  0x89   : > { %v471_v54 = vadd.f32 %v4648_v37, %v441_v41  ;;  %v496_v55 = vmax.f32 %v470_v44, 0.0  ;;  %v3816_v41 = vld [vmem:[%s5586_s4 + $0x20] sm:$0xff] }
  0x8a   : > { %v464_v40 = vadd.f32 %v4648_v37, %v434_v25  ;;  %v3830_v25 = vld [vmem:[%s5586_s4 + $0x90] sm:$0xff] }
  0x8c   : > { %2960 = vperm.xlu2 %4262, %v4593_v17   ;;  %v3835_v17 = vld [vmem:[%s5586_s4 + $0xb8] sm:$0xff]  ;;  %1136 = vmatpush.bf16.msrb.mxu1 %v3816_v41  ;;  %v490_v4 = vmax.f32 %v464_v40, 0.0 }
  0x8d   : > { %2955 = vperm.xlu1 %4261, %v4571_v6   ;;  %2950 = vperm.xlu0 %4260, %v4559_v3   ;;  %v3911_v3 = vunpack.c.l.bf16 %v4059_v63  ;;  %v477_v6 = vadd.f32 %v4648_v37, %v447_v61  ;;  %v3843_v63 = vld [vmem:[%s5586_s4 + $0xf8] sm:$0xff] }
  0x8e   : > { %v621_v48 = vpop.permute.xlu2 %620  ;;  %1315 = vmatpush.bf16.msrb.mxu2 %v3835_v17  ;;  %1617 = vmatpush.bf16.msrb.mxu3 %v3843_v63 }
  0x8f   : > { %v688_v49 = vmul.f32 %v621_v48, %v505_v45  ;;  %v438_v12 = vmul.f32 %v4639_v33, %v3911_v3  ;;  %v503_v15 = vmax.f32 %v477_v6, 0.0  ;;  %v3936_v45 = vunpack.c.h.bf16 %v4065_v35  ;;  %v3833_v3 = vld [vmem:[%s5586_s4 + $0xa8] sm:$0xff] }
  0x90   : > { %v3908_v6 = vunpack.c.h.bf16 %v4058_v58 }
  0x91   : > { %v3991_v51 = vpack.c.bf16 %v688_v49, %v687_v47  ;;  %v3935_v49 = vunpack.c.l.bf16 %v4065_v35  ;;  %v451_v59 = vmul.f32 %v4639_v33, %v3936_v45 }
  0x92   : > { %1316 = vmatpush.bf16.msrb.mxu2 %v3834_v43 }
  0x93   : > { %4076 = vst [vmem:[#allocation2 + $0x38] sm:$0xff] %v3991_v51   ;;  %v450_v62 = vmul.f32 %v4639_v33, %v3935_v49 }
  0x94   : > { %2975 = vperm.xlu2 %4262, %v4604_v22   ;;  %v469_v22 = vadd.f32 %v4648_v37, %v439_v11 }
  0x95   : > { %2970 = vperm.xlu1 %4261, %v4607_v23   ;;  %2965 = vperm.xlu0 %4260, %v4590_v16   ;;  %v501_v16 = vmax.f32 %v475_v7, 0.0  ;;  %v468_v23 = vadd.f32 %v4648_v37, %v438_v12  ;;  %v481_v12 = vadd.f32 %v4648_v37, %v451_v59  ;;  %v480_v17 = vadd.f32 %v4648_v37, %v450_v62 }
  0x96   : > { %v4690_v8 = vpop.permute.xlu2 %575  ;;  %v495_v38 = vmax.f32 %v469_v22, 0.0  ;;  %1317 = vmatpush.bf16.msrb.mxu2 %v3833_v3 }
  0x97   : > { %v494_v39 = vmax.f32 %v468_v23, 0.0  ;;  %v679_v9 = vmul.f32 %v4690_v8, %v496_v55  ;;  %v3842_v8 = vld [vmem:[%s5586_s4 + $0xf0] sm:$0xff] }
  0x98   : > { %1618 = vmatpush.bf16.msrb.mxu3 %v3842_v8  ;;  %v3850_v55 = vld [vmem:[%s5586_s4 + $0x130] sm:$0xff] }
  0x9d   : > { %2985 = vperm.xlu1 %4261, %v4615_v26   ;;  %2980 = vperm.xlu0 %4260, %v4601_v21  }
  0x9e   : > { %v591_v36 = vpop.permute.xlu2 %590 }
  0x9f   : > { %v606_v0 = vpop.permute.xlu1 %605  ;;  %v596_v1 = vpop.permute.xlu0 %595 }
  0xa0   : > { %v685_v26 = vmul.f32 %v606_v0, %v502_v13  ;;  %v683_v27 = vmul.f32 %v596_v1, %v500_v14  ;;  %v498_v0 = vmax.f32 %v472_v53, 0.0  ;;  %v497_v1 = vmax.f32 %v471_v54, 0.0  ;;  %v3832_v14 = vld [vmem:[%s5586_s4 + $0xa0] sm:$0xff] }
  0xa1   : > { %v3907_v13 = vunpack.c.l.bf16 %v4058_v58  ;;  %1318 = vmatpush.bf16.msrb.mxu2 %v3832_v14  ;;  %v3840_v54 = vld [vmem:[%s5586_s4 + $0xe0] sm:$0xff] }
  0xa5   : > { %1319 = vmatpush.bf16.msrb.mxu2 %v3831_v42  ;;  %v3848_v42 = vld [vmem:[%s5586_s4 + $0x120] sm:$0xff] }
  0xa6   : > { %v4741_v10 = vpop.permute.xlu2 %545 }
  0xa7   : > { %v611_v20 = vpop.permute.xlu1 %610  ;;  %v601_v21 = vpop.permute.xlu0 %600 }
  0xa8   : > { %v686_v28 = vmul.f32 %v611_v20, %v503_v15  ;;  %v684_v29 = vmul.f32 %v601_v21, %v501_v16  ;;  %v682_v21 = vmul.f32 %v591_v36, %v499_v60  ;;  %v507_v36 = vmax.f32 %v481_v12, 0.0 }
  0xa9   : > { %1320 = vmatpush.bf16.msrb.mxu2 %v3830_v25 }
  0xaa   : > { %v3986_v31 = vpack.c.bf16 %v686_v28, %v685_v26  ;;  %v3981_v32 = vpack.c.bf16 %v684_v29, %v683_v27  ;;  %v437_v26 = vmul.f32 %v4639_v33, %v3908_v6  ;;  %v436_v29 = vmul.f32 %v4639_v33, %v3907_v13  ;;  %v4068_v13 = vld [vmem:[%s4626_s30 + $0x58] sm:$0xff]  }
  0xab   : > { %v3947_v41 = vunpack.c.l.bf16 %v4068_v13 }
  0xac   : > { %4075 = vst [vmem:[#allocation2 + $0x30] sm:$0xff] %v3986_v31   ;;  %v3841_v31 = vld [vmem:[%s5586_s4 + $0xe8] sm:$0xff]  ;;  %v467_v45 = vadd.f32 %v4648_v37, %v437_v26  ;;  %v4785_v46 = vadd.f32 %v4648_v37, %v436_v29  ;;  %v673_v29 = vmul.f32 %v4741_v10, %v490_v4  ;;  %v3838_v10 = vld [vmem:[%s5586_s4 + $0xd0] sm:$0xff] }
  0xad   : > { %4074 = vst [vmem:[#allocation2 + $0x28] sm:$0xff] %v3981_v32   ;;  %v3851_v32 = vld [vmem:[%s5586_s4 + $0x138] sm:$0xff]  ;;  %1619 = vmatpush.bf16.msrb.mxu3 %v3841_v31 }
  0xae   : > { %1772 = vmatpush.bf16.msrb.mxu0 %v3851_v32  ;;  %v561_v58 = vpop.permute.xlu2 %560  ;;  %v493_v12 = vmax.f32 %v467_v45, 0.0  ;;  %v492_v8 = vmax.f32 %v4785_v46, 0.0  ;;  %v3944_v46 = vunpack.c.h.bf16 %v4067_v5 }
  0xaf   : > { %v571_v47 = vpop.permute.xlu1 %570  ;;  %v566_v48 = vpop.permute.xlu0 %565 }
  0xb0   : > { %v678_v51 = vmul.f32 %v571_v47, %v495_v38  ;;  %v677_v52 = vmul.f32 %v566_v48, %v494_v39  ;;  %v506_v38 = vmax.f32 %v480_v17, 0.0  ;;  %v4066_v39 = vld [vmem:[%s4626_s30 + $0x48] sm:$0xff]  }
  0xb1   : > { %v3939_v53 = vunpack.c.l.bf16 %v4066_v39  ;;  %1620 = vmatpush.bf16.msrb.mxu3 %v3840_v54  ;;  %v3849_v17 = vld [vmem:[%s5586_s4 + $0x128] sm:$0xff] }
  0xb2   : > { %v4720_v57 = vpack.c.bf16 %v678_v51, %v677_v52  ;;  %v465_v51 = vadd.f32 %v4648_v37, %v435_v30  ;;  %v3940_v52 = vunpack.c.h.bf16 %v4066_v39  ;;  %1773 = vmatpush.bf16.msrb.mxu0 %v3850_v55  ;;  %v3948_v30 = vunpack.c.h.bf16 %v4068_v13 }
  0xb3   : > { %v4724_v61 = vld [vmem:[#allocation2 + $0x34] sm:$0xff]  ;;  %v456_v55 = vmul.f32 %v4639_v33, %v3947_v41 }
  0xb4   : > { %4071 = vst [vmem:[#allocation2 + $0x10] sm:$0xff] %v4720_v57   ;;  %v4731_v2 = vld [vmem:[#allocation2 + $0x2c] sm:$0xff]  ;;  %v864_v7 = vrot.slane %v4724_v61, 3  ;;  %v1041_v47 = vshrl.u32 %v4724_v61, 16  ;;  %v1044_v48 = vshll.u32 %v4724_v61, 16  ;;  %v453_v14 = vmul.f32 %v4639_v33, %v3940_v52  ;;  %v4069_v52 = vld [vmem:[%s4626_s30 + $0x60] sm:$0xff]   ;;  %s5374_s30 = scalar_lea.vmem %s5603_s13, %s3782_s19 }
  0xb5   : > { %v862_v11 = vrot.slane %v4731_v2, 3  ;;  %v1032_v19 = vshrl.u32 %v4731_v2, 16  ;;  %v1035_v20 = vshll.u32 %v4731_v2, 16  ;;  %v3951_v13 = vunpack.c.l.bf16 %v4069_v52  ;;  %v3812_v61 = vld [vmem:[%s5586_s4] sm:$0xff]  ;;  %v3892_v2 = vld [vmem:[%s5586_s4 + $0x1f8] sm:$0xff]  ;;  %s5515_s19 = sshll.u32 %s3097_s14, 4  ;;  %s3102_s19 = int_to_ptr.hbm [resolvable:$true] %s5515_s19 }
  0xb6   : > { %v1237_v62 = vrot.slane %v1041_v47, 3  ;;  %v1238_v63 = vrot.slane %v1044_v48, 4  ;;  %v1046_v3 = vrot.slane %v1044_v48, 3  ;;  %1774 = vmatpush.bf16.msrb.mxu0 %v3849_v17  ;;  %v483_v39 = vadd.f32 %v4648_v37, %v453_v14  ;;  %s4279_s13 = sshra.s32 %s3102_s19, 4  ;;  %s4280_s13 = int_to_ptr.hbm [resolvable:$true] %s4279_s13 }
  0xb7   : > { %v586_v15 = vpop.permute.xlu1 %585  ;;  %v581_v16 = vpop.permute.xlu0 %580  ;;  %v865_v24 = vsel %vm852_vm0, %v862_v11, %v864_v7  ;;  %v1233_v34 = vrot.slane %v1032_v19, 3  ;;  %v1234_v35 = vrot.slane %v1035_v20, 4  ;;  %v1034_v43 = vrot.slane %v1032_v19, 2  ;;  %p4286_p4 = scmp.lt.s32.totalorder %s4280_s13, %s5589_s7 }
  0xb8   : > { %v681_v22 = vmul.f32 %v586_v15, %v498_v0  ;;  %v680_v23 = vmul.f32 %v581_v16, %v497_v1  ;;  %962 = vmatmul.bf16.vlgmr.msra.gmra.mxu2 %v865_v24  ;;  %v1037_v44 = vrot.slane %v1035_v20, 3  ;;  %v1043_v1 = vrot.slane %v1041_v47, 2  ;;  %v3839_v16 = vld [vmem:[%s5586_s4 + $0xd8] sm:$0xff]  ;;  %v3829_v47 = vld [vmem:[%s5586_s4 + $0x88] sm:$0xff] }
  0xb9   : > { %v4796_v56 = vor.u32 %v1234_v35, %v1233_v34  ;;  %v452_v15 = vmul.f32 %v4639_v33, %v3939_v53  ;;  %v491_v19 = vmax.f32 %v465_v51, 0.0  ;;  %v3943_v24 = vunpack.c.l.bf16 %v4067_v5  ;;  %1621 = vmatpush.bf16.msrb.mxu3 %v3839_v16  ;;  %v3814_v34 = vld [vmem:[%s5586_s4 + $0x10] sm:$0xff]  ;;  %1321 = vmatpush.bf16.msrb.mxu2 %v3829_v47 }
  0xba   : > { %v4761_v27 = vpack.c.bf16 %v682_v21, %v681_v22  ;;  %v4763_v28 = vpack.c.bf16 %v680_v23, %v679_v9  ;;  %v4798_v0 = vor.u32 %v1037_v44, %v1034_v43  ;;  %v4801_v9 = vor.u32 %v1238_v63, %v1237_v62  ;;  %v3815_v22 = vld [vmem:[%s5586_s4 + $0x18] sm:$0xff]  ;;  %1775 = vmatpush.bf16.msrb.mxu0 %v3848_v42 }
  0xbb   : > { %v4812_v18 = vor.u32 %v1046_v3, %v1043_v1  ;;  %1137 = vmatpush.bf16.msrb.mxu1 %v3815_v22  ;;  %v676_v35 = vmul.f32 %v561_v58, %v493_v12  ;;  %v482_v40 = vadd.f32 %v4648_v37, %v452_v15  ;;  %v454_v48 = vmul.f32 %v4639_v33, %v3943_v24  ;;  %v3837_v58 = vld [vmem:[%s5586_s4 + $0xc8] sm:$0xff]  ;;  %v3828_v3 = vld [vmem:[%s5586_s4 + $0x80] sm:$0xff]  ;;  %v3846_v22 = vld [vmem:[%s5586_s4 + $0x110] sm:$0xff] }
  0xbc   : > { %4073 = vst [vmem:[#allocation2 + $0x20] sm:$0xff] %v4761_v27   ;;  %v4825_v23 = vsel %vm1208_vm1, %v4796_v56, %v4801_v9  ;;  %v457_v53 = vmul.f32 %v4639_v33, %v3948_v30  ;;  %v455_v63 = vmul.f32 %v4639_v33, %v3944_v46  ;;  %v3813_v1 = vld [vmem:[%s5586_s4 + $0x8] sm:$0xff]  ;;  %v3952_v12 = vunpack.c.h.bf16 %v4069_v52 }
  0xbd   : > { %4072 = vst [vmem:[#allocation2 + $0x18] sm:$0xff] %v4763_v28   ;;  %v4833_v26 = vsel %vm986_vm2, %v4798_v0, %v4812_v18  ;;  %1622 = vmatpush.bf16.msrb.mxu3 %v3838_v10  ;;  %v508_v62 = vmax.f32 %v482_v40, 0.0  ;;  %v484_v4 = vadd.f32 %v4648_v37, %v454_v48  ;;  %1322 = vmatpush.bf16.msrb.mxu2 %v3828_v3  ;;  %v3845_v48 = vld [vmem:[%s5586_s4 + $0x108] sm:$0xff] }
  0xbe   : > { %v487_v14 = vadd.f32 %v4648_v37, %v457_v53  ;;  %v459_v30 = vmul.f32 %v4639_v33, %v3952_v12 }
  0xbf   : > { %v631_v49 = vpop.permute.xlu1 %630  ;;  %v626_v50 = vpop.permute.xlu0 %625  ;;  %1138 = vmatpush.bf16.msrb.mxu1 %v3814_v34  ;;  %v458_v34 = vmul.f32 %v4639_v33, %v3951_v13  ;;  %v3844_v13 = vld [vmem:[%s5586_s4 + $0x100] sm:$0xff] }
  0xc0   : > { %v690_v59 = vmul.f32 %v631_v49, %v507_v36  ;;  %v689_v60 = vmul.f32 %v626_v50, %v506_v38  ;;  %v4858_v49 = vpop.permute.xlu2 %645  ;;  %v513_v41 = vmax.f32 %v487_v14, 0.0 }
  0xc1   : > { %1623 = vmatpush.bf16.msrb.mxu3 %v3837_v58  ;;  %v488_v58 = vadd.f32 %v4648_v37, %v458_v34 }
  0xc2   : > { %v3996_v6 = vpack.c.bf16 %v690_v59, %v689_v60  ;;  %v3847_v59 = vld [vmem:[%s5586_s4 + $0x118] sm:$0xff]  ;;  %v509_v60 = vmax.f32 %v483_v39, 0.0 }
  0xc3   : > { %1776 = vmatpush.bf16.msrb.mxu0 %v3847_v59  ;;  %1139 = vmatpush.bf16.msrb.mxu1 %v3813_v1 }
  0xc4   : > { %4077 = vst [vmem:[#allocation2 + $0x40] sm:$0xff] %v3996_v6   ;;  %v4815_v20 = vld [vmem:[#allocation2 + $0x14] sm:$0xff]  ;;  %v4817_v21 = vld [vmem:[#allocation2 + $0x1c] sm:$0xff]  ;;  %v4880_v6 = vld [vmem:[#allocation2 + $0x24] sm:$0xff] }
  0xc5   : > { %v856_v31 = vrot.slane %v4815_v20, 3  ;;  %v858_v32 = vrot.slane %v4817_v21, 3  ;;  %v1017_v39 = vshll.u32 %v4817_v21, 16  ;;  %v1026_v40 = vshll.u32 %v4880_v6, 16 }
  0xc6   : > { %v860_v42 = vrot.slane %v4880_v6, 3 }
  0xc7   : > { %v556_v36 = vpop.permute.xlu1 %555  ;;  %v551_v38 = vpop.permute.xlu0 %550  ;;  %v859_v45 = vsel %vm852_vm0, %v856_v31, %v858_v32  ;;  %1777 = vmatpush.bf16.msrb.mxu0 %v3846_v22  ;;  %1140 = vmatpush.bf16.msrb.mxu1 %v3812_v61  ;;  %v1028_v22 = vrot.slane %v1026_v40, 3 }
  0xc8   : > { %v675_v43 = vmul.f32 %v556_v36, %v492_v8  ;;  %v674_v44 = vmul.f32 %v551_v38, %v491_v19  ;;  %947 = vmatmul.bf16.vlgmr.msra.gmra.mxu1 %v859_v45  ;;  %v486_v8 = vadd.f32 %v4648_v37, %v456_v55  ;;  %v3836_v19 = vld [vmem:[%s5586_s4 + $0xc0] sm:$0xff]  ;;  %v1014_v38 = vshrl.u32 %v4817_v21, 16  ;;  %v661_v33 = vpop.permute.xlu2 %660 }
  0xc9   : > { %1624 = vmatpush.bf16.msrb.mxu3 %v3836_v19  ;;  %v489_v55 = vadd.f32 %v4648_v37, %v459_v30  ;;  %v696_v1 = vmul.f32 %v661_v33, %v513_v41 }
  0xca   : > { %v3961_v50 = vpack.c.bf16 %v676_v35, %v675_v43  ;;  %v3956_v51 = vpack.c.bf16 %v674_v44, %v673_v29  ;;  %v485_v29 = vadd.f32 %v4648_v37, %v455_v63  ;;  %v1023_v35 = vshrl.u32 %v4880_v6, 16  ;;  %v4908_v44 = vld [vmem:[#allocation2 + $0x14] sm:$0xff]  }
  0xcb   : > { %v4862_v54 = vld [vmem:[#allocation2 + $0x3c] sm:$0xff]  ;;  %v512_v10 = vmax.f32 %v486_v8, 0.0  ;;  %1778 = vmatpush.bf16.msrb.mxu0 %v3845_v48  ;;  %v1225_v59 = vrot.slane %v1014_v38, 3  ;;  %v1230_v63 = vrot.slane %v1026_v40, 4  ;;  %v1480_v37 = vshrl.u32 %v4908_v44, 16 }
  0xcc   : > { %4070 = vst [vmem:[#allocation2 + $0x8] sm:$0xff] %v3961_v50   ;;  %v866_v5 = vrot.slane %v4862_v54, 3  ;;  %v511_v45 = vmax.f32 %v485_v29, 0.0  ;;  %v3884_v50 = vld [vmem:[%s5586_s4 + $0x1b8] sm:$0xff]  ;;  %v1025_v19 = vrot.slane %v1023_v35, 2 }
  0xcd   : > { %3957 = vst [vmem:[#allocation2] sm:$0xff] %v3956_v51   ;;  %2351 = vmatpush.bf16.msra.mxu2 %v3884_v50 }
  0xce   : > { %v867_v17 = vsel %vm852_vm0, %v864_v7, %v866_v5  ;;  %v510_v7 = vmax.f32 %v484_v4, 0.0 }
  0xcf   : > { %v641_v15 = vpop.permute.xlu1 %640  ;;  %v636_v16 = vpop.permute.xlu0 %635  ;;  %967 = vmatmul.bf16.gmra.mxu2 %v867_v17  ;;  %v1019_v17 = vrot.slane %v1017_v39, 3  ;;  %1779 = vmatpush.bf16.msrb.mxu0 %v3844_v13 }
  0xd0   : > { %v692_v24 = vmul.f32 %v641_v15, %v509_v60  ;;  %v691_v25 = vmul.f32 %v636_v16, %v508_v62  ;;  %v693_v51 = vmul.f32 %v4858_v49, %v510_v7  ;;  %v1226_v60 = vrot.slane %v1017_v39, 4 }
  0xd1   : > { %v1229_v62 = vrot.slane %v1023_v35, 3  ;;  %v861_v49 = vsel %vm852_vm0, %v858_v32, %v860_v42  ;;  %v1016_v16 = vrot.slane %v1014_v38, 2  ;;  %v3868_v32 = vld [vmem:[%s5586_s4 + $0x178] sm:$0xff]  ;;  %v1483_v38 = vshll.u32 %v4908_v44, 16 }
  0xd2   : > { %v4001_v36 = vpack.c.bf16 %v692_v24, %v691_v25  ;;  %v4940_v29 = vor.u32 %v1226_v60, %v1225_v59  ;;  %2062 = vmatpush.bf16.msra.mxu1 %v3868_v32  ;;  %v515_v39 = vmax.f32 %v489_v55, 0.0  ;;  %v514_v35 = vmax.f32 %v488_v58, 0.0 }
  0xd3   : > { %v4906_v43 = vld [vmem:[#allocation2 + $0x8] sm:$0xf]  ;;  %v4918_v52 = vld [vmem:[#allocation2 + $0xc] sm:$0xff]  ;;  %v1231_v61 = vor.u32 %v1230_v63, %v1229_v62  ;;  %v4947_v33 = vor.u32 %v1019_v17, %v1016_v16  ;;  %v863_v58 = vsel %vm852_vm0, %v860_v42, %v862_v11  ;;  %v4963_v59 = vrot.slane %v1480_v37, 3  ;;  %v3900_v62 = vld [vmem:[%s5586_s4 + $0x238] sm:$0xff] }
  0xd4   : > { %4078 = vst [vmem:[#allocation2 + $0x48] sm:$0xff] %v4001_v36   ;;  %v786_v46 = vld [vmem:[#allocation2 + $0x4] sm:$0x8]  ;;  %v824_v47 = vunpack.c.l.b16 %v4906_v43  ;;  %v854_v21 = vrot.slane %v4918_v52, 3  ;;  %v4097_v36 = vld [vmem:[#allocation2 + $0xc] sm:$0x8] }
  0xd5   : > { %v823_v53 = vunpack.c.l.b16 %v786_v46  ;;  %v751_v50 = vld [vmem:[#allocation2 + $0x4] sm:$0xc]  ;;  %v4953_v44 = vsel %vm1208_vm1, %v4940_v29, %v1231_v61  ;;  %v4965_v60 = vrot.slane %v1483_v38, 4  ;;  %v4981_v42 = vsel %vm1208_vm1, %v1231_v61, %v4796_v56 }
  0xd6   : > { %v984_v11 = vunpack.c.l.b16 %v751_v50  ;;  %v999_v13 = vshll.u32 %v4918_v52, 16  ;;  %v1050_v17 = vshrl.u32 %v4862_v54, 16  ;;  %v1053_v56 = vshll.u32 %v4862_v54, 16 }
  0xd7   : > { %v656_v3 = vpop.permute.xlu1 %655  ;;  %v651_v4 = vpop.permute.xlu0 %650  ;;  %v4929_v12 = vpack.c.b16 %v824_v47, %v823_v53 }
  0xd8   : > { %v695_v14 = vmul.f32 %v656_v3, %v512_v10  ;;  %v694_v15 = vmul.f32 %v651_v4, %v511_v45  ;;  %952 = vmatmul.bf16.gmra.mxu1 %v861_v49  ;;  %v4164_v10 = vld [vmem:[#allocation2 + $0xc] sm:$0xf0]   ;;  %v1029_v45 = vor.u32 %v1028_v22, %v1025_v19  ;;  %v1242_v54 = vrot.slane %v1053_v56, 4 }
  0xd9   : > { %v853_v8 = vrot.slane %v4929_v12, 3  ;;  %v4098_v48 = vor.u32 %v4164_v10, %v4097_v36  ;;  %v1213_v16 = vshll.u32 %v4929_v12, 16  ;;  %v1052_v61 = vrot.slane %v1050_v17, 2 }
  0xda   : > { %v4011_v24 = vpack.c.bf16 %v696_v1, %v695_v14  ;;  %v4006_v25 = vpack.c.bf16 %v694_v15, %v693_v51  ;;  %v4977_v6 = vsel %vm986_vm2, %v4947_v33, %v1029_v45  ;;  %v4985_v4 = vsel %vm986_vm2, %v1029_v45, %v4798_v0  ;;  %v3891_v45 = vld [vmem:[%s5586_s4 + $0x1f0] sm:$0xff] }
  0xdb   : > { %v855_v7 = vsel %vm852_vm0, %v853_v8, %v854_v21  ;;  %v4943_v30 = vld [vmem:[#allocation2 + $0x44] sm:$0xff]  ;;  %v769_v34 = vld [vmem:[#allocation2 + $0x4c] sm:$0x7]  ;;  %v1472_v14 = vshrl.u32 %v4098_v48, 16  ;;  %v1210_v15 = vshrl.u32 %v4929_v12, 16  ;;  %v857_v0 = vsel %vm852_vm0, %v854_v21, %v856_v31  ;;  %v3883_v21 = vld [vmem:[%s5586_s4 + $0x1b0] sm:$0xff] }
  0xdc   : > { %4080 = vst [vmem:[#allocation2 + $0x58] sm:$0xff] %v4011_v24   ;;  %937 = vmatmul.bf16.vlgmr.msra.gmra.mxu0 %v855_v7  ;;  %v841_v40 = vunpack.c.l.b16 %v769_v34  ;;  %v868_v41 = vrot.slane %v4943_v30, 3  ;;  %v1187_v8 = vld [vmem:[#allocation2 + $0x4c] sm:$0xf]  ;;  %v1475_v32 = vshll.u32 %v4098_v48, 16  ;;  %v1059_v19 = vshrl.u32 %v4943_v30, 16  ;;  %2352 = vmatpush.bf16.msra.mxu2 %v3883_v21 }
  0xdd   : > { %4079 = vst [vmem:[#allocation2 + $0x50] sm:$0xff] %v4006_v25   ;;  %2721 = vmatpush.bf16.msra.mxu0 %v3900_v62  ;;  %v1062_v22 = vshll.u32 %v4943_v30, 16  ;;  %v985_v12 = vpack.c.b16 %v824_v47, %v984_v11  ;;  %v1241_v25 = vrot.slane %v1050_v17, 3  ;;  %v1055_v7 = vrot.slane %v1053_v56, 3 }
  0xde   : > { %v4949_v46 = vpack.c.b16 %v841_v40, %v841_v40  ;;  %v869_v55 = vsel %vm852_vm0, %v866_v5, %v868_v41  ;;  %v996_v5 = vshrl.u32 %v4918_v52, 16  ;;  %v1245_v34 = vrot.slane %v1059_v19, 3 }
  0xdf   : > { %v671_v51 = vpop.permute.xlu1 %670  ;;  %v666_v53 = vpop.permute.xlu0 %665  ;;  %972 = vmatmul.bf16.gmra.mxu2 %v869_v55  ;;  %v1206_v36 = vunpack.c.l.b16 %v1187_v8  ;;  %v1212_v38 = vrot.slane %v1210_v15, 3  ;;  %v1215_v31 = vrot.slane %v1213_v16, 4  ;;  %v1246_v30 = vrot.slane %v1062_v22, 4 }
  0xe0   : > { %v698_v63 = vmul.f32 %v671_v51, %v515_v39  ;;  %v697_v1 = vmul.f32 %v666_v53, %v514_v35  ;;  %v870_v3 = vrot.slane %v4949_v46, 3  ;;  %v1217_v24 = vrot.slane %v996_v5, 3 }
  0xe1   : > { %v1243_v39 = vor.u32 %v1242_v54, %v1241_v25  ;;  %v1218_v35 = vrot.slane %v999_v13, 4  ;;  %v1056_v40 = vor.u32 %v1055_v7, %v1052_v61  ;;  %v1061_v43 = vrot.slane %v1059_v19, 2  ;;  %v4168_v7 = vld [vmem:[#allocation2 + $0x1c] sm:$0xff]  }
  0xe2   : > { %v4016_v49 = vpack.c.bf16 %v698_v63, %v697_v1  ;;  %v871_v37 = vsel %vm852_vm0, %v868_v41, %v870_v3  ;;  %v1064_v47 = vrot.slane %v1062_v22, 3  ;;  %v1474_v41 = vrot.slane %v1472_v14, 3  ;;  %v3899_v22 = vld [vmem:[%s5586_s4 + $0x230] sm:$0xff] }
  0xe3   : > { %977 = vmatmul.bf16.vlgmr.msra.gmra.mxu3 %v871_v37  ;;  %v1477_v10 = vrot.slane %v1475_v32, 4  ;;  %v5012_v48 = vsel %vm1208_vm1, %v4801_v9, %v1243_v39  ;;  %v1247_v50 = vor.u32 %v1246_v30, %v1245_v34  ;;  %v988_v51 = vshrl.u32 %v985_v12, 16  ;;  %2722 = vmatpush.bf16.msra.mxu0 %v3899_v22  ;;  %v4174_v22 = vld [vmem:[#allocation2 + $0x34] sm:$0xff]  }
  0xe4   : > { %4081 = vst [vmem:[#allocation2 + $0x60] sm:$0xff] %v4016_v49   ;;  %2521 = vmatpush.bf16.msra.mxu3 %v3892_v2  ;;  %v5016_v53 = vsel %vm986_vm2, %v4812_v18, %v1056_v40  ;;  %v1065_v55 = vor.u32 %v1064_v47, %v1061_v43  ;;  %v1207_v62 = vpack.c.b16 %v1206_v36, %v1206_v36  ;;  %v1068_v1 = vshrl.u32 %v4949_v46, 16  ;;  %v3867_v2 = vld [vmem:[%s5586_s4 + $0x170] sm:$0xff] }
  0xe5   : > { %v5019_v63 = vsel %vm1208_vm1, %v1243_v39, %v1247_v50  ;;  %v1071_v3 = vshll.u32 %v4949_v46, 16  ;;  %v991_v9 = vshll.u32 %v985_v12, 16  ;;  %v1219_v37 = vor.u32 %v1218_v35, %v1217_v24  ;;  %2063 = vmatpush.bf16.msra.mxu1 %v3867_v2  ;;  %v3881_v2 = vld [vmem:[%s5586_s4 + $0x1a0] sm:$0xff] }
  0xe6   : > { %v5027_v18 = vsel %vm986_vm2, %v1056_v40, %v1065_v55  ;;  %v1250_v11 = vshrl.u32 %v1207_v62, 16  ;;  %v1253_v49 = vshll.u32 %v1207_v62, 16  ;;  %v1070_v14 = vrot.slane %v1068_v1, 2  ;;  %v3866_v40 = vld [vmem:[%s5586_s4 + $0x168] sm:$0xff] }
  0xe7   : > { %v1073_v15 = vrot.slane %v1071_v3, 3  ;;  %v1478_v16 = vor.u32 %v1477_v10, %v1474_v41  ;;  %v990_v32 = vrot.slane %v988_v51, 2  ;;  %v993_v19 = vrot.slane %v991_v9, 3  ;;  %v3898_v51 = vld [vmem:[%s5586_s4 + $0x228] sm:$0xff] }
  0xe8   : > { %957 = vmatmul.bf16.gmra.mxu1 %v863_v58  ;;  %v1216_v58 = vor.u32 %v1215_v31, %v1212_v38  ;;  %2522 = vmatpush.bf16.msra.mxu3 %v3891_v45  ;;  %v1252_v17 = vrot.slane %v1250_v11, 3  ;;  %v1255_v56 = vrot.slane %v1253_v49, 4  ;;  %v998_v54 = vrot.slane %v996_v5, 2  ;;  %v3889_v11 = vld [vmem:[%s5586_s4 + $0x1e0] sm:$0xff] }
  0xe9   : > { %v1074_v8 = vor.u32 %v1073_v15, %v1070_v14  ;;  %v1001_v61 = vrot.slane %v999_v13, 3  ;;  %v1005_v34 = vshrl.u32 %v4815_v20, 16  ;;  %v1008_v36 = vshll.u32 %v4815_v20, 16  ;;  %v3882_v13 = vld [vmem:[%s5586_s4 + $0x1a8] sm:$0xff]  ;;  %2064 = vmatpush.bf16.msra.mxu1 %v3866_v40  ;;  %2723 = vmatpush.bf16.msra.mxu0 %v3898_v51  ;;  %v3865_v49 = vld [vmem:[%s5586_s4 + $0x160] sm:$0xff]  ;;  %v4087_v51 = vld [vmem:[#allocation2 + $0x38] sm:$0xff]  }
  0xea   : > { %v1220_v46 = vsel %vm1208_vm1, %v1216_v58, %v1219_v37  ;;  %v1256_v24 = vor.u32 %v1255_v56, %v1252_v17  ;;  %v1489_v31 = vshrl.u32 %v4168_v7, 16  ;;  %v1492_v21 = vshll.u32 %v4168_v7, 16  ;;  %2353 = vmatpush.bf16.msra.mxu2 %v3882_v13  ;;  %v3890_v20 = vld [vmem:[%s5586_s4 + $0x1e8] sm:$0xff]  ;;  %v3897_v15 = vld [vmem:[%s5586_s4 + $0x220] sm:$0xff]  ;;  %v4086_v13 = vld [vmem:[#allocation2 + $0x30] sm:$0xff]  }
  0xeb   : > { %v5036_v12 = vsel %vm986_vm2, %v1065_v55, %v1074_v8  ;;  %v1002_v38 = vor.u32 %v1001_v61, %v998_v54  ;;  %v1221_v5 = vrot.slane %v1005_v34, 3  ;;  %v1222_v52 = vrot.slane %v1008_v36, 4  ;;  %v3896_v54 = vld [vmem:[%s5586_s4 + $0x218] sm:$0xff]  ;;  %v4085_v7 = vld [vmem:[#allocation2 + $0x28] sm:$0xff]  }
  0xec   : > { %942 = vmatmul.bf16.gmra.mxu0 %v857_v0  ;;  %v1486_v0 = vor.u32 %v4965_v60, %v4963_v59  ;;  %v5044_v59 = vsel %vm1208_vm1, %v1247_v50, %v1256_v24  ;;  %v994_v60 = vor.u32 %v993_v19, %v990_v32  ;;  %v1491_v30 = vrot.slane %v1489_v31, 3  ;;  %2523 = vmatpush.bf16.msra.mxu3 %v3890_v20  ;;  %v3888_v32 = vld [vmem:[%s5586_s4 + $0x1d8] sm:$0xff]  ;;  %v3878_v20 = vld [vmem:[%s5586_s4 + $0x188] sm:$0xff] }
  0xed   : > { %v1494_v35 = vrot.slane %v1492_v21, 4  ;;  %v1223_v43 = vor.u32 %v1222_v52, %v1221_v5  ;;  %v1007_v45 = vrot.slane %v1005_v34, 2  ;;  %v1010_v50 = vrot.slane %v1008_v36, 3  ;;  %2065 = vmatpush.bf16.msra.mxu1 %v3865_v49  ;;  %2724 = vmatpush.bf16.msra.mxu0 %v3897_v15  ;;  %v3864_v19 = vld [vmem:[%s5586_s4 + $0x158] sm:$0xff]  ;;  %v3879_v34 = vld [vmem:[%s5586_s4 + $0x190] sm:$0xff]  ;;  %v4178_v40 = vld [vmem:[#allocation2 + $0x44] sm:$0xff]  }
  0xee   : > { %v1487_v25 = vsel %vm1208_vm1, %v1478_v16, %v1486_v0  ;;  %v1003_v39 = vsel %vm986_vm2, %v994_v60, %v1002_v38  ;;  %2354 = vmatpush.bf16.msra.mxu2 %v3881_v2  ;;  %v4172_v16 = vld [vmem:[#allocation2 + $0x2c] sm:$0xff]   ;;  %v1516_v24 = vshrl.u32 %v4174_v22, 16  ;;  %v4176_v31 = vld [vmem:[#allocation2 + $0x3c] sm:$0xff]  }
  0xef   : > { %1323 = vmatmul.bf16.vlgmr.msrb.gmra.mxu2 %v1220_v46  ;;  %v1495_v47 = vor.u32 %v1494_v35, %v1491_v30  ;;  %v1224_v41 = vsel %vm1208_vm1, %v1219_v37, %v1223_v43  ;;  %v1011_v55 = vor.u32 %v1010_v50, %v1007_v45  ;;  %v1228_v14 = vsel %vm1208_vm1, %v1223_v43, %v4940_v29  ;;  %v3887_v36 = vld [vmem:[%s5586_s4 + $0x1d0] sm:$0xff]  ;;  %v3886_v43 = vld [vmem:[%s5586_s4 + $0x1c8] sm:$0xff]  ;;  %v3885_v2 = vld [vmem:[%s5586_s4 + $0x1c0] sm:$0xff] }
  0xf0   : > { %2524 = vmatpush.bf16.msra.mxu3 %v3889_v11  ;;  %v1507_v56 = vshrl.u32 %v4172_v16, 16  ;;  %v1510_v46 = vshll.u32 %v4172_v16, 16  ;;  %v1525_v21 = vshrl.u32 %v4176_v31, 16  ;;  %v4088_v15 = vld [vmem:[#allocation2 + $0x40] sm:$0xff]  }
  0xf1   : > { %v1496_v10 = vsel %vm1208_vm1, %v1486_v0, %v1495_v47  ;;  %v1012_v1 = vsel %vm986_vm2, %v1002_v38, %v1011_v55  ;;  %v1021_v17 = vsel %vm986_vm2, %v1011_v55, %v4947_v33  ;;  %v3880_v0 = vld [vmem:[%s5586_s4 + $0x198] sm:$0xff]  ;;  %2066 = vmatpush.bf16.msra.mxu1 %v3864_v19  ;;  %2725 = vmatpush.bf16.msra.mxu0 %v3896_v54  ;;  %v3894_v55 = vld [vmem:[%s5586_s4 + $0x208] sm:$0xff] }
  0xf2   : > { %v1509_v29 = vrot.slane %v1507_v56, 3  ;;  %v1512_v8 = vrot.slane %v1510_v46, 4  ;;  %2355 = vmatpush.bf16.msra.mxu2 %v3880_v0  ;;  %v1527_v5 = vrot.slane %v1525_v21, 3  ;;  %v3861_v56 = vld [vmem:[%s5586_s4 + $0x140] sm:$0xff] }
  0xf3   : > { %1625 = vmatmul.bf16.vlgmr.msrb.gmra.mxu3 %v1487_v25  ;;  %v1519_v25 = vshll.u32 %v4174_v22, 16  ;;  %v3893_v46 = vld [vmem:[%s5586_s4 + $0x200] sm:$0xff] }
  0xf4   : > { %2525 = vmatpush.bf16.msra.mxu3 %v3888_v32  ;;  %v1513_v33 = vor.u32 %v1512_v8, %v1509_v29  ;;  %v5181_v21 = vld [vmem:[#allocation2 + $0x20] sm:$0xff] }
  0xf5   : > { %v1521_v61 = vrot.slane %v1519_v25, 4 }
  0xf6   : > { %2356 = vmatpush.bf16.msra.mxu2 %v3879_v34 }
  0xf8   : > { %1141 = vmatmul.bf16.vlgmr.msrb.gmra.mxu1 %v1003_v39  ;;  %2526 = vmatpush.bf16.msra.mxu3 %v3887_v36  ;;  %v1528_v39 = vshll.u32 %v4176_v31, 16 }
  0xfa   : > { %v1530_v52 = vrot.slane %v1528_v39, 4  ;;  %2357 = vmatpush.bf16.msra.mxu2 %v3878_v20  ;;  %v4092_v20 = vld [vmem:[#allocation2 + $0x18] sm:$0xf0] }
  0xfc   : > { %1780 = vmatmul.bf16.vlgmr.msrb.gmra.mxu0 %v4720_v57  ;;  %v4170_v57 = vld [vmem:[#allocation2 + $0x24] sm:$0xff]   ;;  %v1531_v30 = vor.u32 %v1530_v52, %v1527_v5  ;;  %2527 = vmatpush.bf16.msra.mxu3 %v3886_v43 }
  0xfd   : > { %v1498_v62 = vshrl.u32 %v4170_v57, 16  ;;  %v1501_v58 = vshll.u32 %v4170_v57, 16 }
  0xff   : > { %1328 = vmatmul.bf16.gmra.mxu2 %v1224_v41  ;;  %v1500_v3 = vrot.slane %v1498_v62, 3  ;;  %v1503_v9 = vrot.slane %v1501_v58, 4  ;;  %v1534_v41 = vshrl.u32 %v4178_v40, 16 }
 0x100   : > { %2528 = vmatpush.bf16.msra.mxu3 %v3885_v2  ;;  %v2446_v2 = vrot.slane %v5181_v21, 1 }
 0x101   : > { %v1504_v37 = vor.u32 %v1503_v9, %v1500_v3  ;;  %v1536_v45 = vrot.slane %v1534_v41, 3  ;;  %v4179_v3 = vld [vmem:[#allocation2 + $0x4c] sm:$0xff]   ;;  %v3877_v9 = vld [vmem:[%s5586_s4 + $0x180] sm:$0xff] }
 0x102   : > { %2358 = vmatpush.bf16.msra.mxu2 %v3877_v9  ;;  %v1543_v49 = vshrl.u32 %v4179_v3, 16  ;;  %v3852_v41 = vld [vmem:[#allocation2 + $0x10] sm:$0xff] }
 0x103   : > { %1630 = vmatmul.bf16.gmra.mxu3 %v1496_v10  ;;  %v1537_v10 = vshll.u32 %v4178_v40, 16 }
 0x105   : > { %v1539_v50 = vrot.slane %v1537_v10, 4 }
 0x107   : > { %v1540_v58 = vor.u32 %v1539_v50, %v1536_v45 }
 0x108   : > { %1146 = vmatmul.bf16.gmra.mxu1 %v1012_v1 }
 0x109   : > { %v1541_v1 = vsel %vm1208_vm1, %v1531_v30, %v1540_v58 }
 0x10c   : > { %1785 = vmatmul.bf16.gmra.mxu0 %v4763_v28  ;;  %v1505_v28 = vsel %vm1208_vm1, %v1495_v47, %v1504_v37  ;;  %v3862_v47 = vld [vmem:[%s5586_s4 + $0x148] sm:$0xff] }
 0x10f   : > { %1333 = vmatmul.bf16.gmra.mxu2 %v1228_v14  ;;  %v1545_v14 = vrot.slane %v1543_v49, 3  ;;  %v1932_v49 = vshll.u32 %v3852_v41, 16 }
 0x113   : > { %1635 = vmatmul.bf16.gmra.mxu3 %v1505_v28 }
 0x118   : > { %1151 = vmatmul.bf16.gmra.mxu1 %v1021_v17  ;;  %v4090_v17 = vld [vmem:[#allocation2 + $0x50] sm:$0xff]  }
 0x11c   : > { %1790 = vmatmul.bf16.gmra.mxu0 %v4761_v27  ;;  %v1514_v27 = vsel %vm1208_vm1, %v1504_v37, %v1513_v33 }
 0x11f   : > { %1338 = vmatmul.bf16.gmra.mxu2 %v4953_v44  ;;  %v1518_v44 = vrot.slane %v1516_v24, 3 }
 0x121   : > { %v1522_v60 = vor.u32 %v1521_v61, %v1518_v44 }
 0x123   : > { %1640 = vmatmul.bf16.gmra.mxu3 %v1514_v27  ;;  %v1523_v38 = vsel %vm1208_vm1, %v1513_v33, %v1522_v60 }
 0x128   : > { %1156 = vmatmul.bf16.gmra.mxu1 %v4977_v6  ;;  %v3863_v6 = vld [vmem:[%s5586_s4 + $0x150] sm:$0xff] }
 0x129   : > { %2067 = vmatpush.bf16.msra.mxu1 %v3863_v6 }
 0x12c   : > { %1795 = vmatmul.bf16.gmra.mxu0 %v4085_v7 }
 0x12d   : > { %2068 = vmatpush.bf16.msra.mxu1 %v3862_v47 }
 0x12f   : > { %1343 = vmatmul.bf16.gmra.mxu2 %v4981_v42  ;;  %v3895_v42 = vld [vmem:[%s5586_s4 + $0x210] sm:$0xff] }
 0x130   : > { %2726 = vmatpush.bf16.msra.mxu0 %v3895_v42 }
 0x131   : > { %2069 = vmatpush.bf16.msra.mxu1 %v3861_v56 }
 0x133   : > { %1645 = vmatmul.bf16.gmra.mxu3 %v1523_v38  ;;  %v4091_v38 = vld [vmem:[#allocation2 + $0x18] sm:$0xff]  }
 0x134   : > { %2727 = vmatpush.bf16.msra.mxu0 %v3894_v55  ;;  %v2221_v39 = vshll.u32 %v4091_v38, 16  ;;  %v2219_v43 = vshrl.u32 %v4091_v38, 16  ;;  %v5185_v55 = vld [vmem:[#allocation2 + $0x18] sm:$0xff] }
 0x138   : > { %1161 = vmatmul.bf16.gmra.mxu1 %v4985_v4  ;;  %v1532_v4 = vsel %vm1208_vm1, %v1522_v60, %v1531_v30  ;;  %2728 = vmatpush.bf16.msra.mxu0 %v3893_v46  ;;  %v2226_v30 = vshll.u32 %v5181_v21, 16 }
 0x13b   : > { %v5115_v35 = vpop.f32.mrf.mxu2 }
 0x13c   : > { %1800 = vmatmul.bf16.gmra.mxu0 %v4086_v13  ;;  %v2223_v13 = vrot.slane %v2221_v39, 1 }
 0x13e   : > { %v2224_v50 = vor.u32 %v2223_v13, %v2219_v43 }
 0x13f   : > { %1348 = vmatmul.bf16.gmra.mxu2 %v4825_v23 }
 0x143   : > { %1650 = vmatmul.bf16.gmra.mxu3 %v1532_v4  ;;  %v5130_v57 = vpop.f32.mrf.mxu2  ;;  %v4093_v4 = vld [vmem:[#allocation2 + $0x18] sm:$0xe] }
 0x144   : > { %v4094_v47 = vor.u32 %v4093_v4, %v4092_v20 }
 0x145   : > { %v5127_v23 = vpop.f32.mrf.mxu1 }
 0x146   : > { %v2445_v9 = vrot.slane %v4094_v47, 1 }
 0x148   : > { %1166 = vmatmul.bf16.gmra.mxu1 %v4833_v26  ;;  %v2447_v46 = vsel %vm2444_vm4, %v2445_v9, %v2446_v2 }
 0x14c   : > { %1805 = vmatmul.bf16.gmra.mxu0 %v4087_v51  ;;  %v2228_v51 = vrot.slane %v2226_v30, 1 }
 0x14d   : > { %v5135_v62 = vpop.f32.mrf.mxu1 }
 0x14f   : > { %1353 = vmatmul.bf16.gmra.mxu2 %v5012_v48  ;;  %v1546_v48 = vshll.u32 %v4179_v3, 16 }
 0x151   : > { %v1548_v28 = vrot.slane %v1546_v48, 4 }
 0x152   : > { %v5139_v26 = vpop.f32.mrf.mxu2 }
 0x153   : > { %1655 = vmatmul.bf16.gmra.mxu3 %v1541_v1  ;;  %v1549_v8 = vor.u32 %v1548_v28, %v1545_v14  ;;  %v2230_v14 = vshrl.u32 %v5181_v21, 16  ;;  %v2619_v28 = vshll.u32 %v4094_v47, 16 }
 0x155   : > { %v5147_v11 = vpop.f32.mrf.mxu1  ;;  %v1550_v32 = vsel %vm1208_vm1, %v1540_v58, %v1549_v8 }
 0x158   : > { %1171 = vmatmul.bf16.gmra.mxu1 %v5016_v53  ;;  %v4053_v53 = vunpack.c.h.b16 %v4090_v17 }
 0x159   : > { %v938_v37 = vpop.f32.mrf.mxu0 }
 0x15a   : > { %v5150_v16 = vpop.f32.mrf.mxu2  ;;  %v1470_v33 = vpack.c.b16 %v4053_v53, %v4053_v53 }
 0x15c   : > { %1810 = vmatmul.bf16.gmra.mxu0 %v4088_v15  ;;  %v1552_v24 = vshrl.u32 %v1470_v33, 16  ;;  %v1555_v25 = vshll.u32 %v1470_v33, 16  ;;  %v1937_v15 = vshll.u32 %v5185_v55, 16 }
 0x15d   : > { %v5158_v29 = vpop.f32.mrf.mxu1 }
 0x15e   : > { %v1554_v44 = vrot.slane %v1552_v24, 3  ;;  %v1557_v61 = vrot.slane %v1555_v25, 4  ;;  %v2621_v24 = vrot.slane %v2619_v28, 2  ;;  %v2624_v25 = vrot.slane %v2226_v30, 2 }
 0x15f   : > { %1358 = vmatmul.bf16.gmra.mxu2 %v5019_v63  ;;  %v4089_v63 = vld [vmem:[#allocation2 + $0x48] sm:$0xff]  }
 0x160   : > { %v1558_v36 = vor.u32 %v1557_v61, %v1554_v44  ;;  %v1930_v44 = vshrl.u32 %v3852_v41, 16  ;;  %v1939_v61 = vrot.slane %v1937_v15, 1 }
 0x161   : > { %v940_v0 = vpop.f32.mrf.mxu0 }
 0x162   : > { %v5162_v19 = vpop.f32.mrf.mxu2  ;;  %v1559_v6 = vsel %vm1208_vm1, %v1549_v8, %v1558_v36  ;;  %v1934_v8 = vrot.slane %v1932_v49, 1  ;;  %v5196_v36 = vld [vmem:[#allocation2 + $0x28] sm:$0xff] }
 0x163   : > { %1660 = vmatmul.bf16.gmra.mxu3 %v1550_v32  ;;  %v2234_v30 = vshll.u32 %v5196_v36, 16  ;;  %v2238_v49 = vshrl.u32 %v5196_v36, 16 }
 0x165   : > { %v5164_v27 = vpop.f32.mrf.mxu1 }
 0x166   : > { %v5166_v22 = vpop.f32.mrf.mxu3 }
 0x168   : > { %1176 = vmatmul.bf16.gmra.mxu1 %v5027_v18 }
 0x169   : > { %v5168_v54 = vpop.f32.mrf.mxu0 }
 0x16a   : > { %v5171_v7 = vpop.f32.mrf.mxu2 }
 0x16c   : > { %1815 = vmatmul.bf16.gmra.mxu0 %v4089_v63 }
 0x16d   : > { %v5173_v60 = vpop.f32.mrf.mxu1 }
 0x16e   : > { %v5175_v34 = vpop.f32.mrf.mxu3 }
 0x16f   : > { %1363 = vmatmul.bf16.gmra.mxu2 %v5044_v59 }
 0x171   : > { %v5178_v31 = vpop.f32.mrf.mxu0 }
 0x172   : > { %v1324_v18 = vpop.f32.mrf.mxu2 }
 0x173   : > { %1665 = vmatmul.bf16.gmra.mxu3 %v1559_v6 }
 0x175   : > { %v1142_v42 = vpop.f32.mrf.mxu1 }
 0x176   : > { %v1626_v5 = vpop.f32.mrf.mxu3  ;;  %v1143_v52 = vadd.f32 %v1142_v42, %v938_v37  ;;  %v2229_v37 = vsel %vm1928_vm3, %v2224_v50, %v2228_v51 }
 0x178   : > { %v1369_v40 = vadd.f32 %v1324_v18, %v1143_v52  ;;  %1181 = vmatmul.bf16.gmra.mxu1 %v5036_v12  ;;  %v2616_v12 = vshrl.u32 %v4094_v47, 16  ;;  %v1935_v18 = vor.u32 %v1934_v8, %v1930_v44  ;;  %v2236_v47 = vrot.slane %v2234_v30, 1 }
 0x179   : > { %v1781_v59 = vpop.f32.mrf.mxu0 }
 0x17a   : > { %v1671_v10 = vadd.f32 %v1626_v5, %v1369_v40  ;;  %v1326_v45 = vpop.f32.mrf.mxu2  ;;  %v2618_v53 = vrot.slane %v2616_v12, 1  ;;  %v1940_v5 = vsel %vm1928_vm3, %v1935_v18, %v1939_v61  ;;  %v1941_v12 = vshrl.u32 %v5185_v55, 16 }
 0x17c   : > { %1820 = vmatmul.bf16.gmra.mxu0 %v4090_v17  ;;  %v5187_v58 = vadd.f32 %v1781_v59, %v1671_v10  ;;  %v2622_v39 = vor.u32 %v2621_v24, %v2618_v53  ;;  %v2232_v59 = vor.u32 %v2230_v14, %v2228_v51  ;;  %v3854_v10 = vld [vmem:[#allocation2 + $0x20] sm:$0xff]  ;;  %v1943_v28 = vor.u32 %v1941_v12, %v1939_v61 }
 0x17d   : > { %v1144_v1 = vpop.f32.mrf.mxu1 }
 0x17e   : > { %v1628_v3 = vpop.f32.mrf.mxu3  ;;  %v1145_v48 = vadd.f32 %v1144_v1, %v940_v0  ;;  %v2623_v0 = vrot.slane %v2230_v14, 1  ;;  %v2237_v50 = vsel %vm1928_vm3, %v2232_v59, %v2236_v47  ;;  %v2448_v1 = vrot.slane %v5196_v36, 1 }
 0x17f   : > { %2359 = vmatmul.bf16.vlgmr.msra.gmra.mxu2 %v2229_v37  ;;  %v2240_v36 = vor.u32 %v2238_v49, %v2236_v47 }
 0x180   : > { %v1370_v17 = vadd.f32 %v1326_v45, %v1145_v48  ;;  %v2625_v42 = vor.u32 %v2624_v25, %v2623_v0  ;;  %v2449_v51 = vsel %vm2444_vm4, %v2446_v2, %v2448_v1  ;;  %v1945_v48 = vshll.u32 %v3854_v10, 16 }
 0x181   : > { %v1783_v56 = vpop.f32.mrf.mxu0 }
 0x182   : > { %v1672_v32 = vadd.f32 %v1628_v3, %v1370_v17  ;;  %v1329_v33 = vpop.f32.mrf.mxu2  ;;  %v2626_v4 = vsel %vm2614_vm5, %v2622_v39, %v2625_v42  ;;  %v2628_v17 = vrot.slane %v2234_v30, 2  ;;  %v1947_v53 = vrot.slane %v1945_v48, 1  ;;  %v3855_v39 = vld [vmem:[#allocation2 + $0x28] sm:$0xff] }
 0x183   : > { %2529 = vmatmul.bf16.vlgmr.msra.gmra.mxu3 %v2447_v46 }
 0x184   : > { %v5194_v63 = vadd.f32 %v1783_v56, %v1672_v32  ;;  %v5212_v56 = vld [vmem:[#allocation2 + $0x30] sm:$0xff]  ;;  %v1948_v2 = vsel %vm1928_vm3, %v1943_v28, %v1947_v53 }
 0x185   : > { %v1147_v38 = vpop.f32.mrf.mxu1  ;;  %v2242_v0 = vshll.u32 %v5212_v56, 16 }
 0x186   : > { %v1631_v6 = vpop.f32.mrf.mxu3  ;;  %v1148_v21 = vadd.f32 %v1147_v38, %v5168_v54 }
 0x188   : > { %v1371_v52 = vadd.f32 %v1329_v33, %v1148_v21  ;;  %2070 = vmatmul.bf16.vlgmr.msra.gmra.mxu1 %v1940_v5 }
 0x189   : > { %v1786_v13 = vpop.f32.mrf.mxu0 }
 0x18a   : > { %v1673_v20 = vadd.f32 %v1631_v6, %v1371_v52  ;;  %v1331_v40 = vpop.f32.mrf.mxu2  ;;  %v2244_v6 = vrot.slane %v2242_v0, 1 }
 0x18c   : > { %2729 = vmatmul.bf16.vlgmr.msra.gmra.mxu0 %v2626_v4  ;;  %v5202_v43 = vadd.f32 %v1786_v13, %v1673_v20  ;;  %v2245_v52 = vsel %vm1928_vm3, %v2240_v36, %v2244_v6  ;;  %v2246_v13 = vshrl.u32 %v5212_v56, 16  ;;  %v1949_v4 = vshrl.u32 %v3854_v10, 16 }
 0x18d   : > { %v1149_v54 = vpop.f32.mrf.mxu1 }
 0x18e   : > { %v1633_v41 = vpop.f32.mrf.mxu3  ;;  %v1150_v45 = vadd.f32 %v1149_v54, %v5178_v31  ;;  %v2627_v31 = vrot.slane %v2238_v49, 1  ;;  %v2631_v54 = vrot.slane %v2246_v13, 1 }
 0x18f   : > { %2364 = vmatmul.bf16.gmra.mxu2 %v2237_v50 }
 0x190   : > { %v1372_v3 = vadd.f32 %v1331_v40, %v1150_v45  ;;  %v2629_v24 = vor.u32 %v2628_v17, %v2627_v31  ;;  %v1953_v40 = vshll.u32 %v3855_v39, 16  ;;  %v1951_v45 = vor.u32 %v1949_v4, %v1947_v53 }
 0x191   : > { %v1788_v9 = vpop.f32.mrf.mxu0  ;;  %v2248_v17 = vor.u32 %v2246_v13, %v2244_v6 }
 0x192   : > { %v1674_v37 = vadd.f32 %v1633_v41, %v1372_v3  ;;  %v1334_v14 = vpop.f32.mrf.mxu2  ;;  %v2630_v44 = vsel %vm2614_vm5, %v2625_v42, %v2629_v24  ;;  %v2632_v41 = vrot.slane %v2242_v0, 2  ;;  %v1955_v49 = vrot.slane %v1953_v40, 1 }
 0x193   : > { %2534 = vmatmul.bf16.gmra.mxu3 %v2449_v51 }
 0x194   : > { %v5210_v15 = vadd.f32 %v1788_v9, %v1674_v37  ;;  %v2633_v12 = vor.u32 %v2632_v41, %v2631_v54 }
 0x195   : > { %v1152_v46 = vpop.f32.mrf.mxu1 }
 0x196   : > { %v1636_v8 = vpop.f32.mrf.mxu3  ;;  %v1153_v32 = vadd.f32 %v1152_v46, %v5127_v23  ;;  %v2450_v23 = vrot.slane %v5212_v56, 1  ;;  %v2634_v28 = vsel %vm2614_vm5, %v2629_v24, %v2633_v12 }
 0x198   : > { %v1373_v33 = vadd.f32 %v1334_v14, %v1153_v32  ;;  %2075 = vmatmul.bf16.gmra.mxu1 %v1948_v2  ;;  %v2451_v20 = vsel %vm2444_vm4, %v2448_v1, %v2450_v23  ;;  %v1956_v1 = vsel %vm1928_vm3, %v1951_v45, %v1955_v49 }
 0x199   : > { %v1791_v55 = vpop.f32.mrf.mxu0 }
 0x19a   : > { %v1675_v25 = vadd.f32 %v1636_v8, %v1373_v33  ;;  %v1336_v61 = vpop.f32.mrf.mxu2 }
 0x19c   : > { %2734 = vmatmul.bf16.gmra.mxu0 %v2630_v44  ;;  %v5218_v38 = vadd.f32 %v1791_v55, %v1675_v25  ;;  %v1957_v44 = vshrl.u32 %v3855_v39, 16 }
 0x19d   : > { %v1154_v18 = vpop.f32.mrf.mxu1 }
 0x19e   : > { %v1638_v21 = vpop.f32.mrf.mxu3  ;;  %v1155_v5 = vadd.f32 %v1154_v18, %v5135_v62  ;;  %v5227_v62 = vld [vmem:[#allocation2 + $0x38] sm:$0xff]  ;;  %v5240_v18 = vld [vmem:[#allocation2 + $0x40] sm:$0xff] }
 0x19f   : > { %2369 = vmatmul.bf16.gmra.mxu2 %v2245_v52  ;;  %v2250_v37 = vshll.u32 %v5227_v62, 16  ;;  %v2452_v33 = vrot.slane %v5227_v62, 1  ;;  %v2254_v24 = vshrl.u32 %v5227_v62, 16  ;;  %v2258_v4 = vshll.u32 %v5240_v18, 16 }
 0x1a0   : > { %v1374_v30 = vadd.f32 %v1336_v61, %v1155_v5 }
 0x1a1   : > { %v1793_v42 = vpop.f32.mrf.mxu0  ;;  %v2252_v46 = vrot.slane %v2250_v37, 1  ;;  %v2453_v25 = vsel %vm2444_vm4, %v2450_v23, %v2452_v33  ;;  %v2635_v5 = vrot.slane %v2254_v24, 1  ;;  %v2636_v52 = vrot.slane %v2250_v37, 2 }
 0x1a2   : > { %v1676_v59 = vadd.f32 %v1638_v21, %v1374_v30  ;;  %v1339_v47 = vpop.f32.mrf.mxu2  ;;  %v1959_v21 = vor.u32 %v1957_v44, %v1955_v49  ;;  %v2260_v45 = vrot.slane %v2258_v4, 1 }
 0x1a3   : > { %2539 = vmatmul.bf16.gmra.mxu3 %v2451_v20  ;;  %v2253_v2 = vsel %vm1928_vm3, %v2248_v17, %v2252_v46 }
 0x1a4   : > { %v5225_v50 = vadd.f32 %v1793_v42, %v1676_v59  ;;  %v2637_v59 = vor.u32 %v2636_v52, %v2635_v5  ;;  %v5263_v52 = vld [vmem:[#allocation2 + $0x40] sm:$0xff] }
 0x1a5   : > { %v1157_v3 = vpop.f32.mrf.mxu1 }
 0x1a6   : > { %v1641_v9 = vpop.f32.mrf.mxu3  ;;  %v1158_v51 = vadd.f32 %v1157_v3, %v5147_v11  ;;  %v3856_v11 = vld [vmem:[#allocation2 + $0x30] sm:$0xff]  ;;  %v2638_v54 = vsel %vm2614_vm5, %v2633_v12, %v2637_v59  ;;  %v2256_v3 = vor.u32 %v2254_v24, %v2252_v46 }
 0x1a7   : > { %v1961_v61 = vshll.u32 %v3856_v11, 16 }
 0x1a8   : > { %v1375_v10 = vadd.f32 %v1339_v47, %v1158_v51  ;;  %2080 = vmatmul.bf16.gmra.mxu1 %v1956_v1  ;;  %v3857_v51 = vld [vmem:[#allocation2 + $0x38] sm:$0xff] }
 0x1a9   : > { %v1796_v48 = vpop.f32.mrf.mxu0  ;;  %v1963_v42 = vrot.slane %v1961_v61, 1 }
 0x1aa   : > { %v1677_v14 = vadd.f32 %v1641_v9, %v1375_v10  ;;  %v1341_v31 = vpop.f32.mrf.mxu2  ;;  %v2261_v10 = vsel %vm1928_vm3, %v2256_v3, %v2260_v45 }
 0x1ab   : > { %v1964_v23 = vsel %vm1928_vm3, %v1959_v21, %v1963_v42 }
 0x1ac   : > { %2739 = vmatmul.bf16.gmra.mxu0 %v2634_v28  ;;  %v5233_v56 = vadd.f32 %v1796_v48, %v1677_v14  ;;  %v2262_v48 = vshrl.u32 %v5240_v18, 16  ;;  %v1965_v28 = vshrl.u32 %v3856_v11, 16 }
 0x1ad   : > { %v1159_v8 = vpop.f32.mrf.mxu1 }
 0x1ae   : > { %v1643_v53 = vpop.f32.mrf.mxu3  ;;  %v1160_v32 = vadd.f32 %v1159_v8, %v5158_v29  ;;  %v2639_v8 = vrot.slane %v2262_v48, 1 }
 0x1af   : > { %2374 = vmatmul.bf16.gmra.mxu2 %v2253_v2  ;;  %v1967_v2 = vor.u32 %v1965_v28, %v1963_v42 }
 0x1b0   : > { %v1376_v55 = vadd.f32 %v1341_v31, %v1160_v32  ;;  %v1969_v31 = vshll.u32 %v3857_v51, 16  ;;  %v5255_v32 = vld [vmem:[#allocation2 + $0x48] sm:$0xff] }
 0x1b1   : > { %v1798_v0 = vpop.f32.mrf.mxu0 }
 0x1b2   : > { %v1678_v36 = vadd.f32 %v1643_v53, %v1376_v55  ;;  %v1344_v6 = vpop.f32.mrf.mxu2  ;;  %v2640_v53 = vrot.slane %v2258_v4, 2  ;;  %v1971_v24 = vrot.slane %v1969_v31, 1 }
 0x1b3   : > { %2544 = vmatmul.bf16.gmra.mxu3 %v2453_v25 }
 0x1b4   : > { %v5242_v29 = vadd.f32 %v1798_v0, %v1678_v36  ;;  %v2641_v44 = vor.u32 %v2640_v53, %v2639_v8  ;;  %v1972_v11 = vsel %vm1928_vm3, %v1967_v2, %v1971_v24  ;;  %v5281_v2 = vld [vmem:[#allocation2 + $0x48] sm:$0xff] }
 0x1b5   : > { %v1162_v13 = vpop.f32.mrf.mxu1 }
 0x1b6   : > { %v1646_v30 = vpop.f32.mrf.mxu3  ;;  %v1163_v20 = vadd.f32 %v1162_v13, %v5164_v27  ;;  %v2454_v27 = vrot.slane %v5240_v18, 1  ;;  %v2642_v18 = vsel %vm2614_vm5, %v2637_v59, %v2641_v44 }
 0x1b8   : > { %v1377_v39 = vadd.f32 %v1344_v6, %v1163_v20  ;;  %2085 = vmatmul.bf16.gmra.mxu1 %v1964_v23  ;;  %v2455_v14 = vsel %vm2444_vm4, %v2452_v33, %v2454_v27  ;;  %v2266_v33 = vshll.u32 %v5255_v32, 16  ;;  %v2456_v20 = vrot.slane %v5255_v32, 1 }
 0x1b9   : > { %v1801_v40 = vpop.f32.mrf.mxu0 }
 0x1ba   : > { %v1679_v47 = vadd.f32 %v1646_v30, %v1377_v39  ;;  %v1346_v41 = vpop.f32.mrf.mxu2  ;;  %v2268_v5 = vrot.slane %v2266_v33, 1  ;;  %v2264_v30 = vor.u32 %v2262_v48, %v2260_v45  ;;  %v2270_v39 = vshrl.u32 %v5255_v32, 16 }
 0x1bc   : > { %2744 = vmatmul.bf16.gmra.mxu0 %v2638_v54  ;;  %v5248_v62 = vadd.f32 %v1801_v40, %v1679_v47  ;;  %v2269_v23 = vsel %vm1928_vm3, %v2264_v30, %v2268_v5  ;;  %v1977_v40 = vshll.u32 %v5263_v52, 16  ;;  %v2457_v54 = vsel %vm2444_vm4, %v2454_v27, %v2456_v20 }
 0x1bd   : > { %v1164_v9 = vpop.f32.mrf.mxu1 }
 0x1be   : > { %v1648_v49 = vpop.f32.mrf.mxu3  ;;  %v1165_v1 = vadd.f32 %v1164_v9, %v5173_v60  ;;  %v2643_v9 = vrot.slane %v2270_v39, 1 }
 0x1bf   : > { %2379 = vmatmul.bf16.gmra.mxu2 %v2261_v10 }
 0x1c0   : > { %v1378_v37 = vadd.f32 %v1346_v41, %v1165_v1  ;;  %v1973_v41 = vshrl.u32 %v3857_v51, 16  ;;  %v5273_v1 = vld [vmem:[#allocation2 + $0x50] sm:$0xff] }
 0x1c1   : > { %v1803_v12 = vpop.f32.mrf.mxu0  ;;  %v2274_v31 = vshll.u32 %v5273_v1, 16 }
 0x1c2   : > { %v1680_v17 = vadd.f32 %v1648_v49, %v1378_v37  ;;  %v1349_v46 = vpop.f32.mrf.mxu2  ;;  %v2644_v49 = vrot.slane %v2266_v33, 2 }
 0x1c3   : > { %2549 = vmatmul.bf16.gmra.mxu3 %v2455_v14  ;;  %v2276_v32 = vrot.slane %v2274_v31, 1 }
 0x1c4   : > { %v5257_v60 = vadd.f32 %v1803_v12, %v1680_v17  ;;  %v1975_v12 = vor.u32 %v1973_v41, %v1971_v24  ;;  %v2645_v28 = vor.u32 %v2644_v49, %v2643_v9 }
 0x1c5   : > { %v1167_v55 = vpop.f32.mrf.mxu1 }
 0x1c6   : > { %v1651_v0 = vpop.f32.mrf.mxu3  ;;  %v1168_v25 = vadd.f32 %v1167_v55, %v5115_v35  ;;  %v2646_v8 = vsel %vm2614_vm5, %v2641_v44, %v2645_v28  ;;  %v1985_v44 = vshll.u32 %v5281_v2, 16 }
 0x1c8   : > { %v1379_v61 = vadd.f32 %v1349_v46, %v1168_v25  ;;  %2090 = vmatmul.bf16.gmra.mxu1 %v1972_v11  ;;  %v2458_v25 = vrot.slane %v5273_v1, 1 }
 0x1c9   : > { %v1806_v36 = vpop.f32.mrf.mxu0 }
 0x1ca   : > { %v1681_v6 = vadd.f32 %v1651_v0, %v1379_v61  ;;  %v1351_v21 = vpop.f32.mrf.mxu2  ;;  %v2272_v0 = vor.u32 %v2270_v39, %v2268_v5  ;;  %v2278_v61 = vshrl.u32 %v5273_v1, 16 }
 0x1cc   : > { %2749 = vmatmul.bf16.gmra.mxu0 %v2642_v18  ;;  %v5265_v13 = vadd.f32 %v1806_v36, %v1681_v6  ;;  %v2277_v11 = vsel %vm1928_vm3, %v2272_v0, %v2276_v32  ;;  %v2459_v18 = vsel %vm2444_vm4, %v2456_v20, %v2458_v25  ;;  %v2647_v30 = vrot.slane %v2278_v61, 1 }
 0x1cd   : > { %v1169_v35 = vpop.f32.mrf.mxu1  ;;  %v2280_v1 = vor.u32 %v2278_v61, %v2276_v32 }
 0x1ce   : > { %v1653_v42 = vpop.f32.mrf.mxu3  ;;  %v1170_v4 = vadd.f32 %v1169_v35, %v5130_v57  ;;  %v1979_v57 = vrot.slane %v1977_v40, 1  ;;  %v2648_v35 = vrot.slane %v2274_v31, 2 }
 0x1cf   : > { %2384 = vmatmul.bf16.gmra.mxu2 %v2269_v23  ;;  %v5294_v23 = vld [vmem:[#allocation2 + $0x58] sm:$0xff] }
 0x1d0   : > { %v1380_v59 = vadd.f32 %v1351_v21, %v1170_v4  ;;  %v1980_v27 = vsel %vm1928_vm3, %v1975_v12, %v1979_v57  ;;  %v1987_v4 = vrot.slane %v1985_v44, 1  ;;  %v2460_v31 = vrot.slane %v5294_v23, 1  ;;  %v2593_v44 = vld [vmem:[#allocation2 + $0x60] sm:$0x3] }
 0x1d1   : > { %v1808_v47 = vpop.f32.mrf.mxu0 }
 0x1d2   : > { %v1682_v3 = vadd.f32 %v1653_v42, %v1380_v59  ;;  %v1354_v45 = vpop.f32.mrf.mxu2  ;;  %v1981_v42 = vshrl.u32 %v5263_v52, 16  ;;  %v2461_v32 = vsel %vm2444_vm4, %v2458_v25, %v2460_v31 }
 0x1d3   : > { %2554 = vmatmul.bf16.gmra.mxu3 %v2457_v54  ;;  %v2649_v54 = vor.u32 %v2648_v35, %v2647_v30 }
 0x1d4   : > { %v5275_v10 = vadd.f32 %v1808_v47, %v1682_v3  ;;  %v1983_v59 = vor.u32 %v1981_v42, %v1979_v57  ;;  %v2612_v42 = vunpack.c.l.b16 %v2593_v44 }
 0x1d5   : > { %v1172_v48 = vpop.f32.mrf.mxu1  ;;  %v2650_v52 = vsel %vm2614_vm5, %v2645_v28, %v2649_v54 }
 0x1d6   : > { %v1656_v37 = vpop.f32.mrf.mxu3  ;;  %v1173_v14 = vadd.f32 %v1172_v48, %v5139_v26  ;;  %v1988_v20 = vsel %vm1928_vm3, %v1983_v59, %v1987_v4  ;;  %v5300_v48 = vld [vmem:[#allocation2 + $0x50] sm:$0xff] }
 0x1d8   : > { %v1381_v51 = vadd.f32 %v1354_v45, %v1173_v14  ;;  %2095 = vmatmul.bf16.gmra.mxu1 %v1980_v27  ;;  %v2282_v45 = vshll.u32 %v5294_v23, 16 }
 0x1d9   : > { %v1811_v17 = vpop.f32.mrf.mxu0 }
 0x1da   : > { %v1683_v46 = vadd.f32 %v1656_v37, %v1381_v51  ;;  %v1356_v53 = vpop.f32.mrf.mxu2  ;;  %v2152_v37 = vld [vmem:[#allocation2 + $0x60] sm:$0x1] }
 0x1db   : > { %v2207_v28 = vunpack.c.l.b16 %v2152_v37 }
 0x1dc   : > { %2754 = vmatmul.bf16.gmra.mxu0 %v2646_v8  ;;  %v5283_v55 = vadd.f32 %v1811_v17, %v1683_v46  ;;  %v2286_v17 = vshrl.u32 %v5294_v23, 16  ;;  %v1993_v46 = vshll.u32 %v5300_v48, 16 }
 0x1dd   : > { %v1174_v26 = vpop.f32.mrf.mxu1 }
 0x1de   : > { %v1658_v24 = vpop.f32.mrf.mxu3  ;;  %v1175_v33 = vadd.f32 %v1174_v26, %v5150_v16  ;;  %v1995_v61 = vrot.slane %v1993_v46, 1  ;;  %v1997_v46 = vshrl.u32 %v5300_v48, 16 }
 0x1df   : > { %2389 = vmatmul.bf16.gmra.mxu2 %v2277_v11  ;;  %v2217_v11 = vpack.c.b16 %v2207_v28, %v2207_v28 }
 0x1e0   : > { %v1382_v36 = vadd.f32 %v1356_v53, %v1175_v33  ;;  %v2652_v33 = vrot.slane %v2282_v45, 2 }
 0x1e1   : > { %v1813_v6 = vpop.f32.mrf.mxu0  ;;  %v2290_v25 = vshll.u32 %v2217_v11, 16 }
 0x1e2   : > { %v1684_v21 = vadd.f32 %v1658_v24, %v1382_v36  ;;  %v1359_v5 = vpop.f32.mrf.mxu2  ;;  %v2651_v24 = vrot.slane %v2286_v17, 1 }
 0x1e3   : > { %2559 = vmatmul.bf16.gmra.mxu3 %v2459_v18 }
 0x1e4   : > { %v5292_v16 = vadd.f32 %v1813_v6, %v1684_v21  ;;  %v1862_v6 = vld [vmem:[#allocation2 + $0x58] sm:$0x1]  ;;  %v2653_v35 = vor.u32 %v2652_v33, %v2651_v24 }
 0x1e5   : > { %v1177_v39 = vpop.f32.mrf.mxu1 }
 0x1e6   : > { %v1661_v40 = vpop.f32.mrf.mxu3  ;;  %v1178_v47 = vadd.f32 %v1177_v39, %v5162_v19  ;;  %v2284_v19 = vrot.slane %v2282_v45, 1  ;;  %v1917_v39 = vunpack.c.l.b16 %v1862_v6 }
 0x1e8   : > { %v1383_v41 = vadd.f32 %v1359_v5, %v1178_v47  ;;  %2100 = vmatmul.bf16.gmra.mxu1 %v1988_v20  ;;  %v2285_v51 = vsel %vm1928_vm3, %v2280_v1, %v2284_v19  ;;  %v2654_v47 = vsel %vm2614_vm5, %v2649_v54, %v2653_v35  ;;  %v1927_v45 = vpack.c.b16 %v1917_v39, %v1917_v39  ;;  %v2901_v39 = vpop.permute.xlu2 %2900 }
 0x1e9   : > { %v1816_v3 = vpop.f32.mrf.mxu0 }
 0x1ea   : > { %v1685_v9 = vadd.f32 %v1661_v40, %v1383_v41  ;;  %v1361_v49 = vpop.f32.mrf.mxu2  ;;  %v2292_v41 = vrot.slane %v2290_v25, 1 }
 0x1ec   : > { %2759 = vmatmul.bf16.gmra.mxu0 %v2650_v52  ;;  %v5302_v57 = vadd.f32 %v1816_v3, %v1685_v9  ;;  %v2613_v3 = vpack.c.b16 %v2612_v42, %v2612_v42 }
 0x1ed   : > { %v1179_v12 = vpop.f32.mrf.mxu1 }
 0x1ee   : > { %v1663_v14 = vpop.f32.mrf.mxu3  ;;  %v1180_v27 = vadd.f32 %v1179_v12, %v5171_v7  ;;  %v1989_v7 = vshrl.u32 %v5281_v2, 16  ;;  %v2656_v12 = vshrl.u32 %v2613_v3, 16 }
 0x1ef   : > { %2394 = vmatmul.bf16.gmra.mxu2 %v2285_v51 }
 0x1f0   : > { %v1384_v8 = vadd.f32 %v1361_v49, %v1180_v27  ;;  %v1991_v5 = vor.u32 %v1989_v7, %v1987_v4  ;;  %v2462_v49 = vrot.slane %v2217_v11, 1  ;;  %v2001_v27 = vshll.u32 %v1927_v45, 16 }
 0x1f1   : > { %v1818_v53 = vpop.f32.mrf.mxu0 }
 0x1f2   : > { %v1686_v0 = vadd.f32 %v1663_v14, %v1384_v8  ;;  %v1364_v26 = vpop.f32.mrf.mxu2  ;;  %v1996_v23 = vsel %vm1928_vm3, %v1991_v5, %v1995_v61  ;;  %v2659_v14 = vshll.u32 %v2613_v3, 16  ;;  %v2463_v28 = vsel %vm2444_vm4, %v2460_v31, %v2462_v49 }
 0x1f3   : > { %2564 = vmatmul.bf16.gmra.mxu3 %v2461_v32  ;;  %v1999_v32 = vor.u32 %v1997_v46, %v1995_v61 }
 0x1f4   : > { %v5311_v36 = vadd.f32 %v1818_v53, %v1686_v0  ;;  %v2661_v53 = vrot.slane %v2659_v14, 2  ;;  %v2003_v0 = vrot.slane %v2001_v27, 1 }
 0x1f5   : > { %v1182_v18 = vpop.f32.mrf.mxu1 }
 0x1f6   : > { %v1666_v21 = vpop.f32.mrf.mxu3  ;;  %v1183_v30 = vadd.f32 %v1182_v18, %v5166_v22  ;;  %v2288_v22 = vor.u32 %v2286_v17, %v2284_v19  ;;  %v2658_v17 = vrot.slane %v2656_v12, 1  ;;  %v2004_v7 = vsel %vm1928_vm3, %v1999_v32, %v2003_v0  ;;  %v2916_v32 = vpop.permute.xlu2 %2915 }
 0x1f8   : > { %v1385_v40 = vadd.f32 %v1364_v26, %v1183_v30  ;;  %2105 = vmatmul.bf16.gmra.mxu1 %v1996_v23  ;;  %v2293_v37 = vsel %vm1928_vm3, %v2288_v22, %v2292_v41  ;;  %v2662_v11 = vor.u32 %v2661_v53, %v2658_v17 }
 0x1f9   : > { %v1821_v59 = vpop.f32.mrf.mxu0 }
 0x1fa   : > { %v1687_v2 = vadd.f32 %v1666_v21, %v1385_v40  ;;  %v1366_v20 = vpop.f32.mrf.mxu2  ;;  %v2663_v48 = vsel %vm2614_vm5, %v2653_v35, %v2662_v11  ;;  %v2906_v40 = vpop.permute.xlu0 %2905 }
 0x1fc   : > { %2764 = vmatmul.bf16.gmra.mxu0 %v2654_v47  ;;  %v5316_v4 = vadd.f32 %v1821_v59, %v1687_v2 }
 0x1fd   : > { %v1184_v9 = vpop.f32.mrf.mxu1 }
 0x1fe   : > { %v1668_v52 = vpop.f32.mrf.mxu3  ;;  %v1185_v1 = vadd.f32 %v1184_v9, %v5175_v34 }
 0x1ff   : > { %2399 = vmatmul.bf16.gmra.mxu2 %v2293_v37  ;;  %v2911_v37 = vpop.permute.xlu1 %2910 }
 0x200   : > { %v1386_v54 = vadd.f32 %v1366_v20, %v1185_v1 }
 0x201   : > { %v1823_v51 = vpop.f32.mrf.mxu0 }
 0x202   : > { %v1688_v8 = vadd.f32 %v1668_v52, %v1386_v54  ;;  %v2360_v19 = vpop.f32.mrf.mxu2 }
 0x203   : > { %2569 = vmatmul.bf16.gmra.mxu3 %v2463_v28 }
 0x204   : > { %v5322_v34 = vadd.f32 %v1823_v51, %v1688_v8 }
 0x205   : > { %v2071_v26 = vpop.f32.mrf.mxu1 }
 0x206   : > { %v2530_v24 = vpop.f32.mrf.mxu3  ;;  %v2116_v33 = vadd.f32 %v2071_v26, %v5187_v58 }
 0x208   : > { %v2405_v44 = vadd.f32 %v2360_v19, %v2116_v33  ;;  %2110 = vmatmul.bf16.gmra.mxu1 %v2004_v7 }
 0x209   : > { %v2730_v31 = vpop.f32.mrf.mxu0 }
 0x20a   : > { %v2362_v6 = vpop.f32.mrf.mxu2  ;;  %v2575_v18 = vadd.f32 %v2530_v24, %v2405_v44 }
 0x20c   : > { %2769 = vmatmul.bf16.gmra.mxu0 %v2663_v48  ;;  %v5328_v30 = vadd.f32 %v2730_v31, %v2575_v18 }
 0x20d   : > { %v2073_v21 = vpop.f32.mrf.mxu1 }
 0x20e   : > { %v2532_v61 = vpop.f32.mrf.mxu3  ;;  %v2117_v5 = vadd.f32 %v2073_v21, %v5194_v63  ;;  %v2988_v59 = vmul.f32 %v2901_v39, %v5328_v30  ;;  %v2921_v21 = vpop.permute.xlu0 %2920 }
 0x210   : > { %v2406_v25 = vadd.f32 %v2362_v6, %v2117_v5  ;;  %v3033_v63 = vmul.f32 %v2988_v59, %v5328_v30 }
 0x211   : > { %v2732_v42 = vpop.f32.mrf.mxu0 }
 0x212   : > { %v2576_v58 = vadd.f32 %v2532_v61, %v2406_v25  ;;  %v2365_v23 = vpop.f32.mrf.mxu2 }
 0x214   : > { %v5331_v2 = vadd.f32 %v2732_v42, %v2576_v58 }
 0x215   : > { %v2076_v35 = vpop.f32.mrf.mxu1 }
 0x216   : > { %v2535_v47 = vpop.f32.mrf.mxu3  ;;  %v2989_v20 = vmul.f32 %v2906_v40, %v5331_v2  ;;  %v2118_v41 = vadd.f32 %v2076_v35, %v5202_v43 }
 0x218   : > { %v3007_v3 = vadd.f32 %v2989_v20, %v2988_v59  ;;  %v3034_v45 = vmul.f32 %v2989_v20, %v5331_v2  ;;  %v2407_v22 = vadd.f32 %v2365_v23, %v2118_v41  ;;  %v2926_v20 = vpop.permute.xlu1 %2925 }
 0x219   : > { %v2735_v9 = vpop.f32.mrf.mxu0 }
 0x21a   : > { %v3051_v52 = vadd.f32 %v3034_v45, %v3033_v63  ;;  %v2577_v49 = vadd.f32 %v2535_v47, %v2407_v22  ;;  %v2367_v1 = vpop.f32.mrf.mxu2  ;;  %v2793_v45 = vlaneseq }
 0x21c   : > { %v5337_v12 = vadd.f32 %v2735_v9, %v2577_v49 }
 0x21d   : > { %v2078_v14 = vpop.f32.mrf.mxu1 }
 0x21e   : > { %v2537_v27 = vpop.f32.mrf.mxu3  ;;  %v2990_v54 = vmul.f32 %v2911_v37, %v5337_v12  ;;  %v2119_v51 = vadd.f32 %v2078_v14, %v5210_v15  ;;  %v2794_v37 = vand.u32 127, %v2793_v45 }
 0x220   : > { %v3008_v43 = vadd.f32 %v3007_v3, %v2990_v54  ;;  %v3035_v28 = vmul.f32 %v2990_v54, %v5337_v12  ;;  %v2408_v46 = vadd.f32 %v2367_v1, %v2119_v51  ;;  %v2931_v51 = vpop.permute.xlu2 %2930  ;;  %vm2795_vm6 = vcmp.ge.s32.totalorder %v2794_v37, 16 }
 0x221   : > { %v2737_v8 = vpop.f32.mrf.mxu0  ;;  %vm2796_vm7 = vcmp.lt.s32.totalorder %v2794_v37, 20  ;;  %v5438_v37 = vld [vmem:[%s5374_s30 + $0x44] sm:$0xf] }
 0x222   : > { %v3052_v19 = vadd.f32 %v3051_v52, %v3035_v28  ;;  %v2578_v17 = vadd.f32 %v2537_v27, %v2408_v46  ;;  %v2370_v53 = vpop.f32.mrf.mxu2  ;;  %vm2797_vm8 = vmand %vm2795_vm6, %vm2796_vm7 }
 0x223   : > { %vm5381_vm9 = vmpackc.low %vm2797_vm8, %vm2797_vm8 }
 0x224   : > { %v5342_v0 = vadd.f32 %v2737_v8, %v2578_v17 }
 0x225   : > { %v2081_v26 = vpop.f32.mrf.mxu1 }
 0x226   : > { %v2540_v24 = vpop.f32.mrf.mxu3  ;;  %v2991_v33 = vmul.f32 %v2916_v32, %v5342_v0  ;;  %v2120_v11 = vadd.f32 %v2081_v26, %v5218_v38 }
 0x228   : > { %v3009_v7 = vadd.f32 %v3008_v43, %v2991_v33  ;;  %v3036_v15 = vmul.f32 %v2991_v33, %v5342_v0  ;;  %v2409_v44 = vadd.f32 %v2370_v53, %v2120_v11  ;;  %v2820_v33 = vpack.c.bf16 %v5328_v30, %v5328_v30  ;;  %v2805_v30 = vld [vmem:[%s5374_s30 + $0xc] sm:$0xf] }
 0x229   : > { %v2740_v31 = vpop.f32.mrf.mxu0  ;;  %v2821_v11 = vpack.c.bf16 %v5331_v2, %v5331_v2  ;;  %v2807_v2 = vld [vmem:[%s5374_s30 + $0x14] sm:$0xf] }
 0x22a   : > { %v3053_v48 = vadd.f32 %v3052_v19, %v3036_v15  ;;  %v2579_v6 = vadd.f32 %v2540_v24, %v2409_v44  ;;  %v2372_v18 = vpop.f32.mrf.mxu2  ;;  %v2802_v15 = vld [vmem:[%s5374_s30] sm:$0xf] }
 0x22c   : > { %v5347_v61 = vadd.f32 %v2740_v31, %v2579_v6  ;;  %v2803_v31 = vld [vmem:[%s5374_s30 + $0x4] sm:$0xf]  ;;  %v2804_v6 = vld [vmem:[%s5374_s30 + $0x8] sm:$0xf] }
 0x22d   : > { %v2083_v5 = vpop.f32.mrf.mxu1 }
 0x22e   : > { %v2542_v25 = vpop.f32.mrf.mxu3  ;;  %v2992_v42 = vmul.f32 %v2921_v21, %v5347_v61  ;;  %v2121_v58 = vadd.f32 %v2083_v5, %v5225_v50  ;;  %v2806_v21 = vld [vmem:[%s5374_s30 + $0x10] sm:$0xf] }
 0x230   : > { %v3010_v23 = vadd.f32 %v3009_v7, %v2992_v42  ;;  %v3037_v38 = vmul.f32 %v2992_v42, %v5347_v61  ;;  %v2410_v39 = vadd.f32 %v2372_v18, %v2121_v58  ;;  %v2936_v7 = vpop.permute.xlu0 %2935  ;;  %v2822_v18 = vpack.c.bf16 %v5337_v12, %v5337_v12  ;;  %v2808_v58 = vld [vmem:[%s5374_s30 + $0x18] sm:$0xf]  ;;  %v2810_v12 = vld [vmem:[%s5374_s30 + $0x20] sm:$0xf] }
 0x231   : > { %v2742_v40 = vpop.f32.mrf.mxu0  ;;  %v2823_v42 = vpack.c.bf16 %v5342_v0, %v5342_v0  ;;  %v2824_v0 = vpack.c.bf16 %v5347_v61, %v5347_v61  ;;  %v5425_v61 = vld [vmem:[%s5374_s30 + $0x38] sm:$0xf] }
 0x232   : > { %v3054_v59 = vadd.f32 %v3053_v48, %v3037_v38  ;;  %v2580_v35 = vadd.f32 %v2542_v25, %v2410_v39  ;;  %v2375_v47 = vpop.f32.mrf.mxu2 }
 0x234   : > { %v5352_v41 = vadd.f32 %v2742_v40, %v2580_v35  ;;  %v2841_v40 = vsel %vm5381_vm9, %v2820_v33, %v2802_v15  ;;  %v2811_v35 = vld [vmem:[%s5374_s30 + $0x24] sm:$0xf] }
 0x235   : > { %v2086_v63 = vpop.f32.mrf.mxu1 }
 0x236   : > { %v2545_v3 = vpop.f32.mrf.mxu3  ;;  %v2993_v22 = vmul.f32 %v2926_v20, %v5352_v41  ;;  %v2122_v9 = vadd.f32 %v2086_v63, %v5233_v56  ;;  %v2825_v20 = vpack.c.bf16 %v5352_v41, %v5352_v41 }
 0x238   : > { %v3011_v50 = vadd.f32 %v3010_v23, %v2993_v22  ;;  %v3038_v52 = vmul.f32 %v2993_v22, %v5352_v41  ;;  %v2411_v49 = vadd.f32 %v2375_v47, %v2122_v9  ;;  %v2809_v23 = vld [vmem:[%s5374_s30 + $0x1c] sm:$0xf]  ;;  %v5411_v47 = vld [vmem:[%s5374_s30 + $0x28] sm:$0xf]  ;;  %v5419_v9 = vld [vmem:[%s5374_s30 + $0x30] sm:$0xf] }
 0x239   : > { %v2745_v1 = vpop.f32.mrf.mxu0  ;;  %v5432_v41 = vld [vmem:[%s5374_s30 + $0x3c] sm:$0xf] }
 0x23a   : > { %v3055_v14 = vadd.f32 %v3054_v59, %v3038_v52  ;;  %v2581_v27 = vadd.f32 %v2545_v3, %v2411_v49  ;;  %v2377_v54 = vpop.f32.mrf.mxu2  ;;  %v2842_v59 = vsel %vm5381_vm9, %v2821_v11, %v2803_v31  ;;  %v2843_v52 = vsel %vm5381_vm9, %v2822_v18, %v2804_v6 }
 0x23c   : > { %v5361_v43 = vadd.f32 %v2745_v1, %v2581_v27  ;;  %v5435_v1 = vld [vmem:[%s5374_s30 + $0x40] sm:$0xf] }
 0x23d   : > { %v2088_v28 = vpop.f32.mrf.mxu1 }
 0x23e   : > { %v2547_v56 = vpop.f32.mrf.mxu3  ;;  %v2994_v46 = vmul.f32 %v2931_v51, %v5361_v43  ;;  %v2123_v8 = vadd.f32 %v2088_v28, %v5242_v29  ;;  %v2826_v49 = vpack.c.bf16 %v5361_v43, %v5361_v43 }
 0x240   : > { %v3012_v19 = vadd.f32 %v3011_v50, %v2994_v46  ;;  %v3039_v17 = vmul.f32 %v2994_v46, %v5361_v43  ;;  %v2412_v53 = vadd.f32 %v2377_v54, %v2123_v8  ;;  %v5422_v50 = vld [vmem:[%s5374_s30 + $0x34] sm:$0xf]  ;;  %v2845_v43 = vsel %vm5381_vm9, %v2824_v0, %v2806_v21 }
 0x241   : > { %v2747_v32 = vpop.f32.mrf.mxu0  ;;  %v2846_v46 = vsel %vm5381_vm9, %v2825_v20, %v2807_v2  ;;  %v2951_v20 = vpop.permute.xlu0 %2950 }
 0x242   : > { %v3056_v29 = vadd.f32 %v3055_v14, %v3039_v17  ;;  %v2582_v26 = vadd.f32 %v2547_v56, %v2412_v53  ;;  %v2380_v24 = vpop.f32.mrf.mxu2  ;;  %v2844_v14 = vsel %vm5381_vm9, %v2823_v42, %v2805_v30  ;;  %v2941_v56 = vpop.permute.xlu1 %2940 }
 0x243   : > { %v2946_v30 = vpop.permute.xlu2 %2945 }
 0x244   : > { %v2782_v48 = vadd.f32 %v2747_v32, %v2582_v26 }
 0x245   : > { %v2091_v5 = vpop.f32.mrf.mxu1 }
 0x246   : > { %v2550_v25 = vpop.f32.mrf.mxu3  ;;  %v2995_v38 = vmul.f32 %v2936_v7, %v2782_v48  ;;  %v2124_v39 = vadd.f32 %v2091_v5, %v5248_v62  ;;  %v5414_v62 = vld [vmem:[%s5374_s30 + $0x2c] sm:$0xf]  ;;  %v2827_v27 = vpack.c.bf16 %v2782_v48, %v2782_v48  ;;  %s4281_s30 = scalar_lea.hbm %s4280_s13, 1 }
 0x247   : > { %2861 = vst [vmem:[%s5403_s25] sm:$0xf] %v2841_v40  ;;  %p4282_p0 = scmp.ne.s32.totalorder %s4280_s13, %s4281_s30  ;;  %p4287_p5 = scmp.lt.s32.totalorder %s4285_s15, %s4281_s30 }
 0x248   : > { %v3013_v63 = vadd.f32 %v3012_v19, %v2995_v38  ;;  %v3040_v3 = vmul.f32 %v2995_v38, %v2782_v48  ;;  %v2413_v45 = vadd.f32 %v2380_v24, %v2124_v39  ;;  %2862 = vst [vmem:[%s5403_s25 + $0x4] sm:$0xf] %v2842_v59  ;;  %v2847_v19 = vsel %vm5381_vm9, %v2826_v49, %v2808_v58 }
 0x249   : > { %v2750_v22 = vpop.f32.mrf.mxu0  ;;  %2863 = vst [vmem:[%s5403_s25 + $0x8] sm:$0xf] %v2843_v52  ;;  %v2848_v32 = vsel %vm5381_vm9, %v2827_v27, %v2809_v23  ;;  %p4283_p1 = pnand %p4282_p0, %p4490_p3  ;;  %p4288_p6 = por %p4287_p5, %p4286_p4 }
 0x24a   : > { %v3057_v54 = vadd.f32 %v3056_v29, %v3040_v3  ;;  %v2583_v51 = vadd.f32 %v2550_v25, %v2413_v45  ;;  %v2382_v28 = vpop.f32.mrf.mxu2  ;;  %2864 = vst [vmem:[%s5403_s25 + $0xc] sm:$0xf] %v2844_v14 }
 0x24b   : > { %2865 = vst [vmem:[%s5403_s25 + $0x10] sm:$0xf] %v2845_v43  ;;  %p4284_p2 = pneg %p4283_p1 }
 0x24c   : > { %v2783_v8 = vadd.f32 %v2750_v22, %v2583_v51  ;;  %2866 = vst [vmem:[%s5403_s25 + $0x14] sm:$0xf] %v2846_v46 }
 0x24d   : > { %v2093_v17 = vpop.f32.mrf.mxu1  ;;  %2867 = vst [vmem:[%s5403_s25 + $0x18] sm:$0xf] %v2847_v19  ;;  %p4289_p7 = pnand %p4288_p6, %p4284_p2 }
 0x24e   : > { %v2552_v53 = vpop.f32.mrf.mxu3  ;;  %v2828_v29 = vpack.c.bf16 %v2783_v8, %v2783_v8  ;;  %v2996_v26 = vmul.f32 %v2941_v56, %v2783_v8  ;;  %v2125_v24 = vadd.f32 %v2093_v17, %v5257_v60  ;;  %2868 = vst [vmem:[%s5403_s25 + $0x1c] sm:$0xf] %v2848_v32  ;;  %v2956_v56 = vpop.permute.xlu1 %2955 }
 0x250   : > { %v2849_v33 = vsel %vm5381_vm9, %v2828_v29, %v2810_v12  ;;  %v3014_v11 = vadd.f32 %v3013_v63, %v2996_v26  ;;  %v3041_v7 = vmul.f32 %v2996_v26, %v2783_v8  ;;  %v2414_v15 = vadd.f32 %v2382_v28, %v2125_v24 }
 0x251   : > { %v2752_v31 = vpop.f32.mrf.mxu0  ;;  %2869 = vst [vmem:[%s5403_s25 + $0x20] sm:$0xf] %v2849_v33 }
 0x252   : > { %v3058_v48 = vadd.f32 %v3057_v54, %v3041_v7  ;;  %v2584_v6 = vadd.f32 %v2552_v53, %v2414_v15  ;;  %v2385_v18 = vpop.f32.mrf.mxu2  ;;  %v2961_v15 = vpop.permute.xlu2 %2960 }
 0x254   : > { %v2784_v21 = vadd.f32 %v2752_v31, %v2584_v6 }
 0x255   : > { %v2096_v2 = vpop.f32.mrf.mxu1 }
 0x256   : > { %v2555_v60 = vpop.f32.mrf.mxu3  ;;  %v2829_v5 = vpack.c.bf16 %v2784_v21, %v2784_v21  ;;  %v2997_v25 = vmul.f32 %v2946_v30, %v2784_v21  ;;  %v2126_v42 = vadd.f32 %v2096_v2, %v5265_v13 }
 0x258   : > { %v2850_v58 = vsel %vm5381_vm9, %v2829_v5, %v2811_v35  ;;  %v3015_v23 = vadd.f32 %v3014_v11, %v2997_v25  ;;  %v3042_v38 = vmul.f32 %v2997_v25, %v2784_v21  ;;  %v2415_v39 = vadd.f32 %v2385_v18, %v2126_v42 }
 0x259   : > { %v2755_v12 = vpop.f32.mrf.mxu0  ;;  %2870 = vst [vmem:[%s5403_s25 + $0x24] sm:$0xf] %v2850_v58 }
 0x25a   : > { %v3059_v40 = vadd.f32 %v3058_v48, %v3042_v38  ;;  %v2585_v59 = vadd.f32 %v2555_v60, %v2415_v39  ;;  %v2387_v0 = vpop.f32.mrf.mxu2 }
 0x25c   : > { %v2785_v63 = vadd.f32 %v2755_v12, %v2585_v59 }
 0x25d   : > { %v2098_v3 = vpop.f32.mrf.mxu1 }
 0x25e   : > { %v2557_v45 = vpop.f32.mrf.mxu3  ;;  %v2830_v22 = vpack.c.bf16 %v2785_v63, %v2785_v63  ;;  %v2998_v52 = vmul.f32 %v2951_v20, %v2785_v63  ;;  %v2127_v13 = vadd.f32 %v2098_v3, %v5275_v10 }
 0x260   : > { %v2851_v35 = vsel %vm5381_vm9, %v2830_v22, %v5411_v47  ;;  %v3016_v49 = vadd.f32 %v3015_v23, %v2998_v52  ;;  %v3043_v14 = vmul.f32 %v2998_v52, %v2785_v63  ;;  %v2416_v27 = vadd.f32 %v2387_v0, %v2127_v13  ;;  %v2966_v23 = vpop.permute.xlu0 %2965  ;;  %v2971_v13 = vpop.permute.xlu1 %2970 }
 0x261   : > { %v2757_v54 = vpop.f32.mrf.mxu0  ;;  %2871 = vst [vmem:[%s5403_s25 + $0x28] sm:$0xf] %v2851_v35 }
 0x262   : > { %v3060_v51 = vadd.f32 %v3059_v40, %v3043_v14  ;;  %v2586_v28 = vadd.f32 %v2557_v45, %v2416_v27  ;;  %v2390_v43 = vpop.f32.mrf.mxu2 }
 0x264   : > { %v2786_v46 = vadd.f32 %v2757_v54, %v2586_v28 }
 0x265   : > { %v2101_v8 = vpop.f32.mrf.mxu1 }
 0x266   : > { %v2560_v19 = vpop.f32.mrf.mxu3  ;;  %v2831_v17 = vpack.c.bf16 %v2786_v46, %v2786_v46  ;;  %v2999_v53 = vmul.f32 %v2956_v56, %v2786_v46  ;;  %v2128_v10 = vadd.f32 %v2101_v8, %v5283_v55 }
 0x268   : > { %v2852_v47 = vsel %vm5381_vm9, %v2831_v17, %v5414_v62  ;;  %v3017_v32 = vadd.f32 %v3016_v49, %v2999_v53  ;;  %v3044_v29 = vmul.f32 %v2999_v53, %v2786_v46  ;;  %v2417_v26 = vadd.f32 %v2390_v43, %v2128_v10 }
 0x269   : > { %v2760_v24 = vpop.f32.mrf.mxu0  ;;  %2872 = vst [vmem:[%s5403_s25 + $0x2c] sm:$0xf] %v2852_v47 }
 0x26a   : > { %v3061_v33 = vadd.f32 %v3060_v51, %v3044_v29  ;;  %v2587_v11 = vadd.f32 %v2560_v19, %v2417_v26  ;;  %v2392_v7 = vpop.f32.mrf.mxu2  ;;  %v2976_v19 = vpop.permute.xlu2 %2975 }
 0x26c   : > { %v2787_v31 = vadd.f32 %v2760_v24, %v2587_v11 }
 0x26d   : > { %v2103_v48 = vpop.f32.mrf.mxu1 }
 0x26e   : > { %v2562_v6 = vpop.f32.mrf.mxu3  ;;  %v2832_v18 = vpack.c.bf16 %v2787_v31, %v2787_v31  ;;  %v3000_v30 = vmul.f32 %v2961_v15, %v2787_v31  ;;  %v2129_v55 = vadd.f32 %v2103_v48, %v5292_v16  ;;  %v2981_v48 = vpop.permute.xlu0 %2980 }
 0x270   : > { %v2853_v62 = vsel %vm5381_vm9, %v2832_v18, %v5419_v9  ;;  %v3018_v21 = vadd.f32 %v3017_v32, %v3000_v30  ;;  %v3045_v2 = vmul.f32 %v3000_v30, %v2787_v31  ;;  %v2418_v60 = vadd.f32 %v2392_v7, %v2129_v55 }
 0x271   : > { %v2762_v5 = vpop.f32.mrf.mxu0  ;;  %2873 = vst [vmem:[%s5403_s25 + $0x30] sm:$0xf] %v2853_v62 }
 0x272   : > { %v3062_v25 = vadd.f32 %v3061_v33, %v3045_v2  ;;  %v2588_v42 = vadd.f32 %v2562_v6, %v2418_v60  ;;  %v2395_v58 = vpop.f32.mrf.mxu2 }
 0x274   : > { %v2788_v38 = vadd.f32 %v2762_v5, %v2588_v42 }
 0x275   : > { %v2106_v39 = vpop.f32.mrf.mxu1 }
 0x276   : > { %v2565_v12 = vpop.f32.mrf.mxu3  ;;  %v2833_v40 = vpack.c.bf16 %v2788_v38, %v2788_v38  ;;  %v3001_v59 = vmul.f32 %v2966_v23, %v2788_v38  ;;  %v2130_v16 = vadd.f32 %v2106_v39, %v5302_v57  ;;  %v2986_v23 = vpop.permute.xlu1 %2985 }
 0x278   : > { %v2854_v9 = vsel %vm5381_vm9, %v2833_v40, %v5422_v50  ;;  %v3019_v0 = vadd.f32 %v3018_v21, %v3001_v59  ;;  %v3046_v20 = vmul.f32 %v3001_v59, %v2788_v38  ;;  %v2419_v63 = vadd.f32 %v2395_v58, %v2130_v16 }
 0x279   : > { %v2765_v3 = vpop.f32.mrf.mxu0  ;;  %2874 = vst [vmem:[%s5403_s25 + $0x34] sm:$0xf] %v2854_v9 }
 0x27a   : > { %v3063_v45 = vadd.f32 %v3062_v25, %v3046_v20  ;;  %v2589_v22 = vadd.f32 %v2565_v12, %v2419_v63  ;;  %v2397_v52 = vpop.f32.mrf.mxu2 }
 0x27c   : > { %v2789_v35 = vadd.f32 %v2765_v3, %v2589_v22 }
 0x27d   : > { %v2108_v49 = vpop.f32.mrf.mxu1 }
 0x27e   : > { %v2567_v14 = vpop.f32.mrf.mxu3  ;;  %v2834_v27 = vpack.c.bf16 %v2789_v35, %v2789_v35  ;;  %v3002_v54 = vmul.f32 %v2971_v13, %v2789_v35  ;;  %v2131_v57 = vadd.f32 %v2108_v49, %v5311_v36  ;;  %v3032_v13 = vld [vmem:[%s4539_s23] sm:$0x1] }
 0x280   : > { %v2855_v50 = vsel %vm5381_vm9, %v2834_v27, %v5425_v61  ;;  %v3020_v51 = vadd.f32 %v3019_v0, %v3002_v54  ;;  %v3047_v28 = vmul.f32 %v3002_v54, %v2789_v35  ;;  %v2420_v43 = vadd.f32 %v2397_v52, %v2131_v57 }
 0x281   : > { %v2767_v56 = vpop.f32.mrf.mxu0  ;;  %2875 = vst [vmem:[%s5403_s25 + $0x38] sm:$0xf] %v2855_v50 }
 0x282   : > { %v3064_v46 = vadd.f32 %v3063_v45, %v3047_v28  ;;  %v2590_v8 = vadd.f32 %v2567_v14, %v2420_v43  ;;  %v2400_v53 = vpop.f32.mrf.mxu2  ;;  %v3006_v45 = vld [vmem:[%s4536_s29] sm:$0x1] }
 0x284   : > { %v2790_v17 = vadd.f32 %v2767_v56, %v2590_v8 }
 0x285   : > { %v2111_v10 = vpop.f32.mrf.mxu1 }
 0x286   : > { %v2835_v47 = vpack.c.bf16 %v2790_v17, %v2790_v17  ;;  %v3003_v32 = vmul.f32 %v2976_v19, %v2790_v17  ;;  %v2132_v36 = vadd.f32 %v2111_v10, %v5316_v4  ;;  %v2570_v29 = vpop.f32.mrf.mxu3 }
 0x288   : > { %v2856_v61 = vsel %vm5381_vm9, %v2835_v47, %v5432_v41  ;;  %v3021_v26 = vadd.f32 %v3020_v51, %v3003_v32  ;;  %v3048_v24 = vmul.f32 %v3003_v32, %v2790_v17  ;;  %v2421_v33 = vadd.f32 %v2400_v53, %v2132_v36 }
 0x289   : > { %v2770_v11 = vpop.f32.mrf.mxu0  ;;  %2876 = vst [vmem:[%s5403_s25 + $0x3c] sm:$0xf] %v2856_v61 }
 0x28a   : > { %v3065_v7 = vadd.f32 %v3064_v46, %v3048_v24  ;;  %v2591_v15 = vadd.f32 %v2570_v29, %v2421_v33  ;;  %v2402_v55 = vpop.f32.mrf.mxu2 }
 0x28c   : > { %v2791_v31 = vadd.f32 %v2770_v11, %v2591_v15 }
 0x28d   : > { %v2113_v6 = vpop.f32.mrf.mxu1 }
 0x28e   : > { %v2836_v18 = vpack.c.bf16 %v2791_v31, %v2791_v31  ;;  %v3004_v30 = vmul.f32 %v2981_v48, %v2791_v31  ;;  %v2133_v4 = vadd.f32 %v2113_v6, %v5322_v34  ;;  %v2572_v60 = vpop.f32.mrf.mxu3 }
 0x290   : > { %v2857_v41 = vsel %vm5381_vm9, %v2836_v18, %v5435_v1  ;;  %v3022_v62 = vadd.f32 %v3021_v26, %v3004_v30  ;;  %v3049_v21 = vmul.f32 %v3004_v30, %v2791_v31  ;;  %v2422_v2 = vadd.f32 %v2402_v55, %v2133_v4 }
 0x291   : > { %2877 = vst [vmem:[%s5403_s25 + $0x40] sm:$0xf] %v2857_v41  ;;  %v2772_v42 = vpop.f32.mrf.mxu0 }
 0x292   : > { %v3066_v5 = vadd.f32 %v3065_v7, %v3049_v21  ;;  %v2592_v25 = vadd.f32 %v2572_v60, %v2422_v2 }
 0x294   : > { %v2792_v58 = vadd.f32 %v2772_v42, %v2592_v25 }
 0x296   : > { %v2837_v38 = vpack.c.bf16 %v2792_v58, %v2792_v58  ;;  %v3005_v39 = vmul.f32 %v2986_v23, %v2792_v58 }
 0x298   : > { %v2858_v34 = vsel %vm5381_vm9, %v2837_v38, %v5438_v37  ;;  %v3023_v1 = vadd.f32 %v3022_v62, %v3005_v39  ;;  %v3050_v12 = vmul.f32 %v3005_v39, %v2792_v58 }
 0x299   : > { %2878 = vst [vmem:[%s5403_s25 + $0x44] sm:$0xf] %v2858_v34 }
 0x29a   : > { %v3024_v40 = vrot.slane %v3023_v1, 4  ;;  %v3067_v59 = vadd.f32 %v3066_v5, %v3050_v12 }
 0x29c   : > { %v3025_v16 = vadd.f32 %v3024_v40, %v3023_v1  ;;  %v3068_v9 = vrot.slane %v3067_v59, 4 }
 0x29e   : > { %v3026_v0 = vrot.slane %v3025_v16, 2  ;;  %v3069_v20 = vadd.f32 %v3068_v9, %v3067_v59 }
 0x2a0   : > { %v3070_v63 = vrot.slane %v3069_v20, 2  ;;  %v3027_v3 = vadd.f32 %v3026_v0, %v3025_v16 }
 0x2a2   : > { %v3028_v44 = vrot.slane %v3027_v3, 1  ;;  %v3071_v37 = vadd.f32 %v3070_v63, %v3069_v20 }
 0x2a4   : > { %v3029_v22 = vadd.f32 %v3028_v44, %v3027_v3  ;;  %v3072_v52 = vrot.slane %v3071_v37, 1 }
 0x2a6   : > { %v3030_v35 = vadd.f32 %v3029_v22, %v3006_v45  ;;  %v3073_v49 = vadd.f32 %v3072_v52, %v3071_v37 }
 0x2a8   : > { %3031 = vst [vmem:[%s4536_s29] sm:$0x1] %v3030_v35  ;;  %v3074_v14 = vadd.f32 %v3073_v49, %v3032_v13 }
 0x2a9   : > { %4292 = shalt.err (!%p4289_p7)
}
 0x2aa   : > { %4181 = dma.vmem_to_hbm [thread:$0]  (%p4490_p3), %s3100_s16, 16, %s3102_s19, %s3082_s9   ;;  %3075 = vst [vmem:[%s4539_s23] sm:$0x1] %v3074_v14 }
 0x2ab   : > { %s3086_s29 = scalar_lea.sflag [#allocation6], %s4511_s22  ;;  %s4307_s10 = sshra.s32 %s3115_s26, 4  ;;  %s4308_s10 = int_to_ptr.hbm [resolvable:$true] %s4307_s10 }
 0x2ac   : > { %s4309_s11 = scalar_lea.hbm %s4308_s10, 1  ;;  %s4313_s25 = scalar_lea.hbm %s5590_s8, 2 }
 0x2ad   : > { %p4310_p8 = scmp.ne.s32.totalorder %s4308_s10, %s4309_s11  ;;  %p4314_p12 = scmp.lt.s32.totalorder %s4308_s10, %s5590_s8 }
 0x2ae   : > { %p4315_p13 = scmp.lt.s32.totalorder %s4313_s25, %s4309_s11 }
 0x2af   : > { %p4311_p10 = pnand %p4310_p8, %p4490_p3 }
 0x2b0   : > { %p4316_p0 = por %p4315_p13, %p4314_p12 }
 0x2b1   : > { %p4312_p11 = pneg %p4311_p10 }
 0x2b3   : > { %p4317_p1 = pnand %p4316_p0, %p4312_p11 }
 0x2b5   : > { %4320 = shalt.err (!%p4317_p1)
}
 0x2b6   : > { %4182 = dma.vmem_to_hbm [thread:$0]  (%p4490_p3), %s5523_s24, 16, %s3115_s26, %s3086_s29  }
 0x2b7 PF: > { %p4192_p2 = scmp.ge.s32.totalorder %s4391_s12, 2  ;;  %s3134_s22 = sand.u32 1, %s4363_s27  }
 0x2b8   : > { %s3135_s23 = scalar_lea.sflag [#allocation4], %s3134_s22 }
 0x2b9   : > { %p4186_p4 = pnand %p4192_p2, %p4500_p9 }
 0x2bb   : > { %p4187_p5 = pneg %p4186_p4 }
 0x2bd   : > { %4354 = dma.done.wait (%p4187_p5), %s3135_s23, 16  }
 0x2be   : > { %4356 = vsyncadd (%p4187_p5), %s3135_s23, 4294967280  ;;  %s3144_s16 = scalar_lea.sflag [#allocation6], %s3134_s22 }
 0x2bf   : > { %4358 = dma.done.wait (%p4187_p5), %s3144_s16, 16  }
 0x2c0   : > { %4360 = vsyncadd (%p4187_p5), %s3144_s16, 4294967280  ;;  %s25_s12 = sadd.s32 1, %s4391_s12   ;;  %s5606_s17 = sld [smem:[#allocation9_spill]] }
 0x2c1   : > { %p22_p6 = scmp.ge.s32.totalorder %s25_s12, 6   ;;  %s5607_s29 = sld [smem:[#allocation14_spill]] }
 0x2c2   : > { %s5608_s30 = sld [smem:[#allocation10_spill]]  ;;  %s5612_s27 = smov %s4367_s28 }
 0x2c3   : > { %s5609_s9 = sld [smem:[#allocation11_spill]]  ;;  %24 = sbr.rel (!%p22_p6) target bundleno = 7 (0x7), region = 128 }
 0x2c4   : > { %s5610_s10 = sld [smem:[#allocation12_spill]] }
 0x2c5   : > { %s5611_s11 = sld [smem:[#allocation13_spill]] }
 0x2c6   : > { %s5613_s28 = smov %s5606_s17 }
 0x2c8   :  { %3149 = vsyncpa [#allocation4], 1 }
 0x2c9   :  { %3151 = vsyncpa [#allocation4 + $0x1], 1 }
 0x2ca   :  { %3152 = vsyncpa [#allocation6], 1 }
 0x2cb   :  { %3154 = vsyncpa [#allocation6 + $0x1], 1 }

</bundles_post_ra>
